<compile_context>
chip_gen: v7x
topology: tpu7x:2x2x1
jax: 0.10.0
libtpu: 0.0.40
codegen_flags: <defaults>
</compile_context>

<pallas_src>
import functools
import math

import jax
import jax.numpy as jnp
from jax.experimental import pallas as pl
from jax.experimental.pallas import tpu as pltpu

# ---------------- config (mirrors ClaimSpeaker.__init__, small synthetic sizes) ------
N_CLAIMS = 13
VOCAB = N_CLAIMS + 3                       # len(claims) + 3
BOS, EOS, PAD = VOCAB - 3, VOCAB - 2, VOCAB - 1
EXPL_LEN = 7
CONTEXT_LEN = EXPL_LEN + 1                 # explanation_length + 1   (power of two)
WIDTH = 32                                 # speaker.width
HEADS = 4                                  # speaker.heads
LAYERS = 4
UNI_LAYERS = MULTI_LAYERS = LAYERS // 2
N_QUERIES = 4                              # speaker.n_queries        (power of two)
ATTN_POOLER_HEADS = 4
CLS_DIM = (-(-VOCAB // ATTN_POOLER_HEADS)) * ATTN_POOLER_HEADS   # ceil(V/heads)*heads = 16
CLS_WIDTH = 48                             # classifier.width (image token feature dim)
N_IMG_TOKENS = 16                          # (power of two)
BATCH = 2
LN_EPS = 1e-5
LOGIT_SCALE_INIT = math.log(1.0 / 0.07)
_MASK_VALUE = -1e30                        # additive mask value (== -inf after softmax)
_LANES = 128
_GELU_C = math.sqrt(2.0 / math.pi)


def _round_up(x, m):
    return -(-x // m) * m


# ------- packed output slab layout (lane-dense, one output DMA) ----------------------
_GEN_ROW = 0                                                   # (B*NQ, WIDTH)
_BLOG_ROW = _GEN_ROW + _round_up(BATCH * N_QUERIES, 8)         # (B, CLS_DIM)
_CLOG_ROW = _BLOG_ROW + _round_up(BATCH, 8)                    # (B*L, VOCAB)
_LOGP_ROW = _CLOG_ROW + _round_up(BATCH * CONTEXT_LEN, 8)      # (B, 1)
_OUT_ROWS = _LOGP_ROW + _round_up(BATCH, 8)


# =============================== in-kernel math helpers ==============================
def _layer_norm(x, g, b, eps=LN_EPS):
    x = x.astype(jnp.float32)
    mu = jnp.mean(x, axis=-1, keepdims=True)
    var = jnp.mean(jnp.square(x - mu), axis=-1, keepdims=True)
    return (x - mu) * jax.lax.rsqrt(var + eps) * g + b


def _gelu(x):
    # TODO(synk): tanh-approximate GELU (per perf review); differs from the exact-erf
    # nn.GELU reference by <~1e-3 but is one EUP op instead of a long VPU chain.
    return 0.5 * x * (1.0 + jnp.tanh(_GELU_C * (x + 0.044715 * x * x * x)))


def _softmax_lastdim(s):
    s = s - jnp.max(s, axis=-1, keepdims=True)
    e = jnp.exp(s)
    return e * pl.reciprocal(jnp.sum(e, axis=-1, keepdims=True), approx=True)


def _log2(v):
    s = int(round(math.log2(v)))
    assert (1 << s) == v, "per-example sizes must be powers of two for shift-based masks"
    return s


def _block_mask(n_rows, rows_per, n_cols, cols_per, causal=False):
    """Additive mask for batch-folded attention: query row i (example i//rows_per) may
    attend key col j only within the same example; optionally causal within-example."""
    r = jax.lax.broadcasted_iota(jnp.int32, (n_rows, n_cols), 0)
    c = jax.lax.broadcasted_iota(jnp.int32, (n_rows, n_cols), 1)
    ok = (r >> _log2(rows_per)) == (c >> _log2(cols_per))
    if causal:
        ok = jnp.logical_and(ok, (c & (cols_per - 1)) <= (r & (rows_per - 1)))
    return jnp.where(ok, 0.0, _MASK_VALUE).astype(jnp.float32)


def _mha(q, k, v, wo, bo, n_head, mask):
    """Multi-head attention on 2-D folded tensors; per-head contexts are concatenated
    along lanes and the out-projection is a single matmul against the full wo."""
    d = q.shape[1]
    dh = d // n_head
    scale = 1.0 / math.sqrt(dh)
    ctxs = []
    for h in range(n_head):
        sl = slice(h * dh, (h + 1) * dh)
        s = jax.lax.dot_general(q[:, sl], k[:, sl], (((1,), (1,)), ((), ())),
                                preferred_element_type=jnp.float32) * scale
        if mask is not None:
            s = s + mask
        p = _softmax_lastdim(s)
        ctxs.append(jnp.dot(p, v[:, sl], preferred_element_type=jnp.float32))
    ctx = jnp.concatenate(ctxs, axis=1)                                   # (Sq, d)
    return jnp.dot(ctx, wo, preferred_element_type=jnp.float32) + bo


def _self_attn_block(x, blk, n_head, mask, g):
    """Pre-LN residual block with fused QKV projection (x: (B*S, W) folded batch)."""
    w = x.shape[1]
    h = _layer_norm(x, g(blk['ln1_g']), g(blk['ln1_b']))
    qkv = jnp.dot(h, g(blk['wqkv']), preferred_element_type=jnp.float32) + g(blk['bqkv'])
    x = x + _mha(qkv[:, :w], qkv[:, w:2 * w], qkv[:, 2 * w:3 * w],
                 g(blk['wo']), g(blk['bo']), n_head, mask)
    h = _layer_norm(x, g(blk['ln2_g']), g(blk['ln2_b']))
    h = _gelu(jnp.dot(h, g(blk['w1']), preferred_element_type=jnp.float32) + g(blk['b1']))
    return x + jnp.dot(h, g(blk['w2']), preferred_element_type=jnp.float32) + g(blk['b2'])


def _cross_attn_block(x, kv_in, blk, n_head, mask, g):
    """Pre-LN residual cross-attention block with fused KV projection (folded batch)."""
    w = x.shape[1]
    h = _layer_norm(x, g(blk['ln1_g']), g(blk['ln1_b']))
    kvh = _layer_norm(kv_in, g(blk['lnkv_g']), g(blk['lnkv_b']))
    q = jnp.dot(h, g(blk['wq']), preferred_element_type=jnp.float32) + g(blk['bq'])
    kv = jnp.dot(kvh, g(blk['wkv']), preferred_element_type=jnp.float32) + g(blk['bkv'])
    x = x + _mha(q, kv[:, :w], kv[:, w:2 * w], g(blk['wo']), g(blk['bo']), n_head, mask)
    h = _layer_norm(x, g(blk['ln2_g']), g(blk['ln2_b']))
    h = _gelu(jnp.dot(h, g(blk['w1']), preferred_element_type=jnp.float32) + g(blk['b1']))
    return x + jnp.dot(h, g(blk['w2']), preferred_element_type=jnp.float32) + g(blk['b2'])


def _attention_pool(imgs, pw, n_head, batch, mask, g):
    """open_clip AttentionalPooler, batch-folded: learned queries (computed once,
    tiled per example) attend to ln_k(img) of their own example via the block mask."""
    kx = _layer_norm(imgs, g(pw['lnk_g']), g(pw['lnk_b']))                # (B*NI, C)
    q = _layer_norm(g(pw['query']), g(pw['lnq_g']), g(pw['lnq_b']))       # (NQ, D)
    d = q.shape[1]
    qp = jnp.dot(q, g(pw['wq']), preferred_element_type=jnp.float32) + g(pw['bq'])
    qp = jnp.concatenate([qp] * batch, axis=0)                            # (B*NQ, D)
    kv = jnp.dot(kx, g(pw['wkv']), preferred_element_type=jnp.float32) + g(pw['bkv'])
    return _mha(qp, kv[:, :d], kv[:, d:2 * d], g(pw['wo']), g(pw['bo']), n_head, mask)


# =============================== the fused forward kernel ============================
def _forward_kernel(pbuf_ref, img_ref, ids_ref, out_ref, *, spec):
    # Static-offset getter into the packed parameter buffer (one lane-dense DMA).
    def g(s):
        off, r, c = s
        return pbuf_ref[off:off + r, :c]

    B, L, NQ, NI = BATCH, CONTEXT_LEN, N_QUERIES, N_IMG_TOKENS
    BL = B * L

    imgs = img_ref[...].astype(jnp.float32)            # (B*NI, CLS_WIDTH)
    ids = ids_ref[...]                                   # (B*L, 3) int32
    claim_col = ids[:, 0:1]                              # claim id at position t
    next_col = ids[:, 1:2]                               # claim id at position t+1 (PAD at t=L-1)
    next_cls = ids[:, 2:3].astype(jnp.float32)           # binary label at position t+1

    # ---- masks (built in-kernel from iota; batch fold => block-diagonal) ------------
    self_mask = _block_mask(BL, L, BL, L, causal=True)        # (BL, BL)
    cross_mask = _block_mask(BL, L, B * NQ, NQ)               # (BL, B*NQ)
    gen_pool_mask = _block_mask(B * NQ, NQ, B * NI, NI)       # (B*NQ, B*NI)
    cls_pool_mask = _block_mask(B * 1, 1, B * NI, NI)         # (B, B*NI)

    # ---- attentional poolers (batch folded) ------------------------------------------
    scale = jnp.exp(g(spec['logit_scale']))                               # (1, 1)
    pooled_cls = _attention_pool(imgs, spec['pool_cls'], ATTN_POOLER_HEADS,
                                 B, cls_pool_mask, g)                     # (B, CLS_DIM)
    blog = scale * pooled_cls                                             # binary logits
    gen = _attention_pool(imgs, spec['pool_gen'], ATTN_POOLER_HEADS,
                          B, gen_pool_mask, g)                            # (B*NQ, W)
    gen = _layer_norm(gen, g(spec['ln_pool_gen_g']), g(spec['ln_pool_gen_b']))
    out_ref[_GEN_ROW:_GEN_ROW + B * NQ, 0:WIDTH] = gen
    out_ref[_BLOG_ROW:_BLOG_ROW + B, 0:CLS_DIM] = blog

    # ---- text encoder + multimodal decoder on the folded (B*L, W) activation ---------
    tp, dp = spec['text'], spec['dec']
    iota_v = jax.lax.broadcasted_iota(jnp.int32, (BL, VOCAB), 1)
    onehot_tok = (iota_v == claim_col).astype(jnp.float32)                # (BL, V)
    pos = jnp.concatenate([g(tp['pos_emb'])] * B, axis=0)                 # (BL, W)
    x = jnp.dot(onehot_tok, g(tp['tok_emb']),
                preferred_element_type=jnp.float32) + pos
    for blk in tp['blocks']:
        x = _self_attn_block(x, blk, HEADS, self_mask, g)
    x = _layer_norm(x, g(tp['lnf_g']), g(tp['lnf_b']))
    for sblk, cblk in zip(dp['self_blocks'], dp['cross_blocks']):
        x = _self_attn_block(x, sblk, HEADS, self_mask, g)
        x = _cross_attn_block(x, gen, cblk, HEADS, cross_mask, g)
    x = _layer_norm(x, g(dp['lnf_g']), g(dp['lnf_b']))
    clog = jnp.dot(x, g(dp['text_proj']), preferred_element_type=jnp.float32)  # (BL, V)
    out_ref[_CLOG_ROW:_CLOG_ROW + BL, 0:VOCAB] = clog

    # ---- fused loss: gather + BCE-with-logits + shifted CE (pad ignored) + sum -------
    # Both terms are indexed by the NEXT token (claims[:, 1:]); the extra row at the
    # last position of each example carries PAD / cls=0 and contributes exactly zero.
    iota_c = jax.lax.broadcasted_iota(jnp.int32, (BL, CLS_DIM), 1)
    onehot_next_c = (iota_c == next_col).astype(jnp.float32)              # (BL, CLS_DIM)
    blog_rows = jnp.concatenate(
        [jnp.broadcast_to(blog[b:b + 1, :], (L, CLS_DIM)) for b in range(B)], axis=0)
    xg = jnp.sum(onehot_next_c * blog_rows, axis=1, keepdims=True)        # gathered logits
    bce = jnp.maximum(xg, 0.0) - xg * next_cls + jnp.log(1.0 + jnp.exp(-jnp.abs(xg)))
    bin_term = jnp.where(next_col >= N_CLAIMS, 0.0, -bce)                 # (BL, 1)

    iota_vv = jax.lax.broadcasted_iota(jnp.int32, (BL, VOCAB), 1)
    onehot_next_v = (iota_vv == next_col).astype(jnp.float32)
    m = jnp.max(clog, axis=1, keepdims=True)
    lse = jnp.log(jnp.sum(jnp.exp(clog - m), axis=1, keepdims=True)) + m
    lab = jnp.sum(onehot_next_v * clog, axis=1, keepdims=True)
    claim_term = jnp.where(next_col == PAD, 0.0, lab - lse)               # (BL, 1)

    total = bin_term + claim_term                                         # (BL, 1)
    logp = jnp.concatenate(
        [jnp.sum(total[b * L:(b + 1) * L, :], axis=0, keepdims=True) for b in range(B)],
        axis=0)                                                           # (B, 1)
    out_ref[_LOGP_ROW:_LOGP_ROW + B, 0:1] = logp


# =============================== parameter packing ====================================
def pack_params(params):
    """Pack every (2-D, f32) parameter leaf into one lane-dense (rows, 128) buffer with
    8-aligned row offsets, and return a spec tree of static (offset, rows, cols)."""
    leaves, treedef = jax.tree_util.tree_flatten(params)
    specs, chunks, off = [], [], 0
    for leaf in leaves:
        leaf = jnp.asarray(leaf, jnp.float32)
        r, c = leaf.shape
        assert c <= _LANES
        rp = _round_up(r, 8)
        specs.append((off, r, c))
        chunks.append(jnp.pad(leaf, ((0, rp - r), (0, _LANES - c))))
        off += rp
    pbuf = jnp.concatenate(chunks, axis=0)
    spec_tree = jax.tree_util.tree_unflatten(treedef, specs)
    return pbuf, spec_tree


# =============================== wrapper =============================================
def make_claim_speaker_forward(spec_tree):
    kernel = functools.partial(_forward_kernel, spec=spec_tree)

    @jax.jit
    def forward(pbuf, image_tokens, explanation):
        b, l = explanation.shape[0], explanation.shape[1]
        ni, ci = image_tokens.shape[1], image_tokens.shape[2]
        claims = explanation[..., 0].astype(jnp.int32)
        cls = explanation[..., 1].astype(jnp.int32)
        nxt = jnp.concatenate([claims[:, 1:], jnp.full((b, 1), PAD, jnp.int32)], axis=1)
        nxt_cls = jnp.concatenate([cls[:, 1:], jnp.zeros((b, 1), jnp.int32)], axis=1)
        ids = jnp.stack([claims, nxt, nxt_cls], axis=-1).reshape(b * l, 3)
        imgs = image_tokens.reshape(b * ni, ci).astype(jnp.float32)

        slab = pl.pallas_call(
            kernel,
            out_shape=jax.ShapeDtypeStruct((_OUT_ROWS, _LANES), jnp.float32),
            compiler_params=pltpu.CompilerParams(vmem_limit_bytes=32 * 1024 * 1024),
        )(pbuf, imgs, ids)

        gen = slab[_GEN_ROW:_GEN_ROW + b * N_QUERIES, 0:WIDTH].reshape(b, N_QUERIES, WIDTH)
        blog = slab[_BLOG_ROW:_BLOG_ROW + b, 0:CLS_DIM]   # columns >= N_CLAIMS are padding
        clog = slab[_CLOG_ROW:_CLOG_ROW + b * l, 0:VOCAB].reshape(b, l, VOCAB)
        logp = slab[_LOGP_ROW:_LOGP_ROW + b, 0]
        return dict(gen_image_tokens=gen, binary_logits=blog,
                    claim_logits=clog, explanation_logp=logp)

    return forward


# =============================== parameter init ======================================
def _init_ln(d):
    return jnp.ones((1, d), jnp.float32), jnp.zeros((1, d), jnp.float32)


def _init_self_block(key, width):
    k = jax.random.split(key, 4)
    s = 0.02
    ln1_g, ln1_b = _init_ln(width)
    ln2_g, ln2_b = _init_ln(width)
    return dict(
        ln1_g=ln1_g, ln1_b=ln1_b,
        wqkv=s * jax.random.normal(k[0], (width, 3 * width), jnp.float32),
        bqkv=jnp.zeros((1, 3 * width), jnp.float32),
        wo=s * jax.random.normal(k[1], (width, width), jnp.float32),
        bo=jnp.zeros((1, width), jnp.float32),
        ln2_g=ln2_g, ln2_b=ln2_b,
        w1=s * jax.random.normal(k[2], (width, 4 * width), jnp.float32),
        b1=jnp.zeros((1, 4 * width), jnp.float32),
        w2=s * jax.random.normal(k[3], (4 * width, width), jnp.float32),
        b2=jnp.zeros((1, width), jnp.float32),
    )


def _init_cross_block(key, width, kv_dim):
    k = jax.random.split(key, 5)
    s = 0.02
    ln1_g, ln1_b = _init_ln(width)
    lnkv_g, lnkv_b = _init_ln(kv_dim)
    ln2_g, ln2_b = _init_ln(width)
    return dict(
        ln1_g=ln1_g, ln1_b=ln1_b, lnkv_g=lnkv_g, lnkv_b=lnkv_b,
        wq=s * jax.random.normal(k[0], (width, width), jnp.float32),
        bq=jnp.zeros((1, width), jnp.float32),
        wkv=s * jax.random.normal(k[1], (kv_dim, 2 * width), jnp.float32),
        bkv=jnp.zeros((1, 2 * width), jnp.float32),
        wo=s * jax.random.normal(k[2], (width, width), jnp.float32),
        bo=jnp.zeros((1, width), jnp.float32),
        ln2_g=ln2_g, ln2_b=ln2_b,
        w1=s * jax.random.normal(k[3], (width, 4 * width), jnp.float32),
        b1=jnp.zeros((1, 4 * width), jnp.float32),
        w2=s * jax.random.normal(k[4], (4 * width, width), jnp.float32),
        b2=jnp.zeros((1, width), jnp.float32),
    )


def _init_pooler(key, d_model, context_dim, n_queries):
    k = jax.random.split(key, 4)
    s = 0.02
    lnq_g, lnq_b = _init_ln(d_model)
    lnk_g, lnk_b = _init_ln(context_dim)
    return dict(
        query=(d_model ** -0.5) * jax.random.normal(k[0], (n_queries, d_model), jnp.float32),
        lnq_g=lnq_g, lnq_b=lnq_b, lnk_g=lnk_g, lnk_b=lnk_b,
        wq=s * jax.random.normal(k[1], (d_model, d_model), jnp.float32),
        bq=jnp.zeros((1, d_model), jnp.float32),
        wkv=s * jax.random.normal(k[2], (context_dim, 2 * d_model), jnp.float32),
        bkv=jnp.zeros((1, 2 * d_model), jnp.float32),
        wo=s * jax.random.normal(k[3], (d_model, d_model), jnp.float32),
        bo=jnp.zeros((1, d_model), jnp.float32),
    )


def init_params(key):
    keys = jax.random.split(key, 8)
    lnf_tg, lnf_tb = _init_ln(WIDTH)
    text = dict(
        tok_emb=0.02 * jax.random.normal(keys[0], (VOCAB, WIDTH), jnp.float32),
        pos_emb=0.01 * jax.random.normal(keys[1], (CONTEXT_LEN, WIDTH), jnp.float32),
        blocks=[_init_self_block(k, WIDTH) for k in jax.random.split(keys[2], UNI_LAYERS)],
        lnf_g=lnf_tg, lnf_b=lnf_tb,
    )
    lnf_dg, lnf_db = _init_ln(WIDTH)
    dec = dict(
        self_blocks=[_init_self_block(k, WIDTH)
                     for k in jax.random.split(keys[3], MULTI_LAYERS)],
        cross_blocks=[_init_cross_block(k, WIDTH, WIDTH)
                      for k in jax.random.split(keys[4], MULTI_LAYERS)],
        lnf_g=lnf_dg, lnf_b=lnf_db,
        # TODO(synk): reference init_parameters() zero-inits decoder.text_projection and
        # the cls-pooler q/k/v weights; small random values are used so the fused kernel
        # exercises non-degenerate compute (synthetic weights, not a checkpoint).
        text_proj=0.02 * jax.random.normal(keys[5], (WIDTH, VOCAB), jnp.float32),
    )
    ln_pg_g, ln_pg_b = _init_ln(WIDTH)
    return dict(
        text=text,
        dec=dec,
        pool_gen=_init_pooler(keys[6], WIDTH, CLS_WIDTH, N_QUERIES),
        pool_cls=_init_pooler(keys[7], CLS_DIM, CLS_WIDTH, 1),
        ln_pool_gen_g=ln_pg_g, ln_pool_gen_b=ln_pg_b,
        logit_scale=jnp.full((1, 1), LOGIT_SCALE_INIT, jnp.float32),
    )


# =============================== main ================================================
if __name__ == "__main__":
    key = jax.random.PRNGKey(0)
    kp, ki = jax.random.split(key)
    params = init_params(kp)
    pbuf, spec_tree = pack_params(params)           # packed once, outside the jit
    forward = make_claim_speaker_forward(spec_tree)

    image_tokens = jax.random.normal(ki, (BATCH, N_IMG_TOKENS, CLS_WIDTH), jnp.float32)
    # explanation: (B, context_length, 2) = [claim id, binary class], bos first, pad tail
    explanation = jnp.array(
        [
            [[BOS, 0], [3, 1], [7, 0], [1, 1], [9, 1], [EOS, 0], [PAD, 0], [PAD, 0]],
            [[BOS, 0], [2, 0], [5, 1], [11, 1], [EOS, 0], [PAD, 0], [PAD, 0], [PAD, 0]],
        ],
        dtype=jnp.int32,
    )

    out = forward(pbuf, image_tokens, explanation)
    jax.block_until_ready(out)

    assert out['gen_image_tokens'].shape == (BATCH, N_QUERIES, WIDTH)
    assert out['binary_logits'].shape == (BATCH, CLS_DIM)
    assert out['claim_logits'].shape == (BATCH, CONTEXT_LEN, VOCAB)
    assert out['explanation_logp'].shape == (BATCH,)
    assert bool(jnp.all(jnp.isfinite(out['gen_image_tokens'])))
    assert bool(jnp.all(jnp.isfinite(out['claim_logits'])))
    assert bool(jnp.all(jnp.isfinite(out['explanation_logp'])))
    print("KERNEL_OK")
</pallas_src>

<mosaic_0001>
module attributes {stable_mosaic.version = 11 : i64} {
  func.func @_forward_kernel(%arg0: memref<2272x128xf32, #tpu.memory_space<vmem>>, %arg1: memref<32x48xf32, #tpu.memory_space<vmem>>, %arg2: memref<16x3xi32, #tpu.memory_space<vmem>>, %arg3: memref<40x128xf32, #tpu.memory_space<vmem>>) attributes {dimension_semantics = [], scalar_prefetch = 0 : i64, scratch_operands = 0 : i64, tpu.core_type = #tpu.core_type<tc>} {
    %c0 = arith.constant 0 : index
    %c0_0 = arith.constant 0 : index
    %0 = vector.load %arg1[%c0, %c0_0] : memref<32x48xf32, #tpu.memory_space<vmem>>, vector<32x48xf32>
    %c0_1 = arith.constant 0 : index
    %c0_2 = arith.constant 0 : index
    %1 = vector.load %arg2[%c0_1, %c0_2] : memref<16x3xi32, #tpu.memory_space<vmem>>, vector<16x3xi32>
    %2 = vector.extract_strided_slice %1 {offsets = [0, 0], sizes = [16, 1], strides = [1, 1]} : vector<16x3xi32> to vector<16x1xi32>
    %3 = vector.extract_strided_slice %1 {offsets = [0, 1], sizes = [16, 1], strides = [1, 1]} : vector<16x3xi32> to vector<16x1xi32>
    %4 = vector.extract_strided_slice %1 {offsets = [0, 2], sizes = [16, 1], strides = [1, 1]} : vector<16x3xi32> to vector<16x1xi32>
    %5 = arith.sitofp %4 : vector<16x1xi32> to vector<16x1xf32>
    %6 = tpu.iota {dimensions = array<i32: 0>} : vector<16x16xi32>
    %7 = tpu.iota {dimensions = array<i32: 1>} : vector<16x16xi32>
    %c3_i32 = arith.constant 3 : i32
    %8 = vector.broadcast %c3_i32 : i32 to vector<16x16xi32>
    %9 = arith.shrsi %6, %8 : vector<16x16xi32>
    %c3_i32_3 = arith.constant 3 : i32
    %10 = vector.broadcast %c3_i32_3 : i32 to vector<16x16xi32>
    %11 = arith.shrsi %7, %10 : vector<16x16xi32>
    %12 = arith.cmpi eq, %9, %11 : vector<16x16xi32>
    %c7_i32 = arith.constant 7 : i32
    %13 = vector.broadcast %c7_i32 : i32 to vector<16x16xi32>
    %14 = arith.andi %7, %13 : vector<16x16xi32>
    %c7_i32_4 = arith.constant 7 : i32
    %15 = vector.broadcast %c7_i32_4 : i32 to vector<16x16xi32>
    %16 = arith.andi %6, %15 : vector<16x16xi32>
    %17 = arith.cmpi sle, %14, %16 : vector<16x16xi32>
    %18 = arith.andi %12, %17 : vector<16x16xi1>
    %cst = arith.constant 0.000000e+00 : f32
    %cst_5 = arith.constant -1.000000e+30 : f32
    %19 = vector.broadcast %cst : f32 to vector<16x16xf32>
    %20 = vector.broadcast %cst_5 : f32 to vector<16x16xf32>
    %21 = arith.select %18, %19, %20 : vector<16x16xi1>, vector<16x16xf32>
    %22 = tpu.iota {dimensions = array<i32: 0>} : vector<16x8xi32>
    %23 = tpu.iota {dimensions = array<i32: 1>} : vector<16x8xi32>
    %c3_i32_6 = arith.constant 3 : i32
    %24 = vector.broadcast %c3_i32_6 : i32 to vector<16x8xi32>
    %25 = arith.shrsi %22, %24 : vector<16x8xi32>
    %c2_i32 = arith.constant 2 : i32
    %26 = vector.broadcast %c2_i32 : i32 to vector<16x8xi32>
    %27 = arith.shrsi %23, %26 : vector<16x8xi32>
    %28 = arith.cmpi eq, %25, %27 : vector<16x8xi32>
    %cst_7 = arith.constant 0.000000e+00 : f32
    %cst_8 = arith.constant -1.000000e+30 : f32
    %29 = vector.broadcast %cst_7 : f32 to vector<16x8xf32>
    %30 = vector.broadcast %cst_8 : f32 to vector<16x8xf32>
    %31 = arith.select %28, %29, %30 : vector<16x8xi1>, vector<16x8xf32>
    %32 = tpu.iota {dimensions = array<i32: 0>} : vector<8x32xi32>
    %33 = tpu.iota {dimensions = array<i32: 1>} : vector<8x32xi32>
    %c2_i32_9 = arith.constant 2 : i32
    %34 = vector.broadcast %c2_i32_9 : i32 to vector<8x32xi32>
    %35 = arith.shrsi %32, %34 : vector<8x32xi32>
    %c4_i32 = arith.constant 4 : i32
    %36 = vector.broadcast %c4_i32 : i32 to vector<8x32xi32>
    %37 = arith.shrsi %33, %36 : vector<8x32xi32>
    %38 = arith.cmpi eq, %35, %37 : vector<8x32xi32>
    %cst_10 = arith.constant 0.000000e+00 : f32
    %cst_11 = arith.constant -1.000000e+30 : f32
    %39 = vector.broadcast %cst_10 : f32 to vector<8x32xf32>
    %40 = vector.broadcast %cst_11 : f32 to vector<8x32xf32>
    %41 = arith.select %38, %39, %40 : vector<8x32xi1>, vector<8x32xf32>
    %42 = tpu.iota {dimensions = array<i32: 0>} : vector<2x32xi32>
    %43 = tpu.iota {dimensions = array<i32: 1>} : vector<2x32xi32>
    %c0_i32 = arith.constant 0 : i32
    %44 = vector.broadcast %c0_i32 : i32 to vector<2x32xi32>
    %45 = arith.shrsi %42, %44 : vector<2x32xi32>
    %c4_i32_12 = arith.constant 4 : i32
    %46 = vector.broadcast %c4_i32_12 : i32 to vector<2x32xi32>
    %47 = arith.shrsi %43, %46 : vector<2x32xi32>
    %48 = arith.cmpi eq, %45, %47 : vector<2x32xi32>
    %cst_13 = arith.constant 0.000000e+00 : f32
    %cst_14 = arith.constant -1.000000e+30 : f32
    %49 = vector.broadcast %cst_13 : f32 to vector<2x32xf32>
    %50 = vector.broadcast %cst_14 : f32 to vector<2x32xf32>
    %51 = arith.select %48, %49, %50 : vector<2x32xi1>, vector<2x32xf32>
    %c1328 = arith.constant 1328 : index
    %c0_15 = arith.constant 0 : index
    %52 = vector.load %arg0[%c1328, %c0_15] : memref<2272x128xf32, #tpu.memory_space<vmem>>, vector<1x1xf32>
    %53 = math.exp %52 : vector<1x1xf32>
    %c1368 = arith.constant 1368 : index
    %c0_16 = arith.constant 0 : index
    %54 = vector.load %arg0[%c1368, %c0_16] : memref<2272x128xf32, #tpu.memory_space<vmem>>, vector<1x48xf32>
    %c1360 = arith.constant 1360 : index
    %c0_17 = arith.constant 0 : index
    %55 = vector.load %arg0[%c1360, %c0_17] : memref<2272x128xf32, #tpu.memory_space<vmem>>, vector<1x48xf32>
    %cst_18 = arith.constant dense<0.000000e+00> : vector<32xf32>
    %56 = vector.multi_reduction <add>, %0, %cst_18 [1] : vector<32x48xf32> to vector<32xf32>
    %57 = vector.shape_cast %56 : vector<32xf32> to vector<32x1xf32>
    %cst_19 = arith.constant 4.800000e+01 : f32
    %58 = vector.broadcast %cst_19 : f32 to vector<32x1xf32>
    %59 = arith.divf %57, %58 : vector<32x1xf32>
    %60 = vector.broadcast %59 : vector<32x1xf32> to vector<32x48xf32>
    %61 = arith.subf %0, %60 : vector<32x48xf32>
    %62 = arith.mulf %61, %61 : vector<32x48xf32>
    %cst_20 = arith.constant dense<0.000000e+00> : vector<32xf32>
    %63 = vector.multi_reduction <add>, %62, %cst_20 [1] : vector<32x48xf32> to vector<32xf32>
    %64 = vector.shape_cast %63 : vector<32xf32> to vector<32x1xf32>
    %cst_21 = arith.constant 4.800000e+01 : f32
    %65 = vector.broadcast %cst_21 : f32 to vector<32x1xf32>
    %66 = arith.divf %64, %65 : vector<32x1xf32>
    %67 = vector.broadcast %59 : vector<32x1xf32> to vector<32x48xf32>
    %68 = arith.subf %0, %67 : vector<32x48xf32>
    %cst_22 = arith.constant 9.99999974E-6 : f32
    %69 = vector.broadcast %cst_22 : f32 to vector<32x1xf32>
    %70 = arith.addf %66, %69 : vector<32x1xf32>
    %71 = math.rsqrt %70 : vector<32x1xf32>
    %72 = vector.broadcast %71 : vector<32x1xf32> to vector<32x48xf32>
    %73 = arith.mulf %68, %72 : vector<32x48xf32>
    %74 = vector.broadcast %54 : vector<1x48xf32> to vector<32x48xf32>
    %75 = arith.mulf %73, %74 : vector<32x48xf32>
    %76 = vector.broadcast %55 : vector<1x48xf32> to vector<32x48xf32>
    %77 = arith.addf %75, %76 : vector<32x48xf32>
    %c1392 = arith.constant 1392 : index
    %c0_23 = arith.constant 0 : index
    %78 = vector.load %arg0[%c1392, %c0_23] : memref<2272x128xf32, #tpu.memory_space<vmem>>, vector<1x16xf32>
    %c1384 = arith.constant 1384 : index
    %c0_24 = arith.constant 0 : index
    %79 = vector.load %arg0[%c1384, %c0_24] : memref<2272x128xf32, #tpu.memory_space<vmem>>, vector<1x16xf32>
    %c1376 = arith.constant 1376 : index
    %c0_25 = arith.constant 0 : index
    %80 = vector.load %arg0[%c1376, %c0_25] : memref<2272x128xf32, #tpu.memory_space<vmem>>, vector<1x16xf32>
    %cst_26 = arith.constant dense<0.000000e+00> : vector<1xf32>
    %81 = vector.multi_reduction <add>, %78, %cst_26 [1] : vector<1x16xf32> to vector<1xf32>
    %82 = vector.shape_cast %81 : vector<1xf32> to vector<1x1xf32>
    %cst_27 = arith.constant 1.600000e+01 : f32
    %83 = vector.broadcast %cst_27 : f32 to vector<1x1xf32>
    %84 = arith.divf %82, %83 : vector<1x1xf32>
    %85 = vector.broadcast %84 : vector<1x1xf32> to vector<1x16xf32>
    %86 = arith.subf %78, %85 : vector<1x16xf32>
    %87 = arith.mulf %86, %86 : vector<1x16xf32>
    %cst_28 = arith.constant dense<0.000000e+00> : vector<1xf32>
    %88 = vector.multi_reduction <add>, %87, %cst_28 [1] : vector<1x16xf32> to vector<1xf32>
    %89 = vector.shape_cast %88 : vector<1xf32> to vector<1x1xf32>
    %cst_29 = arith.constant 1.600000e+01 : f32
    %90 = vector.broadcast %cst_29 : f32 to vector<1x1xf32>
    %91 = arith.divf %89, %90 : vector<1x1xf32>
    %92 = vector.broadcast %84 : vector<1x1xf32> to vector<1x16xf32>
    %93 = arith.subf %78, %92 : vector<1x16xf32>
    %cst_30 = arith.constant 9.99999974E-6 : f32
    %94 = vector.broadcast %cst_30 : f32 to vector<1x1xf32>
    %95 = arith.addf %91, %94 : vector<1x1xf32>
    %96 = math.rsqrt %95 : vector<1x1xf32>
    %97 = vector.broadcast %96 : vector<1x1xf32> to vector<1x16xf32>
    %98 = arith.mulf %93, %97 : vector<1x16xf32>
    %99 = arith.mulf %98, %79 : vector<1x16xf32>
    %100 = arith.addf %99, %80 : vector<1x16xf32>
    %c1464 = arith.constant 1464 : index
    %c0_31 = arith.constant 0 : index
    %101 = vector.load %arg0[%c1464, %c0_31] : memref<2272x128xf32, #tpu.memory_space<vmem>>, vector<16x16xf32>
    %cst_32 = arith.constant dense<0.000000e+00> : vector<1x16xf32>
    %102 = tpu.matmul %100, %101, %cst_32 {dimension_numbers = #tpu.dot_dimension_numbers<[1], [0], [0], [1], [0, 0, 1, 1], [], []>} : vector<1x16xf32>, vector<16x16xf32>, vector<1x16xf32> -> vector<1x16xf32>
    %c1352 = arith.constant 1352 : index
    %c0_33 = arith.constant 0 : index
    %103 = vector.load %arg0[%c1352, %c0_33] : memref<2272x128xf32, #tpu.memory_space<vmem>>, vector<1x16xf32>
    %104 = arith.addf %102, %103 : vector<1x16xf32>
    %105 = tpu.concatenate %104, %104 in 0 : vector<1x16xf32>, vector<1x16xf32> -> vector<2x16xf32>
    %c1400 = arith.constant 1400 : index
    %c0_34 = arith.constant 0 : index
    %106 = vector.load %arg0[%c1400, %c0_34] : memref<2272x128xf32, #tpu.memory_space<vmem>>, vector<48x32xf32>
    %cst_35 = arith.constant dense<0.000000e+00> : vector<32x32xf32>
    %107 = tpu.matmul %77, %106, %cst_35 {dimension_numbers = #tpu.dot_dimension_numbers<[1], [0], [0], [1], [0, 0, 1, 1], [], []>} : vector<32x48xf32>, vector<48x32xf32>, vector<32x32xf32> -> vector<32x32xf32>
    %c1336 = arith.constant 1336 : index
    %c0_36 = arith.constant 0 : index
    %108 = vector.load %arg0[%c1336, %c0_36] : memref<2272x128xf32, #tpu.memory_space<vmem>>, vector<1x32xf32>
    %109 = vector.broadcast %108 : vector<1x32xf32> to vector<32x32xf32>
    %110 = arith.addf %107, %109 : vector<32x32xf32>
    %111 = vector.extract_strided_slice %110 {offsets = [0, 0], sizes = [32, 16], strides = [1, 1]} : vector<32x32xf32> to vector<32x16xf32>
    %112 = vector.extract_strided_slice %110 {offsets = [0, 16], sizes = [32, 16], strides = [1, 1]} : vector<32x32xf32> to vector<32x16xf32>
    %c1448 = arith.constant 1448 : index
    %c0_37 = arith.constant 0 : index
    %113 = vector.load %arg0[%c1448, %c0_37] : memref<2272x128xf32, #tpu.memory_space<vmem>>, vector<16x16xf32>
    %c1344 = arith.constant 1344 : index
    %c0_38 = arith.constant 0 : index
    %114 = vector.load %arg0[%c1344, %c0_38] : memref<2272x128xf32, #tpu.memory_space<vmem>>, vector<1x16xf32>
    %115 = vector.extract_strided_slice %105 {offsets = [0, 0], sizes = [2, 4], strides = [1, 1]} : vector<2x16xf32> to vector<2x4xf32>
    %116 = vector.extract_strided_slice %111 {offsets = [0, 0], sizes = [32, 4], strides = [1, 1]} : vector<32x16xf32> to vector<32x4xf32>
    %cst_39 = arith.constant dense<0.000000e+00> : vector<2x32xf32>
    %117 = tpu.matmul %115, %116, %cst_39 {dimension_numbers = #tpu.dot_dimension_numbers<[1], [1], [0], [0], [0, 0, 1, 0], [], []>} : vector<2x4xf32>, vector<32x4xf32>, vector<2x32xf32> -> vector<2x32xf32>
    %cst_40 = arith.constant 5.000000e-01 : f32
    %118 = vector.broadcast %cst_40 : f32 to vector<2x32xf32>
    %119 = arith.mulf %117, %118 : vector<2x32xf32>
    %120 = arith.addf %119, %51 : vector<2x32xf32>
    %cst_41 = arith.constant dense<0xFF800000> : vector<2xf32>
    %121 = vector.multi_reduction <maximumf>, %120, %cst_41 [1] : vector<2x32xf32> to vector<2xf32>
    %122 = vector.shape_cast %121 : vector<2xf32> to vector<2x1xf32>
    %123 = vector.broadcast %122 : vector<2x1xf32> to vector<2x32xf32>
    %124 = arith.subf %120, %123 : vector<2x32xf32>
    %125 = math.exp %124 : vector<2x32xf32>
    %cst_42 = arith.constant dense<0.000000e+00> : vector<2xf32>
    %126 = vector.multi_reduction <add>, %125, %cst_42 [1] : vector<2x32xf32> to vector<2xf32>
    %127 = vector.shape_cast %126 : vector<2xf32> to vector<2x1xf32>
    %128 = tpu.reciprocal %127 {approx = true} : vector<2x1xf32> -> vector<2x1xf32>
    %129 = vector.broadcast %128 : vector<2x1xf32> to vector<2x32xf32>
    %130 = arith.mulf %125, %129 : vector<2x32xf32>
    %131 = vector.extract_strided_slice %112 {offsets = [0, 0], sizes = [32, 4], strides = [1, 1]} : vector<32x16xf32> to vector<32x4xf32>
    %cst_43 = arith.constant dense<0.000000e+00> : vector<2x4xf32>
    %132 = tpu.matmul %130, %131, %cst_43 {dimension_numbers = #tpu.dot_dimension_numbers<[1], [0], [0], [1], [0, 0, 1, 1], [], []>} : vector<2x32xf32>, vector<32x4xf32>, vector<2x4xf32> -> vector<2x4xf32>
    %133 = vector.extract_strided_slice %105 {offsets = [0, 4], sizes = [2, 4], strides = [1, 1]} : vector<2x16xf32> to vector<2x4xf32>
    %134 = vector.extract_strided_slice %111 {offsets = [0, 4], sizes = [32, 4], strides = [1, 1]} : vector<32x16xf32> to vector<32x4xf32>
    %cst_44 = arith.constant dense<0.000000e+00> : vector<2x32xf32>
    %135 = tpu.matmul %133, %134, %cst_44 {dimension_numbers = #tpu.dot_dimension_numbers<[1], [1], [0], [0], [0, 0, 1, 0], [], []>} : vector<2x4xf32>, vector<32x4xf32>, vector<2x32xf32> -> vector<2x32xf32>
    %cst_45 = arith.constant 5.000000e-01 : f32
    %136 = vector.broadcast %cst_45 : f32 to vector<2x32xf32>
    %137 = arith.mulf %135, %136 : vector<2x32xf32>
    %138 = arith.addf %137, %51 : vector<2x32xf32>
    %cst_46 = arith.constant dense<0xFF800000> : vector<2xf32>
    %139 = vector.multi_reduction <maximumf>, %138, %cst_46 [1] : vector<2x32xf32> to vector<2xf32>
    %140 = vector.shape_cast %139 : vector<2xf32> to vector<2x1xf32>
    %141 = vector.broadcast %140 : vector<2x1xf32> to vector<2x32xf32>
    %142 = arith.subf %138, %141 : vector<2x32xf32>
    %143 = math.exp %142 : vector<2x32xf32>
    %cst_47 = arith.constant dense<0.000000e+00> : vector<2xf32>
    %144 = vector.multi_reduction <add>, %143, %cst_47 [1] : vector<2x32xf32> to vector<2xf32>
    %145 = vector.shape_cast %144 : vector<2xf32> to vector<2x1xf32>
    %146 = tpu.reciprocal %145 {approx = true} : vector<2x1xf32> -> vector<2x1xf32>
    %147 = vector.broadcast %146 : vector<2x1xf32> to vector<2x32xf32>
    %148 = arith.mulf %143, %147 : vector<2x32xf32>
    %149 = vector.extract_strided_slice %112 {offsets = [0, 4], sizes = [32, 4], strides = [1, 1]} : vector<32x16xf32> to vector<32x4xf32>
    %cst_48 = arith.constant dense<0.000000e+00> : vector<2x4xf32>
    %150 = tpu.matmul %148, %149, %cst_48 {dimension_numbers = #tpu.dot_dimension_numbers<[1], [0], [0], [1], [0, 0, 1, 1], [], []>} : vector<2x32xf32>, vector<32x4xf32>, vector<2x4xf32> -> vector<2x4xf32>
    %151 = vector.extract_strided_slice %105 {offsets = [0, 8], sizes = [2, 4], strides = [1, 1]} : vector<2x16xf32> to vector<2x4xf32>
    %152 = vector.extract_strided_slice %111 {offsets = [0, 8], sizes = [32, 4], strides = [1, 1]} : vector<32x16xf32> to vector<32x4xf32>
    %cst_49 = arith.constant dense<0.000000e+00> : vector<2x32xf32>
    %153 = tpu.matmul %151, %152, %cst_49 {dimension_numbers = #tpu.dot_dimension_numbers<[1], [1], [0], [0], [0, 0, 1, 0], [], []>} : vector<2x4xf32>, vector<32x4xf32>, vector<2x32xf32> -> vector<2x32xf32>
    %cst_50 = arith.constant 5.000000e-01 : f32
    %154 = vector.broadcast %cst_50 : f32 to vector<2x32xf32>
    %155 = arith.mulf %153, %154 : vector<2x32xf32>
    %156 = arith.addf %155, %51 : vector<2x32xf32>
    %cst_51 = arith.constant dense<0xFF800000> : vector<2xf32>
    %157 = vector.multi_reduction <maximumf>, %156, %cst_51 [1] : vector<2x32xf32> to vector<2xf32>
    %158 = vector.shape_cast %157 : vector<2xf32> to vector<2x1xf32>
    %159 = vector.broadcast %158 : vector<2x1xf32> to vector<2x32xf32>
    %160 = arith.subf %156, %159 : vector<2x32xf32>
    %161 = math.exp %160 : vector<2x32xf32>
    %cst_52 = arith.constant dense<0.000000e+00> : vector<2xf32>
    %162 = vector.multi_reduction <add>, %161, %cst_52 [1] : vector<2x32xf32> to vector<2xf32>
    %163 = vector.shape_cast %162 : vector<2xf32> to vector<2x1xf32>
    %164 = tpu.reciprocal %163 {approx = true} : vector<2x1xf32> -> vector<2x1xf32>
    %165 = vector.broadcast %164 : vector<2x1xf32> to vector<2x32xf32>
    %166 = arith.mulf %161, %165 : vector<2x32xf32>
    %167 = vector.extract_strided_slice %112 {offsets = [0, 8], sizes = [32, 4], strides = [1, 1]} : vector<32x16xf32> to vector<32x4xf32>
    %cst_53 = arith.constant dense<0.000000e+00> : vector<2x4xf32>
    %168 = tpu.matmul %166, %167, %cst_53 {dimension_numbers = #tpu.dot_dimension_numbers<[1], [0], [0], [1], [0, 0, 1, 1], [], []>} : vector<2x32xf32>, vector<32x4xf32>, vector<2x4xf32> -> vector<2x4xf32>
    %169 = vector.extract_strided_slice %105 {offsets = [0, 12], sizes = [2, 4], strides = [1, 1]} : vector<2x16xf32> to vector<2x4xf32>
    %170 = vector.extract_strided_slice %111 {offsets = [0, 12], sizes = [32, 4], strides = [1, 1]} : vector<32x16xf32> to vector<32x4xf32>
    %cst_54 = arith.constant dense<0.000000e+00> : vector<2x32xf32>
    %171 = tpu.matmul %169, %170, %cst_54 {dimension_numbers = #tpu.dot_dimension_numbers<[1], [1], [0], [0], [0, 0, 1, 0], [], []>} : vector<2x4xf32>, vector<32x4xf32>, vector<2x32xf32> -> vector<2x32xf32>
    %cst_55 = arith.constant 5.000000e-01 : f32
    %172 = vector.broadcast %cst_55 : f32 to vector<2x32xf32>
    %173 = arith.mulf %171, %172 : vector<2x32xf32>
    %174 = arith.addf %173, %51 : vector<2x32xf32>
    %cst_56 = arith.constant dense<0xFF800000> : vector<2xf32>
    %175 = vector.multi_reduction <maximumf>, %174, %cst_56 [1] : vector<2x32xf32> to vector<2xf32>
    %176 = vector.shape_cast %175 : vector<2xf32> to vector<2x1xf32>
    %177 = vector.broadcast %176 : vector<2x1xf32> to vector<2x32xf32>
    %178 = arith.subf %174, %177 : vector<2x32xf32>
    %179 = math.exp %178 : vector<2x32xf32>
    %cst_57 = arith.constant dense<0.000000e+00> : vector<2xf32>
    %180 = vector.multi_reduction <add>, %179, %cst_57 [1] : vector<2x32xf32> to vector<2xf32>
    %181 = vector.shape_cast %180 : vector<2xf32> to vector<2x1xf32>
    %182 = tpu.reciprocal %181 {approx = true} : vector<2x1xf32> -> vector<2x1xf32>
    %183 = vector.broadcast %182 : vector<2x1xf32> to vector<2x32xf32>
    %184 = arith.mulf %179, %183 : vector<2x32xf32>
    %185 = vector.extract_strided_slice %112 {offsets = [0, 12], sizes = [32, 4], strides = [1, 1]} : vector<32x16xf32> to vector<32x4xf32>
    %cst_58 = arith.constant dense<0.000000e+00> : vector<2x4xf32>
    %186 = tpu.matmul %184, %185, %cst_58 {dimension_numbers = #tpu.dot_dimension_numbers<[1], [0], [0], [1], [0, 0, 1, 1], [], []>} : vector<2x32xf32>, vector<32x4xf32>, vector<2x4xf32> -> vector<2x4xf32>
    %187 = tpu.concatenate %132, %150, %168, %186 in 1 : vector<2x4xf32>, vector<2x4xf32>, vector<2x4xf32>, vector<2x4xf32> -> vector<2x16xf32>
    %cst_59 = arith.constant dense<0.000000e+00> : vector<2x16xf32>
    %188 = tpu.matmul %187, %113, %cst_59 {dimension_numbers = #tpu.dot_dimension_numbers<[1], [0], [0], [1], [0, 0, 1, 1], [], []>} : vector<2x16xf32>, vector<16x16xf32>, vector<2x16xf32> -> vector<2x16xf32>
    %189 = vector.broadcast %114 : vector<1x16xf32> to vector<2x16xf32>
    %190 = arith.addf %188, %189 : vector<2x16xf32>
    %191 = vector.broadcast %53 : vector<1x1xf32> to vector<2x16xf32>
    %192 = arith.mulf %191, %190 : vector<2x16xf32>
    %c1512 = arith.constant 1512 : index
    %c0_60 = arith.constant 0 : index
    %193 = vector.load %arg0[%c1512, %c0_60] : memref<2272x128xf32, #tpu.memory_space<vmem>>, vector<1x48xf32>
    %c1504 = arith.constant 1504 : index
    %c0_61 = arith.constant 0 : index
    %194 = vector.load %arg0[%c1504, %c0_61] : memref<2272x128xf32, #tpu.memory_space<vmem>>, vector<1x48xf32>
    %cst_62 = arith.constant dense<0.000000e+00> : vector<32xf32>
    %195 = vector.multi_reduction <add>, %0, %cst_62 [1] : vector<32x48xf32> to vector<32xf32>
    %196 = vector.shape_cast %195 : vector<32xf32> to vector<32x1xf32>
    %cst_63 = arith.constant 4.800000e+01 : f32
    %197 = vector.broadcast %cst_63 : f32 to vector<32x1xf32>
    %198 = arith.divf %196, %197 : vector<32x1xf32>
    %199 = vector.broadcast %198 : vector<32x1xf32> to vector<32x48xf32>
    %200 = arith.subf %0, %199 : vector<32x48xf32>
    %201 = arith.mulf %200, %200 : vector<32x48xf32>
    %cst_64 = arith.constant dense<0.000000e+00> : vector<32xf32>
    %202 = vector.multi_reduction <add>, %201, %cst_64 [1] : vector<32x48xf32> to vector<32xf32>
    %203 = vector.shape_cast %202 : vector<32xf32> to vector<32x1xf32>
    %cst_65 = arith.constant 4.800000e+01 : f32
    %204 = vector.broadcast %cst_65 : f32 to vector<32x1xf32>
    %205 = arith.divf %203, %204 : vector<32x1xf32>
    %206 = vector.broadcast %198 : vector<32x1xf32> to vector<32x48xf32>
    %207 = arith.subf %0, %206 : vector<32x48xf32>
    %cst_66 = arith.constant 9.99999974E-6 : f32
    %208 = vector.broadcast %cst_66 : f32 to vector<32x1xf32>
    %209 = arith.addf %205, %208 : vector<32x1xf32>
    %210 = math.rsqrt %209 : vector<32x1xf32>
    %211 = vector.broadcast %210 : vector<32x1xf32> to vector<32x48xf32>
    %212 = arith.mulf %207, %211 : vector<32x48xf32>
    %213 = vector.broadcast %193 : vector<1x48xf32> to vector<32x48xf32>
    %214 = arith.mulf %212, %213 : vector<32x48xf32>
    %215 = vector.broadcast %194 : vector<1x48xf32> to vector<32x48xf32>
    %216 = arith.addf %214, %215 : vector<32x48xf32>
    %c1536 = arith.constant 1536 : index
    %c0_67 = arith.constant 0 : index
    %217 = vector.load %arg0[%c1536, %c0_67] : memref<2272x128xf32, #tpu.memory_space<vmem>>, vector<4x32xf32>
    %c1528 = arith.constant 1528 : index
    %c0_68 = arith.constant 0 : index
    %218 = vector.load %arg0[%c1528, %c0_68] : memref<2272x128xf32, #tpu.memory_space<vmem>>, vector<1x32xf32>
    %c1520 = arith.constant 1520 : index
    %c0_69 = arith.constant 0 : index
    %219 = vector.load %arg0[%c1520, %c0_69] : memref<2272x128xf32, #tpu.memory_space<vmem>>, vector<1x32xf32>
    %cst_70 = arith.constant dense<0.000000e+00> : vector<4xf32>
    %220 = vector.multi_reduction <add>, %217, %cst_70 [1] : vector<4x32xf32> to vector<4xf32>
    %221 = vector.shape_cast %220 : vector<4xf32> to vector<4x1xf32>
    %cst_71 = arith.constant 3.200000e+01 : f32
    %222 = vector.broadcast %cst_71 : f32 to vector<4x1xf32>
    %223 = arith.divf %221, %222 : vector<4x1xf32>
    %224 = vector.broadcast %223 : vector<4x1xf32> to vector<4x32xf32>
    %225 = arith.subf %217, %224 : vector<4x32xf32>
    %226 = arith.mulf %225, %225 : vector<4x32xf32>
    %cst_72 = arith.constant dense<0.000000e+00> : vector<4xf32>
    %227 = vector.multi_reduction <add>, %226, %cst_72 [1] : vector<4x32xf32> to vector<4xf32>
    %228 = vector.shape_cast %227 : vector<4xf32> to vector<4x1xf32>
    %cst_73 = arith.constant 3.200000e+01 : f32
    %229 = vector.broadcast %cst_73 : f32 to vector<4x1xf32>
    %230 = arith.divf %228, %229 : vector<4x1xf32>
    %231 = vector.broadcast %223 : vector<4x1xf32> to vector<4x32xf32>
    %232 = arith.subf %217, %231 : vector<4x32xf32>
    %cst_74 = arith.constant 9.99999974E-6 : f32
    %233 = vector.broadcast %cst_74 : f32 to vector<4x1xf32>
    %234 = arith.addf %230, %233 : vector<4x1xf32>
    %235 = math.rsqrt %234 : vector<4x1xf32>
    %236 = vector.broadcast %235 : vector<4x1xf32> to vector<4x32xf32>
    %237 = arith.mulf %232, %236 : vector<4x32xf32>
    %238 = vector.broadcast %218 : vector<1x32xf32> to vector<4x32xf32>
    %239 = arith.mulf %237, %238 : vector<4x32xf32>
    %240 = vector.broadcast %219 : vector<1x32xf32> to vector<4x32xf32>
    %241 = arith.addf %239, %240 : vector<4x32xf32>
    %c1624 = arith.constant 1624 : index
    %c0_75 = arith.constant 0 : index
    %242 = vector.load %arg0[%c1624, %c0_75] : memref<2272x128xf32, #tpu.memory_space<vmem>>, vector<32x32xf32>
    %cst_76 = arith.constant dense<0.000000e+00> : vector<4x32xf32>
    %243 = tpu.matmul %241, %242, %cst_76 {dimension_numbers = #tpu.dot_dimension_numbers<[1], [0], [0], [1], [0, 0, 1, 1], [], []>} : vector<4x32xf32>, vector<32x32xf32>, vector<4x32xf32> -> vector<4x32xf32>
    %c1496 = arith.constant 1496 : index
    %c0_77 = arith.constant 0 : index
    %244 = vector.load %arg0[%c1496, %c0_77] : memref<2272x128xf32, #tpu.memory_space<vmem>>, vector<1x32xf32>
    %245 = vector.broadcast %244 : vector<1x32xf32> to vector<4x32xf32>
    %246 = arith.addf %243, %245 : vector<4x32xf32>
    %247 = tpu.concatenate %246, %246 in 0 : vector<4x32xf32>, vector<4x32xf32> -> vector<8x32xf32>
    %c1544 = arith.constant 1544 : index
    %c0_78 = arith.constant 0 : index
    %248 = vector.load %arg0[%c1544, %c0_78] : memref<2272x128xf32, #tpu.memory_space<vmem>>, vector<48x64xf32>
    %cst_79 = arith.constant dense<0.000000e+00> : vector<32x64xf32>
    %249 = tpu.matmul %216, %248, %cst_79 {dimension_numbers = #tpu.dot_dimension_numbers<[1], [0], [0], [1], [0, 0, 1, 1], [], []>} : vector<32x48xf32>, vector<48x64xf32>, vector<32x64xf32> -> vector<32x64xf32>
    %c1480 = arith.constant 1480 : index
    %c0_80 = arith.constant 0 : index
    %250 = vector.load %arg0[%c1480, %c0_80] : memref<2272x128xf32, #tpu.memory_space<vmem>>, vector<1x64xf32>
    %251 = vector.broadcast %250 : vector<1x64xf32> to vector<32x64xf32>
    %252 = arith.addf %249, %251 : vector<32x64xf32>
    %253 = vector.extract_strided_slice %252 {offsets = [0, 0], sizes = [32, 32], strides = [1, 1]} : vector<32x64xf32> to vector<32x32xf32>
    %254 = vector.extract_strided_slice %252 {offsets = [0, 32], sizes = [32, 32], strides = [1, 1]} : vector<32x64xf32> to vector<32x32xf32>
    %c1592 = arith.constant 1592 : index
    %c0_81 = arith.constant 0 : index
    %255 = vector.load %arg0[%c1592, %c0_81] : memref<2272x128xf32, #tpu.memory_space<vmem>>, vector<32x32xf32>
    %c1488 = arith.constant 1488 : index
    %c0_82 = arith.constant 0 : index
    %256 = vector.load %arg0[%c1488, %c0_82] : memref<2272x128xf32, #tpu.memory_space<vmem>>, vector<1x32xf32>
    %257 = vector.extract_strided_slice %247 {offsets = [0, 0], sizes = [8, 8], strides = [1, 1]} : vector<8x32xf32> to vector<8x8xf32>
    %258 = vector.extract_strided_slice %253 {offsets = [0, 0], sizes = [32, 8], strides = [1, 1]} : vector<32x32xf32> to vector<32x8xf32>
    %cst_83 = arith.constant dense<0.000000e+00> : vector<8x32xf32>
    %259 = tpu.matmul %257, %258, %cst_83 {dimension_numbers = #tpu.dot_dimension_numbers<[1], [1], [0], [0], [0, 0, 1, 0], [], []>} : vector<8x8xf32>, vector<32x8xf32>, vector<8x32xf32> -> vector<8x32xf32>
    %cst_84 = arith.constant 0.353553385 : f32
    %260 = vector.broadcast %cst_84 : f32 to vector<8x32xf32>
    %261 = arith.mulf %259, %260 : vector<8x32xf32>
    %262 = arith.addf %261, %41 : vector<8x32xf32>
    %cst_85 = arith.constant dense<0xFF800000> : vector<8xf32>
    %263 = vector.multi_reduction <maximumf>, %262, %cst_85 [1] : vector<8x32xf32> to vector<8xf32>
    %264 = vector.shape_cast %263 : vector<8xf32> to vector<8x1xf32>
    %265 = vector.broadcast %264 : vector<8x1xf32> to vector<8x32xf32>
    %266 = arith.subf %262, %265 : vector<8x32xf32>
    %267 = math.exp %266 : vector<8x32xf32>
    %cst_86 = arith.constant dense<0.000000e+00> : vector<8xf32>
    %268 = vector.multi_reduction <add>, %267, %cst_86 [1] : vector<8x32xf32> to vector<8xf32>
    %269 = vector.shape_cast %268 : vector<8xf32> to vector<8x1xf32>
    %270 = tpu.reciprocal %269 {approx = true} : vector<8x1xf32> -> vector<8x1xf32>
    %271 = vector.broadcast %270 : vector<8x1xf32> to vector<8x32xf32>
    %272 = arith.mulf %267, %271 : vector<8x32xf32>
    %273 = vector.extract_strided_slice %254 {offsets = [0, 0], sizes = [32, 8], strides = [1, 1]} : vector<32x32xf32> to vector<32x8xf32>
    %cst_87 = arith.constant dense<0.000000e+00> : vector<8x8xf32>
    %274 = tpu.matmul %272, %273, %cst_87 {dimension_numbers = #tpu.dot_dimension_numbers<[1], [0], [0], [1], [0, 0, 1, 1], [], []>} : vector<8x32xf32>, vector<32x8xf32>, vector<8x8xf32> -> vector<8x8xf32>
    %275 = vector.extract_strided_slice %247 {offsets = [0, 8], sizes = [8, 8], strides = [1, 1]} : vector<8x32xf32> to vector<8x8xf32>
    %276 = vector.extract_strided_slice %253 {offsets = [0, 8], sizes = [32, 8], strides = [1, 1]} : vector<32x32xf32> to vector<32x8xf32>
    %cst_88 = arith.constant dense<0.000000e+00> : vector<8x32xf32>
    %277 = tpu.matmul %275, %276, %cst_88 {dimension_numbers = #tpu.dot_dimension_numbers<[1], [1], [0], [0], [0, 0, 1, 0], [], []>} : vector<8x8xf32>, vector<32x8xf32>, vector<8x32xf32> -> vector<8x32xf32>
    %cst_89 = arith.constant 0.353553385 : f32
    %278 = vector.broadcast %cst_89 : f32 to vector<8x32xf32>
    %279 = arith.mulf %277, %278 : vector<8x32xf32>
    %280 = arith.addf %279, %41 : vector<8x32xf32>
    %cst_90 = arith.constant dense<0xFF800000> : vector<8xf32>
    %281 = vector.multi_reduction <maximumf>, %280, %cst_90 [1] : vector<8x32xf32> to vector<8xf32>
    %282 = vector.shape_cast %281 : vector<8xf32> to vector<8x1xf32>
    %283 = vector.broadcast %282 : vector<8x1xf32> to vector<8x32xf32>
    %284 = arith.subf %280, %283 : vector<8x32xf32>
    %285 = math.exp %284 : vector<8x32xf32>
    %cst_91 = arith.constant dense<0.000000e+00> : vector<8xf32>
    %286 = vector.multi_reduction <add>, %285, %cst_91 [1] : vector<8x32xf32> to vector<8xf32>
    %287 = vector.shape_cast %286 : vector<8xf32> to vector<8x1xf32>
    %288 = tpu.reciprocal %287 {approx = true} : vector<8x1xf32> -> vector<8x1xf32>
    %289 = vector.broadcast %288 : vector<8x1xf32> to vector<8x32xf32>
    %290 = arith.mulf %285, %289 : vector<8x32xf32>
    %291 = vector.extract_strided_slice %254 {offsets = [0, 8], sizes = [32, 8], strides = [1, 1]} : vector<32x32xf32> to vector<32x8xf32>
    %cst_92 = arith.constant dense<0.000000e+00> : vector<8x8xf32>
    %292 = tpu.matmul %290, %291, %cst_92 {dimension_numbers = #tpu.dot_dimension_numbers<[1], [0], [0], [1], [0, 0, 1, 1], [], []>} : vector<8x32xf32>, vector<32x8xf32>, vector<8x8xf32> -> vector<8x8xf32>
    %293 = vector.extract_strided_slice %247 {offsets = [0, 16], sizes = [8, 8], strides = [1, 1]} : vector<8x32xf32> to vector<8x8xf32>
    %294 = vector.extract_strided_slice %253 {offsets = [0, 16], sizes = [32, 8], strides = [1, 1]} : vector<32x32xf32> to vector<32x8xf32>
    %cst_93 = arith.constant dense<0.000000e+00> : vector<8x32xf32>
    %295 = tpu.matmul %293, %294, %cst_93 {dimension_numbers = #tpu.dot_dimension_numbers<[1], [1], [0], [0], [0, 0, 1, 0], [], []>} : vector<8x8xf32>, vector<32x8xf32>, vector<8x32xf32> -> vector<8x32xf32>
    %cst_94 = arith.constant 0.353553385 : f32
    %296 = vector.broadcast %cst_94 : f32 to vector<8x32xf32>
    %297 = arith.mulf %295, %296 : vector<8x32xf32>
    %298 = arith.addf %297, %41 : vector<8x32xf32>
    %cst_95 = arith.constant dense<0xFF800000> : vector<8xf32>
    %299 = vector.multi_reduction <maximumf>, %298, %cst_95 [1] : vector<8x32xf32> to vector<8xf32>
    %300 = vector.shape_cast %299 : vector<8xf32> to vector<8x1xf32>
    %301 = vector.broadcast %300 : vector<8x1xf32> to vector<8x32xf32>
    %302 = arith.subf %298, %301 : vector<8x32xf32>
    %303 = math.exp %302 : vector<8x32xf32>
    %cst_96 = arith.constant dense<0.000000e+00> : vector<8xf32>
    %304 = vector.multi_reduction <add>, %303, %cst_96 [1] : vector<8x32xf32> to vector<8xf32>
    %305 = vector.shape_cast %304 : vector<8xf32> to vector<8x1xf32>
    %306 = tpu.reciprocal %305 {approx = true} : vector<8x1xf32> -> vector<8x1xf32>
    %307 = vector.broadcast %306 : vector<8x1xf32> to vector<8x32xf32>
    %308 = arith.mulf %303, %307 : vector<8x32xf32>
    %309 = vector.extract_strided_slice %254 {offsets = [0, 16], sizes = [32, 8], strides = [1, 1]} : vector<32x32xf32> to vector<32x8xf32>
    %cst_97 = arith.constant dense<0.000000e+00> : vector<8x8xf32>
    %310 = tpu.matmul %308, %309, %cst_97 {dimension_numbers = #tpu.dot_dimension_numbers<[1], [0], [0], [1], [0, 0, 1, 1], [], []>} : vector<8x32xf32>, vector<32x8xf32>, vector<8x8xf32> -> vector<8x8xf32>
    %311 = vector.extract_strided_slice %247 {offsets = [0, 24], sizes = [8, 8], strides = [1, 1]} : vector<8x32xf32> to vector<8x8xf32>
    %312 = vector.extract_strided_slice %253 {offsets = [0, 24], sizes = [32, 8], strides = [1, 1]} : vector<32x32xf32> to vector<32x8xf32>
    %cst_98 = arith.constant dense<0.000000e+00> : vector<8x32xf32>
    %313 = tpu.matmul %311, %312, %cst_98 {dimension_numbers = #tpu.dot_dimension_numbers<[1], [1], [0], [0], [0, 0, 1, 0], [], []>} : vector<8x8xf32>, vector<32x8xf32>, vector<8x32xf32> -> vector<8x32xf32>
    %cst_99 = arith.constant 0.353553385 : f32
    %314 = vector.broadcast %cst_99 : f32 to vector<8x32xf32>
    %315 = arith.mulf %313, %314 : vector<8x32xf32>
    %316 = arith.addf %315, %41 : vector<8x32xf32>
    %cst_100 = arith.constant dense<0xFF800000> : vector<8xf32>
    %317 = vector.multi_reduction <maximumf>, %316, %cst_100 [1] : vector<8x32xf32> to vector<8xf32>
    %318 = vector.shape_cast %317 : vector<8xf32> to vector<8x1xf32>
    %319 = vector.broadcast %318 : vector<8x1xf32> to vector<8x32xf32>
    %320 = arith.subf %316, %319 : vector<8x32xf32>
    %321 = math.exp %320 : vector<8x32xf32>
    %cst_101 = arith.constant dense<0.000000e+00> : vector<8xf32>
    %322 = vector.multi_reduction <add>, %321, %cst_101 [1] : vector<8x32xf32> to vector<8xf32>
    %323 = vector.shape_cast %322 : vector<8xf32> to vector<8x1xf32>
    %324 = tpu.reciprocal %323 {approx = true} : vector<8x1xf32> -> vector<8x1xf32>
    %325 = vector.broadcast %324 : vector<8x1xf32> to vector<8x32xf32>
    %326 = arith.mulf %321, %325 : vector<8x32xf32>
    %327 = vector.extract_strided_slice %254 {offsets = [0, 24], sizes = [32, 8], strides = [1, 1]} : vector<32x32xf32> to vector<32x8xf32>
    %cst_102 = arith.constant dense<0.000000e+00> : vector<8x8xf32>
    %328 = tpu.matmul %326, %327, %cst_102 {dimension_numbers = #tpu.dot_dimension_numbers<[1], [0], [0], [1], [0, 0, 1, 1], [], []>} : vector<8x32xf32>, vector<32x8xf32>, vector<8x8xf32> -> vector<8x8xf32>
    %329 = tpu.concatenate %274, %292, %310, %328 in 1 : vector<8x8xf32>, vector<8x8xf32>, vector<8x8xf32>, vector<8x8xf32> -> vector<8x32xf32>
    %cst_103 = arith.constant dense<0.000000e+00> : vector<8x32xf32>
    %330 = tpu.matmul %329, %255, %cst_103 {dimension_numbers = #tpu.dot_dimension_numbers<[1], [0], [0], [1], [0, 0, 1, 1], [], []>} : vector<8x32xf32>, vector<32x32xf32>, vector<8x32xf32> -> vector<8x32xf32>
    %331 = vector.broadcast %256 : vector<1x32xf32> to vector<8x32xf32>
    %332 = arith.addf %330, %331 : vector<8x32xf32>
    %c1320 = arith.constant 1320 : index
    %c0_104 = arith.constant 0 : index
    %333 = vector.load %arg0[%c1320, %c0_104] : memref<2272x128xf32, #tpu.memory_space<vmem>>, vector<1x32xf32>
    %c1312 = arith.constant 1312 : index
    %c0_105 = arith.constant 0 : index
    %334 = vector.load %arg0[%c1312, %c0_105] : memref<2272x128xf32, #tpu.memory_space<vmem>>, vector<1x32xf32>
    %cst_106 = arith.constant dense<0.000000e+00> : vector<8xf32>
    %335 = vector.multi_reduction <add>, %332, %cst_106 [1] : vector<8x32xf32> to vector<8xf32>
    %336 = vector.shape_cast %335 : vector<8xf32> to vector<8x1xf32>
    %cst_107 = arith.constant 3.200000e+01 : f32
    %337 = vector.broadcast %cst_107 : f32 to vector<8x1xf32>
    %338 = arith.divf %336, %337 : vector<8x1xf32>
    %339 = vector.broadcast %338 : vector<8x1xf32> to vector<8x32xf32>
    %340 = arith.subf %332, %339 : vector<8x32xf32>
    %341 = arith.mulf %340, %340 : vector<8x32xf32>
    %cst_108 = arith.constant dense<0.000000e+00> : vector<8xf32>
    %342 = vector.multi_reduction <add>, %341, %cst_108 [1] : vector<8x32xf32> to vector<8xf32>
    %343 = vector.shape_cast %342 : vector<8xf32> to vector<8x1xf32>
    %cst_109 = arith.constant 3.200000e+01 : f32
    %344 = vector.broadcast %cst_109 : f32 to vector<8x1xf32>
    %345 = arith.divf %343, %344 : vector<8x1xf32>
    %346 = vector.broadcast %338 : vector<8x1xf32> to vector<8x32xf32>
    %347 = arith.subf %332, %346 : vector<8x32xf32>
    %cst_110 = arith.constant 9.99999974E-6 : f32
    %348 = vector.broadcast %cst_110 : f32 to vector<8x1xf32>
    %349 = arith.addf %345, %348 : vector<8x1xf32>
    %350 = math.rsqrt %349 : vector<8x1xf32>
    %351 = vector.broadcast %350 : vector<8x1xf32> to vector<8x32xf32>
    %352 = arith.mulf %347, %351 : vector<8x32xf32>
    %353 = vector.broadcast %333 : vector<1x32xf32> to vector<8x32xf32>
    %354 = arith.mulf %352, %353 : vector<8x32xf32>
    %355 = vector.broadcast %334 : vector<1x32xf32> to vector<8x32xf32>
    %356 = arith.addf %354, %355 : vector<8x32xf32>
    %c0_111 = arith.constant 0 : index
    %c0_112 = arith.constant 0 : index
    %357 = vector.load %arg3[%c0_111, %c0_112] : memref<40x128xf32, #tpu.memory_space<vmem>>, vector<8x32xf32>
    tpu.vector_store %arg3[%c0_111, %c0_112], %356 {strides = array<i32>} : memref<40x128xf32, #tpu.memory_space<vmem>>, vector<8x32xf32>,
    %c8 = arith.constant 8 : index
    %c0_113 = arith.constant 0 : index
    %358 = vector.load %arg3[%c8, %c0_113] : memref<40x128xf32, #tpu.memory_space<vmem>>, vector<2x16xf32>
    tpu.vector_store %arg3[%c8, %c0_113], %192 {strides = array<i32>} : memref<40x128xf32, #tpu.memory_space<vmem>>, vector<2x16xf32>,
    %359 = tpu.iota {dimensions = array<i32: 1>} : vector<16x16xi32>
    %360 = vector.broadcast %2 : vector<16x1xi32> to vector<16x16xi32>
    %361 = arith.cmpi eq, %359, %360 : vector<16x16xi32>
    %362 = arith.extui %361 : vector<16x16xi1> to vector<16x16xi32>
    %363 = arith.sitofp %362 : vector<16x16xi32> to vector<16x16xf32>
    %c2248 = arith.constant 2248 : index
    %c0_114 = arith.constant 0 : index
    %364 = vector.load %arg0[%c2248, %c0_114] : memref<2272x128xf32, #tpu.memory_space<vmem>>, vector<8x32xf32>
    %365 = tpu.concatenate %364, %364 in 0 : vector<8x32xf32>, vector<8x32xf32> -> vector<16x32xf32>
    %c2256 = arith.constant 2256 : index
    %c0_115 = arith.constant 0 : index
    %366 = vector.load %arg0[%c2256, %c0_115] : memref<2272x128xf32, #tpu.memory_space<vmem>>, vector<16x32xf32>
    %cst_116 = arith.constant dense<0.000000e+00> : vector<16x32xf32>
    %367 = tpu.matmul %363, %366, %cst_116 {dimension_numbers = #tpu.dot_dimension_numbers<[1], [0], [0], [1], [0, 0, 1, 1], [], []>} : vector<16x16xf32>, vector<16x32xf32>, vector<16x32xf32> -> vector<16x32xf32>
    %368 = arith.addf %367, %365 : vector<16x32xf32>
    %c1696 = arith.constant 1696 : index
    %c0_117 = arith.constant 0 : index
    %369 = vector.load %arg0[%c1696, %c0_117] : memref<2272x128xf32, #tpu.memory_space<vmem>>, vector<1x32xf32>
    %c1688 = arith.constant 1688 : index
    %c0_118 = arith.constant 0 : index
    %370 = vector.load %arg0[%c1688, %c0_118] : memref<2272x128xf32, #tpu.memory_space<vmem>>, vector<1x32xf32>
    %cst_119 = arith.constant dense<0.000000e+00> : vector<16xf32>
    %371 = vector.multi_reduction <add>, %368, %cst_119 [1] : vector<16x32xf32> to vector<16xf32>
    %372 = vector.shape_cast %371 : vector<16xf32> to vector<16x1xf32>
    %cst_120 = arith.constant 3.200000e+01 : f32
    %373 = vector.broadcast %cst_120 : f32 to vector<16x1xf32>
    %374 = arith.divf %372, %373 : vector<16x1xf32>
    %375 = vector.broadcast %374 : vector<16x1xf32> to vector<16x32xf32>
    %376 = arith.subf %368, %375 : vector<16x32xf32>
    %377 = arith.mulf %376, %376 : vector<16x32xf32>
    %cst_121 = arith.constant dense<0.000000e+00> : vector<16xf32>
    %378 = vector.multi_reduction <add>, %377, %cst_121 [1] : vector<16x32xf32> to vector<16xf32>
    %379 = vector.shape_cast %378 : vector<16xf32> to vector<16x1xf32>
    %cst_122 = arith.constant 3.200000e+01 : f32
    %380 = vector.broadcast %cst_122 : f32 to vector<16x1xf32>
    %381 = arith.divf %379, %380 : vector<16x1xf32>
    %382 = vector.broadcast %374 : vector<16x1xf32> to vector<16x32xf32>
    %383 = arith.subf %368, %382 : vector<16x32xf32>
    %cst_123 = arith.constant 9.99999974E-6 : f32
    %384 = vector.broadcast %cst_123 : f32 to vector<16x1xf32>
    %385 = arith.addf %381, %384 : vector<16x1xf32>
    %386 = math.rsqrt %385 : vector<16x1xf32>
    %387 = vector.broadcast %386 : vector<16x1xf32> to vector<16x32xf32>
    %388 = arith.mulf %383, %387 : vector<16x32xf32>
    %389 = vector.broadcast %369 : vector<1x32xf32> to vector<16x32xf32>
    %390 = arith.mulf %388, %389 : vector<16x32xf32>
    %391 = vector.broadcast %370 : vector<1x32xf32> to vector<16x32xf32>
    %392 = arith.addf %390, %391 : vector<16x32xf32>
    %c1912 = arith.constant 1912 : index
    %c0_124 = arith.constant 0 : index
    %393 = vector.load %arg0[%c1912, %c0_124] : memref<2272x128xf32, #tpu.memory_space<vmem>>, vector<32x96xf32>
    %cst_125 = arith.constant dense<0.000000e+00> : vector<16x96xf32>
    %394 = tpu.matmul %392, %393, %cst_125 {dimension_numbers = #tpu.dot_dimension_numbers<[1], [0], [0], [1], [0, 0, 1, 1], [], []>} : vector<16x32xf32>, vector<32x96xf32>, vector<16x96xf32> -> vector<16x96xf32>
    %c1680 = arith.constant 1680 : index
    %c0_126 = arith.constant 0 : index
    %395 = vector.load %arg0[%c1680, %c0_126] : memref<2272x128xf32, #tpu.memory_space<vmem>>, vector<1x96xf32>
    %396 = vector.broadcast %395 : vector<1x96xf32> to vector<16x96xf32>
    %397 = arith.addf %394, %396 : vector<16x96xf32>
    %398 = vector.extract_strided_slice %397 {offsets = [0, 0], sizes = [16, 32], strides = [1, 1]} : vector<16x96xf32> to vector<16x32xf32>
    %399 = vector.extract_strided_slice %397 {offsets = [0, 32], sizes = [16, 32], strides = [1, 1]} : vector<16x96xf32> to vector<16x32xf32>
    %400 = vector.extract_strided_slice %397 {offsets = [0, 64], sizes = [16, 32], strides = [1, 1]} : vector<16x96xf32> to vector<16x32xf32>
    %c1880 = arith.constant 1880 : index
    %c0_127 = arith.constant 0 : index
    %401 = vector.load %arg0[%c1880, %c0_127] : memref<2272x128xf32, #tpu.memory_space<vmem>>, vector<32x32xf32>
    %c1672 = arith.constant 1672 : index
    %c0_128 = arith.constant 0 : index
    %402 = vector.load %arg0[%c1672, %c0_128] : memref<2272x128xf32, #tpu.memory_space<vmem>>, vector<1x32xf32>
    %403 = vector.extract_strided_slice %398 {offsets = [0, 0], sizes = [16, 8], strides = [1, 1]} : vector<16x32xf32> to vector<16x8xf32>
    %404 = vector.extract_strided_slice %399 {offsets = [0, 0], sizes = [16, 8], strides = [1, 1]} : vector<16x32xf32> to vector<16x8xf32>
    %cst_129 = arith.constant dense<0.000000e+00> : vector<16x16xf32>
    %405 = tpu.matmul %403, %404, %cst_129 {dimension_numbers = #tpu.dot_dimension_numbers<[1], [1], [0], [0], [0, 0, 1, 0], [], []>} : vector<16x8xf32>, vector<16x8xf32>, vector<16x16xf32> -> vector<16x16xf32>
    %cst_130 = arith.constant 0.353553385 : f32
    %406 = vector.broadcast %cst_130 : f32 to vector<16x16xf32>
    %407 = arith.mulf %405, %406 : vector<16x16xf32>
    %408 = arith.addf %407, %21 : vector<16x16xf32>
    %cst_131 = arith.constant dense<0xFF800000> : vector<16xf32>
    %409 = vector.multi_reduction <maximumf>, %408, %cst_131 [1] : vector<16x16xf32> to vector<16xf32>
    %410 = vector.shape_cast %409 : vector<16xf32> to vector<16x1xf32>
    %411 = vector.broadcast %410 : vector<16x1xf32> to vector<16x16xf32>
    %412 = arith.subf %408, %411 : vector<16x16xf32>
    %413 = math.exp %412 : vector<16x16xf32>
    %cst_132 = arith.constant dense<0.000000e+00> : vector<16xf32>
    %414 = vector.multi_reduction <add>, %413, %cst_132 [1] : vector<16x16xf32> to vector<16xf32>
    %415 = vector.shape_cast %414 : vector<16xf32> to vector<16x1xf32>
    %416 = tpu.reciprocal %415 {approx = true} : vector<16x1xf32> -> vector<16x1xf32>
    %417 = vector.broadcast %416 : vector<16x1xf32> to vector<16x16xf32>
    %418 = arith.mulf %413, %417 : vector<16x16xf32>
    %419 = vector.extract_strided_slice %400 {offsets = [0, 0], sizes = [16, 8], strides = [1, 1]} : vector<16x32xf32> to vector<16x8xf32>
    %cst_133 = arith.constant dense<0.000000e+00> : vector<16x8xf32>
    %420 = tpu.matmul %418, %419, %cst_133 {dimension_numbers = #tpu.dot_dimension_numbers<[1], [0], [0], [1], [0, 0, 1, 1], [], []>} : vector<16x16xf32>, vector<16x8xf32>, vector<16x8xf32> -> vector<16x8xf32>
    %421 = vector.extract_strided_slice %398 {offsets = [0, 8], sizes = [16, 8], strides = [1, 1]} : vector<16x32xf32> to vector<16x8xf32>
    %422 = vector.extract_strided_slice %399 {offsets = [0, 8], sizes = [16, 8], strides = [1, 1]} : vector<16x32xf32> to vector<16x8xf32>
    %cst_134 = arith.constant dense<0.000000e+00> : vector<16x16xf32>
    %423 = tpu.matmul %421, %422, %cst_134 {dimension_numbers = #tpu.dot_dimension_numbers<[1], [1], [0], [0], [0, 0, 1, 0], [], []>} : vector<16x8xf32>, vector<16x8xf32>, vector<16x16xf32> -> vector<16x16xf32>
    %cst_135 = arith.constant 0.353553385 : f32
    %424 = vector.broadcast %cst_135 : f32 to vector<16x16xf32>
    %425 = arith.mulf %423, %424 : vector<16x16xf32>
    %426 = arith.addf %425, %21 : vector<16x16xf32>
    %cst_136 = arith.constant dense<0xFF800000> : vector<16xf32>
    %427 = vector.multi_reduction <maximumf>, %426, %cst_136 [1] : vector<16x16xf32> to vector<16xf32>
    %428 = vector.shape_cast %427 : vector<16xf32> to vector<16x1xf32>
    %429 = vector.broadcast %428 : vector<16x1xf32> to vector<16x16xf32>
    %430 = arith.subf %426, %429 : vector<16x16xf32>
    %431 = math.exp %430 : vector<16x16xf32>
    %cst_137 = arith.constant dense<0.000000e+00> : vector<16xf32>
    %432 = vector.multi_reduction <add>, %431, %cst_137 [1] : vector<16x16xf32> to vector<16xf32>
    %433 = vector.shape_cast %432 : vector<16xf32> to vector<16x1xf32>
    %434 = tpu.reciprocal %433 {approx = true} : vector<16x1xf32> -> vector<16x1xf32>
    %435 = vector.broadcast %434 : vector<16x1xf32> to vector<16x16xf32>
    %436 = arith.mulf %431, %435 : vector<16x16xf32>
    %437 = vector.extract_strided_slice %400 {offsets = [0, 8], sizes = [16, 8], strides = [1, 1]} : vector<16x32xf32> to vector<16x8xf32>
    %cst_138 = arith.constant dense<0.000000e+00> : vector<16x8xf32>
    %438 = tpu.matmul %436, %437, %cst_138 {dimension_numbers = #tpu.dot_dimension_numbers<[1], [0], [0], [1], [0, 0, 1, 1], [], []>} : vector<16x16xf32>, vector<16x8xf32>, vector<16x8xf32> -> vector<16x8xf32>
    %439 = vector.extract_strided_slice %398 {offsets = [0, 16], sizes = [16, 8], strides = [1, 1]} : vector<16x32xf32> to vector<16x8xf32>
    %440 = vector.extract_strided_slice %399 {offsets = [0, 16], sizes = [16, 8], strides = [1, 1]} : vector<16x32xf32> to vector<16x8xf32>
    %cst_139 = arith.constant dense<0.000000e+00> : vector<16x16xf32>
    %441 = tpu.matmul %439, %440, %cst_139 {dimension_numbers = #tpu.dot_dimension_numbers<[1], [1], [0], [0], [0, 0, 1, 0], [], []>} : vector<16x8xf32>, vector<16x8xf32>, vector<16x16xf32> -> vector<16x16xf32>
    %cst_140 = arith.constant 0.353553385 : f32
    %442 = vector.broadcast %cst_140 : f32 to vector<16x16xf32>
    %443 = arith.mulf %441, %442 : vector<16x16xf32>
    %444 = arith.addf %443, %21 : vector<16x16xf32>
    %cst_141 = arith.constant dense<0xFF800000> : vector<16xf32>
    %445 = vector.multi_reduction <maximumf>, %444, %cst_141 [1] : vector<16x16xf32> to vector<16xf32>
    %446 = vector.shape_cast %445 : vector<16xf32> to vector<16x1xf32>
    %447 = vector.broadcast %446 : vector<16x1xf32> to vector<16x16xf32>
    %448 = arith.subf %444, %447 : vector<16x16xf32>
    %449 = math.exp %448 : vector<16x16xf32>
    %cst_142 = arith.constant dense<0.000000e+00> : vector<16xf32>
    %450 = vector.multi_reduction <add>, %449, %cst_142 [1] : vector<16x16xf32> to vector<16xf32>
    %451 = vector.shape_cast %450 : vector<16xf32> to vector<16x1xf32>
    %452 = tpu.reciprocal %451 {approx = true} : vector<16x1xf32> -> vector<16x1xf32>
    %453 = vector.broadcast %452 : vector<16x1xf32> to vector<16x16xf32>
    %454 = arith.mulf %449, %453 : vector<16x16xf32>
    %455 = vector.extract_strided_slice %400 {offsets = [0, 16], sizes = [16, 8], strides = [1, 1]} : vector<16x32xf32> to vector<16x8xf32>
    %cst_143 = arith.constant dense<0.000000e+00> : vector<16x8xf32>
    %456 = tpu.matmul %454, %455, %cst_143 {dimension_numbers = #tpu.dot_dimension_numbers<[1], [0], [0], [1], [0, 0, 1, 1], [], []>} : vector<16x16xf32>, vector<16x8xf32>, vector<16x8xf32> -> vector<16x8xf32>
    %457 = vector.extract_strided_slice %398 {offsets = [0, 24], sizes = [16, 8], strides = [1, 1]} : vector<16x32xf32> to vector<16x8xf32>
    %458 = vector.extract_strided_slice %399 {offsets = [0, 24], sizes = [16, 8], strides = [1, 1]} : vector<16x32xf32> to vector<16x8xf32>
    %cst_144 = arith.constant dense<0.000000e+00> : vector<16x16xf32>
    %459 = tpu.matmul %457, %458, %cst_144 {dimension_numbers = #tpu.dot_dimension_numbers<[1], [1], [0], [0], [0, 0, 1, 0], [], []>} : vector<16x8xf32>, vector<16x8xf32>, vector<16x16xf32> -> vector<16x16xf32>
    %cst_145 = arith.constant 0.353553385 : f32
    %460 = vector.broadcast %cst_145 : f32 to vector<16x16xf32>
    %461 = arith.mulf %459, %460 : vector<16x16xf32>
    %462 = arith.addf %461, %21 : vector<16x16xf32>
    %cst_146 = arith.constant dense<0xFF800000> : vector<16xf32>
    %463 = vector.multi_reduction <maximumf>, %462, %cst_146 [1] : vector<16x16xf32> to vector<16xf32>
    %464 = vector.shape_cast %463 : vector<16xf32> to vector<16x1xf32>
    %465 = vector.broadcast %464 : vector<16x1xf32> to vector<16x16xf32>
    %466 = arith.subf %462, %465 : vector<16x16xf32>
    %467 = math.exp %466 : vector<16x16xf32>
    %cst_147 = arith.constant dense<0.000000e+00> : vector<16xf32>
    %468 = vector.multi_reduction <add>, %467, %cst_147 [1] : vector<16x16xf32> to vector<16xf32>
    %469 = vector.shape_cast %468 : vector<16xf32> to vector<16x1xf32>
    %470 = tpu.reciprocal %469 {approx = true} : vector<16x1xf32> -> vector<16x1xf32>
    %471 = vector.broadcast %470 : vector<16x1xf32> to vector<16x16xf32>
    %472 = arith.mulf %467, %471 : vector<16x16xf32>
    %473 = vector.extract_strided_slice %400 {offsets = [0, 24], sizes = [16, 8], strides = [1, 1]} : vector<16x32xf32> to vector<16x8xf32>
    %cst_148 = arith.constant dense<0.000000e+00> : vector<16x8xf32>
    %474 = tpu.matmul %472, %473, %cst_148 {dimension_numbers = #tpu.dot_dimension_numbers<[1], [0], [0], [1], [0, 0, 1, 1], [], []>} : vector<16x16xf32>, vector<16x8xf32>, vector<16x8xf32> -> vector<16x8xf32>
    %475 = tpu.concatenate %420, %438, %456, %474 in 1 : vector<16x8xf32>, vector<16x8xf32>, vector<16x8xf32>, vector<16x8xf32> -> vector<16x32xf32>
    %cst_149 = arith.constant dense<0.000000e+00> : vector<16x32xf32>
    %476 = tpu.matmul %475, %401, %cst_149 {dimension_numbers = #tpu.dot_dimension_numbers<[1], [0], [0], [1], [0, 0, 1, 1], [], []>} : vector<16x32xf32>, vector<32x32xf32>, vector<16x32xf32> -> vector<16x32xf32>
    %477 = vector.broadcast %402 : vector<1x32xf32> to vector<16x32xf32>
    %478 = arith.addf %476, %477 : vector<16x32xf32>
    %479 = arith.addf %368, %478 : vector<16x32xf32>
    %c1712 = arith.constant 1712 : index
    %c0_150 = arith.constant 0 : index
    %480 = vector.load %arg0[%c1712, %c0_150] : memref<2272x128xf32, #tpu.memory_space<vmem>>, vector<1x32xf32>
    %c1704 = arith.constant 1704 : index
    %c0_151 = arith.constant 0 : index
    %481 = vector.load %arg0[%c1704, %c0_151] : memref<2272x128xf32, #tpu.memory_space<vmem>>, vector<1x32xf32>
    %cst_152 = arith.constant dense<0.000000e+00> : vector<16xf32>
    %482 = vector.multi_reduction <add>, %479, %cst_152 [1] : vector<16x32xf32> to vector<16xf32>
    %483 = vector.shape_cast %482 : vector<16xf32> to vector<16x1xf32>
    %cst_153 = arith.constant 3.200000e+01 : f32
    %484 = vector.broadcast %cst_153 : f32 to vector<16x1xf32>
    %485 = arith.divf %483, %484 : vector<16x1xf32>
    %486 = vector.broadcast %485 : vector<16x1xf32> to vector<16x32xf32>
    %487 = arith.subf %479, %486 : vector<16x32xf32>
    %488 = arith.mulf %487, %487 : vector<16x32xf32>
    %cst_154 = arith.constant dense<0.000000e+00> : vector<16xf32>
    %489 = vector.multi_reduction <add>, %488, %cst_154 [1] : vector<16x32xf32> to vector<16xf32>
    %490 = vector.shape_cast %489 : vector<16xf32> to vector<16x1xf32>
    %cst_155 = arith.constant 3.200000e+01 : f32
    %491 = vector.broadcast %cst_155 : f32 to vector<16x1xf32>
    %492 = arith.divf %490, %491 : vector<16x1xf32>
    %493 = vector.broadcast %485 : vector<16x1xf32> to vector<16x32xf32>
    %494 = arith.subf %479, %493 : vector<16x32xf32>
    %cst_156 = arith.constant 9.99999974E-6 : f32
    %495 = vector.broadcast %cst_156 : f32 to vector<16x1xf32>
    %496 = arith.addf %492, %495 : vector<16x1xf32>
    %497 = math.rsqrt %496 : vector<16x1xf32>
    %498 = vector.broadcast %497 : vector<16x1xf32> to vector<16x32xf32>
    %499 = arith.mulf %494, %498 : vector<16x32xf32>
    %500 = vector.broadcast %480 : vector<1x32xf32> to vector<16x32xf32>
    %501 = arith.mulf %499, %500 : vector<16x32xf32>
    %502 = vector.broadcast %481 : vector<1x32xf32> to vector<16x32xf32>
    %503 = arith.addf %501, %502 : vector<16x32xf32>
    %c1720 = arith.constant 1720 : index
    %c0_157 = arith.constant 0 : index
    %504 = vector.load %arg0[%c1720, %c0_157] : memref<2272x128xf32, #tpu.memory_space<vmem>>, vector<32x128xf32>
    %cst_158 = arith.constant dense<0.000000e+00> : vector<16x128xf32>
    %505 = tpu.matmul %503, %504, %cst_158 {dimension_numbers = #tpu.dot_dimension_numbers<[1], [0], [0], [1], [0, 0, 1, 1], [], []>} : vector<16x32xf32>, vector<32x128xf32>, vector<16x128xf32> -> vector<16x128xf32>
    %c1656 = arith.constant 1656 : index
    %c0_159 = arith.constant 0 : index
    %506 = vector.load %arg0[%c1656, %c0_159] : memref<2272x128xf32, #tpu.memory_space<vmem>>, vector<1x128xf32>
    %507 = vector.broadcast %506 : vector<1x128xf32> to vector<16x128xf32>
    %508 = arith.addf %505, %507 : vector<16x128xf32>
    %cst_160 = arith.constant 5.000000e-01 : f32
    %509 = vector.broadcast %cst_160 : f32 to vector<16x128xf32>
    %510 = arith.mulf %509, %508 : vector<16x128xf32>
    %cst_161 = arith.constant 4.471500e-02 : f32
    %511 = vector.broadcast %cst_161 : f32 to vector<16x128xf32>
    %512 = arith.mulf %511, %508 : vector<16x128xf32>
    %513 = arith.mulf %512, %508 : vector<16x128xf32>
    %514 = arith.mulf %513, %508 : vector<16x128xf32>
    %515 = arith.addf %508, %514 : vector<16x128xf32>
    %cst_162 = arith.constant 0.797884583 : f32
    %516 = vector.broadcast %cst_162 : f32 to vector<16x128xf32>
    %517 = arith.mulf %516, %515 : vector<16x128xf32>
    %518 = math.tanh %517 : vector<16x128xf32>
    %cst_163 = arith.constant 1.000000e+00 : f32
    %519 = vector.broadcast %cst_163 : f32 to vector<16x128xf32>
    %520 = arith.addf %519, %518 : vector<16x128xf32>
    %521 = arith.mulf %510, %520 : vector<16x128xf32>
    %c1752 = arith.constant 1752 : index
    %c0_164 = arith.constant 0 : index
    %522 = vector.load %arg0[%c1752, %c0_164] : memref<2272x128xf32, #tpu.memory_space<vmem>>, vector<128x32xf32>
    %cst_165 = arith.constant dense<0.000000e+00> : vector<16x32xf32>
    %523 = tpu.matmul %521, %522, %cst_165 {dimension_numbers = #tpu.dot_dimension_numbers<[1], [0], [0], [1], [0, 0, 1, 1], [], []>} : vector<16x128xf32>, vector<128x32xf32>, vector<16x32xf32> -> vector<16x32xf32>
    %524 = arith.addf %479, %523 : vector<16x32xf32>
    %c1664 = arith.constant 1664 : index
    %c0_166 = arith.constant 0 : index
    %525 = vector.load %arg0[%c1664, %c0_166] : memref<2272x128xf32, #tpu.memory_space<vmem>>, vector<1x32xf32>
    %526 = vector.broadcast %525 : vector<1x32xf32> to vector<16x32xf32>
    %527 = arith.addf %524, %526 : vector<16x32xf32>
    %c1984 = arith.constant 1984 : index
    %c0_167 = arith.constant 0 : index
    %528 = vector.load %arg0[%c1984, %c0_167] : memref<2272x128xf32, #tpu.memory_space<vmem>>, vector<1x32xf32>
    %c1976 = arith.constant 1976 : index
    %c0_168 = arith.constant 0 : index
    %529 = vector.load %arg0[%c1976, %c0_168] : memref<2272x128xf32, #tpu.memory_space<vmem>>, vector<1x32xf32>
    %cst_169 = arith.constant dense<0.000000e+00> : vector<16xf32>
    %530 = vector.multi_reduction <add>, %527, %cst_169 [1] : vector<16x32xf32> to vector<16xf32>
    %531 = vector.shape_cast %530 : vector<16xf32> to vector<16x1xf32>
    %cst_170 = arith.constant 3.200000e+01 : f32
    %532 = vector.broadcast %cst_170 : f32 to vector<16x1xf32>
    %533 = arith.divf %531, %532 : vector<16x1xf32>
    %534 = vector.broadcast %533 : vector<16x1xf32> to vector<16x32xf32>
    %535 = arith.subf %527, %534 : vector<16x32xf32>
    %536 = arith.mulf %535, %535 : vector<16x32xf32>
    %cst_171 = arith.constant dense<0.000000e+00> : vector<16xf32>
    %537 = vector.multi_reduction <add>, %536, %cst_171 [1] : vector<16x32xf32> to vector<16xf32>
    %538 = vector.shape_cast %537 : vector<16xf32> to vector<16x1xf32>
    %cst_172 = arith.constant 3.200000e+01 : f32
    %539 = vector.broadcast %cst_172 : f32 to vector<16x1xf32>
    %540 = arith.divf %538, %539 : vector<16x1xf32>
    %541 = vector.broadcast %533 : vector<16x1xf32> to vector<16x32xf32>
    %542 = arith.subf %527, %541 : vector<16x32xf32>
    %cst_173 = arith.constant 9.99999974E-6 : f32
    %543 = vector.broadcast %cst_173 : f32 to vector<16x1xf32>
    %544 = arith.addf %540, %543 : vector<16x1xf32>
    %545 = math.rsqrt %544 : vector<16x1xf32>
    %546 = vector.broadcast %545 : vector<16x1xf32> to vector<16x32xf32>
    %547 = arith.mulf %542, %546 : vector<16x32xf32>
    %548 = vector.broadcast %528 : vector<1x32xf32> to vector<16x32xf32>
    %549 = arith.mulf %547, %548 : vector<16x32xf32>
    %550 = vector.broadcast %529 : vector<1x32xf32> to vector<16x32xf32>
    %551 = arith.addf %549, %550 : vector<16x32xf32>
    %c2200 = arith.constant 2200 : index
    %c0_174 = arith.constant 0 : index
    %552 = vector.load %arg0[%c2200, %c0_174] : memref<2272x128xf32, #tpu.memory_space<vmem>>, vector<32x96xf32>
    %cst_175 = arith.constant dense<0.000000e+00> : vector<16x96xf32>
    %553 = tpu.matmul %551, %552, %cst_175 {dimension_numbers = #tpu.dot_dimension_numbers<[1], [0], [0], [1], [0, 0, 1, 1], [], []>} : vector<16x32xf32>, vector<32x96xf32>, vector<16x96xf32> -> vector<16x96xf32>
    %c1968 = arith.constant 1968 : index
    %c0_176 = arith.constant 0 : index
    %554 = vector.load %arg0[%c1968, %c0_176] : memref<2272x128xf32, #tpu.memory_space<vmem>>, vector<1x96xf32>
    %555 = vector.broadcast %554 : vector<1x96xf32> to vector<16x96xf32>
    %556 = arith.addf %553, %555 : vector<16x96xf32>
    %557 = vector.extract_strided_slice %556 {offsets = [0, 0], sizes = [16, 32], strides = [1, 1]} : vector<16x96xf32> to vector<16x32xf32>
    %558 = vector.extract_strided_slice %556 {offsets = [0, 32], sizes = [16, 32], strides = [1, 1]} : vector<16x96xf32> to vector<16x32xf32>
    %559 = vector.extract_strided_slice %556 {offsets = [0, 64], sizes = [16, 32], strides = [1, 1]} : vector<16x96xf32> to vector<16x32xf32>
    %c2168 = arith.constant 2168 : index
    %c0_177 = arith.constant 0 : index
    %560 = vector.load %arg0[%c2168, %c0_177] : memref<2272x128xf32, #tpu.memory_space<vmem>>, vector<32x32xf32>
    %c1960 = arith.constant 1960 : index
    %c0_178 = arith.constant 0 : index
    %561 = vector.load %arg0[%c1960, %c0_178] : memref<2272x128xf32, #tpu.memory_space<vmem>>, vector<1x32xf32>
    %562 = vector.extract_strided_slice %557 {offsets = [0, 0], sizes = [16, 8], strides = [1, 1]} : vector<16x32xf32> to vector<16x8xf32>
    %563 = vector.extract_strided_slice %558 {offsets = [0, 0], sizes = [16, 8], strides = [1, 1]} : vector<16x32xf32> to vector<16x8xf32>
    %cst_179 = arith.constant dense<0.000000e+00> : vector<16x16xf32>
    %564 = tpu.matmul %562, %563, %cst_179 {dimension_numbers = #tpu.dot_dimension_numbers<[1], [1], [0], [0], [0, 0, 1, 0], [], []>} : vector<16x8xf32>, vector<16x8xf32>, vector<16x16xf32> -> vector<16x16xf32>
    %cst_180 = arith.constant 0.353553385 : f32
    %565 = vector.broadcast %cst_180 : f32 to vector<16x16xf32>
    %566 = arith.mulf %564, %565 : vector<16x16xf32>
    %567 = arith.addf %566, %21 : vector<16x16xf32>
    %cst_181 = arith.constant dense<0xFF800000> : vector<16xf32>
    %568 = vector.multi_reduction <maximumf>, %567, %cst_181 [1] : vector<16x16xf32> to vector<16xf32>
    %569 = vector.shape_cast %568 : vector<16xf32> to vector<16x1xf32>
    %570 = vector.broadcast %569 : vector<16x1xf32> to vector<16x16xf32>
    %571 = arith.subf %567, %570 : vector<16x16xf32>
    %572 = math.exp %571 : vector<16x16xf32>
    %cst_182 = arith.constant dense<0.000000e+00> : vector<16xf32>
    %573 = vector.multi_reduction <add>, %572, %cst_182 [1] : vector<16x16xf32> to vector<16xf32>
    %574 = vector.shape_cast %573 : vector<16xf32> to vector<16x1xf32>
    %575 = tpu.reciprocal %574 {approx = true} : vector<16x1xf32> -> vector<16x1xf32>
    %576 = vector.broadcast %575 : vector<16x1xf32> to vector<16x16xf32>
    %577 = arith.mulf %572, %576 : vector<16x16xf32>
    %578 = vector.extract_strided_slice %559 {offsets = [0, 0], sizes = [16, 8], strides = [1, 1]} : vector<16x32xf32> to vector<16x8xf32>
    %cst_183 = arith.constant dense<0.000000e+00> : vector<16x8xf32>
    %579 = tpu.matmul %577, %578, %cst_183 {dimension_numbers = #tpu.dot_dimension_numbers<[1], [0], [0], [1], [0, 0, 1, 1], [], []>} : vector<16x16xf32>, vector<16x8xf32>, vector<16x8xf32> -> vector<16x8xf32>
    %580 = vector.extract_strided_slice %557 {offsets = [0, 8], sizes = [16, 8], strides = [1, 1]} : vector<16x32xf32> to vector<16x8xf32>
    %581 = vector.extract_strided_slice %558 {offsets = [0, 8], sizes = [16, 8], strides = [1, 1]} : vector<16x32xf32> to vector<16x8xf32>
    %cst_184 = arith.constant dense<0.000000e+00> : vector<16x16xf32>
    %582 = tpu.matmul %580, %581, %cst_184 {dimension_numbers = #tpu.dot_dimension_numbers<[1], [1], [0], [0], [0, 0, 1, 0], [], []>} : vector<16x8xf32>, vector<16x8xf32>, vector<16x16xf32> -> vector<16x16xf32>
    %cst_185 = arith.constant 0.353553385 : f32
    %583 = vector.broadcast %cst_185 : f32 to vector<16x16xf32>
    %584 = arith.mulf %582, %583 : vector<16x16xf32>
    %585 = arith.addf %584, %21 : vector<16x16xf32>
    %cst_186 = arith.constant dense<0xFF800000> : vector<16xf32>
    %586 = vector.multi_reduction <maximumf>, %585, %cst_186 [1] : vector<16x16xf32> to vector<16xf32>
    %587 = vector.shape_cast %586 : vector<16xf32> to vector<16x1xf32>
    %588 = vector.broadcast %587 : vector<16x1xf32> to vector<16x16xf32>
    %589 = arith.subf %585, %588 : vector<16x16xf32>
    %590 = math.exp %589 : vector<16x16xf32>
    %cst_187 = arith.constant dense<0.000000e+00> : vector<16xf32>
    %591 = vector.multi_reduction <add>, %590, %cst_187 [1] : vector<16x16xf32> to vector<16xf32>
    %592 = vector.shape_cast %591 : vector<16xf32> to vector<16x1xf32>
    %593 = tpu.reciprocal %592 {approx = true} : vector<16x1xf32> -> vector<16x1xf32>
    %594 = vector.broadcast %593 : vector<16x1xf32> to vector<16x16xf32>
    %595 = arith.mulf %590, %594 : vector<16x16xf32>
    %596 = vector.extract_strided_slice %559 {offsets = [0, 8], sizes = [16, 8], strides = [1, 1]} : vector<16x32xf32> to vector<16x8xf32>
    %cst_188 = arith.constant dense<0.000000e+00> : vector<16x8xf32>
    %597 = tpu.matmul %595, %596, %cst_188 {dimension_numbers = #tpu.dot_dimension_numbers<[1], [0], [0], [1], [0, 0, 1, 1], [], []>} : vector<16x16xf32>, vector<16x8xf32>, vector<16x8xf32> -> vector<16x8xf32>
    %598 = vector.extract_strided_slice %557 {offsets = [0, 16], sizes = [16, 8], strides = [1, 1]} : vector<16x32xf32> to vector<16x8xf32>
    %599 = vector.extract_strided_slice %558 {offsets = [0, 16], sizes = [16, 8], strides = [1, 1]} : vector<16x32xf32> to vector<16x8xf32>
    %cst_189 = arith.constant dense<0.000000e+00> : vector<16x16xf32>
    %600 = tpu.matmul %598, %599, %cst_189 {dimension_numbers = #tpu.dot_dimension_numbers<[1], [1], [0], [0], [0, 0, 1, 0], [], []>} : vector<16x8xf32>, vector<16x8xf32>, vector<16x16xf32> -> vector<16x16xf32>
    %cst_190 = arith.constant 0.353553385 : f32
    %601 = vector.broadcast %cst_190 : f32 to vector<16x16xf32>
    %602 = arith.mulf %600, %601 : vector<16x16xf32>
    %603 = arith.addf %602, %21 : vector<16x16xf32>
    %cst_191 = arith.constant dense<0xFF800000> : vector<16xf32>
    %604 = vector.multi_reduction <maximumf>, %603, %cst_191 [1] : vector<16x16xf32> to vector<16xf32>
    %605 = vector.shape_cast %604 : vector<16xf32> to vector<16x1xf32>
    %606 = vector.broadcast %605 : vector<16x1xf32> to vector<16x16xf32>
    %607 = arith.subf %603, %606 : vector<16x16xf32>
    %608 = math.exp %607 : vector<16x16xf32>
    %cst_192 = arith.constant dense<0.000000e+00> : vector<16xf32>
    %609 = vector.multi_reduction <add>, %608, %cst_192 [1] : vector<16x16xf32> to vector<16xf32>
    %610 = vector.shape_cast %609 : vector<16xf32> to vector<16x1xf32>
    %611 = tpu.reciprocal %610 {approx = true} : vector<16x1xf32> -> vector<16x1xf32>
    %612 = vector.broadcast %611 : vector<16x1xf32> to vector<16x16xf32>
    %613 = arith.mulf %608, %612 : vector<16x16xf32>
    %614 = vector.extract_strided_slice %559 {offsets = [0, 16], sizes = [16, 8], strides = [1, 1]} : vector<16x32xf32> to vector<16x8xf32>
    %cst_193 = arith.constant dense<0.000000e+00> : vector<16x8xf32>
    %615 = tpu.matmul %613, %614, %cst_193 {dimension_numbers = #tpu.dot_dimension_numbers<[1], [0], [0], [1], [0, 0, 1, 1], [], []>} : vector<16x16xf32>, vector<16x8xf32>, vector<16x8xf32> -> vector<16x8xf32>
    %616 = vector.extract_strided_slice %557 {offsets = [0, 24], sizes = [16, 8], strides = [1, 1]} : vector<16x32xf32> to vector<16x8xf32>
    %617 = vector.extract_strided_slice %558 {offsets = [0, 24], sizes = [16, 8], strides = [1, 1]} : vector<16x32xf32> to vector<16x8xf32>
    %cst_194 = arith.constant dense<0.000000e+00> : vector<16x16xf32>
    %618 = tpu.matmul %616, %617, %cst_194 {dimension_numbers = #tpu.dot_dimension_numbers<[1], [1], [0], [0], [0, 0, 1, 0], [], []>} : vector<16x8xf32>, vector<16x8xf32>, vector<16x16xf32> -> vector<16x16xf32>
    %cst_195 = arith.constant 0.353553385 : f32
    %619 = vector.broadcast %cst_195 : f32 to vector<16x16xf32>
    %620 = arith.mulf %618, %619 : vector<16x16xf32>
    %621 = arith.addf %620, %21 : vector<16x16xf32>
    %cst_196 = arith.constant dense<0xFF800000> : vector<16xf32>
    %622 = vector.multi_reduction <maximumf>, %621, %cst_196 [1] : vector<16x16xf32> to vector<16xf32>
    %623 = vector.shape_cast %622 : vector<16xf32> to vector<16x1xf32>
    %624 = vector.broadcast %623 : vector<16x1xf32> to vector<16x16xf32>
    %625 = arith.subf %621, %624 : vector<16x16xf32>
    %626 = math.exp %625 : vector<16x16xf32>
    %cst_197 = arith.constant dense<0.000000e+00> : vector<16xf32>
    %627 = vector.multi_reduction <add>, %626, %cst_197 [1] : vector<16x16xf32> to vector<16xf32>
    %628 = vector.shape_cast %627 : vector<16xf32> to vector<16x1xf32>
    %629 = tpu.reciprocal %628 {approx = true} : vector<16x1xf32> -> vector<16x1xf32>
    %630 = vector.broadcast %629 : vector<16x1xf32> to vector<16x16xf32>
    %631 = arith.mulf %626, %630 : vector<16x16xf32>
    %632 = vector.extract_strided_slice %559 {offsets = [0, 24], sizes = [16, 8], strides = [1, 1]} : vector<16x32xf32> to vector<16x8xf32>
    %cst_198 = arith.constant dense<0.000000e+00> : vector<16x8xf32>
    %633 = tpu.matmul %631, %632, %cst_198 {dimension_numbers = #tpu.dot_dimension_numbers<[1], [0], [0], [1], [0, 0, 1, 1], [], []>} : vector<16x16xf32>, vector<16x8xf32>, vector<16x8xf32> -> vector<16x8xf32>
    %634 = tpu.concatenate %579, %597, %615, %633 in 1 : vector<16x8xf32>, vector<16x8xf32>, vector<16x8xf32>, vector<16x8xf32> -> vector<16x32xf32>
    %cst_199 = arith.constant dense<0.000000e+00> : vector<16x32xf32>
    %635 = tpu.matmul %634, %560, %cst_199 {dimension_numbers = #tpu.dot_dimension_numbers<[1], [0], [0], [1], [0, 0, 1, 1], [], []>} : vector<16x32xf32>, vector<32x32xf32>, vector<16x32xf32> -> vector<16x32xf32>
    %636 = vector.broadcast %561 : vector<1x32xf32> to vector<16x32xf32>
    %637 = arith.addf %635, %636 : vector<16x32xf32>
    %638 = arith.addf %527, %637 : vector<16x32xf32>
    %c2000 = arith.constant 2000 : index
    %c0_200 = arith.constant 0 : index
    %639 = vector.load %arg0[%c2000, %c0_200] : memref<2272x128xf32, #tpu.memory_space<vmem>>, vector<1x32xf32>
    %c1992 = arith.constant 1992 : index
    %c0_201 = arith.constant 0 : index
    %640 = vector.load %arg0[%c1992, %c0_201] : memref<2272x128xf32, #tpu.memory_space<vmem>>, vector<1x32xf32>
    %cst_202 = arith.constant dense<0.000000e+00> : vector<16xf32>
    %641 = vector.multi_reduction <add>, %638, %cst_202 [1] : vector<16x32xf32> to vector<16xf32>
    %642 = vector.shape_cast %641 : vector<16xf32> to vector<16x1xf32>
    %cst_203 = arith.constant 3.200000e+01 : f32
    %643 = vector.broadcast %cst_203 : f32 to vector<16x1xf32>
    %644 = arith.divf %642, %643 : vector<16x1xf32>
    %645 = vector.broadcast %644 : vector<16x1xf32> to vector<16x32xf32>
    %646 = arith.subf %638, %645 : vector<16x32xf32>
    %647 = arith.mulf %646, %646 : vector<16x32xf32>
    %cst_204 = arith.constant dense<0.000000e+00> : vector<16xf32>
    %648 = vector.multi_reduction <add>, %647, %cst_204 [1] : vector<16x32xf32> to vector<16xf32>
    %649 = vector.shape_cast %648 : vector<16xf32> to vector<16x1xf32>
    %cst_205 = arith.constant 3.200000e+01 : f32
    %650 = vector.broadcast %cst_205 : f32 to vector<16x1xf32>
    %651 = arith.divf %649, %650 : vector<16x1xf32>
    %652 = vector.broadcast %644 : vector<16x1xf32> to vector<16x32xf32>
    %653 = arith.subf %638, %652 : vector<16x32xf32>
    %cst_206 = arith.constant 9.99999974E-6 : f32
    %654 = vector.broadcast %cst_206 : f32 to vector<16x1xf32>
    %655 = arith.addf %651, %654 : vector<16x1xf32>
    %656 = math.rsqrt %655 : vector<16x1xf32>
    %657 = vector.broadcast %656 : vector<16x1xf32> to vector<16x32xf32>
    %658 = arith.mulf %653, %657 : vector<16x32xf32>
    %659 = vector.broadcast %639 : vector<1x32xf32> to vector<16x32xf32>
    %660 = arith.mulf %658, %659 : vector<16x32xf32>
    %661 = vector.broadcast %640 : vector<1x32xf32> to vector<16x32xf32>
    %662 = arith.addf %660, %661 : vector<16x32xf32>
    %c2008 = arith.constant 2008 : index
    %c0_207 = arith.constant 0 : index
    %663 = vector.load %arg0[%c2008, %c0_207] : memref<2272x128xf32, #tpu.memory_space<vmem>>, vector<32x128xf32>
    %cst_208 = arith.constant dense<0.000000e+00> : vector<16x128xf32>
    %664 = tpu.matmul %662, %663, %cst_208 {dimension_numbers = #tpu.dot_dimension_numbers<[1], [0], [0], [1], [0, 0, 1, 1], [], []>} : vector<16x32xf32>, vector<32x128xf32>, vector<16x128xf32> -> vector<16x128xf32>
    %c1944 = arith.constant 1944 : index
    %c0_209 = arith.constant 0 : index
    %665 = vector.load %arg0[%c1944, %c0_209] : memref<2272x128xf32, #tpu.memory_space<vmem>>, vector<1x128xf32>
    %666 = vector.broadcast %665 : vector<1x128xf32> to vector<16x128xf32>
    %667 = arith.addf %664, %666 : vector<16x128xf32>
    %cst_210 = arith.constant 5.000000e-01 : f32
    %668 = vector.broadcast %cst_210 : f32 to vector<16x128xf32>
    %669 = arith.mulf %668, %667 : vector<16x128xf32>
    %cst_211 = arith.constant 4.471500e-02 : f32
    %670 = vector.broadcast %cst_211 : f32 to vector<16x128xf32>
    %671 = arith.mulf %670, %667 : vector<16x128xf32>
    %672 = arith.mulf %671, %667 : vector<16x128xf32>
    %673 = arith.mulf %672, %667 : vector<16x128xf32>
    %674 = arith.addf %667, %673 : vector<16x128xf32>
    %cst_212 = arith.constant 0.797884583 : f32
    %675 = vector.broadcast %cst_212 : f32 to vector<16x128xf32>
    %676 = arith.mulf %675, %674 : vector<16x128xf32>
    %677 = math.tanh %676 : vector<16x128xf32>
    %cst_213 = arith.constant 1.000000e+00 : f32
    %678 = vector.broadcast %cst_213 : f32 to vector<16x128xf32>
    %679 = arith.addf %678, %677 : vector<16x128xf32>
    %680 = arith.mulf %669, %679 : vector<16x128xf32>
    %c2040 = arith.constant 2040 : index
    %c0_214 = arith.constant 0 : index
    %681 = vector.load %arg0[%c2040, %c0_214] : memref<2272x128xf32, #tpu.memory_space<vmem>>, vector<128x32xf32>
    %cst_215 = arith.constant dense<0.000000e+00> : vector<16x32xf32>
    %682 = tpu.matmul %680, %681, %cst_215 {dimension_numbers = #tpu.dot_dimension_numbers<[1], [0], [0], [1], [0, 0, 1, 1], [], []>} : vector<16x128xf32>, vector<128x32xf32>, vector<16x32xf32> -> vector<16x32xf32>
    %683 = arith.addf %638, %682 : vector<16x32xf32>
    %c1952 = arith.constant 1952 : index
    %c0_216 = arith.constant 0 : index
    %684 = vector.load %arg0[%c1952, %c0_216] : memref<2272x128xf32, #tpu.memory_space<vmem>>, vector<1x32xf32>
    %685 = vector.broadcast %684 : vector<1x32xf32> to vector<16x32xf32>
    %686 = arith.addf %683, %685 : vector<16x32xf32>
    %c2240 = arith.constant 2240 : index
    %c0_217 = arith.constant 0 : index
    %687 = vector.load %arg0[%c2240, %c0_217] : memref<2272x128xf32, #tpu.memory_space<vmem>>, vector<1x32xf32>
    %c2232 = arith.constant 2232 : index
    %c0_218 = arith.constant 0 : index
    %688 = vector.load %arg0[%c2232, %c0_218] : memref<2272x128xf32, #tpu.memory_space<vmem>>, vector<1x32xf32>
    %cst_219 = arith.constant dense<0.000000e+00> : vector<16xf32>
    %689 = vector.multi_reduction <add>, %686, %cst_219 [1] : vector<16x32xf32> to vector<16xf32>
    %690 = vector.shape_cast %689 : vector<16xf32> to vector<16x1xf32>
    %cst_220 = arith.constant 3.200000e+01 : f32
    %691 = vector.broadcast %cst_220 : f32 to vector<16x1xf32>
    %692 = arith.divf %690, %691 : vector<16x1xf32>
    %693 = vector.broadcast %692 : vector<16x1xf32> to vector<16x32xf32>
    %694 = arith.subf %686, %693 : vector<16x32xf32>
    %695 = arith.mulf %694, %694 : vector<16x32xf32>
    %cst_221 = arith.constant dense<0.000000e+00> : vector<16xf32>
    %696 = vector.multi_reduction <add>, %695, %cst_221 [1] : vector<16x32xf32> to vector<16xf32>
    %697 = vector.shape_cast %696 : vector<16xf32> to vector<16x1xf32>
    %cst_222 = arith.constant 3.200000e+01 : f32
    %698 = vector.broadcast %cst_222 : f32 to vector<16x1xf32>
    %699 = arith.divf %697, %698 : vector<16x1xf32>
    %700 = vector.broadcast %692 : vector<16x1xf32> to vector<16x32xf32>
    %701 = arith.subf %686, %700 : vector<16x32xf32>
    %cst_223 = arith.constant 9.99999974E-6 : f32
    %702 = vector.broadcast %cst_223 : f32 to vector<16x1xf32>
    %703 = arith.addf %699, %702 : vector<16x1xf32>
    %704 = math.rsqrt %703 : vector<16x1xf32>
    %705 = vector.broadcast %704 : vector<16x1xf32> to vector<16x32xf32>
    %706 = arith.mulf %701, %705 : vector<16x32xf32>
    %707 = vector.broadcast %687 : vector<1x32xf32> to vector<16x32xf32>
    %708 = arith.mulf %706, %707 : vector<16x32xf32>
    %709 = vector.broadcast %688 : vector<1x32xf32> to vector<16x32xf32>
    %710 = arith.addf %708, %709 : vector<16x32xf32>
    %c744 = arith.constant 744 : index
    %c0_224 = arith.constant 0 : index
    %711 = vector.load %arg0[%c744, %c0_224] : memref<2272x128xf32, #tpu.memory_space<vmem>>, vector<1x32xf32>
    %c736 = arith.constant 736 : index
    %c0_225 = arith.constant 0 : index
    %712 = vector.load %arg0[%c736, %c0_225] : memref<2272x128xf32, #tpu.memory_space<vmem>>, vector<1x32xf32>
    %cst_226 = arith.constant dense<0.000000e+00> : vector<16xf32>
    %713 = vector.multi_reduction <add>, %710, %cst_226 [1] : vector<16x32xf32> to vector<16xf32>
    %714 = vector.shape_cast %713 : vector<16xf32> to vector<16x1xf32>
    %cst_227 = arith.constant 3.200000e+01 : f32
    %715 = vector.broadcast %cst_227 : f32 to vector<16x1xf32>
    %716 = arith.divf %714, %715 : vector<16x1xf32>
    %717 = vector.broadcast %716 : vector<16x1xf32> to vector<16x32xf32>
    %718 = arith.subf %710, %717 : vector<16x32xf32>
    %719 = arith.mulf %718, %718 : vector<16x32xf32>
    %cst_228 = arith.constant dense<0.000000e+00> : vector<16xf32>
    %720 = vector.multi_reduction <add>, %719, %cst_228 [1] : vector<16x32xf32> to vector<16xf32>
    %721 = vector.shape_cast %720 : vector<16xf32> to vector<16x1xf32>
    %cst_229 = arith.constant 3.200000e+01 : f32
    %722 = vector.broadcast %cst_229 : f32 to vector<16x1xf32>
    %723 = arith.divf %721, %722 : vector<16x1xf32>
    %724 = vector.broadcast %716 : vector<16x1xf32> to vector<16x32xf32>
    %725 = arith.subf %710, %724 : vector<16x32xf32>
    %cst_230 = arith.constant 9.99999974E-6 : f32
    %726 = vector.broadcast %cst_230 : f32 to vector<16x1xf32>
    %727 = arith.addf %723, %726 : vector<16x1xf32>
    %728 = math.rsqrt %727 : vector<16x1xf32>
    %729 = vector.broadcast %728 : vector<16x1xf32> to vector<16x32xf32>
    %730 = arith.mulf %725, %729 : vector<16x32xf32>
    %731 = vector.broadcast %711 : vector<1x32xf32> to vector<16x32xf32>
    %732 = arith.mulf %730, %731 : vector<16x32xf32>
    %733 = vector.broadcast %712 : vector<1x32xf32> to vector<16x32xf32>
    %734 = arith.addf %732, %733 : vector<16x32xf32>
    %c960 = arith.constant 960 : index
    %c0_231 = arith.constant 0 : index
    %735 = vector.load %arg0[%c960, %c0_231] : memref<2272x128xf32, #tpu.memory_space<vmem>>, vector<32x96xf32>
    %cst_232 = arith.constant dense<0.000000e+00> : vector<16x96xf32>
    %736 = tpu.matmul %734, %735, %cst_232 {dimension_numbers = #tpu.dot_dimension_numbers<[1], [0], [0], [1], [0, 0, 1, 1], [], []>} : vector<16x32xf32>, vector<32x96xf32>, vector<16x96xf32> -> vector<16x96xf32>
    %c728 = arith.constant 728 : index
    %c0_233 = arith.constant 0 : index
    %737 = vector.load %arg0[%c728, %c0_233] : memref<2272x128xf32, #tpu.memory_space<vmem>>, vector<1x96xf32>
    %738 = vector.broadcast %737 : vector<1x96xf32> to vector<16x96xf32>
    %739 = arith.addf %736, %738 : vector<16x96xf32>
    %740 = vector.extract_strided_slice %739 {offsets = [0, 0], sizes = [16, 32], strides = [1, 1]} : vector<16x96xf32> to vector<16x32xf32>
    %741 = vector.extract_strided_slice %739 {offsets = [0, 32], sizes = [16, 32], strides = [1, 1]} : vector<16x96xf32> to vector<16x32xf32>
    %742 = vector.extract_strided_slice %739 {offsets = [0, 64], sizes = [16, 32], strides = [1, 1]} : vector<16x96xf32> to vector<16x32xf32>
    %c928 = arith.constant 928 : index
    %c0_234 = arith.constant 0 : index
    %743 = vector.load %arg0[%c928, %c0_234] : memref<2272x128xf32, #tpu.memory_space<vmem>>, vector<32x32xf32>
    %c720 = arith.constant 720 : index
    %c0_235 = arith.constant 0 : index
    %744 = vector.load %arg0[%c720, %c0_235] : memref<2272x128xf32, #tpu.memory_space<vmem>>, vector<1x32xf32>
    %745 = vector.extract_strided_slice %740 {offsets = [0, 0], sizes = [16, 8], strides = [1, 1]} : vector<16x32xf32> to vector<16x8xf32>
    %746 = vector.extract_strided_slice %741 {offsets = [0, 0], sizes = [16, 8], strides = [1, 1]} : vector<16x32xf32> to vector<16x8xf32>
    %cst_236 = arith.constant dense<0.000000e+00> : vector<16x16xf32>
    %747 = tpu.matmul %745, %746, %cst_236 {dimension_numbers = #tpu.dot_dimension_numbers<[1], [1], [0], [0], [0, 0, 1, 0], [], []>} : vector<16x8xf32>, vector<16x8xf32>, vector<16x16xf32> -> vector<16x16xf32>
    %cst_237 = arith.constant 0.353553385 : f32
    %748 = vector.broadcast %cst_237 : f32 to vector<16x16xf32>
    %749 = arith.mulf %747, %748 : vector<16x16xf32>
    %750 = arith.addf %749, %21 : vector<16x16xf32>
    %cst_238 = arith.constant dense<0xFF800000> : vector<16xf32>
    %751 = vector.multi_reduction <maximumf>, %750, %cst_238 [1] : vector<16x16xf32> to vector<16xf32>
    %752 = vector.shape_cast %751 : vector<16xf32> to vector<16x1xf32>
    %753 = vector.broadcast %752 : vector<16x1xf32> to vector<16x16xf32>
    %754 = arith.subf %750, %753 : vector<16x16xf32>
    %755 = math.exp %754 : vector<16x16xf32>
    %cst_239 = arith.constant dense<0.000000e+00> : vector<16xf32>
    %756 = vector.multi_reduction <add>, %755, %cst_239 [1] : vector<16x16xf32> to vector<16xf32>
    %757 = vector.shape_cast %756 : vector<16xf32> to vector<16x1xf32>
    %758 = tpu.reciprocal %757 {approx = true} : vector<16x1xf32> -> vector<16x1xf32>
    %759 = vector.broadcast %758 : vector<16x1xf32> to vector<16x16xf32>
    %760 = arith.mulf %755, %759 : vector<16x16xf32>
    %761 = vector.extract_strided_slice %742 {offsets = [0, 0], sizes = [16, 8], strides = [1, 1]} : vector<16x32xf32> to vector<16x8xf32>
    %cst_240 = arith.constant dense<0.000000e+00> : vector<16x8xf32>
    %762 = tpu.matmul %760, %761, %cst_240 {dimension_numbers = #tpu.dot_dimension_numbers<[1], [0], [0], [1], [0, 0, 1, 1], [], []>} : vector<16x16xf32>, vector<16x8xf32>, vector<16x8xf32> -> vector<16x8xf32>
    %763 = vector.extract_strided_slice %740 {offsets = [0, 8], sizes = [16, 8], strides = [1, 1]} : vector<16x32xf32> to vector<16x8xf32>
    %764 = vector.extract_strided_slice %741 {offsets = [0, 8], sizes = [16, 8], strides = [1, 1]} : vector<16x32xf32> to vector<16x8xf32>
    %cst_241 = arith.constant dense<0.000000e+00> : vector<16x16xf32>
    %765 = tpu.matmul %763, %764, %cst_241 {dimension_numbers = #tpu.dot_dimension_numbers<[1], [1], [0], [0], [0, 0, 1, 0], [], []>} : vector<16x8xf32>, vector<16x8xf32>, vector<16x16xf32> -> vector<16x16xf32>
    %cst_242 = arith.constant 0.353553385 : f32
    %766 = vector.broadcast %cst_242 : f32 to vector<16x16xf32>
    %767 = arith.mulf %765, %766 : vector<16x16xf32>
    %768 = arith.addf %767, %21 : vector<16x16xf32>
    %cst_243 = arith.constant dense<0xFF800000> : vector<16xf32>
    %769 = vector.multi_reduction <maximumf>, %768, %cst_243 [1] : vector<16x16xf32> to vector<16xf32>
    %770 = vector.shape_cast %769 : vector<16xf32> to vector<16x1xf32>
    %771 = vector.broadcast %770 : vector<16x1xf32> to vector<16x16xf32>
    %772 = arith.subf %768, %771 : vector<16x16xf32>
    %773 = math.exp %772 : vector<16x16xf32>
    %cst_244 = arith.constant dense<0.000000e+00> : vector<16xf32>
    %774 = vector.multi_reduction <add>, %773, %cst_244 [1] : vector<16x16xf32> to vector<16xf32>
    %775 = vector.shape_cast %774 : vector<16xf32> to vector<16x1xf32>
    %776 = tpu.reciprocal %775 {approx = true} : vector<16x1xf32> -> vector<16x1xf32>
    %777 = vector.broadcast %776 : vector<16x1xf32> to vector<16x16xf32>
    %778 = arith.mulf %773, %777 : vector<16x16xf32>
    %779 = vector.extract_strided_slice %742 {offsets = [0, 8], sizes = [16, 8], strides = [1, 1]} : vector<16x32xf32> to vector<16x8xf32>
    %cst_245 = arith.constant dense<0.000000e+00> : vector<16x8xf32>
    %780 = tpu.matmul %778, %779, %cst_245 {dimension_numbers = #tpu.dot_dimension_numbers<[1], [0], [0], [1], [0, 0, 1, 1], [], []>} : vector<16x16xf32>, vector<16x8xf32>, vector<16x8xf32> -> vector<16x8xf32>
    %781 = vector.extract_strided_slice %740 {offsets = [0, 16], sizes = [16, 8], strides = [1, 1]} : vector<16x32xf32> to vector<16x8xf32>
    %782 = vector.extract_strided_slice %741 {offsets = [0, 16], sizes = [16, 8], strides = [1, 1]} : vector<16x32xf32> to vector<16x8xf32>
    %cst_246 = arith.constant dense<0.000000e+00> : vector<16x16xf32>
    %783 = tpu.matmul %781, %782, %cst_246 {dimension_numbers = #tpu.dot_dimension_numbers<[1], [1], [0], [0], [0, 0, 1, 0], [], []>} : vector<16x8xf32>, vector<16x8xf32>, vector<16x16xf32> -> vector<16x16xf32>
    %cst_247 = arith.constant 0.353553385 : f32
    %784 = vector.broadcast %cst_247 : f32 to vector<16x16xf32>
    %785 = arith.mulf %783, %784 : vector<16x16xf32>
    %786 = arith.addf %785, %21 : vector<16x16xf32>
    %cst_248 = arith.constant dense<0xFF800000> : vector<16xf32>
    %787 = vector.multi_reduction <maximumf>, %786, %cst_248 [1] : vector<16x16xf32> to vector<16xf32>
    %788 = vector.shape_cast %787 : vector<16xf32> to vector<16x1xf32>
    %789 = vector.broadcast %788 : vector<16x1xf32> to vector<16x16xf32>
    %790 = arith.subf %786, %789 : vector<16x16xf32>
    %791 = math.exp %790 : vector<16x16xf32>
    %cst_249 = arith.constant dense<0.000000e+00> : vector<16xf32>
    %792 = vector.multi_reduction <add>, %791, %cst_249 [1] : vector<16x16xf32> to vector<16xf32>
    %793 = vector.shape_cast %792 : vector<16xf32> to vector<16x1xf32>
    %794 = tpu.reciprocal %793 {approx = true} : vector<16x1xf32> -> vector<16x1xf32>
    %795 = vector.broadcast %794 : vector<16x1xf32> to vector<16x16xf32>
    %796 = arith.mulf %791, %795 : vector<16x16xf32>
    %797 = vector.extract_strided_slice %742 {offsets = [0, 16], sizes = [16, 8], strides = [1, 1]} : vector<16x32xf32> to vector<16x8xf32>
    %cst_250 = arith.constant dense<0.000000e+00> : vector<16x8xf32>
    %798 = tpu.matmul %796, %797, %cst_250 {dimension_numbers = #tpu.dot_dimension_numbers<[1], [0], [0], [1], [0, 0, 1, 1], [], []>} : vector<16x16xf32>, vector<16x8xf32>, vector<16x8xf32> -> vector<16x8xf32>
    %799 = vector.extract_strided_slice %740 {offsets = [0, 24], sizes = [16, 8], strides = [1, 1]} : vector<16x32xf32> to vector<16x8xf32>
    %800 = vector.extract_strided_slice %741 {offsets = [0, 24], sizes = [16, 8], strides = [1, 1]} : vector<16x32xf32> to vector<16x8xf32>
    %cst_251 = arith.constant dense<0.000000e+00> : vector<16x16xf32>
    %801 = tpu.matmul %799, %800, %cst_251 {dimension_numbers = #tpu.dot_dimension_numbers<[1], [1], [0], [0], [0, 0, 1, 0], [], []>} : vector<16x8xf32>, vector<16x8xf32>, vector<16x16xf32> -> vector<16x16xf32>
    %cst_252 = arith.constant 0.353553385 : f32
    %802 = vector.broadcast %cst_252 : f32 to vector<16x16xf32>
    %803 = arith.mulf %801, %802 : vector<16x16xf32>
    %804 = arith.addf %803, %21 : vector<16x16xf32>
    %cst_253 = arith.constant dense<0xFF800000> : vector<16xf32>
    %805 = vector.multi_reduction <maximumf>, %804, %cst_253 [1] : vector<16x16xf32> to vector<16xf32>
    %806 = vector.shape_cast %805 : vector<16xf32> to vector<16x1xf32>
    %807 = vector.broadcast %806 : vector<16x1xf32> to vector<16x16xf32>
    %808 = arith.subf %804, %807 : vector<16x16xf32>
    %809 = math.exp %808 : vector<16x16xf32>
    %cst_254 = arith.constant dense<0.000000e+00> : vector<16xf32>
    %810 = vector.multi_reduction <add>, %809, %cst_254 [1] : vector<16x16xf32> to vector<16xf32>
    %811 = vector.shape_cast %810 : vector<16xf32> to vector<16x1xf32>
    %812 = tpu.reciprocal %811 {approx = true} : vector<16x1xf32> -> vector<16x1xf32>
    %813 = vector.broadcast %812 : vector<16x1xf32> to vector<16x16xf32>
    %814 = arith.mulf %809, %813 : vector<16x16xf32>
    %815 = vector.extract_strided_slice %742 {offsets = [0, 24], sizes = [16, 8], strides = [1, 1]} : vector<16x32xf32> to vector<16x8xf32>
    %cst_255 = arith.constant dense<0.000000e+00> : vector<16x8xf32>
    %816 = tpu.matmul %814, %815, %cst_255 {dimension_numbers = #tpu.dot_dimension_numbers<[1], [0], [0], [1], [0, 0, 1, 1], [], []>} : vector<16x16xf32>, vector<16x8xf32>, vector<16x8xf32> -> vector<16x8xf32>
    %817 = tpu.concatenate %762, %780, %798, %816 in 1 : vector<16x8xf32>, vector<16x8xf32>, vector<16x8xf32>, vector<16x8xf32> -> vector<16x32xf32>
    %cst_256 = arith.constant dense<0.000000e+00> : vector<16x32xf32>
    %818 = tpu.matmul %817, %743, %cst_256 {dimension_numbers = #tpu.dot_dimension_numbers<[1], [0], [0], [1], [0, 0, 1, 1], [], []>} : vector<16x32xf32>, vector<32x32xf32>, vector<16x32xf32> -> vector<16x32xf32>
    %819 = vector.broadcast %744 : vector<1x32xf32> to vector<16x32xf32>
    %820 = arith.addf %818, %819 : vector<16x32xf32>
    %821 = arith.addf %710, %820 : vector<16x32xf32>
    %c760 = arith.constant 760 : index
    %c0_257 = arith.constant 0 : index
    %822 = vector.load %arg0[%c760, %c0_257] : memref<2272x128xf32, #tpu.memory_space<vmem>>, vector<1x32xf32>
    %c752 = arith.constant 752 : index
    %c0_258 = arith.constant 0 : index
    %823 = vector.load %arg0[%c752, %c0_258] : memref<2272x128xf32, #tpu.memory_space<vmem>>, vector<1x32xf32>
    %cst_259 = arith.constant dense<0.000000e+00> : vector<16xf32>
    %824 = vector.multi_reduction <add>, %821, %cst_259 [1] : vector<16x32xf32> to vector<16xf32>
    %825 = vector.shape_cast %824 : vector<16xf32> to vector<16x1xf32>
    %cst_260 = arith.constant 3.200000e+01 : f32
    %826 = vector.broadcast %cst_260 : f32 to vector<16x1xf32>
    %827 = arith.divf %825, %826 : vector<16x1xf32>
    %828 = vector.broadcast %827 : vector<16x1xf32> to vector<16x32xf32>
    %829 = arith.subf %821, %828 : vector<16x32xf32>
    %830 = arith.mulf %829, %829 : vector<16x32xf32>
    %cst_261 = arith.constant dense<0.000000e+00> : vector<16xf32>
    %831 = vector.multi_reduction <add>, %830, %cst_261 [1] : vector<16x32xf32> to vector<16xf32>
    %832 = vector.shape_cast %831 : vector<16xf32> to vector<16x1xf32>
    %cst_262 = arith.constant 3.200000e+01 : f32
    %833 = vector.broadcast %cst_262 : f32 to vector<16x1xf32>
    %834 = arith.divf %832, %833 : vector<16x1xf32>
    %835 = vector.broadcast %827 : vector<16x1xf32> to vector<16x32xf32>
    %836 = arith.subf %821, %835 : vector<16x32xf32>
    %cst_263 = arith.constant 9.99999974E-6 : f32
    %837 = vector.broadcast %cst_263 : f32 to vector<16x1xf32>
    %838 = arith.addf %834, %837 : vector<16x1xf32>
    %839 = math.rsqrt %838 : vector<16x1xf32>
    %840 = vector.broadcast %839 : vector<16x1xf32> to vector<16x32xf32>
    %841 = arith.mulf %836, %840 : vector<16x32xf32>
    %842 = vector.broadcast %822 : vector<1x32xf32> to vector<16x32xf32>
    %843 = arith.mulf %841, %842 : vector<16x32xf32>
    %844 = vector.broadcast %823 : vector<1x32xf32> to vector<16x32xf32>
    %845 = arith.addf %843, %844 : vector<16x32xf32>
    %c768 = arith.constant 768 : index
    %c0_264 = arith.constant 0 : index
    %846 = vector.load %arg0[%c768, %c0_264] : memref<2272x128xf32, #tpu.memory_space<vmem>>, vector<32x128xf32>
    %cst_265 = arith.constant dense<0.000000e+00> : vector<16x128xf32>
    %847 = tpu.matmul %845, %846, %cst_265 {dimension_numbers = #tpu.dot_dimension_numbers<[1], [0], [0], [1], [0, 0, 1, 1], [], []>} : vector<16x32xf32>, vector<32x128xf32>, vector<16x128xf32> -> vector<16x128xf32>
    %c704 = arith.constant 704 : index
    %c0_266 = arith.constant 0 : index
    %848 = vector.load %arg0[%c704, %c0_266] : memref<2272x128xf32, #tpu.memory_space<vmem>>, vector<1x128xf32>
    %849 = vector.broadcast %848 : vector<1x128xf32> to vector<16x128xf32>
    %850 = arith.addf %847, %849 : vector<16x128xf32>
    %cst_267 = arith.constant 5.000000e-01 : f32
    %851 = vector.broadcast %cst_267 : f32 to vector<16x128xf32>
    %852 = arith.mulf %851, %850 : vector<16x128xf32>
    %cst_268 = arith.constant 4.471500e-02 : f32
    %853 = vector.broadcast %cst_268 : f32 to vector<16x128xf32>
    %854 = arith.mulf %853, %850 : vector<16x128xf32>
    %855 = arith.mulf %854, %850 : vector<16x128xf32>
    %856 = arith.mulf %855, %850 : vector<16x128xf32>
    %857 = arith.addf %850, %856 : vector<16x128xf32>
    %cst_269 = arith.constant 0.797884583 : f32
    %858 = vector.broadcast %cst_269 : f32 to vector<16x128xf32>
    %859 = arith.mulf %858, %857 : vector<16x128xf32>
    %860 = math.tanh %859 : vector<16x128xf32>
    %cst_270 = arith.constant 1.000000e+00 : f32
    %861 = vector.broadcast %cst_270 : f32 to vector<16x128xf32>
    %862 = arith.addf %861, %860 : vector<16x128xf32>
    %863 = arith.mulf %852, %862 : vector<16x128xf32>
    %c800 = arith.constant 800 : index
    %c0_271 = arith.constant 0 : index
    %864 = vector.load %arg0[%c800, %c0_271] : memref<2272x128xf32, #tpu.memory_space<vmem>>, vector<128x32xf32>
    %cst_272 = arith.constant dense<0.000000e+00> : vector<16x32xf32>
    %865 = tpu.matmul %863, %864, %cst_272 {dimension_numbers = #tpu.dot_dimension_numbers<[1], [0], [0], [1], [0, 0, 1, 1], [], []>} : vector<16x128xf32>, vector<128x32xf32>, vector<16x32xf32> -> vector<16x32xf32>
    %866 = arith.addf %821, %865 : vector<16x32xf32>
    %c712 = arith.constant 712 : index
    %c0_273 = arith.constant 0 : index
    %867 = vector.load %arg0[%c712, %c0_273] : memref<2272x128xf32, #tpu.memory_space<vmem>>, vector<1x32xf32>
    %868 = vector.broadcast %867 : vector<1x32xf32> to vector<16x32xf32>
    %869 = arith.addf %866, %868 : vector<16x32xf32>
    %c48 = arith.constant 48 : index
    %c0_274 = arith.constant 0 : index
    %870 = vector.load %arg0[%c48, %c0_274] : memref<2272x128xf32, #tpu.memory_space<vmem>>, vector<1x32xf32>
    %c40 = arith.constant 40 : index
    %c0_275 = arith.constant 0 : index
    %871 = vector.load %arg0[%c40, %c0_275] : memref<2272x128xf32, #tpu.memory_space<vmem>>, vector<1x32xf32>
    %cst_276 = arith.constant dense<0.000000e+00> : vector<16xf32>
    %872 = vector.multi_reduction <add>, %869, %cst_276 [1] : vector<16x32xf32> to vector<16xf32>
    %873 = vector.shape_cast %872 : vector<16xf32> to vector<16x1xf32>
    %cst_277 = arith.constant 3.200000e+01 : f32
    %874 = vector.broadcast %cst_277 : f32 to vector<16x1xf32>
    %875 = arith.divf %873, %874 : vector<16x1xf32>
    %876 = vector.broadcast %875 : vector<16x1xf32> to vector<16x32xf32>
    %877 = arith.subf %869, %876 : vector<16x32xf32>
    %878 = arith.mulf %877, %877 : vector<16x32xf32>
    %cst_278 = arith.constant dense<0.000000e+00> : vector<16xf32>
    %879 = vector.multi_reduction <add>, %878, %cst_278 [1] : vector<16x32xf32> to vector<16xf32>
    %880 = vector.shape_cast %879 : vector<16xf32> to vector<16x1xf32>
    %cst_279 = arith.constant 3.200000e+01 : f32
    %881 = vector.broadcast %cst_279 : f32 to vector<16x1xf32>
    %882 = arith.divf %880, %881 : vector<16x1xf32>
    %883 = vector.broadcast %875 : vector<16x1xf32> to vector<16x32xf32>
    %884 = arith.subf %869, %883 : vector<16x32xf32>
    %cst_280 = arith.constant 9.99999974E-6 : f32
    %885 = vector.broadcast %cst_280 : f32 to vector<16x1xf32>
    %886 = arith.addf %882, %885 : vector<16x1xf32>
    %887 = math.rsqrt %886 : vector<16x1xf32>
    %888 = vector.broadcast %887 : vector<16x1xf32> to vector<16x32xf32>
    %889 = arith.mulf %884, %888 : vector<16x32xf32>
    %890 = vector.broadcast %870 : vector<1x32xf32> to vector<16x32xf32>
    %891 = arith.mulf %889, %890 : vector<16x32xf32>
    %892 = vector.broadcast %871 : vector<1x32xf32> to vector<16x32xf32>
    %893 = arith.addf %891, %892 : vector<16x32xf32>
    %c80 = arith.constant 80 : index
    %c0_281 = arith.constant 0 : index
    %894 = vector.load %arg0[%c80, %c0_281] : memref<2272x128xf32, #tpu.memory_space<vmem>>, vector<1x32xf32>
    %c72 = arith.constant 72 : index
    %c0_282 = arith.constant 0 : index
    %895 = vector.load %arg0[%c72, %c0_282] : memref<2272x128xf32, #tpu.memory_space<vmem>>, vector<1x32xf32>
    %cst_283 = arith.constant dense<0.000000e+00> : vector<8xf32>
    %896 = vector.multi_reduction <add>, %356, %cst_283 [1] : vector<8x32xf32> to vector<8xf32>
    %897 = vector.shape_cast %896 : vector<8xf32> to vector<8x1xf32>
    %cst_284 = arith.constant 3.200000e+01 : f32
    %898 = vector.broadcast %cst_284 : f32 to vector<8x1xf32>
    %899 = arith.divf %897, %898 : vector<8x1xf32>
    %900 = vector.broadcast %899 : vector<8x1xf32> to vector<8x32xf32>
    %901 = arith.subf %356, %900 : vector<8x32xf32>
    %902 = arith.mulf %901, %901 : vector<8x32xf32>
    %cst_285 = arith.constant dense<0.000000e+00> : vector<8xf32>
    %903 = vector.multi_reduction <add>, %902, %cst_285 [1] : vector<8x32xf32> to vector<8xf32>
    %904 = vector.shape_cast %903 : vector<8xf32> to vector<8x1xf32>
    %cst_286 = arith.constant 3.200000e+01 : f32
    %905 = vector.broadcast %cst_286 : f32 to vector<8x1xf32>
    %906 = arith.divf %904, %905 : vector<8x1xf32>
    %907 = vector.broadcast %899 : vector<8x1xf32> to vector<8x32xf32>
    %908 = arith.subf %356, %907 : vector<8x32xf32>
    %cst_287 = arith.constant 9.99999974E-6 : f32
    %909 = vector.broadcast %cst_287 : f32 to vector<8x1xf32>
    %910 = arith.addf %906, %909 : vector<8x1xf32>
    %911 = math.rsqrt %910 : vector<8x1xf32>
    %912 = vector.broadcast %911 : vector<8x1xf32> to vector<8x32xf32>
    %913 = arith.mulf %908, %912 : vector<8x32xf32>
    %914 = vector.broadcast %894 : vector<1x32xf32> to vector<8x32xf32>
    %915 = arith.mulf %913, %914 : vector<8x32xf32>
    %916 = vector.broadcast %895 : vector<1x32xf32> to vector<8x32xf32>
    %917 = arith.addf %915, %916 : vector<8x32xf32>
    %c312 = arith.constant 312 : index
    %c0_288 = arith.constant 0 : index
    %918 = vector.load %arg0[%c312, %c0_288] : memref<2272x128xf32, #tpu.memory_space<vmem>>, vector<32x32xf32>
    %cst_289 = arith.constant dense<0.000000e+00> : vector<16x32xf32>
    %919 = tpu.matmul %893, %918, %cst_289 {dimension_numbers = #tpu.dot_dimension_numbers<[1], [0], [0], [1], [0, 0, 1, 1], [], []>} : vector<16x32xf32>, vector<32x32xf32>, vector<16x32xf32> -> vector<16x32xf32>
    %c32 = arith.constant 32 : index
    %c0_290 = arith.constant 0 : index
    %920 = vector.load %arg0[%c32, %c0_290] : memref<2272x128xf32, #tpu.memory_space<vmem>>, vector<1x32xf32>
    %921 = vector.broadcast %920 : vector<1x32xf32> to vector<16x32xf32>
    %922 = arith.addf %919, %921 : vector<16x32xf32>
    %c248 = arith.constant 248 : index
    %c0_291 = arith.constant 0 : index
    %923 = vector.load %arg0[%c248, %c0_291] : memref<2272x128xf32, #tpu.memory_space<vmem>>, vector<32x64xf32>
    %cst_292 = arith.constant dense<0.000000e+00> : vector<8x64xf32>
    %924 = tpu.matmul %917, %923, %cst_292 {dimension_numbers = #tpu.dot_dimension_numbers<[1], [0], [0], [1], [0, 0, 1, 1], [], []>} : vector<8x32xf32>, vector<32x64xf32>, vector<8x64xf32> -> vector<8x64xf32>
    %c16 = arith.constant 16 : index
    %c0_293 = arith.constant 0 : index
    %925 = vector.load %arg0[%c16, %c0_293] : memref<2272x128xf32, #tpu.memory_space<vmem>>, vector<1x64xf32>
    %926 = vector.broadcast %925 : vector<1x64xf32> to vector<8x64xf32>
    %927 = arith.addf %924, %926 : vector<8x64xf32>
    %928 = vector.extract_strided_slice %927 {offsets = [0, 0], sizes = [8, 32], strides = [1, 1]} : vector<8x64xf32> to vector<8x32xf32>
    %929 = vector.extract_strided_slice %927 {offsets = [0, 32], sizes = [8, 32], strides = [1, 1]} : vector<8x64xf32> to vector<8x32xf32>
    %c280 = arith.constant 280 : index
    %c0_294 = arith.constant 0 : index
    %930 = vector.load %arg0[%c280, %c0_294] : memref<2272x128xf32, #tpu.memory_space<vmem>>, vector<32x32xf32>
    %c24 = arith.constant 24 : index
    %c0_295 = arith.constant 0 : index
    %931 = vector.load %arg0[%c24, %c0_295] : memref<2272x128xf32, #tpu.memory_space<vmem>>, vector<1x32xf32>
    %932 = vector.extract_strided_slice %922 {offsets = [0, 0], sizes = [16, 8], strides = [1, 1]} : vector<16x32xf32> to vector<16x8xf32>
    %933 = vector.extract_strided_slice %928 {offsets = [0, 0], sizes = [8, 8], strides = [1, 1]} : vector<8x32xf32> to vector<8x8xf32>
    %cst_296 = arith.constant dense<0.000000e+00> : vector<16x8xf32>
    %934 = tpu.matmul %932, %933, %cst_296 {dimension_numbers = #tpu.dot_dimension_numbers<[1], [1], [0], [0], [0, 0, 1, 0], [], []>} : vector<16x8xf32>, vector<8x8xf32>, vector<16x8xf32> -> vector<16x8xf32>
    %cst_297 = arith.constant 0.353553385 : f32
    %935 = vector.broadcast %cst_297 : f32 to vector<16x8xf32>
    %936 = arith.mulf %934, %935 : vector<16x8xf32>
    %937 = arith.addf %936, %31 : vector<16x8xf32>
    %cst_298 = arith.constant dense<0xFF800000> : vector<16xf32>
    %938 = vector.multi_reduction <maximumf>, %937, %cst_298 [1] : vector<16x8xf32> to vector<16xf32>
    %939 = vector.shape_cast %938 : vector<16xf32> to vector<16x1xf32>
    %940 = vector.broadcast %939 : vector<16x1xf32> to vector<16x8xf32>
    %941 = arith.subf %937, %940 : vector<16x8xf32>
    %942 = math.exp %941 : vector<16x8xf32>
    %cst_299 = arith.constant dense<0.000000e+00> : vector<16xf32>
    %943 = vector.multi_reduction <add>, %942, %cst_299 [1] : vector<16x8xf32> to vector<16xf32>
    %944 = vector.shape_cast %943 : vector<16xf32> to vector<16x1xf32>
    %945 = tpu.reciprocal %944 {approx = true} : vector<16x1xf32> -> vector<16x1xf32>
    %946 = vector.broadcast %945 : vector<16x1xf32> to vector<16x8xf32>
    %947 = arith.mulf %942, %946 : vector<16x8xf32>
    %948 = vector.extract_strided_slice %929 {offsets = [0, 0], sizes = [8, 8], strides = [1, 1]} : vector<8x32xf32> to vector<8x8xf32>
    %cst_300 = arith.constant dense<0.000000e+00> : vector<16x8xf32>
    %949 = tpu.matmul %947, %948, %cst_300 {dimension_numbers = #tpu.dot_dimension_numbers<[1], [0], [0], [1], [0, 0, 1, 1], [], []>} : vector<16x8xf32>, vector<8x8xf32>, vector<16x8xf32> -> vector<16x8xf32>
    %950 = vector.extract_strided_slice %922 {offsets = [0, 8], sizes = [16, 8], strides = [1, 1]} : vector<16x32xf32> to vector<16x8xf32>
    %951 = vector.extract_strided_slice %928 {offsets = [0, 8], sizes = [8, 8], strides = [1, 1]} : vector<8x32xf32> to vector<8x8xf32>
    %cst_301 = arith.constant dense<0.000000e+00> : vector<16x8xf32>
    %952 = tpu.matmul %950, %951, %cst_301 {dimension_numbers = #tpu.dot_dimension_numbers<[1], [1], [0], [0], [0, 0, 1, 0], [], []>} : vector<16x8xf32>, vector<8x8xf32>, vector<16x8xf32> -> vector<16x8xf32>
    %cst_302 = arith.constant 0.353553385 : f32
    %953 = vector.broadcast %cst_302 : f32 to vector<16x8xf32>
    %954 = arith.mulf %952, %953 : vector<16x8xf32>
    %955 = arith.addf %954, %31 : vector<16x8xf32>
    %cst_303 = arith.constant dense<0xFF800000> : vector<16xf32>
    %956 = vector.multi_reduction <maximumf>, %955, %cst_303 [1] : vector<16x8xf32> to vector<16xf32>
    %957 = vector.shape_cast %956 : vector<16xf32> to vector<16x1xf32>
    %958 = vector.broadcast %957 : vector<16x1xf32> to vector<16x8xf32>
    %959 = arith.subf %955, %958 : vector<16x8xf32>
    %960 = math.exp %959 : vector<16x8xf32>
    %cst_304 = arith.constant dense<0.000000e+00> : vector<16xf32>
    %961 = vector.multi_reduction <add>, %960, %cst_304 [1] : vector<16x8xf32> to vector<16xf32>
    %962 = vector.shape_cast %961 : vector<16xf32> to vector<16x1xf32>
    %963 = tpu.reciprocal %962 {approx = true} : vector<16x1xf32> -> vector<16x1xf32>
    %964 = vector.broadcast %963 : vector<16x1xf32> to vector<16x8xf32>
    %965 = arith.mulf %960, %964 : vector<16x8xf32>
    %966 = vector.extract_strided_slice %929 {offsets = [0, 8], sizes = [8, 8], strides = [1, 1]} : vector<8x32xf32> to vector<8x8xf32>
    %cst_305 = arith.constant dense<0.000000e+00> : vector<16x8xf32>
    %967 = tpu.matmul %965, %966, %cst_305 {dimension_numbers = #tpu.dot_dimension_numbers<[1], [0], [0], [1], [0, 0, 1, 1], [], []>} : vector<16x8xf32>, vector<8x8xf32>, vector<16x8xf32> -> vector<16x8xf32>
    %968 = vector.extract_strided_slice %922 {offsets = [0, 16], sizes = [16, 8], strides = [1, 1]} : vector<16x32xf32> to vector<16x8xf32>
    %969 = vector.extract_strided_slice %928 {offsets = [0, 16], sizes = [8, 8], strides = [1, 1]} : vector<8x32xf32> to vector<8x8xf32>
    %cst_306 = arith.constant dense<0.000000e+00> : vector<16x8xf32>
    %970 = tpu.matmul %968, %969, %cst_306 {dimension_numbers = #tpu.dot_dimension_numbers<[1], [1], [0], [0], [0, 0, 1, 0], [], []>} : vector<16x8xf32>, vector<8x8xf32>, vector<16x8xf32> -> vector<16x8xf32>
    %cst_307 = arith.constant 0.353553385 : f32
    %971 = vector.broadcast %cst_307 : f32 to vector<16x8xf32>
    %972 = arith.mulf %970, %971 : vector<16x8xf32>
    %973 = arith.addf %972, %31 : vector<16x8xf32>
    %cst_308 = arith.constant dense<0xFF800000> : vector<16xf32>
    %974 = vector.multi_reduction <maximumf>, %973, %cst_308 [1] : vector<16x8xf32> to vector<16xf32>
    %975 = vector.shape_cast %974 : vector<16xf32> to vector<16x1xf32>
    %976 = vector.broadcast %975 : vector<16x1xf32> to vector<16x8xf32>
    %977 = arith.subf %973, %976 : vector<16x8xf32>
    %978 = math.exp %977 : vector<16x8xf32>
    %cst_309 = arith.constant dense<0.000000e+00> : vector<16xf32>
    %979 = vector.multi_reduction <add>, %978, %cst_309 [1] : vector<16x8xf32> to vector<16xf32>
    %980 = vector.shape_cast %979 : vector<16xf32> to vector<16x1xf32>
    %981 = tpu.reciprocal %980 {approx = true} : vector<16x1xf32> -> vector<16x1xf32>
    %982 = vector.broadcast %981 : vector<16x1xf32> to vector<16x8xf32>
    %983 = arith.mulf %978, %982 : vector<16x8xf32>
    %984 = vector.extract_strided_slice %929 {offsets = [0, 16], sizes = [8, 8], strides = [1, 1]} : vector<8x32xf32> to vector<8x8xf32>
    %cst_310 = arith.constant dense<0.000000e+00> : vector<16x8xf32>
    %985 = tpu.matmul %983, %984, %cst_310 {dimension_numbers = #tpu.dot_dimension_numbers<[1], [0], [0], [1], [0, 0, 1, 1], [], []>} : vector<16x8xf32>, vector<8x8xf32>, vector<16x8xf32> -> vector<16x8xf32>
    %986 = vector.extract_strided_slice %922 {offsets = [0, 24], sizes = [16, 8], strides = [1, 1]} : vector<16x32xf32> to vector<16x8xf32>
    %987 = vector.extract_strided_slice %928 {offsets = [0, 24], sizes = [8, 8], strides = [1, 1]} : vector<8x32xf32> to vector<8x8xf32>
    %cst_311 = arith.constant dense<0.000000e+00> : vector<16x8xf32>
    %988 = tpu.matmul %986, %987, %cst_311 {dimension_numbers = #tpu.dot_dimension_numbers<[1], [1], [0], [0], [0, 0, 1, 0], [], []>} : vector<16x8xf32>, vector<8x8xf32>, vector<16x8xf32> -> vector<16x8xf32>
    %cst_312 = arith.constant 0.353553385 : f32
    %989 = vector.broadcast %cst_312 : f32 to vector<16x8xf32>
    %990 = arith.mulf %988, %989 : vector<16x8xf32>
    %991 = arith.addf %990, %31 : vector<16x8xf32>
    %cst_313 = arith.constant dense<0xFF800000> : vector<16xf32>
    %992 = vector.multi_reduction <maximumf>, %991, %cst_313 [1] : vector<16x8xf32> to vector<16xf32>
    %993 = vector.shape_cast %992 : vector<16xf32> to vector<16x1xf32>
    %994 = vector.broadcast %993 : vector<16x1xf32> to vector<16x8xf32>
    %995 = arith.subf %991, %994 : vector<16x8xf32>
    %996 = math.exp %995 : vector<16x8xf32>
    %cst_314 = arith.constant dense<0.000000e+00> : vector<16xf32>
    %997 = vector.multi_reduction <add>, %996, %cst_314 [1] : vector<16x8xf32> to vector<16xf32>
    %998 = vector.shape_cast %997 : vector<16xf32> to vector<16x1xf32>
    %999 = tpu.reciprocal %998 {approx = true} : vector<16x1xf32> -> vector<16x1xf32>
    %1000 = vector.broadcast %999 : vector<16x1xf32> to vector<16x8xf32>
    %1001 = arith.mulf %996, %1000 : vector<16x8xf32>
    %1002 = vector.extract_strided_slice %929 {offsets = [0, 24], sizes = [8, 8], strides = [1, 1]} : vector<8x32xf32> to vector<8x8xf32>
    %cst_315 = arith.constant dense<0.000000e+00> : vector<16x8xf32>
    %1003 = tpu.matmul %1001, %1002, %cst_315 {dimension_numbers = #tpu.dot_dimension_numbers<[1], [0], [0], [1], [0, 0, 1, 1], [], []>} : vector<16x8xf32>, vector<8x8xf32>, vector<16x8xf32> -> vector<16x8xf32>
    %1004 = tpu.concatenate %949, %967, %985, %1003 in 1 : vector<16x8xf32>, vector<16x8xf32>, vector<16x8xf32>, vector<16x8xf32> -> vector<16x32xf32>
    %cst_316 = arith.constant dense<0.000000e+00> : vector<16x32xf32>
    %1005 = tpu.matmul %1004, %930, %cst_316 {dimension_numbers = #tpu.dot_dimension_numbers<[1], [0], [0], [1], [0, 0, 1, 1], [], []>} : vector<16x32xf32>, vector<32x32xf32>, vector<16x32xf32> -> vector<16x32xf32>
    %1006 = vector.broadcast %931 : vector<1x32xf32> to vector<16x32xf32>
    %1007 = arith.addf %1005, %1006 : vector<16x32xf32>
    %1008 = arith.addf %869, %1007 : vector<16x32xf32>
    %c64 = arith.constant 64 : index
    %c0_317 = arith.constant 0 : index
    %1009 = vector.load %arg0[%c64, %c0_317] : memref<2272x128xf32, #tpu.memory_space<vmem>>, vector<1x32xf32>
    %c56 = arith.constant 56 : index
    %c0_318 = arith.constant 0 : index
    %1010 = vector.load %arg0[%c56, %c0_318] : memref<2272x128xf32, #tpu.memory_space<vmem>>, vector<1x32xf32>
    %cst_319 = arith.constant dense<0.000000e+00> : vector<16xf32>
    %1011 = vector.multi_reduction <add>, %1008, %cst_319 [1] : vector<16x32xf32> to vector<16xf32>
    %1012 = vector.shape_cast %1011 : vector<16xf32> to vector<16x1xf32>
    %cst_320 = arith.constant 3.200000e+01 : f32
    %1013 = vector.broadcast %cst_320 : f32 to vector<16x1xf32>
    %1014 = arith.divf %1012, %1013 : vector<16x1xf32>
    %1015 = vector.broadcast %1014 : vector<16x1xf32> to vector<16x32xf32>
    %1016 = arith.subf %1008, %1015 : vector<16x32xf32>
    %1017 = arith.mulf %1016, %1016 : vector<16x32xf32>
    %cst_321 = arith.constant dense<0.000000e+00> : vector<16xf32>
    %1018 = vector.multi_reduction <add>, %1017, %cst_321 [1] : vector<16x32xf32> to vector<16xf32>
    %1019 = vector.shape_cast %1018 : vector<16xf32> to vector<16x1xf32>
    %cst_322 = arith.constant 3.200000e+01 : f32
    %1020 = vector.broadcast %cst_322 : f32 to vector<16x1xf32>
    %1021 = arith.divf %1019, %1020 : vector<16x1xf32>
    %1022 = vector.broadcast %1014 : vector<16x1xf32> to vector<16x32xf32>
    %1023 = arith.subf %1008, %1022 : vector<16x32xf32>
    %cst_323 = arith.constant 9.99999974E-6 : f32
    %1024 = vector.broadcast %cst_323 : f32 to vector<16x1xf32>
    %1025 = arith.addf %1021, %1024 : vector<16x1xf32>
    %1026 = math.rsqrt %1025 : vector<16x1xf32>
    %1027 = vector.broadcast %1026 : vector<16x1xf32> to vector<16x32xf32>
    %1028 = arith.mulf %1023, %1027 : vector<16x32xf32>
    %1029 = vector.broadcast %1009 : vector<1x32xf32> to vector<16x32xf32>
    %1030 = arith.mulf %1028, %1029 : vector<16x32xf32>
    %1031 = vector.broadcast %1010 : vector<1x32xf32> to vector<16x32xf32>
    %1032 = arith.addf %1030, %1031 : vector<16x32xf32>
    %c88 = arith.constant 88 : index
    %c0_324 = arith.constant 0 : index
    %1033 = vector.load %arg0[%c88, %c0_324] : memref<2272x128xf32, #tpu.memory_space<vmem>>, vector<32x128xf32>
    %cst_325 = arith.constant dense<0.000000e+00> : vector<16x128xf32>
    %1034 = tpu.matmul %1032, %1033, %cst_325 {dimension_numbers = #tpu.dot_dimension_numbers<[1], [0], [0], [1], [0, 0, 1, 1], [], []>} : vector<16x32xf32>, vector<32x128xf32>, vector<16x128xf32> -> vector<16x128xf32>
    %c0_326 = arith.constant 0 : index
    %c0_327 = arith.constant 0 : index
    %1035 = vector.load %arg0[%c0_326, %c0_327] : memref<2272x128xf32, #tpu.memory_space<vmem>>, vector<1x128xf32>
    %1036 = vector.broadcast %1035 : vector<1x128xf32> to vector<16x128xf32>
    %1037 = arith.addf %1034, %1036 : vector<16x128xf32>
    %cst_328 = arith.constant 5.000000e-01 : f32
    %1038 = vector.broadcast %cst_328 : f32 to vector<16x128xf32>
    %1039 = arith.mulf %1038, %1037 : vector<16x128xf32>
    %cst_329 = arith.constant 4.471500e-02 : f32
    %1040 = vector.broadcast %cst_329 : f32 to vector<16x128xf32>
    %1041 = arith.mulf %1040, %1037 : vector<16x128xf32>
    %1042 = arith.mulf %1041, %1037 : vector<16x128xf32>
    %1043 = arith.mulf %1042, %1037 : vector<16x128xf32>
    %1044 = arith.addf %1037, %1043 : vector<16x128xf32>
    %cst_330 = arith.constant 0.797884583 : f32
    %1045 = vector.broadcast %cst_330 : f32 to vector<16x128xf32>
    %1046 = arith.mulf %1045, %1044 : vector<16x128xf32>
    %1047 = math.tanh %1046 : vector<16x128xf32>
    %cst_331 = arith.constant 1.000000e+00 : f32
    %1048 = vector.broadcast %cst_331 : f32 to vector<16x128xf32>
    %1049 = arith.addf %1048, %1047 : vector<16x128xf32>
    %1050 = arith.mulf %1039, %1049 : vector<16x128xf32>
    %c120 = arith.constant 120 : index
    %c0_332 = arith.constant 0 : index
    %1051 = vector.load %arg0[%c120, %c0_332] : memref<2272x128xf32, #tpu.memory_space<vmem>>, vector<128x32xf32>
    %cst_333 = arith.constant dense<0.000000e+00> : vector<16x32xf32>
    %1052 = tpu.matmul %1050, %1051, %cst_333 {dimension_numbers = #tpu.dot_dimension_numbers<[1], [0], [0], [1], [0, 0, 1, 1], [], []>} : vector<16x128xf32>, vector<128x32xf32>, vector<16x32xf32> -> vector<16x32xf32>
    %1053 = arith.addf %1008, %1052 : vector<16x32xf32>
    %c8_334 = arith.constant 8 : index
    %c0_335 = arith.constant 0 : index
    %1054 = vector.load %arg0[%c8_334, %c0_335] : memref<2272x128xf32, #tpu.memory_space<vmem>>, vector<1x32xf32>
    %1055 = vector.broadcast %1054 : vector<1x32xf32> to vector<16x32xf32>
    %1056 = arith.addf %1053, %1055 : vector<16x32xf32>
    %c1032 = arith.constant 1032 : index
    %c0_336 = arith.constant 0 : index
    %1057 = vector.load %arg0[%c1032, %c0_336] : memref<2272x128xf32, #tpu.memory_space<vmem>>, vector<1x32xf32>
    %c1024 = arith.constant 1024 : index
    %c0_337 = arith.constant 0 : index
    %1058 = vector.load %arg0[%c1024, %c0_337] : memref<2272x128xf32, #tpu.memory_space<vmem>>, vector<1x32xf32>
    %cst_338 = arith.constant dense<0.000000e+00> : vector<16xf32>
    %1059 = vector.multi_reduction <add>, %1056, %cst_338 [1] : vector<16x32xf32> to vector<16xf32>
    %1060 = vector.shape_cast %1059 : vector<16xf32> to vector<16x1xf32>
    %cst_339 = arith.constant 3.200000e+01 : f32
    %1061 = vector.broadcast %cst_339 : f32 to vector<16x1xf32>
    %1062 = arith.divf %1060, %1061 : vector<16x1xf32>
    %1063 = vector.broadcast %1062 : vector<16x1xf32> to vector<16x32xf32>
    %1064 = arith.subf %1056, %1063 : vector<16x32xf32>
    %1065 = arith.mulf %1064, %1064 : vector<16x32xf32>
    %cst_340 = arith.constant dense<0.000000e+00> : vector<16xf32>
    %1066 = vector.multi_reduction <add>, %1065, %cst_340 [1] : vector<16x32xf32> to vector<16xf32>
    %1067 = vector.shape_cast %1066 : vector<16xf32> to vector<16x1xf32>
    %cst_341 = arith.constant 3.200000e+01 : f32
    %1068 = vector.broadcast %cst_341 : f32 to vector<16x1xf32>
    %1069 = arith.divf %1067, %1068 : vector<16x1xf32>
    %1070 = vector.broadcast %1062 : vector<16x1xf32> to vector<16x32xf32>
    %1071 = arith.subf %1056, %1070 : vector<16x32xf32>
    %cst_342 = arith.constant 9.99999974E-6 : f32
    %1072 = vector.broadcast %cst_342 : f32 to vector<16x1xf32>
    %1073 = arith.addf %1069, %1072 : vector<16x1xf32>
    %1074 = math.rsqrt %1073 : vector<16x1xf32>
    %1075 = vector.broadcast %1074 : vector<16x1xf32> to vector<16x32xf32>
    %1076 = arith.mulf %1071, %1075 : vector<16x32xf32>
    %1077 = vector.broadcast %1057 : vector<1x32xf32> to vector<16x32xf32>
    %1078 = arith.mulf %1076, %1077 : vector<16x32xf32>
    %1079 = vector.broadcast %1058 : vector<1x32xf32> to vector<16x32xf32>
    %1080 = arith.addf %1078, %1079 : vector<16x32xf32>
    %c1248 = arith.constant 1248 : index
    %c0_343 = arith.constant 0 : index
    %1081 = vector.load %arg0[%c1248, %c0_343] : memref<2272x128xf32, #tpu.memory_space<vmem>>, vector<32x96xf32>
    %cst_344 = arith.constant dense<0.000000e+00> : vector<16x96xf32>
    %1082 = tpu.matmul %1080, %1081, %cst_344 {dimension_numbers = #tpu.dot_dimension_numbers<[1], [0], [0], [1], [0, 0, 1, 1], [], []>} : vector<16x32xf32>, vector<32x96xf32>, vector<16x96xf32> -> vector<16x96xf32>
    %c1016 = arith.constant 1016 : index
    %c0_345 = arith.constant 0 : index
    %1083 = vector.load %arg0[%c1016, %c0_345] : memref<2272x128xf32, #tpu.memory_space<vmem>>, vector<1x96xf32>
    %1084 = vector.broadcast %1083 : vector<1x96xf32> to vector<16x96xf32>
    %1085 = arith.addf %1082, %1084 : vector<16x96xf32>
    %1086 = vector.extract_strided_slice %1085 {offsets = [0, 0], sizes = [16, 32], strides = [1, 1]} : vector<16x96xf32> to vector<16x32xf32>
    %1087 = vector.extract_strided_slice %1085 {offsets = [0, 32], sizes = [16, 32], strides = [1, 1]} : vector<16x96xf32> to vector<16x32xf32>
    %1088 = vector.extract_strided_slice %1085 {offsets = [0, 64], sizes = [16, 32], strides = [1, 1]} : vector<16x96xf32> to vector<16x32xf32>
    %c1216 = arith.constant 1216 : index
    %c0_346 = arith.constant 0 : index
    %1089 = vector.load %arg0[%c1216, %c0_346] : memref<2272x128xf32, #tpu.memory_space<vmem>>, vector<32x32xf32>
    %c1008 = arith.constant 1008 : index
    %c0_347 = arith.constant 0 : index
    %1090 = vector.load %arg0[%c1008, %c0_347] : memref<2272x128xf32, #tpu.memory_space<vmem>>, vector<1x32xf32>
    %1091 = vector.extract_strided_slice %1086 {offsets = [0, 0], sizes = [16, 8], strides = [1, 1]} : vector<16x32xf32> to vector<16x8xf32>
    %1092 = vector.extract_strided_slice %1087 {offsets = [0, 0], sizes = [16, 8], strides = [1, 1]} : vector<16x32xf32> to vector<16x8xf32>
    %cst_348 = arith.constant dense<0.000000e+00> : vector<16x16xf32>
    %1093 = tpu.matmul %1091, %1092, %cst_348 {dimension_numbers = #tpu.dot_dimension_numbers<[1], [1], [0], [0], [0, 0, 1, 0], [], []>} : vector<16x8xf32>, vector<16x8xf32>, vector<16x16xf32> -> vector<16x16xf32>
    %cst_349 = arith.constant 0.353553385 : f32
    %1094 = vector.broadcast %cst_349 : f32 to vector<16x16xf32>
    %1095 = arith.mulf %1093, %1094 : vector<16x16xf32>
    %1096 = arith.addf %1095, %21 : vector<16x16xf32>
    %cst_350 = arith.constant dense<0xFF800000> : vector<16xf32>
    %1097 = vector.multi_reduction <maximumf>, %1096, %cst_350 [1] : vector<16x16xf32> to vector<16xf32>
    %1098 = vector.shape_cast %1097 : vector<16xf32> to vector<16x1xf32>
    %1099 = vector.broadcast %1098 : vector<16x1xf32> to vector<16x16xf32>
    %1100 = arith.subf %1096, %1099 : vector<16x16xf32>
    %1101 = math.exp %1100 : vector<16x16xf32>
    %cst_351 = arith.constant dense<0.000000e+00> : vector<16xf32>
    %1102 = vector.multi_reduction <add>, %1101, %cst_351 [1] : vector<16x16xf32> to vector<16xf32>
    %1103 = vector.shape_cast %1102 : vector<16xf32> to vector<16x1xf32>
    %1104 = tpu.reciprocal %1103 {approx = true} : vector<16x1xf32> -> vector<16x1xf32>
    %1105 = vector.broadcast %1104 : vector<16x1xf32> to vector<16x16xf32>
    %1106 = arith.mulf %1101, %1105 : vector<16x16xf32>
    %1107 = vector.extract_strided_slice %1088 {offsets = [0, 0], sizes = [16, 8], strides = [1, 1]} : vector<16x32xf32> to vector<16x8xf32>
    %cst_352 = arith.constant dense<0.000000e+00> : vector<16x8xf32>
    %1108 = tpu.matmul %1106, %1107, %cst_352 {dimension_numbers = #tpu.dot_dimension_numbers<[1], [0], [0], [1], [0, 0, 1, 1], [], []>} : vector<16x16xf32>, vector<16x8xf32>, vector<16x8xf32> -> vector<16x8xf32>
    %1109 = vector.extract_strided_slice %1086 {offsets = [0, 8], sizes = [16, 8], strides = [1, 1]} : vector<16x32xf32> to vector<16x8xf32>
    %1110 = vector.extract_strided_slice %1087 {offsets = [0, 8], sizes = [16, 8], strides = [1, 1]} : vector<16x32xf32> to vector<16x8xf32>
    %cst_353 = arith.constant dense<0.000000e+00> : vector<16x16xf32>
    %1111 = tpu.matmul %1109, %1110, %cst_353 {dimension_numbers = #tpu.dot_dimension_numbers<[1], [1], [0], [0], [0, 0, 1, 0], [], []>} : vector<16x8xf32>, vector<16x8xf32>, vector<16x16xf32> -> vector<16x16xf32>
    %cst_354 = arith.constant 0.353553385 : f32
    %1112 = vector.broadcast %cst_354 : f32 to vector<16x16xf32>
    %1113 = arith.mulf %1111, %1112 : vector<16x16xf32>
    %1114 = arith.addf %1113, %21 : vector<16x16xf32>
    %cst_355 = arith.constant dense<0xFF800000> : vector<16xf32>
    %1115 = vector.multi_reduction <maximumf>, %1114, %cst_355 [1] : vector<16x16xf32> to vector<16xf32>
    %1116 = vector.shape_cast %1115 : vector<16xf32> to vector<16x1xf32>
    %1117 = vector.broadcast %1116 : vector<16x1xf32> to vector<16x16xf32>
    %1118 = arith.subf %1114, %1117 : vector<16x16xf32>
    %1119 = math.exp %1118 : vector<16x16xf32>
    %cst_356 = arith.constant dense<0.000000e+00> : vector<16xf32>
    %1120 = vector.multi_reduction <add>, %1119, %cst_356 [1] : vector<16x16xf32> to vector<16xf32>
    %1121 = vector.shape_cast %1120 : vector<16xf32> to vector<16x1xf32>
    %1122 = tpu.reciprocal %1121 {approx = true} : vector<16x1xf32> -> vector<16x1xf32>
    %1123 = vector.broadcast %1122 : vector<16x1xf32> to vector<16x16xf32>
    %1124 = arith.mulf %1119, %1123 : vector<16x16xf32>
    %1125 = vector.extract_strided_slice %1088 {offsets = [0, 8], sizes = [16, 8], strides = [1, 1]} : vector<16x32xf32> to vector<16x8xf32>
    %cst_357 = arith.constant dense<0.000000e+00> : vector<16x8xf32>
    %1126 = tpu.matmul %1124, %1125, %cst_357 {dimension_numbers = #tpu.dot_dimension_numbers<[1], [0], [0], [1], [0, 0, 1, 1], [], []>} : vector<16x16xf32>, vector<16x8xf32>, vector<16x8xf32> -> vector<16x8xf32>
    %1127 = vector.extract_strided_slice %1086 {offsets = [0, 16], sizes = [16, 8], strides = [1, 1]} : vector<16x32xf32> to vector<16x8xf32>
    %1128 = vector.extract_strided_slice %1087 {offsets = [0, 16], sizes = [16, 8], strides = [1, 1]} : vector<16x32xf32> to vector<16x8xf32>
    %cst_358 = arith.constant dense<0.000000e+00> : vector<16x16xf32>
    %1129 = tpu.matmul %1127, %1128, %cst_358 {dimension_numbers = #tpu.dot_dimension_numbers<[1], [1], [0], [0], [0, 0, 1, 0], [], []>} : vector<16x8xf32>, vector<16x8xf32>, vector<16x16xf32> -> vector<16x16xf32>
    %cst_359 = arith.constant 0.353553385 : f32
    %1130 = vector.broadcast %cst_359 : f32 to vector<16x16xf32>
    %1131 = arith.mulf %1129, %1130 : vector<16x16xf32>
    %1132 = arith.addf %1131, %21 : vector<16x16xf32>
    %cst_360 = arith.constant dense<0xFF800000> : vector<16xf32>
    %1133 = vector.multi_reduction <maximumf>, %1132, %cst_360 [1] : vector<16x16xf32> to vector<16xf32>
    %1134 = vector.shape_cast %1133 : vector<16xf32> to vector<16x1xf32>
    %1135 = vector.broadcast %1134 : vector<16x1xf32> to vector<16x16xf32>
    %1136 = arith.subf %1132, %1135 : vector<16x16xf32>
    %1137 = math.exp %1136 : vector<16x16xf32>
    %cst_361 = arith.constant dense<0.000000e+00> : vector<16xf32>
    %1138 = vector.multi_reduction <add>, %1137, %cst_361 [1] : vector<16x16xf32> to vector<16xf32>
    %1139 = vector.shape_cast %1138 : vector<16xf32> to vector<16x1xf32>
    %1140 = tpu.reciprocal %1139 {approx = true} : vector<16x1xf32> -> vector<16x1xf32>
    %1141 = vector.broadcast %1140 : vector<16x1xf32> to vector<16x16xf32>
    %1142 = arith.mulf %1137, %1141 : vector<16x16xf32>
    %1143 = vector.extract_strided_slice %1088 {offsets = [0, 16], sizes = [16, 8], strides = [1, 1]} : vector<16x32xf32> to vector<16x8xf32>
    %cst_362 = arith.constant dense<0.000000e+00> : vector<16x8xf32>
    %1144 = tpu.matmul %1142, %1143, %cst_362 {dimension_numbers = #tpu.dot_dimension_numbers<[1], [0], [0], [1], [0, 0, 1, 1], [], []>} : vector<16x16xf32>, vector<16x8xf32>, vector<16x8xf32> -> vector<16x8xf32>
    %1145 = vector.extract_strided_slice %1086 {offsets = [0, 24], sizes = [16, 8], strides = [1, 1]} : vector<16x32xf32> to vector<16x8xf32>
    %1146 = vector.extract_strided_slice %1087 {offsets = [0, 24], sizes = [16, 8], strides = [1, 1]} : vector<16x32xf32> to vector<16x8xf32>
    %cst_363 = arith.constant dense<0.000000e+00> : vector<16x16xf32>
    %1147 = tpu.matmul %1145, %1146, %cst_363 {dimension_numbers = #tpu.dot_dimension_numbers<[1], [1], [0], [0], [0, 0, 1, 0], [], []>} : vector<16x8xf32>, vector<16x8xf32>, vector<16x16xf32> -> vector<16x16xf32>
    %cst_364 = arith.constant 0.353553385 : f32
    %1148 = vector.broadcast %cst_364 : f32 to vector<16x16xf32>
    %1149 = arith.mulf %1147, %1148 : vector<16x16xf32>
    %1150 = arith.addf %1149, %21 : vector<16x16xf32>
    %cst_365 = arith.constant dense<0xFF800000> : vector<16xf32>
    %1151 = vector.multi_reduction <maximumf>, %1150, %cst_365 [1] : vector<16x16xf32> to vector<16xf32>
    %1152 = vector.shape_cast %1151 : vector<16xf32> to vector<16x1xf32>
    %1153 = vector.broadcast %1152 : vector<16x1xf32> to vector<16x16xf32>
    %1154 = arith.subf %1150, %1153 : vector<16x16xf32>
    %1155 = math.exp %1154 : vector<16x16xf32>
    %cst_366 = arith.constant dense<0.000000e+00> : vector<16xf32>
    %1156 = vector.multi_reduction <add>, %1155, %cst_366 [1] : vector<16x16xf32> to vector<16xf32>
    %1157 = vector.shape_cast %1156 : vector<16xf32> to vector<16x1xf32>
    %1158 = tpu.reciprocal %1157 {approx = true} : vector<16x1xf32> -> vector<16x1xf32>
    %1159 = vector.broadcast %1158 : vector<16x1xf32> to vector<16x16xf32>
    %1160 = arith.mulf %1155, %1159 : vector<16x16xf32>
    %1161 = vector.extract_strided_slice %1088 {offsets = [0, 24], sizes = [16, 8], strides = [1, 1]} : vector<16x32xf32> to vector<16x8xf32>
    %cst_367 = arith.constant dense<0.000000e+00> : vector<16x8xf32>
    %1162 = tpu.matmul %1160, %1161, %cst_367 {dimension_numbers = #tpu.dot_dimension_numbers<[1], [0], [0], [1], [0, 0, 1, 1], [], []>} : vector<16x16xf32>, vector<16x8xf32>, vector<16x8xf32> -> vector<16x8xf32>
    %1163 = tpu.concatenate %1108, %1126, %1144, %1162 in 1 : vector<16x8xf32>, vector<16x8xf32>, vector<16x8xf32>, vector<16x8xf32> -> vector<16x32xf32>
    %cst_368 = arith.constant dense<0.000000e+00> : vector<16x32xf32>
    %1164 = tpu.matmul %1163, %1089, %cst_368 {dimension_numbers = #tpu.dot_dimension_numbers<[1], [0], [0], [1], [0, 0, 1, 1], [], []>} : vector<16x32xf32>, vector<32x32xf32>, vector<16x32xf32> -> vector<16x32xf32>
    %1165 = vector.broadcast %1090 : vector<1x32xf32> to vector<16x32xf32>
    %1166 = arith.addf %1164, %1165 : vector<16x32xf32>
    %1167 = arith.addf %1056, %1166 : vector<16x32xf32>
    %c1048 = arith.constant 1048 : index
    %c0_369 = arith.constant 0 : index
    %1168 = vector.load %arg0[%c1048, %c0_369] : memref<2272x128xf32, #tpu.memory_space<vmem>>, vector<1x32xf32>
    %c1040 = arith.constant 1040 : index
    %c0_370 = arith.constant 0 : index
    %1169 = vector.load %arg0[%c1040, %c0_370] : memref<2272x128xf32, #tpu.memory_space<vmem>>, vector<1x32xf32>
    %cst_371 = arith.constant dense<0.000000e+00> : vector<16xf32>
    %1170 = vector.multi_reduction <add>, %1167, %cst_371 [1] : vector<16x32xf32> to vector<16xf32>
    %1171 = vector.shape_cast %1170 : vector<16xf32> to vector<16x1xf32>
    %cst_372 = arith.constant 3.200000e+01 : f32
    %1172 = vector.broadcast %cst_372 : f32 to vector<16x1xf32>
    %1173 = arith.divf %1171, %1172 : vector<16x1xf32>
    %1174 = vector.broadcast %1173 : vector<16x1xf32> to vector<16x32xf32>
    %1175 = arith.subf %1167, %1174 : vector<16x32xf32>
    %1176 = arith.mulf %1175, %1175 : vector<16x32xf32>
    %cst_373 = arith.constant dense<0.000000e+00> : vector<16xf32>
    %1177 = vector.multi_reduction <add>, %1176, %cst_373 [1] : vector<16x32xf32> to vector<16xf32>
    %1178 = vector.shape_cast %1177 : vector<16xf32> to vector<16x1xf32>
    %cst_374 = arith.constant 3.200000e+01 : f32
    %1179 = vector.broadcast %cst_374 : f32 to vector<16x1xf32>
    %1180 = arith.divf %1178, %1179 : vector<16x1xf32>
    %1181 = vector.broadcast %1173 : vector<16x1xf32> to vector<16x32xf32>
    %1182 = arith.subf %1167, %1181 : vector<16x32xf32>
    %cst_375 = arith.constant 9.99999974E-6 : f32
    %1183 = vector.broadcast %cst_375 : f32 to vector<16x1xf32>
    %1184 = arith.addf %1180, %1183 : vector<16x1xf32>
    %1185 = math.rsqrt %1184 : vector<16x1xf32>
    %1186 = vector.broadcast %1185 : vector<16x1xf32> to vector<16x32xf32>
    %1187 = arith.mulf %1182, %1186 : vector<16x32xf32>
    %1188 = vector.broadcast %1168 : vector<1x32xf32> to vector<16x32xf32>
    %1189 = arith.mulf %1187, %1188 : vector<16x32xf32>
    %1190 = vector.broadcast %1169 : vector<1x32xf32> to vector<16x32xf32>
    %1191 = arith.addf %1189, %1190 : vector<16x32xf32>
    %c1056 = arith.constant 1056 : index
    %c0_376 = arith.constant 0 : index
    %1192 = vector.load %arg0[%c1056, %c0_376] : memref<2272x128xf32, #tpu.memory_space<vmem>>, vector<32x128xf32>
    %cst_377 = arith.constant dense<0.000000e+00> : vector<16x128xf32>
    %1193 = tpu.matmul %1191, %1192, %cst_377 {dimension_numbers = #tpu.dot_dimension_numbers<[1], [0], [0], [1], [0, 0, 1, 1], [], []>} : vector<16x32xf32>, vector<32x128xf32>, vector<16x128xf32> -> vector<16x128xf32>
    %c992 = arith.constant 992 : index
    %c0_378 = arith.constant 0 : index
    %1194 = vector.load %arg0[%c992, %c0_378] : memref<2272x128xf32, #tpu.memory_space<vmem>>, vector<1x128xf32>
    %1195 = vector.broadcast %1194 : vector<1x128xf32> to vector<16x128xf32>
    %1196 = arith.addf %1193, %1195 : vector<16x128xf32>
    %cst_379 = arith.constant 5.000000e-01 : f32
    %1197 = vector.broadcast %cst_379 : f32 to vector<16x128xf32>
    %1198 = arith.mulf %1197, %1196 : vector<16x128xf32>
    %cst_380 = arith.constant 4.471500e-02 : f32
    %1199 = vector.broadcast %cst_380 : f32 to vector<16x128xf32>
    %1200 = arith.mulf %1199, %1196 : vector<16x128xf32>
    %1201 = arith.mulf %1200, %1196 : vector<16x128xf32>
    %1202 = arith.mulf %1201, %1196 : vector<16x128xf32>
    %1203 = arith.addf %1196, %1202 : vector<16x128xf32>
    %cst_381 = arith.constant 0.797884583 : f32
    %1204 = vector.broadcast %cst_381 : f32 to vector<16x128xf32>
    %1205 = arith.mulf %1204, %1203 : vector<16x128xf32>
    %1206 = math.tanh %1205 : vector<16x128xf32>
    %cst_382 = arith.constant 1.000000e+00 : f32
    %1207 = vector.broadcast %cst_382 : f32 to vector<16x128xf32>
    %1208 = arith.addf %1207, %1206 : vector<16x128xf32>
    %1209 = arith.mulf %1198, %1208 : vector<16x128xf32>
    %c1088 = arith.constant 1088 : index
    %c0_383 = arith.constant 0 : index
    %1210 = vector.load %arg0[%c1088, %c0_383] : memref<2272x128xf32, #tpu.memory_space<vmem>>, vector<128x32xf32>
    %cst_384 = arith.constant dense<0.000000e+00> : vector<16x32xf32>
    %1211 = tpu.matmul %1209, %1210, %cst_384 {dimension_numbers = #tpu.dot_dimension_numbers<[1], [0], [0], [1], [0, 0, 1, 1], [], []>} : vector<16x128xf32>, vector<128x32xf32>, vector<16x32xf32> -> vector<16x32xf32>
    %1212 = arith.addf %1167, %1211 : vector<16x32xf32>
    %c1000 = arith.constant 1000 : index
    %c0_385 = arith.constant 0 : index
    %1213 = vector.load %arg0[%c1000, %c0_385] : memref<2272x128xf32, #tpu.memory_space<vmem>>, vector<1x32xf32>
    %1214 = vector.broadcast %1213 : vector<1x32xf32> to vector<16x32xf32>
    %1215 = arith.addf %1212, %1214 : vector<16x32xf32>
    %c392 = arith.constant 392 : index
    %c0_386 = arith.constant 0 : index
    %1216 = vector.load %arg0[%c392, %c0_386] : memref<2272x128xf32, #tpu.memory_space<vmem>>, vector<1x32xf32>
    %c384 = arith.constant 384 : index
    %c0_387 = arith.constant 0 : index
    %1217 = vector.load %arg0[%c384, %c0_387] : memref<2272x128xf32, #tpu.memory_space<vmem>>, vector<1x32xf32>
    %cst_388 = arith.constant dense<0.000000e+00> : vector<16xf32>
    %1218 = vector.multi_reduction <add>, %1215, %cst_388 [1] : vector<16x32xf32> to vector<16xf32>
    %1219 = vector.shape_cast %1218 : vector<16xf32> to vector<16x1xf32>
    %cst_389 = arith.constant 3.200000e+01 : f32
    %1220 = vector.broadcast %cst_389 : f32 to vector<16x1xf32>
    %1221 = arith.divf %1219, %1220 : vector<16x1xf32>
    %1222 = vector.broadcast %1221 : vector<16x1xf32> to vector<16x32xf32>
    %1223 = arith.subf %1215, %1222 : vector<16x32xf32>
    %1224 = arith.mulf %1223, %1223 : vector<16x32xf32>
    %cst_390 = arith.constant dense<0.000000e+00> : vector<16xf32>
    %1225 = vector.multi_reduction <add>, %1224, %cst_390 [1] : vector<16x32xf32> to vector<16xf32>
    %1226 = vector.shape_cast %1225 : vector<16xf32> to vector<16x1xf32>
    %cst_391 = arith.constant 3.200000e+01 : f32
    %1227 = vector.broadcast %cst_391 : f32 to vector<16x1xf32>
    %1228 = arith.divf %1226, %1227 : vector<16x1xf32>
    %1229 = vector.broadcast %1221 : vector<16x1xf32> to vector<16x32xf32>
    %1230 = arith.subf %1215, %1229 : vector<16x32xf32>
    %cst_392 = arith.constant 9.99999974E-6 : f32
    %1231 = vector.broadcast %cst_392 : f32 to vector<16x1xf32>
    %1232 = arith.addf %1228, %1231 : vector<16x1xf32>
    %1233 = math.rsqrt %1232 : vector<16x1xf32>
    %1234 = vector.broadcast %1233 : vector<16x1xf32> to vector<16x32xf32>
    %1235 = arith.mulf %1230, %1234 : vector<16x32xf32>
    %1236 = vector.broadcast %1216 : vector<1x32xf32> to vector<16x32xf32>
    %1237 = arith.mulf %1235, %1236 : vector<16x32xf32>
    %1238 = vector.broadcast %1217 : vector<1x32xf32> to vector<16x32xf32>
    %1239 = arith.addf %1237, %1238 : vector<16x32xf32>
    %c424 = arith.constant 424 : index
    %c0_393 = arith.constant 0 : index
    %1240 = vector.load %arg0[%c424, %c0_393] : memref<2272x128xf32, #tpu.memory_space<vmem>>, vector<1x32xf32>
    %c416 = arith.constant 416 : index
    %c0_394 = arith.constant 0 : index
    %1241 = vector.load %arg0[%c416, %c0_394] : memref<2272x128xf32, #tpu.memory_space<vmem>>, vector<1x32xf32>
    %cst_395 = arith.constant dense<0.000000e+00> : vector<8xf32>
    %1242 = vector.multi_reduction <add>, %356, %cst_395 [1] : vector<8x32xf32> to vector<8xf32>
    %1243 = vector.shape_cast %1242 : vector<8xf32> to vector<8x1xf32>
    %cst_396 = arith.constant 3.200000e+01 : f32
    %1244 = vector.broadcast %cst_396 : f32 to vector<8x1xf32>
    %1245 = arith.divf %1243, %1244 : vector<8x1xf32>
    %1246 = vector.broadcast %1245 : vector<8x1xf32> to vector<8x32xf32>
    %1247 = arith.subf %356, %1246 : vector<8x32xf32>
    %1248 = arith.mulf %1247, %1247 : vector<8x32xf32>
    %cst_397 = arith.constant dense<0.000000e+00> : vector<8xf32>
    %1249 = vector.multi_reduction <add>, %1248, %cst_397 [1] : vector<8x32xf32> to vector<8xf32>
    %1250 = vector.shape_cast %1249 : vector<8xf32> to vector<8x1xf32>
    %cst_398 = arith.constant 3.200000e+01 : f32
    %1251 = vector.broadcast %cst_398 : f32 to vector<8x1xf32>
    %1252 = arith.divf %1250, %1251 : vector<8x1xf32>
    %1253 = vector.broadcast %1245 : vector<8x1xf32> to vector<8x32xf32>
    %1254 = arith.subf %356, %1253 : vector<8x32xf32>
    %cst_399 = arith.constant 9.99999974E-6 : f32
    %1255 = vector.broadcast %cst_399 : f32 to vector<8x1xf32>
    %1256 = arith.addf %1252, %1255 : vector<8x1xf32>
    %1257 = math.rsqrt %1256 : vector<8x1xf32>
    %1258 = vector.broadcast %1257 : vector<8x1xf32> to vector<8x32xf32>
    %1259 = arith.mulf %1254, %1258 : vector<8x32xf32>
    %1260 = vector.broadcast %1240 : vector<1x32xf32> to vector<8x32xf32>
    %1261 = arith.mulf %1259, %1260 : vector<8x32xf32>
    %1262 = vector.broadcast %1241 : vector<1x32xf32> to vector<8x32xf32>
    %1263 = arith.addf %1261, %1262 : vector<8x32xf32>
    %c656 = arith.constant 656 : index
    %c0_400 = arith.constant 0 : index
    %1264 = vector.load %arg0[%c656, %c0_400] : memref<2272x128xf32, #tpu.memory_space<vmem>>, vector<32x32xf32>
    %cst_401 = arith.constant dense<0.000000e+00> : vector<16x32xf32>
    %1265 = tpu.matmul %1239, %1264, %cst_401 {dimension_numbers = #tpu.dot_dimension_numbers<[1], [0], [0], [1], [0, 0, 1, 1], [], []>} : vector<16x32xf32>, vector<32x32xf32>, vector<16x32xf32> -> vector<16x32xf32>
    %c376 = arith.constant 376 : index
    %c0_402 = arith.constant 0 : index
    %1266 = vector.load %arg0[%c376, %c0_402] : memref<2272x128xf32, #tpu.memory_space<vmem>>, vector<1x32xf32>
    %1267 = vector.broadcast %1266 : vector<1x32xf32> to vector<16x32xf32>
    %1268 = arith.addf %1265, %1267 : vector<16x32xf32>
    %c592 = arith.constant 592 : index
    %c0_403 = arith.constant 0 : index
    %1269 = vector.load %arg0[%c592, %c0_403] : memref<2272x128xf32, #tpu.memory_space<vmem>>, vector<32x64xf32>
    %cst_404 = arith.constant dense<0.000000e+00> : vector<8x64xf32>
    %1270 = tpu.matmul %1263, %1269, %cst_404 {dimension_numbers = #tpu.dot_dimension_numbers<[1], [0], [0], [1], [0, 0, 1, 1], [], []>} : vector<8x32xf32>, vector<32x64xf32>, vector<8x64xf32> -> vector<8x64xf32>
    %c360 = arith.constant 360 : index
    %c0_405 = arith.constant 0 : index
    %1271 = vector.load %arg0[%c360, %c0_405] : memref<2272x128xf32, #tpu.memory_space<vmem>>, vector<1x64xf32>
    %1272 = vector.broadcast %1271 : vector<1x64xf32> to vector<8x64xf32>
    %1273 = arith.addf %1270, %1272 : vector<8x64xf32>
    %1274 = vector.extract_strided_slice %1273 {offsets = [0, 0], sizes = [8, 32], strides = [1, 1]} : vector<8x64xf32> to vector<8x32xf32>
    %1275 = vector.extract_strided_slice %1273 {offsets = [0, 32], sizes = [8, 32], strides = [1, 1]} : vector<8x64xf32> to vector<8x32xf32>
    %c624 = arith.constant 624 : index
    %c0_406 = arith.constant 0 : index
    %1276 = vector.load %arg0[%c624, %c0_406] : memref<2272x128xf32, #tpu.memory_space<vmem>>, vector<32x32xf32>
    %c368 = arith.constant 368 : index
    %c0_407 = arith.constant 0 : index
    %1277 = vector.load %arg0[%c368, %c0_407] : memref<2272x128xf32, #tpu.memory_space<vmem>>, vector<1x32xf32>
    %1278 = vector.extract_strided_slice %1268 {offsets = [0, 0], sizes = [16, 8], strides = [1, 1]} : vector<16x32xf32> to vector<16x8xf32>
    %1279 = vector.extract_strided_slice %1274 {offsets = [0, 0], sizes = [8, 8], strides = [1, 1]} : vector<8x32xf32> to vector<8x8xf32>
    %cst_408 = arith.constant dense<0.000000e+00> : vector<16x8xf32>
    %1280 = tpu.matmul %1278, %1279, %cst_408 {dimension_numbers = #tpu.dot_dimension_numbers<[1], [1], [0], [0], [0, 0, 1, 0], [], []>} : vector<16x8xf32>, vector<8x8xf32>, vector<16x8xf32> -> vector<16x8xf32>
    %cst_409 = arith.constant 0.353553385 : f32
    %1281 = vector.broadcast %cst_409 : f32 to vector<16x8xf32>
    %1282 = arith.mulf %1280, %1281 : vector<16x8xf32>
    %1283 = arith.addf %1282, %31 : vector<16x8xf32>
    %cst_410 = arith.constant dense<0xFF800000> : vector<16xf32>
    %1284 = vector.multi_reduction <maximumf>, %1283, %cst_410 [1] : vector<16x8xf32> to vector<16xf32>
    %1285 = vector.shape_cast %1284 : vector<16xf32> to vector<16x1xf32>
    %1286 = vector.broadcast %1285 : vector<16x1xf32> to vector<16x8xf32>
    %1287 = arith.subf %1283, %1286 : vector<16x8xf32>
    %1288 = math.exp %1287 : vector<16x8xf32>
    %cst_411 = arith.constant dense<0.000000e+00> : vector<16xf32>
    %1289 = vector.multi_reduction <add>, %1288, %cst_411 [1] : vector<16x8xf32> to vector<16xf32>
    %1290 = vector.shape_cast %1289 : vector<16xf32> to vector<16x1xf32>
    %1291 = tpu.reciprocal %1290 {approx = true} : vector<16x1xf32> -> vector<16x1xf32>
    %1292 = vector.broadcast %1291 : vector<16x1xf32> to vector<16x8xf32>
    %1293 = arith.mulf %1288, %1292 : vector<16x8xf32>
    %1294 = vector.extract_strided_slice %1275 {offsets = [0, 0], sizes = [8, 8], strides = [1, 1]} : vector<8x32xf32> to vector<8x8xf32>
    %cst_412 = arith.constant dense<0.000000e+00> : vector<16x8xf32>
    %1295 = tpu.matmul %1293, %1294, %cst_412 {dimension_numbers = #tpu.dot_dimension_numbers<[1], [0], [0], [1], [0, 0, 1, 1], [], []>} : vector<16x8xf32>, vector<8x8xf32>, vector<16x8xf32> -> vector<16x8xf32>
    %1296 = vector.extract_strided_slice %1268 {offsets = [0, 8], sizes = [16, 8], strides = [1, 1]} : vector<16x32xf32> to vector<16x8xf32>
    %1297 = vector.extract_strided_slice %1274 {offsets = [0, 8], sizes = [8, 8], strides = [1, 1]} : vector<8x32xf32> to vector<8x8xf32>
    %cst_413 = arith.constant dense<0.000000e+00> : vector<16x8xf32>
    %1298 = tpu.matmul %1296, %1297, %cst_413 {dimension_numbers = #tpu.dot_dimension_numbers<[1], [1], [0], [0], [0, 0, 1, 0], [], []>} : vector<16x8xf32>, vector<8x8xf32>, vector<16x8xf32> -> vector<16x8xf32>
    %cst_414 = arith.constant 0.353553385 : f32
    %1299 = vector.broadcast %cst_414 : f32 to vector<16x8xf32>
    %1300 = arith.mulf %1298, %1299 : vector<16x8xf32>
    %1301 = arith.addf %1300, %31 : vector<16x8xf32>
    %cst_415 = arith.constant dense<0xFF800000> : vector<16xf32>
    %1302 = vector.multi_reduction <maximumf>, %1301, %cst_415 [1] : vector<16x8xf32> to vector<16xf32>
    %1303 = vector.shape_cast %1302 : vector<16xf32> to vector<16x1xf32>
    %1304 = vector.broadcast %1303 : vector<16x1xf32> to vector<16x8xf32>
    %1305 = arith.subf %1301, %1304 : vector<16x8xf32>
    %1306 = math.exp %1305 : vector<16x8xf32>
    %cst_416 = arith.constant dense<0.000000e+00> : vector<16xf32>
    %1307 = vector.multi_reduction <add>, %1306, %cst_416 [1] : vector<16x8xf32> to vector<16xf32>
    %1308 = vector.shape_cast %1307 : vector<16xf32> to vector<16x1xf32>
    %1309 = tpu.reciprocal %1308 {approx = true} : vector<16x1xf32> -> vector<16x1xf32>
    %1310 = vector.broadcast %1309 : vector<16x1xf32> to vector<16x8xf32>
    %1311 = arith.mulf %1306, %1310 : vector<16x8xf32>
    %1312 = vector.extract_strided_slice %1275 {offsets = [0, 8], sizes = [8, 8], strides = [1, 1]} : vector<8x32xf32> to vector<8x8xf32>
    %cst_417 = arith.constant dense<0.000000e+00> : vector<16x8xf32>
    %1313 = tpu.matmul %1311, %1312, %cst_417 {dimension_numbers = #tpu.dot_dimension_numbers<[1], [0], [0], [1], [0, 0, 1, 1], [], []>} : vector<16x8xf32>, vector<8x8xf32>, vector<16x8xf32> -> vector<16x8xf32>
    %1314 = vector.extract_strided_slice %1268 {offsets = [0, 16], sizes = [16, 8], strides = [1, 1]} : vector<16x32xf32> to vector<16x8xf32>
    %1315 = vector.extract_strided_slice %1274 {offsets = [0, 16], sizes = [8, 8], strides = [1, 1]} : vector<8x32xf32> to vector<8x8xf32>
    %cst_418 = arith.constant dense<0.000000e+00> : vector<16x8xf32>
    %1316 = tpu.matmul %1314, %1315, %cst_418 {dimension_numbers = #tpu.dot_dimension_numbers<[1], [1], [0], [0], [0, 0, 1, 0], [], []>} : vector<16x8xf32>, vector<8x8xf32>, vector<16x8xf32> -> vector<16x8xf32>
    %cst_419 = arith.constant 0.353553385 : f32
    %1317 = vector.broadcast %cst_419 : f32 to vector<16x8xf32>
    %1318 = arith.mulf %1316, %1317 : vector<16x8xf32>
    %1319 = arith.addf %1318, %31 : vector<16x8xf32>
    %cst_420 = arith.constant dense<0xFF800000> : vector<16xf32>
    %1320 = vector.multi_reduction <maximumf>, %1319, %cst_420 [1] : vector<16x8xf32> to vector<16xf32>
    %1321 = vector.shape_cast %1320 : vector<16xf32> to vector<16x1xf32>
    %1322 = vector.broadcast %1321 : vector<16x1xf32> to vector<16x8xf32>
    %1323 = arith.subf %1319, %1322 : vector<16x8xf32>
    %1324 = math.exp %1323 : vector<16x8xf32>
    %cst_421 = arith.constant dense<0.000000e+00> : vector<16xf32>
    %1325 = vector.multi_reduction <add>, %1324, %cst_421 [1] : vector<16x8xf32> to vector<16xf32>
    %1326 = vector.shape_cast %1325 : vector<16xf32> to vector<16x1xf32>
    %1327 = tpu.reciprocal %1326 {approx = true} : vector<16x1xf32> -> vector<16x1xf32>
    %1328 = vector.broadcast %1327 : vector<16x1xf32> to vector<16x8xf32>
    %1329 = arith.mulf %1324, %1328 : vector<16x8xf32>
    %1330 = vector.extract_strided_slice %1275 {offsets = [0, 16], sizes = [8, 8], strides = [1, 1]} : vector<8x32xf32> to vector<8x8xf32>
    %cst_422 = arith.constant dense<0.000000e+00> : vector<16x8xf32>
    %1331 = tpu.matmul %1329, %1330, %cst_422 {dimension_numbers = #tpu.dot_dimension_numbers<[1], [0], [0], [1], [0, 0, 1, 1], [], []>} : vector<16x8xf32>, vector<8x8xf32>, vector<16x8xf32> -> vector<16x8xf32>
    %1332 = vector.extract_strided_slice %1268 {offsets = [0, 24], sizes = [16, 8], strides = [1, 1]} : vector<16x32xf32> to vector<16x8xf32>
    %1333 = vector.extract_strided_slice %1274 {offsets = [0, 24], sizes = [8, 8], strides = [1, 1]} : vector<8x32xf32> to vector<8x8xf32>
    %cst_423 = arith.constant dense<0.000000e+00> : vector<16x8xf32>
    %1334 = tpu.matmul %1332, %1333, %cst_423 {dimension_numbers = #tpu.dot_dimension_numbers<[1], [1], [0], [0], [0, 0, 1, 0], [], []>} : vector<16x8xf32>, vector<8x8xf32>, vector<16x8xf32> -> vector<16x8xf32>
    %cst_424 = arith.constant 0.353553385 : f32
    %1335 = vector.broadcast %cst_424 : f32 to vector<16x8xf32>
    %1336 = arith.mulf %1334, %1335 : vector<16x8xf32>
    %1337 = arith.addf %1336, %31 : vector<16x8xf32>
    %cst_425 = arith.constant dense<0xFF800000> : vector<16xf32>
    %1338 = vector.multi_reduction <maximumf>, %1337, %cst_425 [1] : vector<16x8xf32> to vector<16xf32>
    %1339 = vector.shape_cast %1338 : vector<16xf32> to vector<16x1xf32>
    %1340 = vector.broadcast %1339 : vector<16x1xf32> to vector<16x8xf32>
    %1341 = arith.subf %1337, %1340 : vector<16x8xf32>
    %1342 = math.exp %1341 : vector<16x8xf32>
    %cst_426 = arith.constant dense<0.000000e+00> : vector<16xf32>
    %1343 = vector.multi_reduction <add>, %1342, %cst_426 [1] : vector<16x8xf32> to vector<16xf32>
    %1344 = vector.shape_cast %1343 : vector<16xf32> to vector<16x1xf32>
    %1345 = tpu.reciprocal %1344 {approx = true} : vector<16x1xf32> -> vector<16x1xf32>
    %1346 = vector.broadcast %1345 : vector<16x1xf32> to vector<16x8xf32>
    %1347 = arith.mulf %1342, %1346 : vector<16x8xf32>
    %1348 = vector.extract_strided_slice %1275 {offsets = [0, 24], sizes = [8, 8], strides = [1, 1]} : vector<8x32xf32> to vector<8x8xf32>
    %cst_427 = arith.constant dense<0.000000e+00> : vector<16x8xf32>
    %1349 = tpu.matmul %1347, %1348, %cst_427 {dimension_numbers = #tpu.dot_dimension_numbers<[1], [0], [0], [1], [0, 0, 1, 1], [], []>} : vector<16x8xf32>, vector<8x8xf32>, vector<16x8xf32> -> vector<16x8xf32>
    %1350 = tpu.concatenate %1295, %1313, %1331, %1349 in 1 : vector<16x8xf32>, vector<16x8xf32>, vector<16x8xf32>, vector<16x8xf32> -> vector<16x32xf32>
    %cst_428 = arith.constant dense<0.000000e+00> : vector<16x32xf32>
    %1351 = tpu.matmul %1350, %1276, %cst_428 {dimension_numbers = #tpu.dot_dimension_numbers<[1], [0], [0], [1], [0, 0, 1, 1], [], []>} : vector<16x32xf32>, vector<32x32xf32>, vector<16x32xf32> -> vector<16x32xf32>
    %1352 = vector.broadcast %1277 : vector<1x32xf32> to vector<16x32xf32>
    %1353 = arith.addf %1351, %1352 : vector<16x32xf32>
    %1354 = arith.addf %1215, %1353 : vector<16x32xf32>
    %c408 = arith.constant 408 : index
    %c0_429 = arith.constant 0 : index
    %1355 = vector.load %arg0[%c408, %c0_429] : memref<2272x128xf32, #tpu.memory_space<vmem>>, vector<1x32xf32>
    %c400 = arith.constant 400 : index
    %c0_430 = arith.constant 0 : index
    %1356 = vector.load %arg0[%c400, %c0_430] : memref<2272x128xf32, #tpu.memory_space<vmem>>, vector<1x32xf32>
    %cst_431 = arith.constant dense<0.000000e+00> : vector<16xf32>
    %1357 = vector.multi_reduction <add>, %1354, %cst_431 [1] : vector<16x32xf32> to vector<16xf32>
    %1358 = vector.shape_cast %1357 : vector<16xf32> to vector<16x1xf32>
    %cst_432 = arith.constant 3.200000e+01 : f32
    %1359 = vector.broadcast %cst_432 : f32 to vector<16x1xf32>
    %1360 = arith.divf %1358, %1359 : vector<16x1xf32>
    %1361 = vector.broadcast %1360 : vector<16x1xf32> to vector<16x32xf32>
    %1362 = arith.subf %1354, %1361 : vector<16x32xf32>
    %1363 = arith.mulf %1362, %1362 : vector<16x32xf32>
    %cst_433 = arith.constant dense<0.000000e+00> : vector<16xf32>
    %1364 = vector.multi_reduction <add>, %1363, %cst_433 [1] : vector<16x32xf32> to vector<16xf32>
    %1365 = vector.shape_cast %1364 : vector<16xf32> to vector<16x1xf32>
    %cst_434 = arith.constant 3.200000e+01 : f32
    %1366 = vector.broadcast %cst_434 : f32 to vector<16x1xf32>
    %1367 = arith.divf %1365, %1366 : vector<16x1xf32>
    %1368 = vector.broadcast %1360 : vector<16x1xf32> to vector<16x32xf32>
    %1369 = arith.subf %1354, %1368 : vector<16x32xf32>
    %cst_435 = arith.constant 9.99999974E-6 : f32
    %1370 = vector.broadcast %cst_435 : f32 to vector<16x1xf32>
    %1371 = arith.addf %1367, %1370 : vector<16x1xf32>
    %1372 = math.rsqrt %1371 : vector<16x1xf32>
    %1373 = vector.broadcast %1372 : vector<16x1xf32> to vector<16x32xf32>
    %1374 = arith.mulf %1369, %1373 : vector<16x32xf32>
    %1375 = vector.broadcast %1355 : vector<1x32xf32> to vector<16x32xf32>
    %1376 = arith.mulf %1374, %1375 : vector<16x32xf32>
    %1377 = vector.broadcast %1356 : vector<1x32xf32> to vector<16x32xf32>
    %1378 = arith.addf %1376, %1377 : vector<16x32xf32>
    %c432 = arith.constant 432 : index
    %c0_436 = arith.constant 0 : index
    %1379 = vector.load %arg0[%c432, %c0_436] : memref<2272x128xf32, #tpu.memory_space<vmem>>, vector<32x128xf32>
    %cst_437 = arith.constant dense<0.000000e+00> : vector<16x128xf32>
    %1380 = tpu.matmul %1378, %1379, %cst_437 {dimension_numbers = #tpu.dot_dimension_numbers<[1], [0], [0], [1], [0, 0, 1, 1], [], []>} : vector<16x32xf32>, vector<32x128xf32>, vector<16x128xf32> -> vector<16x128xf32>
    %c344 = arith.constant 344 : index
    %c0_438 = arith.constant 0 : index
    %1381 = vector.load %arg0[%c344, %c0_438] : memref<2272x128xf32, #tpu.memory_space<vmem>>, vector<1x128xf32>
    %1382 = vector.broadcast %1381 : vector<1x128xf32> to vector<16x128xf32>
    %1383 = arith.addf %1380, %1382 : vector<16x128xf32>
    %cst_439 = arith.constant 5.000000e-01 : f32
    %1384 = vector.broadcast %cst_439 : f32 to vector<16x128xf32>
    %1385 = arith.mulf %1384, %1383 : vector<16x128xf32>
    %cst_440 = arith.constant 4.471500e-02 : f32
    %1386 = vector.broadcast %cst_440 : f32 to vector<16x128xf32>
    %1387 = arith.mulf %1386, %1383 : vector<16x128xf32>
    %1388 = arith.mulf %1387, %1383 : vector<16x128xf32>
    %1389 = arith.mulf %1388, %1383 : vector<16x128xf32>
    %1390 = arith.addf %1383, %1389 : vector<16x128xf32>
    %cst_441 = arith.constant 0.797884583 : f32
    %1391 = vector.broadcast %cst_441 : f32 to vector<16x128xf32>
    %1392 = arith.mulf %1391, %1390 : vector<16x128xf32>
    %1393 = math.tanh %1392 : vector<16x128xf32>
    %cst_442 = arith.constant 1.000000e+00 : f32
    %1394 = vector.broadcast %cst_442 : f32 to vector<16x128xf32>
    %1395 = arith.addf %1394, %1393 : vector<16x128xf32>
    %1396 = arith.mulf %1385, %1395 : vector<16x128xf32>
    %c464 = arith.constant 464 : index
    %c0_443 = arith.constant 0 : index
    %1397 = vector.load %arg0[%c464, %c0_443] : memref<2272x128xf32, #tpu.memory_space<vmem>>, vector<128x32xf32>
    %cst_444 = arith.constant dense<0.000000e+00> : vector<16x32xf32>
    %1398 = tpu.matmul %1396, %1397, %cst_444 {dimension_numbers = #tpu.dot_dimension_numbers<[1], [0], [0], [1], [0, 0, 1, 1], [], []>} : vector<16x128xf32>, vector<128x32xf32>, vector<16x32xf32> -> vector<16x32xf32>
    %1399 = arith.addf %1354, %1398 : vector<16x32xf32>
    %c352 = arith.constant 352 : index
    %c0_445 = arith.constant 0 : index
    %1400 = vector.load %arg0[%c352, %c0_445] : memref<2272x128xf32, #tpu.memory_space<vmem>>, vector<1x32xf32>
    %1401 = vector.broadcast %1400 : vector<1x32xf32> to vector<16x32xf32>
    %1402 = arith.addf %1399, %1401 : vector<16x32xf32>
    %c696 = arith.constant 696 : index
    %c0_446 = arith.constant 0 : index
    %1403 = vector.load %arg0[%c696, %c0_446] : memref<2272x128xf32, #tpu.memory_space<vmem>>, vector<1x32xf32>
    %c688 = arith.constant 688 : index
    %c0_447 = arith.constant 0 : index
    %1404 = vector.load %arg0[%c688, %c0_447] : memref<2272x128xf32, #tpu.memory_space<vmem>>, vector<1x32xf32>
    %cst_448 = arith.constant dense<0.000000e+00> : vector<16xf32>
    %1405 = vector.multi_reduction <add>, %1402, %cst_448 [1] : vector<16x32xf32> to vector<16xf32>
    %1406 = vector.shape_cast %1405 : vector<16xf32> to vector<16x1xf32>
    %cst_449 = arith.constant 3.200000e+01 : f32
    %1407 = vector.broadcast %cst_449 : f32 to vector<16x1xf32>
    %1408 = arith.divf %1406, %1407 : vector<16x1xf32>
    %1409 = vector.broadcast %1408 : vector<16x1xf32> to vector<16x32xf32>
    %1410 = arith.subf %1402, %1409 : vector<16x32xf32>
    %1411 = arith.mulf %1410, %1410 : vector<16x32xf32>
    %cst_450 = arith.constant dense<0.000000e+00> : vector<16xf32>
    %1412 = vector.multi_reduction <add>, %1411, %cst_450 [1] : vector<16x32xf32> to vector<16xf32>
    %1413 = vector.shape_cast %1412 : vector<16xf32> to vector<16x1xf32>
    %cst_451 = arith.constant 3.200000e+01 : f32
    %1414 = vector.broadcast %cst_451 : f32 to vector<16x1xf32>
    %1415 = arith.divf %1413, %1414 : vector<16x1xf32>
    %1416 = vector.broadcast %1408 : vector<16x1xf32> to vector<16x32xf32>
    %1417 = arith.subf %1402, %1416 : vector<16x32xf32>
    %cst_452 = arith.constant 9.99999974E-6 : f32
    %1418 = vector.broadcast %cst_452 : f32 to vector<16x1xf32>
    %1419 = arith.addf %1415, %1418 : vector<16x1xf32>
    %1420 = math.rsqrt %1419 : vector<16x1xf32>
    %1421 = vector.broadcast %1420 : vector<16x1xf32> to vector<16x32xf32>
    %1422 = arith.mulf %1417, %1421 : vector<16x32xf32>
    %1423 = vector.broadcast %1403 : vector<1x32xf32> to vector<16x32xf32>
    %1424 = arith.mulf %1422, %1423 : vector<16x32xf32>
    %1425 = vector.broadcast %1404 : vector<1x32xf32> to vector<16x32xf32>
    %1426 = arith.addf %1424, %1425 : vector<16x32xf32>
    %c1280 = arith.constant 1280 : index
    %c0_453 = arith.constant 0 : index
    %1427 = vector.load %arg0[%c1280, %c0_453] : memref<2272x128xf32, #tpu.memory_space<vmem>>, vector<32x16xf32>
    %cst_454 = arith.constant dense<0.000000e+00> : vector<16x16xf32>
    %1428 = tpu.matmul %1426, %1427, %cst_454 {dimension_numbers = #tpu.dot_dimension_numbers<[1], [0], [0], [1], [0, 0, 1, 1], [], []>} : vector<16x32xf32>, vector<32x16xf32>, vector<16x16xf32> -> vector<16x16xf32>
    %c16_455 = arith.constant 16 : index
    %c0_456 = arith.constant 0 : index
    %1429 = vector.load %arg3[%c16_455, %c0_456] : memref<40x128xf32, #tpu.memory_space<vmem>>, vector<16x16xf32>
    tpu.vector_store %arg3[%c16_455, %c0_456], %1428 {strides = array<i32>} : memref<40x128xf32, #tpu.memory_space<vmem>>, vector<16x16xf32>,
    %1430 = tpu.iota {dimensions = array<i32: 1>} : vector<16x16xi32>
    %1431 = vector.broadcast %3 : vector<16x1xi32> to vector<16x16xi32>
    %1432 = arith.cmpi eq, %1430, %1431 : vector<16x16xi32>
    %1433 = arith.extui %1432 : vector<16x16xi1> to vector<16x16xi32>
    %1434 = arith.sitofp %1433 : vector<16x16xi32> to vector<16x16xf32>
    %1435 = vector.extract_strided_slice %192 {offsets = [0, 0], sizes = [1, 16], strides = [1, 1]} : vector<2x16xf32> to vector<1x16xf32>
    %1436 = vector.shape_cast %1435 : vector<1x16xf32> to vector<1x16xf32>
    %1437 = vector.broadcast %1436 : vector<1x16xf32> to vector<8x16xf32>
    %1438 = vector.extract_strided_slice %192 {offsets = [1, 0], sizes = [1, 16], strides = [1, 1]} : vector<2x16xf32> to vector<1x16xf32>
    %1439 = vector.shape_cast %1438 : vector<1x16xf32> to vector<1x16xf32>
    %1440 = vector.broadcast %1439 : vector<1x16xf32> to vector<8x16xf32>
    %1441 = tpu.concatenate %1437, %1440 in 0 : vector<8x16xf32>, vector<8x16xf32> -> vector<16x16xf32>
    %1442 = arith.mulf %1434, %1441 : vector<16x16xf32>
    %cst_457 = arith.constant dense<0.000000e+00> : vector<16xf32>
    %1443 = vector.multi_reduction <add>, %1442, %cst_457 [1] : vector<16x16xf32> to vector<16xf32>
    %1444 = vector.shape_cast %1443 : vector<16xf32> to vector<16x1xf32>
    %cst_458 = arith.constant 0.000000e+00 : f32
    %1445 = vector.broadcast %cst_458 : f32 to vector<16x1xf32>
    %1446 = arith.maximumf %1444, %1445 : vector<16x1xf32>
    %1447 = arith.mulf %1444, %5 : vector<16x1xf32>
    %1448 = arith.subf %1446, %1447 : vector<16x1xf32>
    %1449 = math.absf %1444 : vector<16x1xf32>
    %cst_459 = arith.constant 0.000000e+00 : f32
    %1450 = vector.broadcast %cst_459 : f32 to vector<16x1xf32>
    %1451 = arith.subf %1450, %1449 : vector<16x1xf32>
    %1452 = math.exp %1451 : vector<16x1xf32>
    %cst_460 = arith.constant 1.000000e+00 : f32
    %1453 = vector.broadcast %cst_460 : f32 to vector<16x1xf32>
    %1454 = arith.addf %1453, %1452 : vector<16x1xf32>
    %1455 = math.log %1454 : vector<16x1xf32>
    %1456 = arith.addf %1448, %1455 : vector<16x1xf32>
    %c13_i32 = arith.constant 13 : i32
    %1457 = vector.broadcast %c13_i32 : i32 to vector<16x1xi32>
    %1458 = arith.cmpi sge, %3, %1457 : vector<16x1xi32>
    %cst_461 = arith.constant 0.000000e+00 : f32
    %1459 = vector.broadcast %cst_461 : f32 to vector<16x1xf32>
    %1460 = arith.subf %1459, %1456 : vector<16x1xf32>
    %cst_462 = arith.constant 0.000000e+00 : f32
    %1461 = vector.broadcast %cst_462 : f32 to vector<16x1xf32>
    %1462 = arith.select %1458, %1461, %1460 : vector<16x1xi1>, vector<16x1xf32>
    %1463 = tpu.iota {dimensions = array<i32: 1>} : vector<16x16xi32>
    %1464 = vector.broadcast %3 : vector<16x1xi32> to vector<16x16xi32>
    %1465 = arith.cmpi eq, %1463, %1464 : vector<16x16xi32>
    %1466 = arith.extui %1465 : vector<16x16xi1> to vector<16x16xi32>
    %1467 = arith.sitofp %1466 : vector<16x16xi32> to vector<16x16xf32>
    %cst_463 = arith.constant dense<0xFF800000> : vector<16xf32>
    %1468 = vector.multi_reduction <maximumf>, %1428, %cst_463 [1] : vector<16x16xf32> to vector<16xf32>
    %1469 = vector.shape_cast %1468 : vector<16xf32> to vector<16x1xf32>
    %1470 = vector.broadcast %1469 : vector<16x1xf32> to vector<16x16xf32>
    %1471 = arith.subf %1428, %1470 : vector<16x16xf32>
    %1472 = math.exp %1471 : vector<16x16xf32>
    %cst_464 = arith.constant dense<0.000000e+00> : vector<16xf32>
    %1473 = vector.multi_reduction <add>, %1472, %cst_464 [1] : vector<16x16xf32> to vector<16xf32>
    %1474 = vector.shape_cast %1473 : vector<16xf32> to vector<16x1xf32>
    %1475 = math.log %1474 : vector<16x1xf32>
    %1476 = arith.addf %1475, %1469 : vector<16x1xf32>
    %1477 = arith.mulf %1467, %1428 : vector<16x16xf32>
    %cst_465 = arith.constant dense<0.000000e+00> : vector<16xf32>
    %1478 = vector.multi_reduction <add>, %1477, %cst_465 [1] : vector<16x16xf32> to vector<16xf32>
    %1479 = vector.shape_cast %1478 : vector<16xf32> to vector<16x1xf32>
    %c15_i32 = arith.constant 15 : i32
    %1480 = vector.broadcast %c15_i32 : i32 to vector<16x1xi32>
    %1481 = arith.cmpi eq, %3, %1480 : vector<16x1xi32>
    %1482 = arith.subf %1479, %1476 : vector<16x1xf32>
    %cst_466 = arith.constant 0.000000e+00 : f32
    %1483 = vector.broadcast %cst_466 : f32 to vector<16x1xf32>
    %1484 = arith.select %1481, %1483, %1482 : vector<16x1xi1>, vector<16x1xf32>
    %1485 = arith.addf %1462, %1484 : vector<16x1xf32>
    %1486 = vector.extract_strided_slice %1485 {offsets = [0, 0], sizes = [8, 1], strides = [1, 1]} : vector<16x1xf32> to vector<8x1xf32>
    %cst_467 = arith.constant dense<0.000000e+00> : vector<1xf32>
    %1487 = vector.multi_reduction <add>, %1486, %cst_467 [0] : vector<8x1xf32> to vector<1xf32>
    %1488 = vector.shape_cast %1487 : vector<1xf32> to vector<1x1xf32>
    %1489 = vector.extract_strided_slice %1485 {offsets = [8, 0], sizes = [8, 1], strides = [1, 1]} : vector<16x1xf32> to vector<8x1xf32>
    %cst_468 = arith.constant dense<0.000000e+00> : vector<1xf32>
    %1490 = vector.multi_reduction <add>, %1489, %cst_468 [0] : vector<8x1xf32> to vector<1xf32>
    %1491 = vector.shape_cast %1490 : vector<1xf32> to vector<1x1xf32>
    %1492 = tpu.concatenate %1488, %1491 in 0 : vector<1x1xf32>, vector<1x1xf32> -> vector<2x1xf32>
    %c32_469 = arith.constant 32 : index
    %c0_470 = arith.constant 0 : index
    %1493 = vector.load %arg3[%c32_469, %c0_470] : memref<40x128xf32, #tpu.memory_space<vmem>>, vector<2x1xf32>
    tpu.vector_store %arg3[%c32_469, %c0_470], %1492 {strides = array<i32>} : memref<40x128xf32, #tpu.memory_space<vmem>>, vector<2x1xf32>,
    return
  }
}

</mosaic_0001>

<bundles_post_ra>
// kernel: forward.1
= control target key start
LH: loop header
LB: loop body
LE: loop exit
PB: predicated region body
PF: predicated region fallthrough
CT: control target
= control target key end

     0   :  { %8 = vsyncpa [#allocation3], 0  ;;  %s15403_s0 = inlined_call_operand.hbm [shape: f32[2272,128], index: 0, kind: input, shape index: {}]   ;;  %s15404_s1 = inlined_call_operand.hbm [shape: f32[32,48], index: 1, kind: input, shape index: {}]   ;;  %s15405_s2 = inlined_call_operand.vmem [shape: s32[16,3], index: 2, kind: input, shape index: {}]   ;;  %s15406_s3 = inlined_call_operand.vmem [shape: f32[40,128], index: 3, kind: output, shape index: {}]  }
   0x1   :  { %9 = vsyncpa [#allocation5], 0  ;;  %s13992_s12 = smov [#allocation2]   ;;  %s13944_s16 = scalar_lea.hbm %s15403_s0, 36352 }
   0x2   :  { %s15_s13 = sshll.u32 %s13992_s12, 4  ;;  %p13945_p0 = scmp.ne.s32.totalorder %s15403_s0, %s13944_s16  ;;  %s16_s13 = int_to_ptr.vmem [resolvable:$true] %s15_s13 }
   0x3   :  { %p13948_p1 = scmp.lt.u32.totalorder %s13944_s16, %s15403_s0 }
   0x5   :  { %p13950_p2 = pnand %p13948_p1, %p13945_p0 }
   0x7   :  { %13953 = shalt.err (!%p13950_p2)
}
   0x8   :  { %s13954_s21 = scalar_lea.vmem %s16_s13, 36352  ;;  %p13959_p4 = scmp.lt.s32.totalorder %s16_s13, %s16_s13 }
   0x9   :  { %p13955_p3 = scmp.ne.s32.totalorder %s16_s13, %s13954_s21  ;;  %p13960_p5 = scmp.lt.s32.totalorder %s13954_s21, %s13954_s21 }
   0xb   :  { %p13961_p6 = por %p13960_p5, %p13959_p4 }
   0xd   :  { %p13962_p7 = pnand %p13961_p6, %p13955_p3 }
   0xf   :  { %13965 = shalt.err (!%p13962_p7)
}
  0x10   :  { %s13993_s22 = smov 128   ;;  %s13994_s23 = smov 8  }
  0x11   :  { %21 = dma.hbm_to_vmem [thread:$0]  %s15403_s0, 36352, %s16_s13, [#allocation3], %s13993_s22, %s13993_s22, %s13994_s23  }
  0x12   :  { %s13995_s26 = smov [#allocation4]   ;;  %s13966_s30 = scalar_lea.hbm %s15404_s1, 512 }
  0x13   :  { %s27_s27 = sshll.u32 %s13995_s26, 4  ;;  %p13967_p8 = scmp.ne.s32.totalorder %s15404_s1, %s13966_s30  ;;  %s28_s27 = int_to_ptr.vmem [resolvable:$true] %s27_s27 }
  0x14   :  { %p13970_p9 = scmp.lt.u32.totalorder %s13966_s30, %s15404_s1 }
  0x16   :  { %p13972_p10 = pnand %p13970_p9, %p13967_p8 }
  0x18   :  { %13975 = shalt.err (!%p13972_p10)
}
  0x19   :  { %s13976_s8 = scalar_lea.vmem %s28_s27, 512  ;;  %p13981_p12 = scmp.lt.s32.totalorder %s28_s27, %s28_s27 }
  0x1a   :  { %p13977_p11 = scmp.ne.s32.totalorder %s28_s27, %s13976_s8  ;;  %p13982_p13 = scmp.lt.s32.totalorder %s13976_s8, %s13976_s8 }
  0x1c   :  { %p13983_p0 = por %p13982_p13, %p13981_p12 }
  0x1e   :  { %p13984_p1 = pnand %p13983_p0, %p13977_p11 }
  0x20   :  { %13987 = shalt.err (!%p13984_p1)
}
  0x21   :  { %33 = dma.hbm_to_vmem [thread:$0]  %s15404_s1, 512, %s28_s27, [#allocation5], %s13993_s22, %s13993_s22, %s13994_s23  }
  0x22   :  { %13988 = dma.done.wait [#allocation3], 36352  }
  0x23   :  { %13989 = vsyncadd [#allocation3], 4294930944 }
  0x24   :  { %13990 = dma.done.wait [#allocation5], 512  }
  0x25   :  { %13991 = vsyncadd [#allocation5], 4294966784  ;;  %vm158_vm0 = vcmask 122880   ;;  %vm85_vm1 = vcmask 392192   ;;  %v155_v0 = vld [vmem:[#allocation2 + $0x570] sm:$0x1] }
  0x26   :  { %v43_v1 = vld [vmem:[#allocation4 + $0x8] sm:$0xff]  ;;  %v42_v2 = vld [vmem:[#allocation4] sm:$0xff]  ;;  %v159_v3 = vsel %vm158_vm0, %v155_v0, 0.0  ;;  %v44_v5 = vld [vmem:[#allocation4 + $0x10] sm:$0xff]  ;;  %v13996_v38 = vmov 0.0|0.0   ;;  %vm13997_vm2 = vmmov 0  }
  0x27   :  { %v89_v4 = vsel %vm85_vm1, %v43_v1, 0.0  ;;  %160 = vadd.xlane.f32.xlu0 %v159_v3  ;;  %v86_v6 = vsel %vm85_vm1, %v42_v2, 0.0  ;;  %v92_v7 = vsel %vm85_vm1, %v44_v5, 0.0  ;;  %v45_v8 = vld [vmem:[#allocation4 + $0x18] sm:$0xff]  ;;  %v176_v36 = vld [vmem:[#allocation2 + $0x5c0] sm:$0xff]  ;;  %12594 = vmatprep.subr.bf16.mxu0 %v13996_v38  ;;  %v13998_v42 = vmov 0.0  }
  0x28   :  { %90 = vadd.xlane.f32.xlu1 %v89_v4  ;;  %v95_v9 = vsel %vm85_vm1, %v45_v8, 0.0  ;;  %v175_v35 = vld [vmem:[#allocation2 + $0x5b8] sm:$0xff]  ;;  %12617 = vmatprep.subr.bf16.mxu1 %v13996_v38  ;;  %v258_v40 = vld [vmem:[#allocation2 + $0x580] sm:$0xff]  ;;  %v156_v59 = vld [vmem:[#allocation2 + $0x568] sm:$0x1]  ;;  %vm178_vm3 = vcmask 130048  }
  0x29   :  { %v12595_v37 = vpack.c.bf16 %v176_v36, %v175_v35  ;;  %v257_v39 = vld [vmem:[#allocation2 + $0x578] sm:$0xff]  ;;  %11598 = vmatprep.mubr.msk.f32.mxu0 %vm13997_vm2, %v13998_v42  ;;  %11638 = vmatprep.mubr.msk.f32.mxu1 %vm13997_vm2, %v13998_v42  ;;  %v157_v61 = vld [vmem:[#allocation2 + $0x560] sm:$0x1]  ;;  %v259_v62 = vld [vmem:[#allocation2 + $0x588] sm:$0xff]  ;;  %vm368_vm4 = vcmask 31744   ;;  %s13999_s1 = smov 124  }
  0x2a   :  { %v12597_v41 = vpack.c.bf16 %v258_v40, %v257_v39  ;;  %v260_v63 = vld [vmem:[#allocation2 + $0x590] sm:$0xff]  ;;  %v10753_v4 = vld [vmem:[#allocation2 + $0x558] ss:$0 sm:$0xff]  ;;  %vm14131_vm5 = vmpackc.low %vm368_vm4, %vm368_vm4  ;;  %vm255_vm6 = vcmask 1040384   ;;  %vm456_vm8 = vcmask 254976   ;;  %s14001_s10 = smov 112  }
  0x2b   :  { %87 = vadd.xlane.f32.xlu0 %v86_v6  ;;  %12596 = vmatpush3.bf16.msra.mxu0 %v12595_v37  ;;  %v12601_v3 = vpack.c.bf16 %v260_v63, %v259_v62  ;;  %s14002_s11 = smov 108   ;;  %s14003_s12 = smov 120   ;;  %vm480_vm9 = vcmask 261120   ;;  %vm1238_vm10 = vcmask 257024   ;;  %vm1131_vm11 = vcmask 64512  }
  0x2c   :  { %93 = vadd.xlane.f32.xlu1 %v92_v7  ;;  %12598 = vmatprep.subr.bf16.mxu0 %v12597_v41  ;;  %v261_v7 = vld [vmem:[#allocation2 + $0x598] sm:$0xff]  ;;  %s14004_s13 = smov 104   ;;  %s14005_s14 = smov 116   ;;  %vm1133_vm12 = vcmask 97280   ;;  %vm14298_vm13 = vmpackc.low %vm1131_vm11, %vm1131_vm11  ;;  %vm2329_vm14 = vcmask 123904   ;;  %vm1348_vm15 = vcmask 1043456  }
  0x2d   :  { %s14006_s15 = smov 100   ;;  %s14007_s16 = smov 4  }
  0x2e   :  { %s14008_s17 = smov 12   ;;  %s14009_s18 = smov 96  }
  0x2f   :  { %96 = vadd.xlane.f32.xlu0 %v95_v9  ;;  %v10754_v9 = vld [vmem:[#allocation2 + $0x550] ss:$0 sm:$0xff]  ;;  %s14010_s22 = smov 88   ;;  %s14011_s24 = smov 80  }
  0x30   :  { %s14013_s29 = smov 72   ;;  %s14014_s30 = smov 16  }
  0x31   :  { %s14015_s4 = smov 24   ;;  %s14016_s5 = smov 64  }
  0x32   :  { %s14017_s6 = smov 56   ;;  %s14018_s7 = smov 48  }
  0x33   :  { %s14019_s8 = smov 40  }
  0xb4   :  { %v161_v10 = vpop.xlane.xlu0 %160 }
  0xb5   :  { %v91_v11 = vpop.xlane.xlu1 %90  ;;  %v163_v12 = vmul.f32 0.0625, %v161_v10 }
  0xb6   :  { %v100_v13 = vmul.f32 0.020833334, %v91_v11 }
  0xb7   :  { %v14073_v14 = vsub.f32 %v155_v0, %v163_v12 }
  0xb8   :  { %v14075_v15 = vsub.f32 %v43_v1, %v100_v13  ;;  %v88_v16 = vpop.xlane.xlu0 %87 }
  0xb9   :  { %v94_v17 = vpop.xlane.xlu1 %93  ;;  %v99_v18 = vmul.f32 0.020833334, %v88_v16  ;;  %v165_v19 = vmul.f32 %v14073_v14, %v14073_v14 }
  0xba   :  { %v101_v20 = vmul.f32 0.020833334, %v94_v17  ;;  %v108_v21 = vmul.f32 %v14075_v15, %v14075_v15 }
  0xbb   :  { %v14081_v22 = vsub.f32 %v42_v2, %v99_v18  ;;  %v166_v23 = vsel %vm158_vm0, %v165_v19, 0.0 }
  0xbc   :  { %v14084_v24 = vsub.f32 %v44_v5, %v101_v20  ;;  %167 = vadd.xlane.f32.xlu1 %v166_v23  ;;  %v97_v25 = vpop.xlane.xlu0 %96  ;;  %v114_v27 = vsel %vm85_vm1, %v108_v21, 0.0 }
  0xbd   :  { %v102_v26 = vmul.f32 0.020833334, %v97_v25  ;;  %v107_v28 = vmul.f32 %v14081_v22, %v14081_v22 }
  0xbe   :  { %v109_v29 = vmul.f32 %v14084_v24, %v14084_v24 }
  0xbf   :  { %v14091_v30 = vsub.f32 %v45_v8, %v102_v26  ;;  %v111_v31 = vsel %vm85_vm1, %v107_v28, 0.0  ;;  %v262_v8 = vld [vmem:[#allocation2 + $0x5a0] sm:$0xff]  ;;  %v10756_v26 = vld [vmem:[#allocation2 + $0x538] ss:$0 sm:$0xff] }
  0xc0   :  { %115 = vadd.xlane.f32.xlu1 %v114_v27  ;;  %112 = vadd.xlane.f32.xlu0 %v111_v31  ;;  %v117_v32 = vsel %vm85_vm1, %v109_v29, 0.0  ;;  %v12605_v13 = vpack.c.bf16 %v262_v8, %v261_v7  ;;  %v177_v27 = vld [vmem:[#allocation2 + $0x548] sm:$0x1] }
  0xc1   :  { %v110_v33 = vmul.f32 %v14091_v30, %v14091_v30 }
  0xc3   :  { %v120_v34 = vsel %vm85_vm1, %v110_v33, 0.0 }
  0xc4   :  { %118 = vadd.xlane.f32.xlu0 %v117_v32  ;;  %121 = vadd.xlane.f32.xlu1 %v120_v34 }
 0x149   :  { %v168_v43 = vpop.xlane.xlu1 %167 }
 0x14a   :  { %v169_v44 = vmul.f32 0.0625, %v168_v43 }
 0x14c   :  { %v170_v45 = vadd.f32 1e-05, %v169_v44 }
 0x14d   :  { %v116_v46 = vpop.xlane.xlu1 %115  ;;  %v113_v47 = vpop.xlane.xlu0 %112 }
 0x14e   :  { %13604 = vrsqrt.f32 %v170_v45  ;;  %v124_v48 = vmul.f32 0.020833334, %v116_v46  ;;  %v123_v49 = vmul.f32 0.020833334, %v113_v47 }
 0x150   :  { %v128_v50 = vadd.f32 1e-05, %v124_v48  ;;  %v127_v51 = vadd.f32 1e-05, %v123_v49 }
 0x151   :  { %v122_v52 = vpop.xlane.xlu1 %121  ;;  %v119_v53 = vpop.xlane.xlu0 %118 }
 0x152   :  { %v126_v54 = vmul.f32 0.020833334, %v122_v52  ;;  %v125_v55 = vmul.f32 0.020833334, %v119_v53  ;;  %13606 = vrsqrt.f32 %v127_v51 }
 0x153   :  { %13608 = vrsqrt.f32 %v128_v50 }
 0x154   :  { %v130_v56 = vadd.f32 1e-05, %v126_v54  ;;  %v129_v57 = vadd.f32 1e-05, %v125_v55  ;;  %v50_v55 = vlaneseq }
 0x156   :  { %13610 = vrsqrt.f32 %v129_v57  ;;  %v14166_v57 = vshrl.u32 %v50_v55, 7 }
 0x157   :  { %13612 = vrsqrt.f32 %v130_v56  ;;  %v14164_v56 = vand.u32 127, %v50_v55 }
 0x158   :  { %v13605_v58 = vpop.eup %13604 }
 0x159   :  { %v172_v60 = vmul.f32 %v13605_v58, %v14073_v14  ;;  %v75_v58 = vshra.s32 %v14164_v56, 4 }
 0x15b   :  { %v173_v0 = vmul.f32 %v172_v60, %v156_v59  ;;  %vm78_vm7 = vcmp.eq.s32.totalorder %v14166_v57, %v75_v58  ;;  %v14000_v60 = vmov -1e+30  }
 0x15c   :  { %v13607_v1 = vpop.eup %13606 }
 0x15d   :  { %v174_v2 = vadd.f32 %v173_v0, %v157_v61  ;;  %v13609_v5 = vpop.eup %13608  ;;  %v14106_v6 = vmul.f32 %v13607_v1, %v14081_v22  ;;  %v14173_v61 = vsel %vm78_vm7, 0.0, %v14000_v60 }
 0x15e   :  { %v14111_v12 = vmul.f32 %v13609_v5, %v14075_v15 }
 0x15f   :  { %11599 = vmatmul.mubr.msk.f32.vlgmr.msra.gmra.mrb[0].mxu0 %vm178_vm3, %v174_v2  ;;  %v143_v10 = vmul.f32 %v10753_v4, %v14106_v6 }
 0x160   :  { %12600 = vmatpush3.bf16.msra.mxu0 %v12597_v41  ;;  %v13611_v11 = vpop.eup %13610  ;;  %v144_v18 = vmul.f32 %v10753_v4, %v14111_v12 }
 0x161   :  { %12602 = vmatprep.subr.bf16.mxu0 %v12601_v3  ;;  %v13613_v14 = vpop.eup %13612  ;;  %v151_v16 = vadd.f32 %v10754_v9, %v143_v10  ;;  %v14114_v17 = vmul.f32 %v13611_v11, %v14084_v24 }
 0x162   :  { %v14119_v19 = vmul.f32 %v13613_v14, %v14091_v30  ;;  %v152_v15 = vadd.f32 %v10754_v9, %v144_v18 }
 0x163   :  { %11613 = vmatprep.mubr.msk.f32.mxu0 %vm85_vm1, %v151_v16  ;;  %v145_v20 = vmul.f32 %v10753_v4, %v14114_v17 }
 0x164   :  { %12604 = vmatpush3.bf16.msra.mxu0 %v12601_v3  ;;  %v146_v21 = vmul.f32 %v10753_v4, %v14119_v19 }
 0x165   :  { %12606 = vmatprep.subr.bf16.mxu0 %v12605_v13  ;;  %v153_v22 = vadd.f32 %v10754_v9, %v145_v20 }
 0x166   :  { %v154_v23 = vadd.f32 %v10754_v9, %v146_v21 }
 0x168   :  { %12608 = vmatpush3.bf16.msra.mxu0 %v12605_v13 }
 0x169   :  { %12609 = vmatprep.subr.bf16.mxu0 %v13996_v38 }
 0x16b   :  { %11614 = vmatmul.mubr.msk.f32.vlgmr.msra.gmra.mrb[2].mxu0 %vm85_vm1, %v152_v15 }
 0x16c   :  { %11616 = vmatprep.mubr.msk.f32.mxu0 %vm85_vm1, %v153_v22 }
 0x16f   :  { %11617 = vmatmul.mubr.msk.f32.gmra.mrb[4].mxu0 %vm85_vm1, %v154_v23 }
 0x170   :  { %11627 = vmatprep.mubr.msk.f32.mxu0 %vm13997_vm2, %v13998_v42 }
 0x232   :  { %v248_v24 = vpop.f32.mrb[0].mxu0 }
 0x233   :  { %v11600_v25 = vpop.f32.mrb[1].mxu0  ;;  %v249_v32 = vadd.f32 %v248_v24, %v177_v27 }
 0x235   :  { %v253_v41 = vrot.slane %v249_v32, 7 }
 0x237   :  { %v14145_v45 = vsel %vm255_vm6, %v249_v32, %v253_v41 }
 0x23e   :  { %v11615_v28 = vpop.f32.mrb[2].mxu0 }
 0x23f   :  { %v352_v29 = vadd.f32 %v11615_v28, %v10756_v26  ;;  %v346_v30 = vpop.f32.mrb[3].mxu0 }
 0x240   :  { %v347_v31 = vadd.f32 %v10756_v26, %v346_v30 }
 0x242   :  { %v11618_v34 = vpop.f32.mrb[4].mxu0  ;;  %v14135_v35 = vpack.i.bf16 %v352_v29, %v347_v31  ;;  %v12610_v36 = vpack.c.bf16 %v352_v29, %v347_v31 }
 0x243   :  { %v362_v37 = vadd.f32 %v11618_v34, %v10756_v26  ;;  %v356_v39 = vpop.f32.mrb[5].mxu0 }
 0x244   :  { %v357_v40 = vadd.f32 %v10756_v26, %v356_v39  ;;  %13301 = vrot.lane.b32.xlu0 %v14135_v35, %s13999_s1  ;;  %12612 = vmatpush3.bf16.xpose.msk.msra.mxu0 %vm14131_vm5, %v12610_v36 }
 0x245   :  { %12613 = vmatprep.subr.bf16.mxu0 %v13996_v38 }
 0x246   :  { %v14141_v43 = vpack.i.bf16 %v362_v37, %v357_v40  ;;  %v12614_v44 = vpack.c.bf16 %v362_v37, %v357_v40 }
 0x248   :  { %13306 = vrot.lane.b32.xlu1 %v14141_v43, %s13999_s1 }
 0x24c   :  { %554 = vrot.lane.b32.xlu1 %v14145_v45, %s13999_s1  ;;  %12616 = vmatpush3.bf16.xpose.msk.msra.mxu0 %vm14131_vm5, %v12614_v44 }
 0x24d   :  { %12623 = vmatprep.subr.bf16.mxu0 %v13996_v38 }
 0x253   :  { %11628 = vmatmul.mubr.msk.f32.vlgmr.msra.gmra.mrb[6].mxu0 %vm368_vm4, %v14145_v45 }
 0x254   :  { %11649 = vmatprep.mubr.msk.f32.mxu0 %vm13997_vm2, %v13998_v42 }
 0x2b6   :  { %v13302_v46 = vpop.permute.xlu0 %13301 }
 0x2b7   :  { %v13304_v47 = vunpack.i.h.bf16 %v13302_v46  ;;  %v13303_v48 = vunpack.i.l.bf16 %v13302_v46 }
 0x2b9   :  { %v12624_v49 = vpack.c.bf16 %v13304_v47, %v13303_v48 }
 0x2ba   :  { %v13307_v50 = vpop.permute.xlu1 %13306 }
 0x2bb   :  { %12626 = vmatpush3.bf16.xpose.msk.msra.mxu0 %vm14131_vm5, %v12624_v49  ;;  %v13309_v51 = vunpack.i.h.bf16 %v13307_v50  ;;  %v13308_v52 = vunpack.i.l.bf16 %v13307_v50 }
 0x2bc   :  { %12627 = vmatprep.subr.bf16.mxu0 %v13996_v38 }
 0x2bd   :  { %v12628_v53 = vpack.c.bf16 %v13309_v51, %v13308_v52 }
 0x2be   :  { %v555_v54 = vpop.permute.xlu1 %554 }
 0x2c3   :  { %12630 = vmatpush3.bf16.xpose.msk.msra.mxu0 %vm14131_vm5, %v12628_v53 }
 0x2c4   :  { %12645 = vmatprep.subr.bf16.mxu0 %v13996_v38 }
 0x2ca   :  { %11650 = vmatmul.mubr.msk.f32.vlgmr.msra.gmra.mrb[8].mxu0 %vm368_vm4, %v555_v54 }
 0x2cb   :  { %11682 = vmatprep.mubr.msk.f32.mxu0 %vm13997_vm2, %v13998_v42 }
 0x326   :  { %v450_v59 = vpop.f32.mrb[6].mxu0 }
 0x327   :  { %v454_v62 = vmul.f32 0.5, %v450_v59  ;;  %v11629_v63 = vpop.f32.mrb[7].mxu0 }
 0x329   :  { %v455_v0 = vadd.f32 %v454_v62, %v14173_v61 }
 0x32b   :  { %v457_v1 = vsel %vm456_vm8, %v455_v0, -inf }
 0x32c   :  { %458 = vmax.xlane.f32.xlu1 %v457_v1 }
 0x33d   :  { %13311 = vrot.lane.b32.xlu1 %v14135_v35, %s14001_s10 }
 0x341   :  { %13321 = vrot.lane.b32.xlu1 %v14135_v35, %s14002_s11 }
 0x345   :  { %13326 = vrot.lane.b32.xlu1 %v14141_v43, %s14002_s11 }
 0x349   :  { %13331 = vrot.lane.b32.xlu1 %v14135_v35, %s14003_s12 }
 0x34d   :  { %742 = vrot.lane.b32.xlu1 %v14145_v45, %s14003_s12 }
 0x351   :  { %13346 = vrot.lane.b32.xlu1 %v14141_v43, %s14004_s13 }
 0x39d   :  { %v640_v2 = vpop.f32.mrb[8].mxu0 }
 0x39e   :  { %v644_v3 = vmul.f32 0.5, %v640_v2  ;;  %v11651_v4 = vpop.f32.mrb[9].mxu0 }
 0x3a0   :  { %v645_v5 = vadd.f32 %v644_v3, %v14173_v61 }
 0x3a2   :  { %v646_v7 = vsel %vm456_vm8, %v645_v5, -inf }
 0x3a3   :  { %647 = vmax.xlane.f32.xlu0 %v646_v7 }
 0x3b9   :  { %v459_v8 = vpop.xlane.xlu1 %458 }
 0x3ba   :  { %v460_v9 = vsub.f32 %v455_v0, %v459_v8 }
 0x3bc   :  { %v461_v10 = vmul.f32 1.442695, %v460_v9 }
 0x3bd   :  { %v13312_v11 = vpop.permute.xlu1 %13311 }
 0x3be   :  { %13614 = vpow2.f32 %v461_v10  ;;  %v13314_v13 = vunpack.i.h.bf16 %v13312_v11  ;;  %v13313_v14 = vunpack.i.l.bf16 %v13312_v11 }
 0x3c0   :  { %v12618_v16 = vpack.c.bf16 %v13314_v13, %v13313_v14 }
 0x3c1   :  { %v13322_v27 = vpop.permute.xlu1 %13321 }
 0x3c2   :  { %12619 = vmatpush3.bf16.msra.mxu1 %v12618_v16  ;;  %v13324_v32 = vunpack.i.h.bf16 %v13322_v27  ;;  %v13323_v34 = vunpack.i.l.bf16 %v13322_v27 }
 0x3c3   :  { %12620 = vmatprep.subr.bf16.mxu1 %v13996_v38 }
 0x3c4   :  { %v12632_v40 = vpack.c.bf16 %v13324_v32, %v13323_v34 }
 0x3c5   :  { %v13327_v37 = vpop.permute.xlu1 %13326 }
 0x3c6   :  { %v13329_v41 = vunpack.i.h.bf16 %v13327_v37  ;;  %v13328_v44 = vunpack.i.l.bf16 %v13327_v37  ;;  %v1351_v37 = vld [vmem:[#allocation2 + $0x610] sm:$0xff] }
 0x3c8   :  { %v13615_v18 = vpop.eup %13614  ;;  %v12635_v47 = vpack.c.bf16 %v13329_v41, %v13328_v44  ;;  %v10787_v41 = vld [vmem:[#allocation2 + $0x5e8] ss:$0 sm:$0xff] }
 0x3c9   :  { %v463_v20 = vsel %vm456_vm8, %v13615_v18, 0.0  ;;  %v13332_v48 = vpop.permute.xlu1 %13331  ;;  %v1223_v44 = vmul.f32 %v10787_v41, %v14106_v6  ;;  %v1224_v33 = vmul.f32 %v10787_v41, %v14111_v12  ;;  %v1225_v6 = vmul.f32 %v10787_v41, %v14114_v17 }
 0x3ca   :  { %464 = vadd.xlane.f32.xlu0 %v463_v20  ;;  %v13334_v50 = vunpack.i.h.bf16 %v13332_v48  ;;  %v13333_v51 = vunpack.i.l.bf16 %v13332_v48  ;;  %v10788_v48 = vld [vmem:[#allocation2 + $0x5e0] ss:$0 sm:$0xff] }
 0x3cc   :  { %v12638_v52 = vpack.c.bf16 %v13334_v50, %v13333_v51  ;;  %v1231_v51 = vadd.f32 %v10788_v48, %v1223_v44 }
 0x3cd   :  { %v743_v62 = vpop.permute.xlu1 %742 }
 0x3d1   :  { %v13347_v13 = vpop.permute.xlu1 %13346 }
 0x3d2   :  { %v13349_v20 = vunpack.i.h.bf16 %v13347_v13 }
 0x430   :  { %v648_v15 = vpop.xlane.xlu0 %647 }
 0x431   :  { %v649_v21 = vsub.f32 %v645_v5, %v648_v15  ;;  %v13348_v15 = vunpack.i.l.bf16 %v13347_v13 }
 0x433   :  { %v650_v22 = vmul.f32 1.442695, %v649_v21 }
 0x435   :  { %13616 = vpow2.f32 %v650_v22  ;;  %v12649_v22 = vpack.c.bf16 %v13349_v20, %v13348_v15 }
 0x43f   :  { %v13617_v23 = vpop.eup %13616 }
 0x440   :  { %v652_v24 = vsel %vm456_vm8, %v13617_v23, 0.0 }
 0x441   :  { %653 = vadd.xlane.f32.xlu0 %v652_v24 }
 0x457   :  { %13316 = vrot.lane.b32.xlu0 %v14141_v43, %s14001_s10  ;;  %v465_v25 = vpop.xlane.xlu0 %464 }
 0x458   :  { %13618 = vrcp.f32 %v465_v25 }
 0x45b   :  { %13336 = vrot.lane.b32.xlu0 %v14141_v43, %s14003_s12 }
 0x462   :  { %v13619_v31 = vpop.eup %13618 }
 0x463   :  { %v467_v39 = vmul.f32 %v13619_v31, %v13615_v18 }
 0x4ce   :  { %v654_v26 = vpop.xlane.xlu0 %653 }
 0x4cf   :  { %13620 = vrcp.f32 %v654_v26 }
 0x4d2   :  { %v13317_v28 = vpop.permute.xlu0 %13316 }
 0x4d3   :  { %v13319_v29 = vunpack.i.h.bf16 %v13317_v28  ;;  %v13318_v30 = vunpack.i.l.bf16 %v13317_v28 }
 0x4d5   :  { %v12621_v36 = vpack.c.bf16 %v13319_v29, %v13318_v30 }
 0x4d6   :  { %v13337_v53 = vpop.permute.xlu0 %13336 }
 0x4d7   :  { %12622 = vmatpush3.bf16.msra.mxu1 %v12621_v36  ;;  %v13339_v54 = vunpack.i.h.bf16 %v13337_v53  ;;  %v13338_v55 = vunpack.i.l.bf16 %v13337_v53  ;;  %v1350_v36 = vld [vmem:[#allocation2 + $0x608] sm:$0xff]  ;;  %v1355_v53 = vld [vmem:[#allocation2 + $0x630] sm:$0xff] }
 0x4d8   :  { %12631 = vmatprep.subr.bf16.mxu1 %v13996_v38 }
 0x4d9   :  { %v13621_v46 = vpop.eup %13620  ;;  %v12642_v59 = vpack.c.bf16 %v13339_v54, %v13338_v55  ;;  %v1232_v55 = vadd.f32 %v10788_v48, %v1224_v33 }
 0x4da   :  { %11639 = vmatmul.mubr.msk.f32.vlgmr.msra.gmra.mrb[0].mxu1 %vm480_vm9, %v467_v39  ;;  %v656_v49 = vmul.f32 %v13621_v46, %v13617_v23  ;;  %v12674_v39 = vpack.c.bf16 %v1351_v37, %v1350_v36  ;;  %v1352_v46 = vld [vmem:[#allocation2 + $0x618] sm:$0xff] }
 0x4db   :  { %12633 = vmatpush3.bf16.msra.mxu1 %v12632_v40  ;;  %11660 = vmatprep.mubr.msk.f32.mxu1 %vm13997_vm2, %v13998_v42 }
 0x4dc   :  { %12634 = vmatprep.subr.bf16.mxu1 %v13996_v38 }
 0x4df   :  { %12636 = vmatpush3.bf16.msra.mxu1 %v12635_v47  ;;  %v1353_v47 = vld [vmem:[#allocation2 + $0x620] sm:$0xff] }
 0x4e0   :  { %12637 = vmatprep.subr.bf16.mxu1 %v13996_v38 }
 0x4e2   :  { %11661 = vmatmul.mubr.msk.f32.vlgmr.msra.gmra.mrb[2].mxu1 %vm480_vm9, %v656_v49  ;;  %v12678_v49 = vpack.c.bf16 %v1353_v47, %v1352_v46 }
 0x4e3   :  { %11671 = vmatprep.mubr.msk.f32.mxu1 %vm13997_vm2, %v13998_v42 }
 0x4e8   :  { %12640 = vmatpush3.bf16.xpose.msk.msra.mxu1 %vm14131_vm5, %v12638_v52  ;;  %v1354_v52 = vld [vmem:[#allocation2 + $0x628] sm:$0xff] }
 0x4e9   :  { %12641 = vmatprep.subr.bf16.mxu1 %v13996_v38  ;;  %v12682_v54 = vpack.c.bf16 %v1355_v53, %v1354_v52  ;;  %v80_v52 = vld [vmem:[#allocation2 + $0x530] sm:$0x1] }
 0x4ea   :  { %v81_v53 = vmul.f32 1.442695, %v80_v52 }
 0x4f0   :  { %12644 = vmatpush3.bf16.xpose.msk.msra.mxu1 %vm14131_vm5, %v12642_v59  ;;  %v1226_v59 = vmul.f32 %v10787_v41, %v14119_v19 }
 0x4f1   :  { %12659 = vmatprep.subr.bf16.mxu1 %v13996_v38 }
 0x4f7   :  { %11672 = vmatmul.mubr.msk.f32.vlgmr.msra.gmra.mrb[4].mxu1 %vm368_vm4, %v743_v62  ;;  %v1233_v62 = vadd.f32 %v10788_v48, %v1225_v6 }
 0x4f8   :  { %11704 = vmatprep.mubr.msk.f32.mxu1 %vm13997_vm2, %v13998_v42 }
 0x5ad   :  { %v14214_v63 = vpop.f32.mrb[0].mxu1 }
 0x5ae   :  { %v11640_v0 = vpop.f32.mrb[1].mxu1 }
 0x5af   :  { %v1234_v0 = vadd.f32 %v10788_v48, %v1226_v59  ;;  %v366_v48 = vld [vmem:[#allocation2 + $0x5b0] sm:$0xff] }
 0x5b5   :  { %v14216_v1 = vpop.f32.mrb[2].mxu1 }
 0x5b6   :  { %v11662_v2 = vpop.f32.mrb[3].mxu1 }
 0x5ca   :  { %v828_v3 = vpop.f32.mrb[4].mxu1 }
 0x5cb   :  { %v832_v4 = vmul.f32 0.5, %v828_v3  ;;  %v11673_v5 = vpop.f32.mrb[5].mxu1 }
 0x5cd   :  { %v833_v7 = vadd.f32 %v832_v4, %v14173_v61 }
 0x5cf   :  { %v834_v8 = vsel %vm456_vm8, %v833_v7, -inf }
 0x5d0   :  { %835 = vmax.xlane.f32.xlu0 %v834_v8 }
 0x5e6   :  { %13341 = vrot.lane.b32.xlu0 %v14135_v35, %s14004_s13 }
 0x5ea   :  { %13351 = vrot.lane.b32.xlu0 %v14135_v35, %s14005_s14 }
 0x5ee   :  { %930 = vrot.lane.b32.xlu0 %v14145_v45, %s14005_s14 }
 0x65d   :  { %v836_v9 = vpop.xlane.xlu0 %835 }
 0x65e   :  { %v837_v10 = vsub.f32 %v833_v7, %v836_v9  ;;  %v10793_v7 = vld [vmem:[#allocation2 + $0x5c8] ss:$0 sm:$0xff] }
 0x660   :  { %v838_v11 = vmul.f32 1.442695, %v837_v10 }
 0x661   :  { %v13342_v14 = vpop.permute.xlu0 %13341 }
 0x662   :  { %13622 = vpow2.f32 %v838_v11  ;;  %v13344_v16 = vunpack.i.h.bf16 %v13342_v14  ;;  %v13343_v18 = vunpack.i.l.bf16 %v13342_v14 }
 0x664   :  { %v12646_v21 = vpack.c.bf16 %v13344_v16, %v13343_v18 }
 0x665   :  { %v13352_v25 = vpop.permute.xlu0 %13351 }
 0x666   :  { %12647 = vmatpush3.bf16.msra.mxu0 %v12646_v21  ;;  %v13354_v26 = vunpack.i.h.bf16 %v13352_v25  ;;  %v13353_v27 = vunpack.i.l.bf16 %v13352_v25 }
 0x667   :  { %12648 = vmatprep.subr.bf16.mxu0 %v13996_v38 }
 0x668   :  { %v12652_v30 = vpack.c.bf16 %v13354_v26, %v13353_v27 }
 0x669   :  { %v931_v50 = vpop.permute.xlu0 %930 }
 0x66a   :  { %12650 = vmatpush3.bf16.msra.mxu0 %v12649_v22  ;;  %v1235_v22 = vld [vmem:[#allocation2 + $0x600] sm:$0xf] }
 0x66b   :  { %12651 = vmatprep.subr.bf16.mxu0 %v13996_v38 }
 0x66c   :  { %v13623_v23 = vpop.eup %13622 }
 0x66d   :  { %v840_v45 = vsel %vm456_vm8, %v13623_v23, 0.0 }
 0x66e   :  { %841 = vadd.xlane.f32.xlu1 %v840_v45 }
 0x67f   :  { %13356 = vrot.lane.b32.xlu1 %v14141_v43, %s14005_s14 }
 0x6fb   :  { %v842_v24 = vpop.xlane.xlu1 %841 }
 0x6fc   :  { %13624 = vrcp.f32 %v842_v24 }
 0x6ff   :  { %v13357_v31 = vpop.permute.xlu1 %13356 }
 0x700   :  { %v13359_v32 = vunpack.i.h.bf16 %v13357_v31  ;;  %v13358_v34 = vunpack.i.l.bf16 %v13357_v31 }
 0x702   :  { %v12656_v40 = vpack.c.bf16 %v13359_v32, %v13358_v34 }
 0x706   :  { %v13625_v28 = vpop.eup %13624 }
 0x707   :  { %v844_v29 = vmul.f32 %v13625_v28, %v13623_v23  ;;  %v1239_v23 = vsel %vm1238_vm10, %v1235_v22, 0.0 }
 0x709   :  { %11683 = vmatmul.mubr.msk.f32.vlgmr.msra.gmra.mrb[10].mxu0 %vm480_vm9, %v844_v29 }
 0x70a   :  { %12654 = vmatpush3.bf16.xpose.msk.msra.mxu0 %vm14131_vm5, %v12652_v30  ;;  %11693 = vmatprep.mubr.msk.f32.mxu0 %vm13997_vm2, %v13998_v42 }
 0x70b   :  { %12655 = vmatprep.subr.bf16.mxu0 %v13996_v38 }
 0x712   :  { %12658 = vmatpush3.bf16.xpose.msk.msra.mxu0 %vm14131_vm5, %v12656_v40  ;;  %vm2224_vm5 = vcmask 195584  }
 0x713   :  { %12675 = vmatprep.subr.bf16.mxu0 %v12674_v39 }
 0x719   :  { %11694 = vmatmul.mubr.msk.f32.vlgmr.msra.gmra.mrb[12].mxu0 %vm368_vm4, %v931_v50 }
 0x71a   :  { %12677 = vmatpush3.bf16.msra.mxu0 %v12674_v39  ;;  %11737 = vmatprep.mubr.msk.f32.mxu0 %vm85_vm1, %v1231_v51 }
 0x71b   :  { %12679 = vmatprep.subr.bf16.mxu0 %v12678_v49 }
 0x71e   :  { %12681 = vmatpush3.bf16.msra.mxu0 %v12678_v49 }
 0x71f   :  { %12683 = vmatprep.subr.bf16.mxu0 %v12682_v54 }
 0x722   :  { %12685 = vmatpush3.bf16.msra.mxu0 %v12682_v54 }
 0x723   :  { %12694 = vmatprep.subr.bf16.mxu0 %v13996_v38 }
 0x725   :  { %11738 = vmatmul.mubr.msk.f32.vlgmr.msra.gmra.mrb[14].mxu0 %vm85_vm1, %v1232_v55 }
 0x726   :  { %11740 = vmatprep.mubr.msk.f32.mxu0 %vm85_vm1, %v1233_v62 }
 0x729   :  { %11741 = vmatmul.mubr.msk.f32.gmra.mrb[16].mxu0 %vm85_vm1, %v1234_v0  ;;  %v1263_v0 = vld [vmem:[#allocation2 + $0x658] sm:$0xff] }
 0x72a   :  { %11762 = vmatprep.mubr.msk.f32.mxu0 %vm13997_vm2, %v13998_v42 }
 0x7dc   :  { %v926_v12 = vpop.f32.mrb[10].mxu0 }
 0x7dd   :  { %v11684_v2 = vpop.f32.mrb[11].mxu0 }
 0x7ec   :  { %v1016_v17 = vpop.f32.mrb[12].mxu0 }
 0x7ed   :  { %v1020_v3 = vmul.f32 0.5, %v1016_v17  ;;  %v11695_v4 = vpop.f32.mrb[13].mxu0 }
 0x7ef   :  { %v1021_v19 = vadd.f32 %v1020_v3, %v14173_v61 }
 0x7f1   :  { %v1022_v5 = vsel %vm456_vm8, %v1021_v19, -inf }
 0x7f2   :  { %1023 = vmax.xlane.f32.xlu1 %v1022_v5 }
 0x7f8   :  { %v11739_v8 = vpop.f32.mrb[14].mxu0 }
 0x7f9   :  { %v14250_v9 = vadd.f32 %v11739_v8, %v10793_v7  ;;  %v1439_v10 = vpop.f32.mrb[15].mxu0  ;;  %v1266_v8 = vld [vmem:[#allocation2 + $0x670] sm:$0xff] }
 0x7fa   :  { %v14252_v11 = vadd.f32 %v10793_v7, %v1439_v10 }
 0x7fc   :  { %v11742_v13 = vpop.f32.mrb[16].mxu0  ;;  %v12687_v14 = vpack.c.bf16 %v14250_v9, %v14252_v11  ;;  %v14258_v16 = vpack.i.bf16 %v14250_v9, %v14252_v11  ;;  %v10791_v11 = vld [vmem:[#allocation2 + $0x5d8] ss:$0 sm:$0xff] }
 0x7fd   :  { %v14260_v18 = vadd.f32 %v11742_v13, %v10793_v7  ;;  %v1449_v61 = vpop.f32.mrb[17].mxu0  ;;  %v10789_v13 = vld [vmem:[#allocation2 + $0x5f8] ss:$0 sm:$0xff] }
 0x7fe   :  { %v14262_v20 = vadd.f32 %v10793_v7, %v1449_v61  ;;  %v1265_v7 = vld [vmem:[#allocation2 + $0x668] sm:$0xff] }
 0x7ff   :  { %v12672_v61 = vpack.c.bf16 %v1266_v8, %v1265_v7 }
 0x800   :  { %v14266_v15 = vpack.i.bf16 %v14260_v18, %v14262_v20  ;;  %v12691_v21 = vpack.c.bf16 %v14260_v18, %v14262_v20 }
 0x803   :  { %13366 = vrot.lane.b32.xlu1 %v14141_v43, %s14006_s15 }
 0x827   :  { %1240 = vadd.xlane.f32.xlu1 %v1239_v23 }
 0x838   :  { %1123 = vrot.lane.b32.xlu1 %v926_v12, %s13994_s23  ;;  %v1264_v12 = vld [vmem:[#allocation2 + $0x660] sm:$0xff] }
 0x839   :  { %v12669_v3 = vpack.c.bf16 %v1264_v12, %v1263_v0 }
 0x87f   :  { %v1024_v45 = vpop.xlane.xlu1 %1023 }
 0x880   :  { %v1025_v24 = vsub.f32 %v1021_v19, %v1024_v45 }
 0x882   :  { %v1026_v25 = vmul.f32 1.442695, %v1025_v24  ;;  %v10785_v24 = vld [vmem:[#allocation2 + $0x540] ss:$0 sm:$0xff] }
 0x883   :  { %v13367_v28 = vpop.permute.xlu1 %13366 }
 0x884   :  { %13626 = vpow2.f32 %v1026_v25  ;;  %v13369_v40 = vunpack.i.h.bf16 %v13367_v28  ;;  %v13368_v41 = vunpack.i.l.bf16 %v13367_v28 }
 0x886   :  { %v12663_v46 = vpack.c.bf16 %v13369_v40, %v13368_v41 }
 0x88e   :  { %v13627_v26 = vpop.eup %13626 }
 0x88f   :  { %v1028_v27 = vsel %vm456_vm8, %v13627_v26, 0.0 }
 0x890   :  { %1029 = vadd.xlane.f32.xlu0 %v1028_v27 }
 0x8a6   :  { %13361 = vrot.lane.b32.xlu0 %v14135_v35, %s14006_s15  ;;  %s14021_s15 = smov 127  }
 0x8b4   :  { %v1241_v29 = vpop.xlane.xlu1 %1240 }
 0x8b5   :  { %v1243_v43 = vmul.f32 0.03125, %v1241_v29 }
 0x8b7   :  { %v1244_v30 = vsub.f32 %v1235_v22, %v1243_v43  ;;  %v10790_v22 = vld [vmem:[#allocation2 + $0x5f0] ss:$0 sm:$0xff]  ;;  %v74_v43 = vshra.s32 %v14166_v57, 2 }
 0x8b8   :  { %v1124_v62 = vpop.permute.xlu1 %1123 }
 0x8b9   :  { %v1245_v31 = vmul.f32 %v1244_v30, %v1244_v30  ;;  %vm76_vm0 = vcmp.eq.s32.totalorder %v74_v43, %v75_v58 }
 0x8bb   :  { %v1246_v32 = vsel %vm1238_vm10, %v1245_v31, 0.0  ;;  %v14330_v31 = vsel %vm76_vm0, 0.0, %v14000_v60 }
 0x8c5   :  { %1247 = vadd.xlane.f32.xlu0 %v1246_v32 }
 0x8db   :  { %1119 = vrot.lane.b32.xlu0 %v14216_v1, %s14007_s16  ;;  %v365_v1 = vld [vmem:[#allocation2 + $0x5a8] sm:$0xff] }
 0x8dc   :  { %v12666_v49 = vpack.c.bf16 %v366_v48, %v365_v1 }
 0x91d   :  { %v1030_v34 = vpop.xlane.xlu0 %1029 }
 0x91e   :  { %13628 = vrcp.f32 %v1030_v34 }
 0x91f   :  { %13630 = vpow2.f32 %v81_v53 }
 0x921   :  { %v13362_v36 = vpop.permute.xlu0 %13361 }
 0x922   :  { %v13364_v37 = vunpack.i.h.bf16 %v13362_v36  ;;  %v13363_v39 = vunpack.i.l.bf16 %v13362_v36 }
 0x924   :  { %v12660_v44 = vpack.c.bf16 %v13364_v37, %v13363_v39 }
 0x926   :  { %12661 = vmatpush3.bf16.msra.mxu1 %v12660_v44 }
 0x927   :  { %12662 = vmatprep.subr.bf16.mxu1 %v13996_v38 }
 0x928   :  { %v13629_v35 = vpop.eup %13628 }
 0x929   :  { %v1032_v47 = vmul.f32 %v13629_v35, %v13627_v26  ;;  %v13631_v54 = vpop.eup %13630 }
 0x92a   :  { %12664 = vmatpush3.bf16.msra.mxu1 %v12663_v46  ;;  %13268 = vpush %v13631_v54 }
 0x92b   :  { %12665 = vmatprep.subr.bf16.mxu1 %v13996_v38 }
 0x92d   :  { %11705 = vmatmul.mubr.msk.f32.vlgmr.msra.gmra.mrb[6].mxu1 %vm480_vm9, %v1032_v47 }
 0x92e   :  { %11711 = vmatprep.mubr.msk.f32.mxu1 %vm13997_vm2, %v13998_v42  ;;  %12667 = vmatpush3.bf16.msra.mxu1 %v12666_v49 }
 0x92f   :  { %12668 = vmatprep.subr.bf16.mxu1 %v13996_v38 }
 0x952   :  { %v1248_v33 = vpop.xlane.xlu0 %1247 }
 0x953   :  { %v1249_v6 = vmul.f32 0.03125, %v1248_v33 }
 0x955   :  { %v1250_v55 = vadd.f32 1e-05, %v1249_v6 }
 0x956   :  { %v1120_v59 = vpop.permute.xlu0 %1119 }
 0x957   :  { %13632 = vrsqrt.f32 %v1250_v55  ;;  %v1130_v17 = vsel %vm368_vm4, %v14214_v63, %v1120_v59 }
 0x958   :  { %v1132_v19 = vsel %vm1131_vm11, %v1130_v17, %v1124_v62 }
 0x95b   :  { %s13269_s19 = spop %13268 }
 0x95c   :  { %v1214_v26 = vstv %s13269_s19 }
 0x961   :  { %v13633_v2 = vpop.eup %13632 }
 0x962   :  { %v1252_v4 = vmul.f32 %v13633_v2, %v1244_v30 }
 0x964   :  { %v1257_v63 = vmul.f32 %v10789_v13, %v1252_v4 }
 0x966   :  { %v1262_v23 = vadd.f32 %v10790_v22, %v1257_v63 }
 0xa00   :  { %v1114_v50 = vpop.f32.mrb[6].mxu1 }
 0xa01   :  { %1127 = vrot.lane.b32.xlu1 %v1114_v50, %s14008_s17  ;;  %v11706_v51 = vpop.f32.mrb[7].mxu1 }
 0xa05   :  { %13376 = vrot.lane.b32.xlu1 %v14266_v15, %s14009_s18 }
 0xa73   :  { %v1128_v5 = vpop.permute.xlu1 %1127 }
 0xa74   :  { %v1134_v10 = vsel %vm1133_vm12, %v1132_v19, %v1128_v5 }
 0xa75   :  { %11712 = vmatmul.mubr.msk.f32.vlgmr.msra.gmra.mrb[8].mxu1 %vm178_vm3, %v1134_v10 }
 0xa76   :  { %12670 = vmatpush3.bf16.msra.mxu1 %v12669_v3  ;;  %11722 = vmatprep.mubr.msk.f32.mxu1 %vm13997_vm2, %v13998_v42 }
 0xa77   :  { %12671 = vmatprep.subr.bf16.mxu1 %v13996_v38  ;;  %v13377_v41 = vpop.permute.xlu1 %13376 }
 0xa78   :  { %v13379_v47 = vunpack.i.h.bf16 %v13377_v41  ;;  %v13378_v1 = vunpack.i.l.bf16 %v13377_v41 }
 0xa7a   :  { %12673 = vmatpush3.bf16.msra.mxu1 %v12672_v61  ;;  %v12698_v49 = vpack.c.bf16 %v13379_v47, %v13378_v1 }
 0xa7b   :  { %12686 = vmatprep.subr.bf16.mxu1 %v13996_v38 }
 0xa7d   :  { %11723 = vmatmul.mubr.msk.f32.vlgmr.msra.gmra.mrb[10].mxu1 %vm480_vm9, %v1262_v23 }
 0xa7e   :  { %11751 = vmatprep.mubr.msk.f32.mxu1 %vm13997_vm2, %v13998_v42 }
 0xa83   :  { %12689 = vmatpush3.bf16.xpose.msk.msra.mxu1 %vm14298_vm13, %v12687_v14 }
 0xa84   :  { %12690 = vmatprep.subr.bf16.mxu1 %v13996_v38 }
 0xa8b   :  { %12693 = vmatpush3.bf16.xpose.msk.msra.mxu1 %vm14298_vm13, %v12691_v21 }
 0xa8c   :  { %12708 = vmatprep.subr.bf16.mxu1 %v13996_v38 }
 0xb48   :  { %v1208_v25 = vpop.f32.mrb[8].mxu1 }
 0xb49   :  { %v1209_v27 = vadd.f32 %v10785_v24, %v1208_v25  ;;  %v11713_v28 = vpop.f32.mrb[9].mxu1 }
 0xb4b   :  { %v14314_v9 = vmul.f32 %v1214_v26, %v1209_v27 }
 0xb4d   :  { %2330 = vst.msk [vmem:[%s15406_s3 + $0x8] sm:$0x3] %vm2329_vm14, %v14314_v9 }
 0xb50   :  { %v1341_v14 = vpop.f32.mrb[10].mxu1 }
 0xb51   :  { %v1342_v18 = vadd.f32 %v10791_v11, %v1341_v14  ;;  %v11724_v20 = vpop.f32.mrb[11].mxu1 }
 0xb53   :  { %v1346_v21 = vrot.slane %v1342_v18, 4 }
 0xb55   :  { %v14320_v29 = vsel %vm1348_vm15, %v1342_v18, %v1346_v21 }
 0xb56   :  { %11752 = vmatmul.mubr.msk.f32.vlgmr.msra.gmra.mrb[12].mxu1 %vm1131_vm11, %v14320_v29 }
 0xb57   :  { %11784 = vmatprep.mubr.msk.f32.mxu1 %vm13997_vm2, %v13998_v42 }
 0xc29   :  { %v1544_v30 = vpop.f32.mrb[12].mxu1 }
 0xc2a   :  { %v1548_v32 = vmul.f32 0.35355338, %v1544_v30  ;;  %v11753_v34 = vpop.f32.mrb[13].mxu1 }
 0xc2c   :  { %v1549_v36 = vadd.f32 %v1548_v32, %v14330_v31 }
 0xc2e   :  { %v1550_v37 = vsel %vm480_vm9, %v1549_v36, -inf }
 0xc2f   :  { %1551 = vmax.xlane.f32.xlu0 %v1550_v37 }
 0xc45   :  { %13371 = vrot.lane.b32.xlu0 %v14258_v16, %s14009_s18 }
 0xc49   :  { %13381 = vrot.lane.b32.xlu0 %v14258_v16, %s14003_s12 }
 0xc4d   :  { %1646 = vrot.lane.b32.xlu0 %v14320_v29, %s14003_s12 }
 0xcbc   :  { %v1552_v58 = vpop.xlane.xlu0 %1551 }
 0xcbd   :  { %v1553_v39 = vsub.f32 %v1549_v36, %v1552_v58 }
 0xcbf   :  { %v1554_v40 = vmul.f32 1.442695, %v1553_v39 }
 0xcc0   :  { %v13372_v44 = vpop.permute.xlu0 %13371 }
 0xcc1   :  { %13634 = vpow2.f32 %v1554_v40  ;;  %v13374_v35 = vunpack.i.h.bf16 %v13372_v44  ;;  %v13373_v46 = vunpack.i.l.bf16 %v13372_v44 }
 0xcc3   :  { %v12695_v48 = vpack.c.bf16 %v13374_v35, %v13373_v46 }
 0xcc4   :  { %v13382_v53 = vpop.permute.xlu0 %13381 }
 0xcc5   :  { %12696 = vmatpush3.bf16.msra.mxu0 %v12695_v48  ;;  %v13384_v54 = vunpack.i.h.bf16 %v13382_v53  ;;  %v13383_v33 = vunpack.i.l.bf16 %v13382_v53 }
 0xcc6   :  { %12697 = vmatprep.subr.bf16.mxu0 %v13996_v38 }
 0xcc7   :  { %v12701_v59 = vpack.c.bf16 %v13384_v54, %v13383_v33 }
 0xcc8   :  { %v1647_v17 = vpop.permute.xlu0 %1646 }
 0xcc9   :  { %12699 = vmatpush3.bf16.msra.mxu0 %v12698_v49 }
 0xcca   :  { %12700 = vmatprep.subr.bf16.mxu0 %v13996_v38 }
 0xccb   :  { %v13635_v50 = vpop.eup %13634 }
 0xccc   :  { %v1556_v51 = vsel %vm480_vm9, %v13635_v50, 0.0 }
 0xccd   :  { %1557 = vadd.xlane.f32.xlu1 %v1556_v51  ;;  %v47_v51 = vld [vmem:[%s15405_s2 + $0x8] sm:$0xff] }
 0xcde   :  { %13386 = vrot.lane.b32.xlu1 %v14266_v15, %s14003_s12 }
 0xd5a   :  { %v1558_v52 = vpop.xlane.xlu1 %1557 }
 0xd5b   :  { %13636 = vrcp.f32 %v1558_v52 }
 0xd5e   :  { %v13387_v62 = vpop.permute.xlu1 %13386 }
 0xd5f   :  { %v13389_v0 = vunpack.i.h.bf16 %v13387_v62  ;;  %v13388_v12 = vunpack.i.l.bf16 %v13387_v62 }
 0xd61   :  { %v12705_v2 = vpack.c.bf16 %v13389_v0, %v13388_v12 }
 0xd65   :  { %v13637_v6 = vpop.eup %13636 }
 0xd66   :  { %v1560_v55 = vmul.f32 %v13637_v6, %v13635_v50  ;;  %v14012_v50 = vmov 0  }
 0xd67   :  { %13430 = vset.pattern.permute.xlu1 %v14012_v50  ;;  %13431 = vset.pattern.permute.xlu0 %v14012_v50 }
 0xd68   :  { %11763 = vmatmul.mubr.msk.f32.vlgmr.msra.gmra.mrb[18].mxu0 %vm480_vm9, %v1560_v55 }
 0xd69   :  { %12703 = vmatpush3.bf16.xpose.msk.msra.mxu0 %vm14298_vm13, %v12701_v59  ;;  %11773 = vmatprep.mubr.msk.f32.mxu0 %vm13997_vm2, %v13998_v42 }
 0xd6a   :  { %12704 = vmatprep.subr.bf16.mxu0 %v13996_v38 }
 0xd71   :  { %12707 = vmatpush3.bf16.xpose.msk.msra.mxu0 %vm14298_vm13, %v12705_v2 }
 0xd72   :  { %12722 = vmatprep.subr.bf16.mxu0 %v13996_v38 }
 0xd78   :  { %11774 = vmatmul.mubr.msk.f32.vlgmr.msra.gmra.mrb[20].mxu0 %vm1131_vm11, %v1647_v17 }
 0xd79   :  { %11806 = vmatprep.mubr.msk.f32.mxu0 %vm13997_vm2, %v13998_v42 }
 0xe3b   :  { %v14357_v3 = vpop.f32.mrb[18].mxu0 }
 0xe3c   :  { %v11764_v4 = vpop.f32.mrb[19].mxu0 }
 0xe3d   :  { %v46_v4 = vld [vmem:[%s15405_s2] sm:$0xff] }
 0xe4b   :  { %v1732_v19 = vpop.f32.mrb[20].mxu0 }
 0xe4c   :  { %v1736_v5 = vmul.f32 0.35355338, %v1732_v19  ;;  %v11775_v7 = vpop.f32.mrb[21].mxu0 }
 0xe4e   :  { %v1737_v8 = vadd.f32 %v1736_v5, %v14330_v31 }
 0xe50   :  { %v1738_v10 = vsel %vm480_vm9, %v1737_v8, -inf }
 0xe51   :  { %1739 = vmax.xlane.f32.xlu1 %v1738_v10 }
 0xe62   :  { %13396 = vrot.lane.b32.xlu1 %v14266_v15, %s14010_s22 }
 0xe66   :  { %13401 = vrot.lane.b32.xlu1 %v14258_v16, %s14001_s10 }
 0xe6a   :  { %1834 = vrot.lane.b32.xlu1 %v14320_v29, %s14001_s10 }
 0xe6e   :  { %13416 = vrot.lane.b32.xlu1 %v14266_v15, %s14011_s24 }
 0xede   :  { %v1740_v13 = vpop.xlane.xlu1 %1739 }
 0xedf   :  { %v1741_v61 = vsub.f32 %v1737_v8, %v1740_v13 }
 0xee1   :  { %v1742_v63 = vmul.f32 1.442695, %v1741_v61 }
 0xee2   :  { %v13397_v25 = vpop.permute.xlu1 %13396 }
 0xee3   :  { %13638 = vpow2.f32 %v1742_v63  ;;  %v13399_v11 = vunpack.i.h.bf16 %v13397_v25  ;;  %v13398_v14 = vunpack.i.l.bf16 %v13397_v25  ;;  %v2345_v25 = vld [vmem:[#allocation2 + $0x8d8] sm:$0xff] }
 0xee5   :  { %v12712_v21 = vpack.c.bf16 %v13399_v11, %v13398_v14 }
 0xee6   :  { %v13402_v43 = vpop.permute.xlu1 %13401 }
 0xee7   :  { %v13404_v32 = vunpack.i.h.bf16 %v13402_v43  ;;  %v13403_v34 = vunpack.i.l.bf16 %v13402_v43 }
 0xee9   :  { %v12715_v36 = vpack.c.bf16 %v13404_v32, %v13403_v34 }
 0xeea   :  { %v1835_v41 = vpop.permute.xlu1 %1834 }
 0xeed   :  { %v13639_v22 = vpop.eup %13638 }
 0xeee   :  { %v1744_v23 = vsel %vm480_vm9, %v13639_v22, 0.0  ;;  %v13417_v33 = vpop.permute.xlu1 %13416 }
 0xeef   :  { %1745 = vadd.xlane.f32.xlu0 %v1744_v23  ;;  %v13419_v62 = vunpack.i.h.bf16 %v13417_v33  ;;  %v13418_v0 = vunpack.i.l.bf16 %v13417_v33 }
 0xf05   :  { %13391 = vrot.lane.b32.xlu0 %v14258_v16, %s14010_s22 }
 0xf09   :  { %13406 = vrot.lane.b32.xlu0 %v14266_v15, %s14001_s10 }
 0xf7c   :  { %v1746_v24 = vpop.xlane.xlu0 %1745 }
 0xf7d   :  { %13640 = vrcp.f32 %v1746_v24  ;;  %v2344_v24 = vld [vmem:[#allocation2 + $0x8d0] sm:$0xff] }
 0xf80   :  { %v13392_v26 = vpop.permute.xlu0 %13391 }
 0xf81   :  { %v13394_v27 = vunpack.i.h.bf16 %v13392_v26  ;;  %v13393_v28 = vunpack.i.l.bf16 %v13392_v26  ;;  %v12748_v26 = vpack.c.bf16 %v2345_v25, %v2344_v24  ;;  %v2468_v24 = vld [vmem:[#allocation2 + $0x780] sm:$0xff] }
 0xf83   :  { %v12709_v18 = vpack.c.bf16 %v13394_v27, %v13393_v28 }
 0xf84   :  { %v13407_v37 = vpop.permute.xlu0 %13406 }
 0xf85   :  { %12710 = vmatpush3.bf16.msra.mxu1 %v12709_v18  ;;  %v13409_v58 = vunpack.i.h.bf16 %v13407_v37  ;;  %v13408_v39 = vunpack.i.l.bf16 %v13407_v37 }
 0xf86   :  { %12711 = vmatprep.subr.bf16.mxu1 %v13996_v38 }
 0xf87   :  { %v13641_v20 = vpop.eup %13640  ;;  %v12719_v40 = vpack.c.bf16 %v13409_v58, %v13408_v39  ;;  %v2343_v58 = vld [vmem:[#allocation2 + $0x8c8] sm:$0xff] }
 0xf88   :  { %v1748_v30 = vmul.f32 %v13641_v20, %v13639_v22 }
 0xf89   :  { %12713 = vmatpush3.bf16.msra.mxu1 %v12712_v21 }
 0xf8a   :  { %12714 = vmatprep.subr.bf16.mxu1 %v13996_v38 }
 0xf8c   :  { %11785 = vmatmul.mubr.msk.f32.vlgmr.msra.gmra.mrb[14].mxu1 %vm480_vm9, %v1748_v30 }
 0xf8d   :  { %11795 = vmatprep.mubr.msk.f32.mxu1 %vm13997_vm2, %v13998_v42 }
 0xf92   :  { %12717 = vmatpush3.bf16.xpose.msk.msra.mxu1 %vm14298_vm13, %v12715_v36 }
 0xf93   :  { %12718 = vmatprep.subr.bf16.mxu1 %v13996_v38 }
 0xf9a   :  { %12721 = vmatpush3.bf16.xpose.msk.msra.mxu1 %vm14298_vm13, %v12719_v40 }
 0xf9b   :  { %12736 = vmatprep.subr.bf16.mxu1 %v13996_v38 }
 0xfa1   :  { %11796 = vmatmul.mubr.msk.f32.vlgmr.msra.gmra.mrb[16].mxu1 %vm1131_vm11, %v1835_v41 }
 0xfa2   :  { %11828 = vmatprep.mubr.msk.f32.mxu1 %vm13997_vm2, %v13998_v42 }
0x105f   :  { %v14388_v44 = vpop.f32.mrb[14].mxu1 }
0x1060   :  { %v11786_v35 = vpop.f32.mrb[15].mxu1 }
0x1074   :  { %v1920_v46 = vpop.f32.mrb[16].mxu1 }
0x1075   :  { %v1924_v47 = vmul.f32 0.35355338, %v1920_v46  ;;  %v11797_v1 = vpop.f32.mrb[17].mxu1 }
0x1077   :  { %v1925_v48 = vadd.f32 %v1924_v47, %v14330_v31 }
0x1079   :  { %v1926_v49 = vsel %vm480_vm9, %v1925_v48, -inf }
0x107a   :  { %1927 = vmax.xlane.f32.xlu0 %v1926_v49 }
0x1090   :  { %13411 = vrot.lane.b32.xlu0 %v14258_v16, %s14011_s24 }
0x1094   :  { %13421 = vrot.lane.b32.xlu0 %v14258_v16, %s14004_s13 }
0x1098   :  { %2022 = vrot.lane.b32.xlu0 %v14320_v29, %s14004_s13  ;;  %v12726_v29 = vpack.c.bf16 %v13419_v62, %v13418_v0 }
0x109c   :  { %2335 = vperm.xlu0 %13431, %v47_v51  }
0x1107   :  { %v1928_v52 = vpop.xlane.xlu0 %1927 }
0x1108   :  { %v1929_v53 = vsub.f32 %v1925_v48, %v1928_v52 }
0x110a   :  { %v1930_v54 = vmul.f32 1.442695, %v1929_v53 }
0x110b   :  { %v13412_v6 = vpop.permute.xlu0 %13411 }
0x110c   :  { %13642 = vpow2.f32 %v1930_v54  ;;  %v13414_v55 = vunpack.i.h.bf16 %v13412_v6  ;;  %v13413_v59 = vunpack.i.l.bf16 %v13412_v6 }
0x110e   :  { %v12723_v12 = vpack.c.bf16 %v13414_v55, %v13413_v59 }
0x110f   :  { %v13422_v5 = vpop.permute.xlu0 %13421 }
0x1110   :  { %12724 = vmatpush3.bf16.msra.mxu0 %v12723_v12  ;;  %v13424_v7 = vunpack.i.h.bf16 %v13422_v5  ;;  %v13423_v8 = vunpack.i.l.bf16 %v13422_v5 }
0x1111   :  { %12725 = vmatprep.subr.bf16.mxu0 %v13996_v38 }
0x1112   :  { %v12729_v61 = vpack.c.bf16 %v13424_v7, %v13423_v8  ;;  %v1458_v8 = vld [vmem:[#allocation2 + $0x638] sm:$0xff] }
0x1113   :  { %v2023_v27 = vpop.permute.xlu0 %2022 }
0x1114   :  { %12727 = vmatpush3.bf16.msra.mxu0 %v12726_v29 }
0x1115   :  { %12728 = vmatprep.subr.bf16.mxu0 %v13996_v38 }
0x1116   :  { %v13643_v2 = vpop.eup %13642 }
0x1117   :  { %v1932_v17 = vsel %vm480_vm9, %v13643_v2, 0.0 }
0x1118   :  { %1933 = vadd.xlane.f32.xlu1 %v1932_v17 }
0x111b   :  { %v2336_v14 = vpop.permute.xlu0 %2335 }
0x111c   :  { %vm2338_vm4 = vcmp.eq.s32.totalorder %v14164_v56, %v2336_v14 }
0x111d   :  { %v10827_v20 = vsel %vm2338_vm4, 1.0, %v13998_v42 }
0x1129   :  { %13426 = vrot.lane.b32.xlu1 %v14266_v15, %s14004_s13 }
0x112d   :  { %2332 = vperm.xlu1 %13430, %v46_v4  }
0x11a5   :  { %v1934_v19 = vpop.xlane.xlu1 %1933 }
0x11a6   :  { %13644 = vrcp.f32 %v1934_v19 }
0x11a9   :  { %v13427_v63 = vpop.permute.xlu1 %13426 }
0x11aa   :  { %v13429_v22 = vunpack.i.h.bf16 %v13427_v63  ;;  %v13428_v23 = vunpack.i.l.bf16 %v13427_v63  ;;  %v1461_v63 = vld [vmem:[#allocation2 + $0x650] sm:$0xff] }
0x11ac   :  { %v12733_v28 = vpack.c.bf16 %v13429_v22, %v13428_v23  ;;  %v2467_v23 = vld [vmem:[#allocation2 + $0x778] sm:$0xff] }
0x11ad   :  { %v2333_v11 = vpop.permute.xlu1 %2332  ;;  %v12752_v25 = vpack.c.bf16 %v2468_v24, %v2467_v23 }
0x11ae   :  { %vm2337_vm1 = vcmp.eq.s32.totalorder %v14164_v56, %v2333_v11 }
0x11af   :  { %v10826_v18 = vsel %vm2337_vm1, 1.0, %v13998_v42 }
0x11b0   :  { %v13645_v10 = vpop.eup %13644 }
0x11b1   :  { %v1936_v13 = vmul.f32 %v13645_v10, %v13643_v2  ;;  %v1459_v10 = vld [vmem:[#allocation2 + $0x640] sm:$0xff] }
0x11b3   :  { %11807 = vmatmul.mubr.msk.f32.vlgmr.msra.gmra.mrb[22].mxu0 %vm480_vm9, %v1936_v13  ;;  %v1460_v13 = vld [vmem:[#allocation2 + $0x648] sm:$0xff] }
0x11b4   :  { %12731 = vmatpush3.bf16.xpose.msk.msra.mxu0 %vm14298_vm13, %v12729_v61  ;;  %11817 = vmatprep.mubr.msk.f32.mxu0 %vm13997_vm2, %v13998_v42  ;;  %v12743_v61 = vpack.c.bf16 %v1459_v10, %v1458_v8  ;;  %v12746_v22 = vpack.c.bf16 %v1461_v63, %v1460_v13  ;;  %v57_v10 = vshra.s32 %v14164_v56, 3  ;;  %v60_v13 = vand.u32 7, %v14164_v56 }
0x11b5   :  { %12732 = vmatprep.subr.bf16.mxu0 %v13996_v38  ;;  %v55_v63 = vshra.s32 %v14166_v57, 3 }
0x11b7   :  { %vm58_vm10 = vcmp.eq.s32.totalorder %v55_v63, %v57_v10 }
0x11bc   :  { %12735 = vmatpush3.bf16.xpose.msk.msra.mxu0 %vm14298_vm13, %v12733_v28 }
0x11bd   :  { %12749 = vmatprep.subr.bf16.mxu0 %v12748_v26 }
0x11c3   :  { %11818 = vmatmul.mubr.msk.f32.vlgmr.msra.gmra.mrb[24].mxu0 %vm1131_vm11, %v2023_v27 }
0x11c4   :  { %12751 = vmatpush3.bf16.msra.mxu0 %v12748_v26  ;;  %11846 = vmatprep.mubr.msk.f32.mxu0 %vm178_vm3, %v10826_v18 }
0x11c7   :  { %11847 = vmatmul.mubr.msk.f32.vlgmr.msra.gmra.mrb[26].mxu0 %vm178_vm3, %v10827_v20 }
0x1286   :  { %v2018_v21 = vpop.f32.mrb[22].mxu0 }
0x1287   :  { %v11808_v43 = vpop.f32.mrb[23].mxu0 }
0x1296   :  { %v2108_v30 = vpop.f32.mrb[24].mxu0 }
0x1297   :  { %v2112_v32 = vmul.f32 0.35355338, %v2108_v30  ;;  %v11819_v34 = vpop.f32.mrb[25].mxu0 }
0x1299   :  { %v2113_v36 = vadd.f32 %v2112_v32, %v14330_v31  ;;  %v10830_v32 = vld [vmem:[#allocation2 + $0x6a0] ss:$0 sm:$0xff] }
0x129a   :  { %v11848_v37 = vpop.f32.mrb[26].mxu0 }
0x129b   :  { %v2114_v39 = vsel %vm480_vm9, %v2113_v36, -inf  ;;  %v14426_v40 = vadd.f32 %v11848_v37, %v2343_v58  ;;  %v2418_v41 = vpop.f32.mrb[27].mxu0 }
0x129c   :  { %2115 = vmax.xlane.f32.xlu1 %v2114_v39  ;;  %v14430_v35 = vadd.f32 %v2418_v41, %v2343_v58  ;;  %v2469_v39 = vld [vmem:[#allocation2 + $0x788] sm:$0xff]  ;;  %v2470_v41 = vld [vmem:[#allocation2 + $0x790] sm:$0xff] }
0x129d   :  { %v2432_v53 = vsel %vm480_vm9, %v14426_v40, 0.0 }
0x129e   :  { %v2429_v46 = vsel %vm480_vm9, %v14430_v35, 0.0 }
0x12ad   :  { %13438 = vrot.lane.b32.xlu1 %v14266_v15, %s14013_s29 }
0x12d1   :  { %2430 = vadd.xlane.f32.xlu1 %v2429_v46  ;;  %v10831_v46 = vld [vmem:[#allocation2 + $0x698] ss:$0 sm:$0xff] }
0x1329   :  { %v2116_v47 = vpop.xlane.xlu1 %2115 }
0x132a   :  { %v2117_v31 = vsub.f32 %v2113_v36, %v2116_v47 }
0x132c   :  { %v2118_v1 = vmul.f32 1.442695, %v2117_v31 }
0x132d   :  { %v13439_v50 = vpop.permute.xlu1 %13438 }
0x132e   :  { %13646 = vpow2.f32 %v2118_v1  ;;  %v13441_v62 = vunpack.i.h.bf16 %v13439_v50  ;;  %v13440_v0 = vunpack.i.l.bf16 %v13439_v50 }
0x1330   :  { %v12740_v2 = vpack.c.bf16 %v13441_v62, %v13440_v0 }
0x1338   :  { %v13647_v48 = vpop.eup %13646 }
0x1339   :  { %v2120_v49 = vsel %vm480_vm9, %v13647_v48, 0.0 }
0x133a   :  { %2121 = vadd.xlane.f32.xlu0 %v2120_v49  ;;  %v12756_v49 = vpack.c.bf16 %v2470_v41, %v2469_v39 }
0x1350   :  { %13433 = vrot.lane.b32.xlu0 %v14258_v16, %s14013_s29 }
0x135e   :  { %v2431_v51 = vpop.xlane.xlu1 %2430 }
0x135f   :  { %v2435_v15 = vmul.f32 0.03125, %v2431_v51 }
0x1361   :  { %v2437_v52 = vsub.f32 %v14430_v35, %v2435_v15 }
0x1363   :  { %v2439_v54 = vmul.f32 %v2437_v52, %v2437_v52 }
0x1365   :  { %v2441_v33 = vsel %vm480_vm9, %v2439_v54, 0.0  ;;  %v10832_v54 = vld [vmem:[#allocation2 + $0x690] ss:$0 sm:$0xff] }
0x136f   :  { %2433 = vadd.xlane.f32.xlu0 %v2432_v53 }
0x1373   :  { %2442 = vadd.xlane.f32.xlu0 %v2441_v33 }
0x1389   :  { %2211 = vrot.lane.b32.xlu0 %v14388_v44, %s13994_s23 }
0x13c7   :  { %v2122_v6 = vpop.xlane.xlu0 %2121 }
0x13c8   :  { %13648 = vrcp.f32 %v2122_v6 }
0x13cb   :  { %v13434_v55 = vpop.permute.xlu0 %13433 }
0x13cc   :  { %v13436_v16 = vunpack.i.h.bf16 %v13434_v55  ;;  %v13435_v59 = vunpack.i.l.bf16 %v13434_v55 }
0x13ce   :  { %v12737_v12 = vpack.c.bf16 %v13436_v16, %v13435_v59 }
0x13d0   :  { %12738 = vmatpush3.bf16.msra.mxu1 %v12737_v12 }
0x13d1   :  { %12739 = vmatprep.subr.bf16.mxu1 %v13996_v38 }
0x13d2   :  { %v13649_v29 = vpop.eup %13648 }
0x13d3   :  { %v2124_v17 = vmul.f32 %v13649_v29, %v13647_v48 }
0x13d4   :  { %12741 = vmatpush3.bf16.msra.mxu1 %v12740_v2 }
0x13d5   :  { %12742 = vmatprep.subr.bf16.mxu1 %v13996_v38 }
0x13d7   :  { %11829 = vmatmul.mubr.msk.f32.vlgmr.msra.gmra.mrb[18].mxu1 %vm480_vm9, %v2124_v17 }
0x13d8   :  { %11839 = vmatprep.mubr.msk.f32.mxu1 %vm13997_vm2, %v13998_v42  ;;  %12744 = vmatpush3.bf16.msra.mxu1 %v12743_v61 }
0x13d9   :  { %12745 = vmatprep.subr.bf16.mxu1 %v13996_v38 }
0x13dc   :  { %12747 = vmatpush3.bf16.msra.mxu1 %v12746_v22  ;;  %v61_v22 = vand.u32 7, %v14166_v57 }
0x13dd   :  { %12753 = vmatprep.subr.bf16.mxu1 %v12752_v25 }
0x13de   :  { %vm63_vm12 = vcmp.le.s32.totalorder %v60_v13, %v61_v22 }
0x13df   :  { %vm65_vm15 = vmand %vm58_vm10, %vm63_vm12 }
0x13fc   :  { %v2434_v44 = vpop.xlane.xlu0 %2433 }
0x13fd   :  { %v2436_v4 = vmul.f32 0.03125, %v2434_v44 }
0x13ff   :  { %v2438_v19 = vsub.f32 %v14426_v40, %v2436_v4 }
0x1400   :  { %v2443_v28 = vpop.xlane.xlu0 %2442 }
0x1401   :  { %v2440_v5 = vmul.f32 %v2438_v19, %v2438_v19  ;;  %v2447_v11 = vmul.f32 0.03125, %v2443_v28 }
0x1403   :  { %v2444_v7 = vsel %vm480_vm9, %v2440_v5, 0.0  ;;  %v2449_v14 = vadd.f32 1e-05, %v2447_v11 }
0x1404   :  { %2445 = vadd.xlane.f32.xlu1 %v2444_v7  ;;  %v2212_v34 = vpop.permute.xlu0 %2211  ;;  %v14493_v7 = vadd.s32 8, %v14166_v57 }
0x1405   :  { %13650 = vrsqrt.f32 %v2449_v14  ;;  %v2222_v47 = vsel %vm1131_vm11, %v14357_v3, %v2212_v34 }
0x1406   :  { %v56_v8 = vshra.s32 %v14493_v7, 3  ;;  %v62_v61 = vand.u32 7, %v14493_v7 }
0x1408   :  { %vm59_vm7 = vcmp.eq.s32.totalorder %v56_v8, %v57_v10  ;;  %vm64_vm8 = vcmp.le.s32.totalorder %v60_v13, %v62_v61 }
0x1409   :  { %vm66_vm14 = vmand %vm59_vm7, %vm64_vm8  ;;  %vm10745_vm7 = vcmask 1024  }
0x140a   :  { %v14506_v23 = vsel %vm66_vm14, 0.0, %v14000_v60 }
0x140f   :  { %v13651_v43 = vpop.eup %13650 }
0x1410   :  { %v2453_v30 = vmul.f32 %v13651_v43, %v2437_v52 }
0x1412   :  { %v2459_v58 = vmul.f32 %v10830_v32, %v2453_v30 }
0x1414   :  { %v2465_v51 = vadd.f32 %v10831_v46, %v2459_v58 }
0x1415   :  { %2215 = vrot.lane.b32.xlu1 %v2018_v21, %s14014_s30 }
0x1491   :  { %v2446_v18 = vpop.xlane.xlu1 %2445 }
0x1492   :  { %v2448_v20 = vmul.f32 0.03125, %v2446_v18 }
0x1494   :  { %v2450_v21 = vadd.f32 1e-05, %v2448_v20 }
0x1495   :  { %v2216_v36 = vpop.permute.xlu1 %2215 }
0x1496   :  { %13652 = vrsqrt.f32 %v2450_v21  ;;  %v2223_v31 = vsel %vm178_vm3, %v2222_v47, %v2216_v36 }
0x14a0   :  { %v13653_v37 = vpop.eup %13652 }
0x14a1   :  { %v2454_v48 = vmul.f32 %v13653_v37, %v2438_v19 }
0x14a3   :  { %v2460_v15 = vmul.f32 %v10830_v32, %v2454_v48 }
0x14a5   :  { %v2466_v52 = vadd.f32 %v10831_v46, %v2460_v15 }
0x14aa   :  { %v2206_v26 = vpop.f32.mrb[18].mxu1 }
0x14ab   :  { %2219 = vrot.lane.b32.xlu1 %v2206_v26, %s14015_s4  ;;  %v11830_v27 = vpop.f32.mrb[19].mxu1 }
0x151d   :  { %v2220_v1 = vpop.permute.xlu1 %2219 }
0x151e   :  { %v2225_v50 = vsel %vm2224_vm5, %v2223_v31, %v2220_v1 }
0x151f   :  { %11840 = vmatmul.mubr.msk.f32.vlgmr.msra.gmra.mrb[20].mxu1 %vm480_vm9, %v2225_v50 }
0x1520   :  { %12755 = vmatpush3.bf16.msra.mxu1 %v12752_v25  ;;  %11857 = vmatprep.mubr.msk.f32.mxu1 %vm480_vm9, %v2465_v51  ;;  %v14509_v25 = vsel %vm65_vm15, 0.0, %v14000_v60 }
0x1521   :  { %12757 = vmatprep.subr.bf16.mxu1 %v12756_v49 }
0x1524   :  { %12759 = vmatpush3.bf16.msra.mxu1 %v12756_v49 }
0x1527   :  { %11858 = vmatmul.mubr.msk.f32.vlgmr.msra.gmra.mrb[22].mxu1 %vm480_vm9, %v2466_v52 }
0x15f2   :  { %v14460_v3 = vpop.f32.mrb[20].mxu1 }
0x15f3   :  { %v11841_v53 = vpop.f32.mrb[21].mxu1 }
0x15fa   :  { %v11859_v33 = vpop.f32.mrb[22].mxu1 }
0x15fb   :  { %v14462_v6 = vadd.f32 %v11859_v33, %v10832_v54  ;;  %v2548_v55 = vpop.f32.mrb[23].mxu1 }
0x15fc   :  { %v14464_v16 = vadd.f32 %v10832_v54, %v2548_v55 }
0x15fe   :  { %11864 = vmatprep.mubr.msk.f32.mxu0 %vm1131_vm11, %v14464_v16  ;;  %v14470_v59 = vpack.i.bf16 %v14462_v6, %v14464_v16 }
0x1600   :  { %13448 = vrot.lane.b32.xlu0 %v14470_v59, %s14010_s22  ;;  %13443 = vrot.lane.b32.xlu1 %v14470_v59, %s14009_s18 }
0x1604   :  { %2766 = vrot.lane.b32.xlu0 %v14462_v6, %s14003_s12  ;;  %2764 = vrot.lane.b32.xlu1 %v14464_v16, %s14003_s12 }
0x1672   :  { %v13449_v62 = vpop.permute.xlu0 %13448  ;;  %v13444_v0 = vpop.permute.xlu1 %13443 }
0x1673   :  { %v13451_v12 = vunpack.i.h.bf16 %v13449_v62  ;;  %v13450_v29 = vunpack.i.l.bf16 %v13449_v62  ;;  %v13446_v2 = vunpack.i.h.bf16 %v13444_v0  ;;  %v13445_v17 = vunpack.i.l.bf16 %v13444_v0 }
0x1675   :  { %v12760_v44 = vpack.c.bf16 %v13446_v2, %v13445_v17  ;;  %v12770_v4 = vpack.c.bf16 %v13451_v12, %v13450_v29 }
0x1676   :  { %v2765_v19 = vpop.permute.xlu1 %2764  ;;  %v2767_v5 = vpop.permute.xlu0 %2766 }
0x1677   :  { %12762 = vmatprep.subr.msk.bf16.mxu0 %vm14298_vm13, %v12760_v44 }
0x1678   :  { %12765 = vmatpush3.bf16.xpose.msk.msra.mxu0 %vm14298_vm13, %v12760_v44 }
0x1679   :  { %12772 = vmatprep.subr.msk.bf16.mxu0 %vm14298_vm13, %v12770_v4 }
0x167f   :  { %11865 = vmatmul.mubr.msk.f32.vlgmr.msra.gmra.mrb[28].mxu0 %vm1131_vm11, %v14462_v6 }
0x1680   :  { %12775 = vmatpush3.bf16.xpose.msk.msra.mxu0 %vm14298_vm13, %v12770_v4  ;;  %11878 = vmatprep.mubr.msk.f32.mxu0 %vm1131_vm11, %v2765_v19 }
0x1687   :  { %11879 = vmatmul.mubr.msk.f32.vlgmr.msra.gmra.mrb[30].mxu0 %vm1131_vm11, %v2767_v5 }
0x1752   :  { %v11866_v24 = vpop.f32.mrb[28].mxu0 }
0x1753   :  { %v2652_v26 = vmul.f32 0.35355338, %v11866_v24  ;;  %v2642_v27 = vpop.f32.mrb[29].mxu0 }
0x1754   :  { %v2651_v28 = vmul.f32 0.35355338, %v2642_v27 }
0x1755   :  { %v2654_v11 = vadd.f32 %v2652_v26, %v14506_v23 }
0x1756   :  { %v2653_v14 = vadd.f32 %v2651_v28, %v14509_v25 }
0x1757   :  { %v2658_v18 = vsel %vm178_vm3, %v2654_v11, -inf }
0x1758   :  { %2659 = vmax.xlane.f32.xlu0 %v2658_v18  ;;  %v2655_v20 = vsel %vm178_vm3, %v2653_v14, -inf }
0x1759   :  { %2656 = vmax.xlane.f32.xlu1 %v2655_v20 }
0x175a   :  { %v11880_v21 = vpop.f32.mrb[30].mxu0 }
0x175b   :  { %v2846_v43 = vpop.f32.mrb[31].mxu0  ;;  %v2856_v30 = vmul.f32 0.35355338, %v11880_v21 }
0x175c   :  { %v2855_v32 = vmul.f32 0.35355338, %v2846_v43 }
0x175d   :  { %v2858_v37 = vadd.f32 %v2856_v30, %v14506_v23 }
0x175e   :  { %v2857_v34 = vadd.f32 %v2855_v32, %v14509_v25 }
0x175f   :  { %v2862_v58 = vsel %vm178_vm3, %v2858_v37, -inf }
0x1760   :  { %v2859_v36 = vsel %vm178_vm3, %v2857_v34, -inf }
0x1761   :  { %2860 = vmax.xlane.f32.xlu0 %v2859_v36 }
0x1765   :  { %2863 = vmax.xlane.f32.xlu0 %v2862_v58 }
0x176a   :  { %13453 = vrot.lane.b32.xlu1 %v14470_v59, %s14016_s5 }
0x17e5   :  { %v2660_v39 = vpop.xlane.xlu0 %2659 }
0x17e6   :  { %v2662_v41 = vsub.f32 %v2654_v11, %v2660_v39  ;;  %v2657_v46 = vpop.xlane.xlu1 %2656 }
0x17e7   :  { %v2661_v47 = vsub.f32 %v2653_v14, %v2657_v46 }
0x17e8   :  { %v2665_v31 = vmul.f32 1.442695, %v2662_v41 }
0x17e9   :  { %v2663_v1 = vmul.f32 1.442695, %v2661_v47 }
0x17ea   :  { %13654 = vpow2.f32 %v2665_v31  ;;  %v13454_v48 = vpop.permute.xlu1 %13453 }
0x17eb   :  { %13656 = vpow2.f32 %v2663_v1  ;;  %v13456_v49 = vunpack.i.h.bf16 %v13454_v48  ;;  %v13455_v50 = vunpack.i.l.bf16 %v13454_v48 }
0x17ed   :  { %v12766_v51 = vpack.c.bf16 %v13456_v49, %v13455_v50 }
0x17ee   :  { %v2861_v15 = vpop.xlane.xlu0 %2860 }
0x17ef   :  { %12767 = vmatprep.subr.bf16.mxu1 %v12766_v51  ;;  %v2865_v2 = vsub.f32 %v2857_v34, %v2861_v15 }
0x17f0   :  { %12769 = vmatpush3.bf16.msra.mxu1 %v12766_v51 }
0x17f1   :  { %v2867_v17 = vmul.f32 1.442695, %v2865_v2 }
0x17f2   :  { %v2864_v52 = vpop.xlane.xlu0 %2863 }
0x17f3   :  { %v2866_v53 = vsub.f32 %v2858_v37, %v2864_v52 }
0x17f4   :  { %v13655_v54 = vpop.eup %13654 }
0x17f5   :  { %v13657_v33 = vpop.eup %13656  ;;  %v2869_v55 = vmul.f32 1.442695, %v2866_v53  ;;  %v2670_v62 = vsel %vm178_vm3, %v13655_v54, 0.0 }
0x17f6   :  { %2671 = vadd.xlane.f32.xlu0 %v2670_v62  ;;  %v2667_v0 = vsel %vm178_vm3, %v13657_v33, 0.0 }
0x17f7   :  { %13658 = vpow2.f32 %v2869_v55  ;;  %2668 = vadd.xlane.f32.xlu1 %v2667_v0 }
0x17f8   :  { %13660 = vpow2.f32 %v2867_v17 }
0x1801   :  { %v13659_v12 = vpop.eup %13658 }
0x1802   :  { %v2874_v29 = vsel %vm178_vm3, %v13659_v12, 0.0  ;;  %v13661_v44 = vpop.eup %13660 }
0x1803   :  { %2875 = vadd.xlane.f32.xlu0 %v2874_v29  ;;  %v2871_v4 = vsel %vm178_vm3, %v13661_v44, 0.0 }
0x1808   :  { %13463 = vrot.lane.b32.xlu1 %v14470_v59, %s14011_s24 }
0x180c   :  { %2968 = vrot.lane.b32.xlu1 %v14464_v16, %s14001_s10 }
0x1819   :  { %13458 = vrot.lane.b32.xlu0 %v14470_v59, %s14017_s6 }
0x1830   :  { %2872 = vadd.xlane.f32.xlu1 %v2871_v4 }
0x1841   :  { %2970 = vrot.lane.b32.xlu1 %v14462_v6, %s14001_s10 }
0x1883   :  { %v2672_v19 = vpop.xlane.xlu0 %2671 }
0x1884   :  { %13662 = vrcp.f32 %v2672_v19  ;;  %v2669_v5 = vpop.xlane.xlu1 %2668 }
0x1885   :  { %13664 = vrcp.f32 %v2669_v5 }
0x1888   :  { %v13464_v26 = vpop.permute.xlu1 %13463 }
0x1889   :  { %v13466_v28 = vunpack.i.h.bf16 %v13464_v26  ;;  %v13465_v11 = vunpack.i.l.bf16 %v13464_v26 }
0x188b   :  { %v12780_v21 = vpack.c.bf16 %v13466_v28, %v13465_v11 }
0x188c   :  { %v2969_v43 = vpop.permute.xlu1 %2968 }
0x188e   :  { %v13663_v10 = vpop.eup %13662 }
0x188f   :  { %v13665_v13 = vpop.eup %13664  ;;  %v2676_v24 = vmul.f32 %v13663_v10, %v13655_v54 }
0x1890   :  { %v2876_v61 = vpop.xlane.xlu0 %2875  ;;  %v2675_v22 = vmul.f32 %v13665_v13, %v13657_v33 }
0x1891   :  { %13666 = vrcp.f32 %v2876_v61 }
0x1892   :  { %11871 = vmatprep.mubr.msk.f32.mxu1 %vm178_vm3, %v2675_v22 }
0x1893   :  { %11872 = vmatmul.mubr.msk.f32.vlgmr.msra.gmra.mrb[24].mxu1 %vm178_vm3, %v2676_v24 }
0x1894   :  { %v13459_v27 = vpop.permute.xlu0 %13458 }
0x1895   :  { %v13461_v14 = vunpack.i.h.bf16 %v13459_v27  ;;  %v13460_v18 = vunpack.i.l.bf16 %v13459_v27 }
0x1897   :  { %v12776_v20 = vpack.c.bf16 %v13461_v14, %v13460_v18 }
0x1899   :  { %12777 = vmatprep.subr.bf16.mxu1 %v12776_v20 }
0x189a   :  { %12779 = vmatpush3.bf16.msra.mxu1 %v12776_v20 }
0x189b   :  { %12782 = vmatprep.subr.msk.bf16.mxu1 %vm14298_vm13, %v12780_v21  ;;  %v13667_v32 = vpop.eup %13666 }
0x189c   :  { %v2880_v37 = vmul.f32 %v13667_v32, %v13659_v12 }
0x18bd   :  { %v2873_v30 = vpop.xlane.xlu1 %2872 }
0x18be   :  { %13668 = vrcp.f32 %v2873_v30 }
0x18c1   :  { %v2971_v58 = vpop.permute.xlu1 %2970 }
0x18c8   :  { %v13669_v34 = vpop.eup %13668 }
0x18c9   :  { %v2879_v36 = vmul.f32 %v13669_v34, %v13661_v44 }
0x18cb   :  { %11885 = vmatprep.mubr.msk.f32.mxu1 %vm178_vm3, %v2879_v36 }
0x18cc   :  { %11886 = vmatmul.mubr.msk.f32.vlgmr.msra.gmra.mrb[26].mxu1 %vm178_vm3, %v2880_v37 }
0x18cd   :  { %12785 = vmatpush3.bf16.xpose.msk.msra.mxu1 %vm14298_vm13, %v12780_v21  ;;  %11892 = vmatprep.mubr.msk.f32.mxu1 %vm1131_vm11, %v2969_v43 }
0x18d4   :  { %11893 = vmatmul.mubr.msk.f32.vlgmr.msra.gmra.mrb[28].mxu1 %vm1131_vm11, %v2971_v58 }
0x1966   :  { %v14543_v39 = vpop.f32.mrb[24].mxu1 }
0x1967   :  { %v14545_v41 = vpop.f32.mrb[25].mxu1 }
0x199f   :  { %v14547_v46 = vpop.f32.mrb[26].mxu1 }
0x19a0   :  { %v14549_v47 = vpop.f32.mrb[27].mxu1 }
0x19a7   :  { %v11894_v31 = vpop.f32.mrb[28].mxu1 }
0x19a8   :  { %v3060_v1 = vmul.f32 0.35355338, %v11894_v31  ;;  %v3050_v48 = vpop.f32.mrb[29].mxu1 }
0x19a9   :  { %v3059_v49 = vmul.f32 0.35355338, %v3050_v48 }
0x19aa   :  { %v3062_v50 = vadd.f32 %v3060_v1, %v14506_v23 }
0x19ab   :  { %v3061_v51 = vadd.f32 %v3059_v49, %v14509_v25 }
0x19ac   :  { %v3066_v15 = vsel %vm178_vm3, %v3062_v50, -inf }
0x19ad   :  { %3067 = vmax.xlane.f32.xlu1 %v3066_v15  ;;  %v3063_v52 = vsel %vm178_vm3, %v3061_v51, -inf }
0x19ae   :  { %3064 = vmax.xlane.f32.xlu0 %v3063_v52 }
0x19be   :  { %13473 = vrot.lane.b32.xlu1 %v14470_v59, %s14013_s29 }
0x19c2   :  { %3172 = vrot.lane.b32.xlu1 %v14464_v16, %s14004_s13 }
0x19c6   :  { %3174 = vrot.lane.b32.xlu1 %v14462_v6, %s14004_s13 }
0x1a3a   :  { %v3068_v53 = vpop.xlane.xlu1 %3067 }
0x1a3b   :  { %v3070_v54 = vsub.f32 %v3062_v50, %v3068_v53  ;;  %v3065_v33 = vpop.xlane.xlu0 %3064 }
0x1a3c   :  { %v3069_v55 = vsub.f32 %v3061_v51, %v3065_v33 }
0x1a3d   :  { %v3073_v62 = vmul.f32 1.442695, %v3070_v54 }
0x1a3e   :  { %v3071_v0 = vmul.f32 1.442695, %v3069_v55  ;;  %v13474_v44 = vpop.permute.xlu1 %13473 }
0x1a3f   :  { %13670 = vpow2.f32 %v3073_v62  ;;  %v13476_v19 = vunpack.i.h.bf16 %v13474_v44  ;;  %v13475_v5 = vunpack.i.l.bf16 %v13474_v44 }
0x1a40   :  { %13672 = vpow2.f32 %v3071_v0 }
0x1a41   :  { %v12790_v22 = vpack.c.bf16 %v13476_v19, %v13475_v5 }
0x1a42   :  { %v3173_v11 = vpop.permute.xlu1 %3172 }
0x1a46   :  { %v3175_v14 = vpop.permute.xlu1 %3174 }
0x1a49   :  { %v13671_v12 = vpop.eup %13670 }
0x1a4a   :  { %v3078_v29 = vsel %vm178_vm3, %v13671_v12, 0.0  ;;  %v13673_v2 = vpop.eup %13672 }
0x1a4b   :  { %3079 = vadd.xlane.f32.xlu0 %v3078_v29  ;;  %v3075_v17 = vsel %vm178_vm3, %v13673_v2, 0.0 }
0x1a4f   :  { %3076 = vadd.xlane.f32.xlu0 %v3075_v17 }
0x1a65   :  { %13468 = vrot.lane.b32.xlu0 %v14470_v59, %s14018_s7 }
0x1ad8   :  { %v3080_v6 = vpop.xlane.xlu0 %3079 }
0x1ad9   :  { %13674 = vrcp.f32 %v3080_v6  ;;  %v2558_v6 = vld [vmem:[#allocation2 + $0x760] sm:$0xff] }
0x1adc   :  { %v3077_v16 = vpop.xlane.xlu0 %3076 }
0x1add   :  { %13676 = vrcp.f32 %v3077_v16  ;;  %v2559_v16 = vld [vmem:[#allocation2 + $0x768] sm:$0xff] }
0x1ae0   :  { %v13469_v4 = vpop.permute.xlu0 %13468 }
0x1ae1   :  { %v13471_v10 = vunpack.i.h.bf16 %v13469_v4  ;;  %v13470_v13 = vunpack.i.l.bf16 %v13469_v4  ;;  %v2560_v4 = vld [vmem:[#allocation2 + $0x770] sm:$0xff] }
0x1ae2   :  { %v12804_v19 = vpack.c.bf16 %v2560_v4, %v2559_v16  ;;  %v10862_v4 = vld [vmem:[#allocation2 + $0x6b0] ss:$0 sm:$0xff] }
0x1ae3   :  { %v12786_v61 = vpack.c.bf16 %v13471_v10, %v13470_v13  ;;  %v13675_v24 = vpop.eup %13674 }
0x1ae4   :  { %v3084_v28 = vmul.f32 %v13675_v24, %v13671_v12 }
0x1ae5   :  { %12787 = vmatprep.subr.bf16.mxu0 %v12786_v61 }
0x1ae6   :  { %12789 = vmatpush3.bf16.msra.mxu0 %v12786_v61 }
0x1ae7   :  { %v13677_v26 = vpop.eup %13676  ;;  %12792 = vmatprep.subr.msk.bf16.mxu0 %vm14298_vm13, %v12790_v22 }
0x1ae8   :  { %v3083_v27 = vmul.f32 %v13677_v26, %v13673_v2 }
0x1aea   :  { %11899 = vmatprep.mubr.msk.f32.mxu0 %vm178_vm3, %v3083_v27 }
0x1aeb   :  { %11900 = vmatmul.mubr.msk.f32.vlgmr.msra.gmra.mrb[32].mxu0 %vm178_vm3, %v3084_v28 }
0x1aec   :  { %11906 = vmatprep.mubr.msk.f32.mxu0 %vm1131_vm11, %v3173_v11 }
0x1aef   :  { %12795 = vmatpush3.bf16.xpose.msk.msra.mxu0 %vm14298_vm13, %v12790_v22 }
0x1af6   :  { %11907 = vmatmul.mubr.msk.f32.vlgmr.msra.gmra.mrb[34].mxu0 %vm1131_vm11, %v3175_v14 }
0x1bbe   :  { %v11901_v18 = vpop.f32.mrb[32].mxu0 }
0x1bbf   :  { %v3163_v20 = vpop.f32.mrb[33].mxu0 }
0x1bc9   :  { %v11908_v21 = vpop.f32.mrb[34].mxu0 }
0x1bca   :  { %v3264_v43 = vmul.f32 0.35355338, %v11908_v21  ;;  %v3254_v30 = vpop.f32.mrb[35].mxu0 }
0x1bcb   :  { %v3263_v32 = vmul.f32 0.35355338, %v3254_v30 }
0x1bcc   :  { %v3266_v34 = vadd.f32 %v3264_v43, %v14506_v23  ;;  %v10859_v43 = vld [vmem:[#allocation2 + $0x688] ss:$0 sm:$0xff] }
0x1bcd   :  { %v3265_v36 = vadd.f32 %v3263_v32, %v14509_v25 }
0x1bce   :  { %v3270_v37 = vsel %vm178_vm3, %v3266_v34, -inf }
0x1bcf   :  { %3271 = vmax.xlane.f32.xlu1 %v3270_v37  ;;  %v3267_v58 = vsel %vm178_vm3, %v3265_v36, -inf }
0x1bd0   :  { %3268 = vmax.xlane.f32.xlu0 %v3267_v58 }
0x1be0   :  { %3378 = vrot.lane.b32.xlu1 %v14549_v47, %s13994_s23 }
0x1be4   :  { %3380 = vrot.lane.b32.xlu1 %v14547_v46, %s13994_s23 }
0x1be8   :  { %3386 = vrot.lane.b32.xlu1 %v3163_v20, %s14014_s30 }
0x1c5c   :  { %v3272_v31 = vpop.xlane.xlu1 %3271 }
0x1c5d   :  { %v3274_v1 = vsub.f32 %v3266_v34, %v3272_v31  ;;  %v3269_v48 = vpop.xlane.xlu0 %3268 }
0x1c5e   :  { %v3273_v49 = vsub.f32 %v3265_v36, %v3269_v48 }
0x1c5f   :  { %v3277_v50 = vmul.f32 1.442695, %v3274_v1 }
0x1c60   :  { %v3275_v51 = vmul.f32 1.442695, %v3273_v49  ;;  %v3379_v13 = vpop.permute.xlu1 %3378 }
0x1c61   :  { %13678 = vpow2.f32 %v3277_v50  ;;  %v3400_v26 = vsel %vm1131_vm11, %v14545_v41, %v3379_v13 }
0x1c62   :  { %13680 = vpow2.f32 %v3275_v51 }
0x1c64   :  { %v3381_v61 = vpop.permute.xlu1 %3380 }
0x1c65   :  { %v3401_v28 = vsel %vm1131_vm11, %v14543_v39, %v3381_v61 }
0x1c68   :  { %v3387_v24 = vpop.permute.xlu1 %3386 }
0x1c69   :  { %v3402_v11 = vsel %vm178_vm3, %v3400_v26, %v3387_v24 }
0x1c6b   :  { %v13679_v15 = vpop.eup %13678 }
0x1c6c   :  { %v3282_v52 = vsel %vm178_vm3, %v13679_v15, 0.0  ;;  %v13681_v53 = vpop.eup %13680 }
0x1c6d   :  { %3283 = vadd.xlane.f32.xlu0 %v3282_v52  ;;  %v3279_v47 = vsel %vm178_vm3, %v13681_v53, 0.0 }
0x1c71   :  { %3280 = vadd.xlane.f32.xlu0 %v3279_v47  ;;  %v3534_v47 = vld [vmem:[#allocation2 + $0x6c0] sm:$0xff] }
0x1c87   :  { %13478 = vrot.lane.b32.xlu0 %v14470_v59, %s14019_s8  ;;  %v2557_v59 = vld [vmem:[#allocation2 + $0x758] sm:$0xff] }
0x1c88   :  { %v12800_v44 = vpack.c.bf16 %v2558_v6, %v2557_v59 }
0x1c8b   :  { %3388 = vrot.lane.b32.xlu0 %v11901_v18, %s14014_s30 }
0x1cfa   :  { %v3284_v46 = vpop.xlane.xlu0 %3283 }
0x1cfb   :  { %13682 = vrcp.f32 %v3284_v46  ;;  %v3535_v46 = vld [vmem:[#allocation2 + $0x6c8] sm:$0xff] }
0x1cfe   :  { %v3281_v54 = vpop.xlane.xlu0 %3280 }
0x1cff   :  { %13684 = vrcp.f32 %v3281_v54 }
0x1d02   :  { %v13479_v33 = vpop.permute.xlu0 %13478 }
0x1d03   :  { %v13481_v55 = vunpack.i.h.bf16 %v13479_v33  ;;  %v13480_v62 = vunpack.i.l.bf16 %v13479_v33  ;;  %v3536_v33 = vld [vmem:[#allocation2 + $0x6d0] sm:$0xff] }
0x1d05   :  { %v12796_v0 = vpack.c.bf16 %v13481_v55, %v13480_v62  ;;  %v13683_v12 = vpop.eup %13682  ;;  %v12812_v55 = vpack.c.bf16 %v3536_v33, %v3535_v46  ;;  %v3641_v62 = vld [vmem:[#allocation2 + $0x6d8] sm:$0xff] }
0x1d06   :  { %v3288_v17 = vmul.f32 %v13683_v12, %v13679_v15  ;;  %v3389_v22 = vpop.permute.xlu0 %3388 }
0x1d07   :  { %12797 = vmatprep.subr.bf16.mxu1 %v12796_v0  ;;  %v3403_v18 = vsel %vm178_vm3, %v3401_v28, %v3389_v22  ;;  %v3644_v28 = vld [vmem:[#allocation2 + $0x6f0] sm:$0xff] }
0x1d08   :  { %12799 = vmatpush3.bf16.msra.mxu1 %v12796_v0  ;;  %v3642_v0 = vld [vmem:[#allocation2 + $0x6e0] sm:$0xff] }
0x1d09   :  { %v13685_v29 = vpop.eup %13684  ;;  %12801 = vmatprep.subr.bf16.mxu1 %v12800_v44  ;;  %v12816_v12 = vpack.c.bf16 %v3642_v0, %v3641_v62 }
0x1d0a   :  { %v3287_v2 = vmul.f32 %v13685_v29, %v13681_v53  ;;  %v3533_v53 = vld [vmem:[#allocation2 + $0x6b8] sm:$0xff] }
0x1d0b   :  { %v12808_v54 = vpack.c.bf16 %v3534_v47, %v3533_v53 }
0x1d0c   :  { %11913 = vmatprep.mubr.msk.f32.mxu1 %vm178_vm3, %v3287_v2 }
0x1d0d   :  { %11914 = vmatmul.mubr.msk.f32.vlgmr.msra.gmra.mrb[30].mxu1 %vm178_vm3, %v3288_v17  ;;  %12809 = vmatprep.subr.bf16.mxu0 %v12808_v54 }
0x1d0e   :  { %12803 = vmatpush3.bf16.msra.mxu1 %v12800_v44  ;;  %12811 = vmatpush3.bf16.msra.mxu0 %v12808_v54 }
0x1d0f   :  { %12805 = vmatprep.subr.bf16.mxu1 %v12804_v19  ;;  %12813 = vmatprep.subr.bf16.mxu0 %v12812_v55 }
0x1d12   :  { %12807 = vmatpush3.bf16.msra.mxu1 %v12804_v19  ;;  %12815 = vmatpush3.bf16.msra.mxu0 %v12812_v55 }
0x1d13   :  { %12817 = vmatprep.subr.bf16.mxu1 %v12816_v12 }
0x1de0   :  { %v11915_v5 = vpop.f32.mrb[30].mxu1 }
0x1de1   :  { %3396 = vrot.lane.b32.xlu0 %v11915_v5, %s14015_s4  ;;  %v3367_v10 = vpop.f32.mrb[31].mxu1  ;;  %v10863_v5 = vld [vmem:[#allocation2 + $0x6a8] ss:$0 sm:$0xff] }
0x1de2   :  { %3394 = vrot.lane.b32.xlu1 %v3367_v10, %s14015_s4 }
0x1e53   :  { %v3397_v27 = vpop.permute.xlu0 %3396 }
0x1e54   :  { %v3395_v14 = vpop.permute.xlu1 %3394  ;;  %v3405_v21 = vsel %vm2224_vm5, %v3403_v18, %v3397_v27  ;;  %v3643_v27 = vld [vmem:[#allocation2 + $0x6e8] sm:$0xff]  ;;  %v3646_v18 = vld [vmem:[#allocation2 + $0x700] sm:$0xff] }
0x1e55   :  { %v3404_v20 = vsel %vm2224_vm5, %v3402_v11, %v3395_v14  ;;  %v12820_v11 = vpack.c.bf16 %v3644_v28, %v3643_v27  ;;  %v3645_v14 = vld [vmem:[#allocation2 + $0x6f8] sm:$0xff] }
0x1e56   :  { %11924 = vmatprep.mubr.msk.f32.mxu1 %vm480_vm9, %v3404_v20  ;;  %v12824_v20 = vpack.c.bf16 %v3646_v18, %v3645_v14 }
0x1e57   :  { %11925 = vmatmul.mubr.msk.f32.vlgmr.msra.gmra.mrb[32].mxu1 %vm480_vm9, %v3405_v21  ;;  %v3647_v21 = vld [vmem:[#allocation2 + $0x708] sm:$0xff] }
0x1e58   :  { %12819 = vmatpush3.bf16.msra.mxu1 %v12816_v12 }
0x1e59   :  { %12821 = vmatprep.subr.bf16.mxu1 %v12820_v11 }
0x1e5c   :  { %12823 = vmatpush3.bf16.msra.mxu1 %v12820_v11 }
0x1e5d   :  { %12825 = vmatprep.subr.bf16.mxu1 %v12824_v20 }
0x1e60   :  { %12827 = vmatpush3.bf16.msra.mxu1 %v12824_v20 }
0x1f2a   :  { %v11926_v30 = vpop.f32.mrb[32].mxu1 }
0x1f2b   :  { %v3488_v41 = vadd.f32 %v11926_v30, %v10859_v43  ;;  %v3482_v32 = vpop.f32.mrb[33].mxu1 }
0x1f2c   :  { %v3483_v34 = vadd.f32 %v10859_v43, %v3482_v32  ;;  %v3648_v43 = vld [vmem:[#allocation2 + $0x710] sm:$0xff]  ;;  %v3650_v32 = vld [vmem:[#allocation2 + $0x720] sm:$0xff] }
0x1f2d   :  { %v14602_v39 = vadd.f32 %v3488_v41, %v14426_v40  ;;  %v12828_v30 = vpack.c.bf16 %v3648_v43, %v3647_v21  ;;  %v3649_v41 = vld [vmem:[#allocation2 + $0x718] sm:$0xff] }
0x1f2e   :  { %v14605_v36 = vadd.f32 %v3483_v34, %v14430_v35  ;;  %v3651_v34 = vld [vmem:[#allocation2 + $0x728] sm:$0xff] }
0x1f2f   :  { %v3498_v37 = vsel %vm480_vm9, %v14602_v39, 0.0  ;;  %12829 = vmatprep.subr.bf16.mxu1 %v12828_v30 }
0x1f30   :  { %3499 = vadd.xlane.f32.xlu0 %v3498_v37  ;;  %v3495_v58 = vsel %vm480_vm9, %v14605_v36, 0.0  ;;  %v12832_v37 = vpack.c.bf16 %v3650_v32, %v3649_v41  ;;  %12831 = vmatpush3.bf16.msra.mxu1 %v12828_v30 }
0x1f31   :  { %3496 = vadd.xlane.f32.xlu1 %v3495_v58  ;;  %v3652_v58 = vld [vmem:[#allocation2 + $0x730] sm:$0xff] }
0x1f32   :  { %12833 = vmatprep.subr.bf16.mxu1 %v12832_v37 }
0x1f34   :  { %12835 = vmatpush3.bf16.msra.mxu1 %v12832_v37  ;;  %v3781_v37 = vld [vmem:[#allocation2 + $0x898] sm:$0xff] }
0x1fbd   :  { %v3500_v31 = vpop.xlane.xlu0 %3499 }
0x1fbe   :  { %v3502_v1 = vmul.f32 0.03125, %v3500_v31  ;;  %v3497_v48 = vpop.xlane.xlu1 %3496  ;;  %v12836_v31 = vpack.c.bf16 %v3652_v58, %v3651_v34  ;;  %v3782_v58 = vld [vmem:[#allocation2 + $0x8a0] sm:$0xff] }
0x1fbf   :  { %v3501_v49 = vmul.f32 0.03125, %v3497_v48  ;;  %v3654_v48 = vld [vmem:[#allocation2 + $0x740] sm:$0xff] }
0x1fc0   :  { %v3504_v50 = vsub.f32 %v14602_v39, %v3502_v1  ;;  %v3653_v1 = vld [vmem:[#allocation2 + $0x738] sm:$0xff]  ;;  %12837 = vmatprep.subr.bf16.mxu1 %v12836_v31 }
0x1fc1   :  { %v3503_v40 = vsub.f32 %v14605_v36, %v3501_v49  ;;  %v12840_v49 = vpack.c.bf16 %v3654_v48, %v3653_v1  ;;  %12839 = vmatpush3.bf16.msra.mxu1 %v12836_v31  ;;  %v3783_v31 = vld [vmem:[#allocation2 + $0x8a8] sm:$0xff]  ;;  %v12848_v1 = vpack.c.bf16 %v3782_v58, %v3781_v37  ;;  %v3784_v48 = vld [vmem:[#allocation2 + $0x8b0] sm:$0xff] }
0x1fc2   :  { %v3506_v15 = vmul.f32 %v3504_v50, %v3504_v50 }
0x1fc3   :  { %v3505_v51 = vmul.f32 %v3503_v40, %v3503_v40  ;;  %12841 = vmatprep.subr.bf16.mxu1 %v12840_v49  ;;  %12849 = vmatprep.subr.bf16.mxu0 %v12848_v1 }
0x1fc4   :  { %v3510_v52 = vsel %vm480_vm9, %v3506_v15, 0.0 }
0x1fc5   :  { %v3507_v35 = vsel %vm480_vm9, %v3505_v51, 0.0  ;;  %12843 = vmatpush3.bf16.msra.mxu1 %v12840_v49  ;;  %v12852_v49 = vpack.c.bf16 %v3784_v48, %v3783_v31 }
0x1fc6   :  { %3508 = vadd.xlane.f32.xlu0 %v3507_v35  ;;  %v10864_v35 = vld [vmem:[#allocation2 + $0x678] ss:$0 sm:$0xff] }
0x1fca   :  { %3511 = vadd.xlane.f32.xlu0 %v3510_v52 }
0x2053   :  { %v3509_v29 = vpop.xlane.xlu0 %3508 }
0x2054   :  { %v3513_v2 = vmul.f32 0.03125, %v3509_v29 }
0x2056   :  { %v3515_v17 = vadd.f32 1e-05, %v3513_v2 }
0x2057   :  { %v3512_v59 = vpop.xlane.xlu0 %3511 }
0x2058   :  { %13686 = vrsqrt.f32 %v3515_v17  ;;  %v3514_v6 = vmul.f32 0.03125, %v3512_v59 }
0x205a   :  { %v3516_v16 = vadd.f32 1e-05, %v3514_v6 }
0x205c   :  { %13688 = vrsqrt.f32 %v3516_v16 }
0x2062   :  { %v13687_v44 = vpop.eup %13686 }
0x2063   :  { %v3519_v19 = vmul.f32 %v13687_v44, %v3503_v40  ;;  %v3656_v40 = vld [vmem:[#allocation2 + $0x750] sm:$0xff] }
0x2065   :  { %v3525_v10 = vmul.f32 %v10862_v4, %v3519_v19 }
0x2066   :  { %v13689_v13 = vpop.eup %13688 }
0x2067   :  { %v3520_v61 = vmul.f32 %v13689_v13, %v3504_v50  ;;  %v3531_v22 = vadd.f32 %v10863_v5, %v3525_v10  ;;  %v3655_v50 = vld [vmem:[#allocation2 + $0x748] sm:$0xff] }
0x2068   :  { %v12844_v51 = vpack.c.bf16 %v3656_v40, %v3655_v50 }
0x2069   :  { %v3526_v24 = vmul.f32 %v10862_v4, %v3520_v61  ;;  %11935 = vmatprep.mubr.msk.f32.mxu0 %vm480_vm9, %v3531_v22  ;;  %v10867_v61 = vld [vmem:[#allocation2 + $0x680] ss:$0 sm:$0xff] }
0x206a   :  { %12845 = vmatprep.subr.bf16.mxu1 %v12844_v51 }
0x206b   :  { %v3532_v26 = vadd.f32 %v10863_v5, %v3526_v24  ;;  %12847 = vmatpush3.bf16.msra.mxu1 %v12844_v51 }
0x206d   :  { %11936 = vmatmul.mubr.msk.f32.vlgmr.msra.gmra.mrb[36].mxu0 %vm480_vm9, %v3532_v26 }
0x206e   :  { %12851 = vmatpush3.bf16.msra.mxu0 %v12848_v1 }
0x206f   :  { %12853 = vmatprep.subr.bf16.mxu0 %v12852_v49 }
0x2072   :  { %12855 = vmatpush3.bf16.msra.mxu0 %v12852_v49 }
0x2140   :  { %v11937_v15 = vpop.f32.mrb[36].mxu0 }
0x2141   :  { %v3620_v52 = vadd.f32 %v11937_v15, %v10864_v35  ;;  %v3614_v53 = vpop.f32.mrb[37].mxu0 }
0x2142   :  { %v3615_v47 = vadd.f32 %v10864_v35, %v3614_v53 }
0x2143   :  { %v3626_v46 = vmul.f32 0.044715, %v3620_v52  ;;  %v3624_v19 = vmul.f32 0.5, %v3620_v52 }
0x2144   :  { %v3625_v54 = vmul.f32 0.044715, %v3615_v47  ;;  %v3623_v44 = vmul.f32 0.5, %v3615_v47 }
0x2145   :  { %v3628_v33 = vmul.f32 %v3626_v46, %v3620_v52 }
0x2146   :  { %v3627_v55 = vmul.f32 %v3625_v54, %v3615_v47 }
0x2147   :  { %v3630_v62 = vmul.f32 %v3628_v33, %v3620_v52 }
0x2148   :  { %v3629_v0 = vmul.f32 %v3627_v55, %v3615_v47  ;;  %v10869_v55 = vld [vmem:[#allocation2 + $0x7b8] ss:$0 sm:$0xff] }
0x2149   :  { %v3632_v12 = vadd.f32 %v3630_v62, %v3620_v52 }
0x214a   :  { %v3631_v29 = vadd.f32 %v3629_v0, %v3615_v47  ;;  %v10868_v47 = vld [vmem:[#allocation2 + $0x7c0] ss:$0 sm:$0xff] }
0x214b   :  { %v3634_v2 = vmul.f32 0.7978846, %v3632_v12 }
0x214c   :  { %v3633_v17 = vmul.f32 0.7978846, %v3631_v29 }
0x214d   :  { %13690 = vtanh.f32 %v3634_v2  ;;  %v10870_v2 = vld [vmem:[#allocation2 + $0x7b0] ss:$0 sm:$0xff] }
0x214e   :  { %13692 = vtanh.f32 %v3633_v17 }
0x2157   :  { %v13691_v59 = vpop.eup %13690 }
0x2158   :  { %v13693_v6 = vpop.eup %13692  ;;  %v3638_v16 = vadd.f32 1.0, %v13691_v59 }
0x2159   :  { %v3637_v4 = vadd.f32 1.0, %v13693_v6 }
0x215a   :  { %v3640_v10 = vmul.f32 %v3638_v16, %v3624_v19 }
0x215b   :  { %v3639_v5 = vmul.f32 %v3637_v4, %v3623_v44 }
0x215d   :  { %11970 = vmatprep.mubr.f32.mxu1 %v3639_v5 }
0x215e   :  { %11971 = vmatmul.mubr.f32.vlgmr.msra.gmra.mrb[34].mxu1 %v3640_v10 }
0x2231   :  { %v11972_v13 = vpop.f32.mrb[34].mxu1 }
0x2232   :  { %v3733_v22 = vadd.f32 %v11972_v13, %v14602_v39  ;;  %v3723_v24 = vpop.f32.mrb[35].mxu1 }
0x2233   :  { %v3732_v26 = vadd.f32 %v3723_v24, %v14605_v36 }
0x2234   :  { %v14619_v27 = vadd.f32 %v10867_v61, %v3733_v22 }
0x2235   :  { %v14621_v28 = vadd.f32 %v10867_v61, %v3732_v26 }
0x2236   :  { %v3746_v11 = vsel %vm480_vm9, %v14619_v27, 0.0 }
0x2237   :  { %3747 = vadd.xlane.f32.xlu0 %v3746_v11  ;;  %v3743_v14 = vsel %vm480_vm9, %v14621_v28, 0.0 }
0x2238   :  { %3744 = vadd.xlane.f32.xlu1 %v3743_v14 }
0x22c4   :  { %v3748_v18 = vpop.xlane.xlu0 %3747 }
0x22c5   :  { %v3750_v20 = vmul.f32 0.03125, %v3748_v18  ;;  %v3745_v21 = vpop.xlane.xlu1 %3744 }
0x22c6   :  { %v3749_v43 = vmul.f32 0.03125, %v3745_v21 }
0x22c7   :  { %v3752_v39 = vsub.f32 %v14619_v27, %v3750_v20 }
0x22c8   :  { %v3751_v36 = vsub.f32 %v14621_v28, %v3749_v43 }
0x22c9   :  { %v3754_v30 = vmul.f32 %v3752_v39, %v3752_v39 }
0x22ca   :  { %v3753_v41 = vmul.f32 %v3751_v36, %v3751_v36 }
0x22cb   :  { %v3758_v32 = vsel %vm480_vm9, %v3754_v30, 0.0 }
0x22cc   :  { %3759 = vadd.xlane.f32.xlu0 %v3758_v32  ;;  %v3755_v34 = vsel %vm480_vm9, %v3753_v41, 0.0 }
0x22cd   :  { %3756 = vadd.xlane.f32.xlu1 %v3755_v34 }
0x2359   :  { %v3760_v50 = vpop.xlane.xlu0 %3759 }
0x235a   :  { %v3762_v40 = vmul.f32 0.03125, %v3760_v50  ;;  %v3757_v51 = vpop.xlane.xlu1 %3756 }
0x235b   :  { %v3761_v35 = vmul.f32 0.03125, %v3757_v51 }
0x235c   :  { %v3764_v15 = vadd.f32 1e-05, %v3762_v40 }
0x235d   :  { %v3763_v52 = vadd.f32 1e-05, %v3761_v35 }
0x235e   :  { %13694 = vrsqrt.f32 %v3764_v15 }
0x235f   :  { %13696 = vrsqrt.f32 %v3763_v52 }
0x2368   :  { %v13695_v53 = vpop.eup %13694 }
0x2369   :  { %v13697_v46 = vpop.eup %13696  ;;  %v3768_v54 = vmul.f32 %v13695_v53, %v3752_v39 }
0x236a   :  { %v3767_v33 = vmul.f32 %v13697_v46, %v3751_v36 }
0x236b   :  { %v3774_v62 = vmul.f32 %v10868_v47, %v3768_v54 }
0x236c   :  { %v3773_v0 = vmul.f32 %v10868_v47, %v3767_v33 }
0x236d   :  { %v3780_v29 = vadd.f32 %v10869_v55, %v3774_v62 }
0x236e   :  { %v3779_v12 = vadd.f32 %v10869_v55, %v3773_v0 }
0x2370   :  { %11981 = vmatprep.mubr.msk.f32.mxu0 %vm480_vm9, %v3779_v12 }
0x2371   :  { %11982 = vmatmul.mubr.msk.f32.vlgmr.msra.gmra.mrb[38].mxu0 %vm480_vm9, %v3780_v29 }
0x2444   :  { %v11983_v17 = vpop.f32.mrb[38].mxu0 }
0x2445   :  { %v14633_v59 = vadd.f32 %v11983_v17, %v10870_v2  ;;  %v3862_v6 = vpop.f32.mrb[39].mxu0 }
0x2446   :  { %v14635_v16 = vadd.f32 %v10870_v2, %v3862_v6 }
0x2448   :  { %11988 = vmatprep.mubr.msk.f32.mxu0 %vm1131_vm11, %v14635_v16  ;;  %v14641_v44 = vpack.i.bf16 %v14633_v59, %v14635_v16 }
0x244a   :  { %13483 = vrot.lane.b32.xlu1 %v14641_v44, %s14009_s18 }
0x244e   :  { %13488 = vrot.lane.b32.xlu1 %v14641_v44, %s14016_s5 }
0x2452   :  { %4078 = vrot.lane.b32.xlu1 %v14635_v16, %s14003_s12 }
0x2456   :  { %13498 = vrot.lane.b32.xlu1 %v14641_v44, %s14011_s24 }
0x245a   :  { %4080 = vrot.lane.b32.xlu1 %v14633_v59, %s14003_s12 }
0x245e   :  { %4282 = vrot.lane.b32.xlu1 %v14635_v16, %s14001_s10 }
0x2462   :  { %4284 = vrot.lane.b32.xlu1 %v14633_v59, %s14001_s10 }
0x24bc   :  { %v13484_v4 = vpop.permute.xlu1 %13483 }
0x24bd   :  { %v13486_v19 = vunpack.i.h.bf16 %v13484_v4  ;;  %v13485_v5 = vunpack.i.l.bf16 %v13484_v4 }
0x24bf   :  { %v12856_v10 = vpack.c.bf16 %v13486_v19, %v13485_v5 }
0x24c0   :  { %v13489_v13 = vpop.permute.xlu1 %13488 }
0x24c1   :  { %v13491_v61 = vunpack.i.h.bf16 %v13489_v13  ;;  %v13490_v22 = vunpack.i.l.bf16 %v13489_v13  ;;  %12858 = vmatprep.subr.msk.bf16.mxu0 %vm14298_vm13, %v12856_v10 }
0x24c2   :  { %12861 = vmatpush3.bf16.xpose.msk.msra.mxu0 %vm14298_vm13, %v12856_v10 }
0x24c3   :  { %v12862_v24 = vpack.c.bf16 %v13491_v61, %v13490_v22 }
0x24c4   :  { %v4079_v26 = vpop.permute.xlu1 %4078 }
0x24c5   :  { %12863 = vmatprep.subr.bf16.mxu0 %v12862_v24 }
0x24c8   :  { %v13499_v11 = vpop.permute.xlu1 %13498 }
0x24c9   :  { %v13501_v14 = vunpack.i.h.bf16 %v13499_v11  ;;  %v13500_v18 = vunpack.i.l.bf16 %v13499_v11  ;;  %11989 = vmatmul.mubr.msk.f32.vlgmr.msra.gmra.mrb[40].mxu0 %vm1131_vm11, %v14633_v59 }
0x24ca   :  { %12865 = vmatpush3.bf16.msra.mxu0 %v12862_v24 }
0x24cb   :  { %v12876_v20 = vpack.c.bf16 %v13501_v14, %v13500_v18 }
0x24cc   :  { %v4081_v21 = vpop.permute.xlu1 %4080 }
0x24cd   :  { %12878 = vmatprep.subr.msk.bf16.mxu1 %vm14298_vm13, %v12876_v20 }
0x24ce   :  { %12881 = vmatpush3.bf16.xpose.msk.msra.mxu1 %vm14298_vm13, %v12876_v20 }
0x24d0   :  { %v4283_v43 = vpop.permute.xlu1 %4282 }
0x24d1   :  { %12016 = vmatprep.mubr.msk.f32.mxu1 %vm1131_vm11, %v4283_v43 }
0x24d4   :  { %v4285_v39 = vpop.permute.xlu1 %4284 }
0x24d5   :  { %12017 = vmatmul.mubr.msk.f32.vlgmr.msra.gmra.mrb[36].mxu1 %vm1131_vm11, %v4285_v39 }
0x259c   :  { %v11990_v36 = vpop.f32.mrb[40].mxu0 }
0x259d   :  { %v3956_v30 = vpop.f32.mrb[41].mxu0  ;;  %v3966_v41 = vmul.f32 0.35355338, %v11990_v36 }
0x259e   :  { %v3965_v32 = vmul.f32 0.35355338, %v3956_v30 }
0x259f   :  { %v3968_v37 = vadd.f32 %v3966_v41, %v14506_v23 }
0x25a0   :  { %v3967_v34 = vadd.f32 %v3965_v32, %v14509_v25 }
0x25a1   :  { %v3972_v31 = vsel %vm178_vm3, %v3968_v37, -inf }
0x25a2   :  { %v3969_v58 = vsel %vm178_vm3, %v3967_v34, -inf }
0x25a3   :  { %3970 = vmax.xlane.f32.xlu0 %v3969_v58 }
0x25a7   :  { %3973 = vmax.xlane.f32.xlu0 %v3972_v31 }
0x25a8   :  { %v12018_v1 = vpop.f32.mrb[36].mxu1 }
0x25a9   :  { %v4364_v48 = vpop.f32.mrb[37].mxu1  ;;  %v4374_v14 = vmul.f32 0.35355338, %v12018_v1 }
0x25aa   :  { %v4373_v10 = vmul.f32 0.35355338, %v4364_v48 }
0x25ac   :  { %v4375_v18 = vadd.f32 %v4373_v10, %v14509_v25 }
0x25ae   :  { %v4377_v43 = vsel %vm178_vm3, %v4375_v18, -inf }
0x2630   :  { %v3971_v49 = vpop.xlane.xlu0 %3970 }
0x2631   :  { %v3975_v50 = vsub.f32 %v3967_v34, %v3971_v49 }
0x2633   :  { %v3977_v35 = vmul.f32 1.442695, %v3975_v50 }
0x2634   :  { %v3974_v40 = vpop.xlane.xlu0 %3973 }
0x2635   :  { %v3976_v51 = vsub.f32 %v3968_v37, %v3974_v40 }
0x2637   :  { %v3979_v15 = vmul.f32 1.442695, %v3976_v51 }
0x2639   :  { %13698 = vpow2.f32 %v3979_v15 }
0x263a   :  { %13700 = vpow2.f32 %v3977_v35 }
0x2643   :  { %v13699_v52 = vpop.eup %13698 }
0x2644   :  { %v3984_v53 = vsel %vm178_vm3, %v13699_v52, 0.0  ;;  %v13701_v47 = vpop.eup %13700 }
0x2645   :  { %3985 = vadd.xlane.f32.xlu0 %v3984_v53  ;;  %v3981_v46 = vsel %vm178_vm3, %v13701_v47, 0.0 }
0x2649   :  { %3982 = vadd.xlane.f32.xlu0 %v3981_v46 }
0x265f   :  { %13493 = vrot.lane.b32.xlu0 %v14641_v44, %s14010_s22 }
0x26d2   :  { %v3986_v54 = vpop.xlane.xlu0 %3985 }
0x26d3   :  { %13702 = vrcp.f32 %v3986_v54 }
0x26d6   :  { %v3983_v33 = vpop.xlane.xlu0 %3982 }
0x26d7   :  { %13704 = vrcp.f32 %v3983_v33 }
0x26da   :  { %v13494_v55 = vpop.permute.xlu0 %13493 }
0x26db   :  { %v13496_v62 = vunpack.i.h.bf16 %v13494_v55  ;;  %v13495_v0 = vunpack.i.l.bf16 %v13494_v55 }
0x26dd   :  { %v12866_v12 = vpack.c.bf16 %v13496_v62, %v13495_v0  ;;  %v13703_v29 = vpop.eup %13702 }
0x26de   :  { %v3990_v6 = vmul.f32 %v13703_v29, %v13699_v52 }
0x26df   :  { %12868 = vmatprep.subr.msk.bf16.mxu0 %vm14298_vm13, %v12866_v12 }
0x26e1   :  { %v13705_v2 = vpop.eup %13704 }
0x26e2   :  { %v3989_v17 = vmul.f32 %v13705_v2, %v13701_v47 }
0x26e4   :  { %11995 = vmatprep.mubr.msk.f32.mxu0 %vm178_vm3, %v3989_v17 }
0x26e5   :  { %11996 = vmatmul.mubr.msk.f32.vlgmr.msra.gmra.mrb[42].mxu0 %vm178_vm3, %v3990_v6 }
0x26e6   :  { %12871 = vmatpush3.bf16.xpose.msk.msra.mxu0 %vm14298_vm13, %v12866_v12  ;;  %12002 = vmatprep.mubr.msk.f32.mxu0 %vm1131_vm11, %v4079_v26 }
0x26ed   :  { %12003 = vmatmul.mubr.msk.f32.vlgmr.msra.gmra.mrb[44].mxu0 %vm1131_vm11, %v4081_v21  ;;  %v4376_v21 = vadd.f32 %v4374_v14, %v14506_v23 }
0x26ef   :  { %v4380_v39 = vsel %vm178_vm3, %v4376_v21, -inf }
0x27b8   :  { %v14685_v4 = vpop.f32.mrb[42].mxu0 }
0x27b9   :  { %v14687_v19 = vpop.f32.mrb[43].mxu0 }
0x27c0   :  { %v12004_v5 = vpop.f32.mrb[44].mxu0 }
0x27c1   :  { %v4170_v13 = vmul.f32 0.35355338, %v12004_v5  ;;  %v4160_v61 = vpop.f32.mrb[45].mxu0 }
0x27c2   :  { %v4169_v22 = vmul.f32 0.35355338, %v4160_v61 }
0x27c3   :  { %v4172_v24 = vadd.f32 %v4170_v13, %v14506_v23 }
0x27c4   :  { %v4171_v11 = vadd.f32 %v4169_v22, %v14509_v25 }
0x27c5   :  { %v4176_v26 = vsel %vm178_vm3, %v4172_v24, -inf }
0x27c6   :  { %4177 = vmax.xlane.f32.xlu0 %v4176_v26  ;;  %v4173_v20 = vsel %vm178_vm3, %v4171_v11, -inf }
0x27c7   :  { %4174 = vmax.xlane.f32.xlu1 %v4173_v20 }
0x27ca   :  { %4378 = vmax.xlane.f32.xlu0 %v4377_v43 }
0x27ce   :  { %4381 = vmax.xlane.f32.xlu0 %v4380_v39 }
0x2853   :  { %v4178_v36 = vpop.xlane.xlu0 %4177 }
0x2854   :  { %v4180_v32 = vsub.f32 %v4172_v24, %v4178_v36  ;;  %v4175_v15 = vpop.xlane.xlu1 %4174 }
0x2855   :  { %v4179_v52 = vsub.f32 %v4171_v11, %v4175_v15 }
0x2856   :  { %v4183_v31 = vmul.f32 1.442695, %v4180_v32 }
0x2857   :  { %v4379_v30 = vpop.xlane.xlu0 %4378  ;;  %v4181_v53 = vmul.f32 1.442695, %v4179_v52 }
0x2858   :  { %v4383_v41 = vsub.f32 %v4375_v18, %v4379_v30 }
0x285a   :  { %v4385_v34 = vmul.f32 1.442695, %v4383_v41 }
0x285b   :  { %v4382_v37 = vpop.xlane.xlu0 %4381 }
0x285c   :  { %13706 = vpow2.f32 %v4385_v34  ;;  %v4384_v58 = vsub.f32 %v4376_v21, %v4382_v37 }
0x285e   :  { %v4387_v1 = vmul.f32 1.442695, %v4384_v58 }
0x2860   :  { %13708 = vpow2.f32 %v4387_v1 }
0x2861   :  { %13710 = vpow2.f32 %v4183_v31 }
0x2862   :  { %13712 = vpow2.f32 %v4181_v53 }
0x2866   :  { %v13707_v48 = vpop.eup %13706 }
0x2867   :  { %v4389_v49 = vsel %vm178_vm3, %v13707_v48, 0.0 }
0x2868   :  { %4390 = vadd.xlane.f32.xlu1 %v4389_v49 }
0x286a   :  { %v13709_v50 = vpop.eup %13708 }
0x286b   :  { %v4392_v40 = vsel %vm178_vm3, %v13709_v50, 0.0  ;;  %v13711_v51 = vpop.eup %13710 }
0x286c   :  { %4393 = vadd.xlane.f32.xlu0 %v4392_v40  ;;  %v4188_v35 = vsel %vm178_vm3, %v13711_v51, 0.0  ;;  %v13713_v47 = vpop.eup %13712 }
0x286d   :  { %v4185_v46 = vsel %vm178_vm3, %v13713_v47, 0.0 }
0x2870   :  { %4189 = vadd.xlane.f32.xlu0 %v4188_v35 }
0x2879   :  { %13503 = vrot.lane.b32.xlu1 %v14641_v44, %s14017_s6 }
0x2886   :  { %13508 = vrot.lane.b32.xlu0 %v14641_v44, %s14018_s7 }
0x289d   :  { %4186 = vadd.xlane.f32.xlu1 %v4185_v46 }
0x28ae   :  { %13513 = vrot.lane.b32.xlu1 %v14641_v44, %s14013_s29 }
0x28b2   :  { %4486 = vrot.lane.b32.xlu1 %v14635_v16, %s14004_s13 }
0x28b6   :  { %4488 = vrot.lane.b32.xlu1 %v14633_v59, %s14004_s13 }
0x28f5   :  { %v4391_v54 = vpop.xlane.xlu1 %4390 }
0x28f6   :  { %13714 = vrcp.f32 %v4391_v54 }
0x28f9   :  { %v4394_v33 = vpop.xlane.xlu0 %4393  ;;  %v13504_v55 = vpop.permute.xlu1 %13503 }
0x28fa   :  { %v13506_v62 = vunpack.i.h.bf16 %v13504_v55  ;;  %v13505_v0 = vunpack.i.l.bf16 %v13504_v55 }
0x28fc   :  { %v12872_v12 = vpack.c.bf16 %v13506_v62, %v13505_v0 }
0x28fd   :  { %v4190_v29 = vpop.xlane.xlu0 %4189 }
0x28fe   :  { %12873 = vmatprep.subr.bf16.mxu0 %v12872_v12  ;;  %13716 = vrcp.f32 %v4190_v29 }
0x28ff   :  { %12875 = vmatpush3.bf16.msra.mxu0 %v12872_v12 }
0x2900   :  { %v13715_v10 = vpop.eup %13714 }
0x2901   :  { %v13509_v2 = vpop.permute.xlu0 %13508  ;;  %v4397_v26 = vmul.f32 %v13715_v10, %v13707_v48  ;;  %v3873_v10 = vld [vmem:[#allocation2 + $0x888] sm:$0xff] }
0x2902   :  { %v13511_v17 = vunpack.i.h.bf16 %v13509_v2  ;;  %v13510_v6 = vunpack.i.l.bf16 %v13509_v2 }
0x2904   :  { %v12882_v5 = vpack.c.bf16 %v13511_v17, %v13510_v6 }
0x2906   :  { %12883 = vmatprep.subr.bf16.mxu0 %v12882_v5 }
0x2908   :  { %v13717_v13 = vpop.eup %13716 }
0x2909   :  { %v4194_v14 = vmul.f32 %v13717_v13, %v13711_v51 }
0x292a   :  { %v4187_v16 = vpop.xlane.xlu1 %4186 }
0x292b   :  { %13718 = vrcp.f32 %v4187_v16 }
0x292c   :  { %13720 = vrcp.f32 %v4394_v33 }
0x292e   :  { %v13514_v59 = vpop.permute.xlu1 %13513 }
0x292f   :  { %v13516_v22 = vunpack.i.h.bf16 %v13514_v59  ;;  %v13515_v24 = vunpack.i.l.bf16 %v13514_v59  ;;  %v3872_v59 = vld [vmem:[#allocation2 + $0x880] sm:$0xff] }
0x2931   :  { %v12886_v20 = vpack.c.bf16 %v13516_v22, %v13515_v24 }
0x2932   :  { %v4487_v43 = vpop.permute.xlu1 %4486 }
0x2935   :  { %v13719_v61 = vpop.eup %13718 }
0x2936   :  { %v4193_v11 = vmul.f32 %v13719_v61, %v13713_v47  ;;  %v13721_v18 = vpop.eup %13720  ;;  %v4489_v39 = vpop.permute.xlu1 %4488  ;;  %v3874_v61 = vld [vmem:[#allocation2 + $0x890] sm:$0xff] }
0x2937   :  { %v4398_v21 = vmul.f32 %v13721_v18, %v13709_v50  ;;  %v12900_v22 = vpack.c.bf16 %v3874_v61, %v3873_v10  ;;  %v10900_v61 = vld [vmem:[#allocation2 + $0x7d0] ss:$0 sm:$0xff] }
0x2938   :  { %12009 = vmatprep.mubr.msk.f32.mxu0 %vm178_vm3, %v4193_v11 }
0x2939   :  { %12010 = vmatmul.mubr.msk.f32.vlgmr.msra.gmra.mrb[46].mxu0 %vm178_vm3, %v4194_v14 }
0x293a   :  { %12885 = vmatpush3.bf16.msra.mxu0 %v12882_v5  ;;  %12023 = vmatprep.mubr.msk.f32.mxu0 %vm178_vm3, %v4397_v26 }
0x293b   :  { %12888 = vmatprep.subr.msk.bf16.mxu0 %vm14298_vm13, %v12886_v20 }
0x293d   :  { %12024 = vmatmul.mubr.msk.f32.vlgmr.msra.gmra.mrb[48].mxu0 %vm178_vm3, %v4398_v21 }
0x293e   :  { %12030 = vmatprep.mubr.msk.f32.mxu0 %vm1131_vm11, %v4487_v43 }
0x2943   :  { %12891 = vmatpush3.bf16.xpose.msk.msra.mxu0 %vm14298_vm13, %v12886_v20 }
0x294a   :  { %12031 = vmatmul.mubr.msk.f32.vlgmr.msra.gmra.mrb[50].mxu0 %vm1131_vm11, %v4489_v39 }
0x2a0c   :  { %v12011_v36 = vpop.f32.mrb[46].mxu0 }
0x2a0d   :  { %v4273_v30 = vpop.f32.mrb[47].mxu0 }
0x2a10   :  { %v12025_v41 = vpop.f32.mrb[48].mxu0 }
0x2a11   :  { %v4477_v32 = vpop.f32.mrb[49].mxu0 }
0x2a1d   :  { %v12032_v34 = vpop.f32.mrb[50].mxu0 }
0x2a1e   :  { %v4578_v37 = vmul.f32 0.35355338, %v12032_v34  ;;  %v4568_v58 = vpop.f32.mrb[51].mxu0 }
0x2a1f   :  { %v4577_v31 = vmul.f32 0.35355338, %v4568_v58 }
0x2a20   :  { %v4580_v1 = vadd.f32 %v4578_v37, %v14506_v23  ;;  %v10897_v37 = vld [vmem:[#allocation2 + $0x7a8] ss:$0 sm:$0xff] }
0x2a21   :  { %v4579_v48 = vadd.f32 %v4577_v31, %v14509_v25 }
0x2a22   :  { %v4584_v49 = vsel %vm178_vm3, %v4580_v1, -inf }
0x2a23   :  { %4585 = vmax.xlane.f32.xlu1 %v4584_v49  ;;  %v4581_v50 = vsel %vm178_vm3, %v4579_v48, -inf }
0x2a24   :  { %4582 = vmax.xlane.f32.xlu0 %v4581_v50 }
0x2a34   :  { %4692 = vrot.lane.b32.xlu1 %v4273_v30, %s13994_s23 }
0x2a38   :  { %4694 = vrot.lane.b32.xlu1 %v12011_v36, %s13994_s23 }
0x2a3c   :  { %4700 = vrot.lane.b32.xlu1 %v4477_v32, %s14014_s30 }
0x2ab0   :  { %v4586_v40 = vpop.xlane.xlu1 %4585 }
0x2ab1   :  { %v4588_v51 = vsub.f32 %v4580_v1, %v4586_v40  ;;  %v4583_v35 = vpop.xlane.xlu0 %4582 }
0x2ab2   :  { %v4587_v15 = vsub.f32 %v4579_v48, %v4583_v35 }
0x2ab3   :  { %v4591_v52 = vmul.f32 1.442695, %v4588_v51 }
0x2ab4   :  { %v4589_v53 = vmul.f32 1.442695, %v4587_v15  ;;  %v4693_v14 = vpop.permute.xlu1 %4692 }
0x2ab5   :  { %13722 = vpow2.f32 %v4591_v52  ;;  %v4714_v21 = vsel %vm1131_vm11, %v14687_v19, %v4693_v14 }
0x2ab6   :  { %13724 = vpow2.f32 %v4589_v53 }
0x2ab8   :  { %v4695_v18 = vpop.permute.xlu1 %4694 }
0x2ab9   :  { %v4715_v39 = vsel %vm1131_vm11, %v14685_v4, %v4695_v18 }
0x2abc   :  { %v4701_v20 = vpop.permute.xlu1 %4700 }
0x2abd   :  { %v4716_v36 = vsel %vm178_vm3, %v4714_v21, %v4701_v20 }
0x2abf   :  { %v13723_v47 = vpop.eup %13722 }
0x2ac0   :  { %v4596_v46 = vsel %vm178_vm3, %v13723_v47, 0.0  ;;  %v13725_v54 = vpop.eup %13724 }
0x2ac1   :  { %4597 = vadd.xlane.f32.xlu0 %v4596_v46  ;;  %v4593_v33 = vsel %vm178_vm3, %v13725_v54, 0.0 }
0x2ac5   :  { %4594 = vadd.xlane.f32.xlu0 %v4593_v33  ;;  %v4848_v33 = vld [vmem:[#allocation2 + $0x7e0] sm:$0xff] }
0x2adb   :  { %13518 = vrot.lane.b32.xlu0 %v14641_v44, %s14019_s8  ;;  %v3871_v44 = vld [vmem:[#allocation2 + $0x878] sm:$0xff] }
0x2adc   :  { %v12896_v13 = vpack.c.bf16 %v3872_v59, %v3871_v44 }
0x2adf   :  { %4702 = vrot.lane.b32.xlu0 %v12025_v41, %s14014_s30 }
0x2b4e   :  { %v4598_v55 = vpop.xlane.xlu0 %4597 }
0x2b4f   :  { %13726 = vrcp.f32 %v4598_v55  ;;  %v4849_v55 = vld [vmem:[#allocation2 + $0x7e8] sm:$0xff] }
0x2b52   :  { %v4595_v62 = vpop.xlane.xlu0 %4594 }
0x2b53   :  { %13728 = vrcp.f32 %v4595_v62 }
0x2b56   :  { %v13519_v0 = vpop.permute.xlu0 %13518 }
0x2b57   :  { %v13521_v12 = vunpack.i.h.bf16 %v13519_v0  ;;  %v13520_v29 = vunpack.i.l.bf16 %v13519_v0  ;;  %v4850_v0 = vld [vmem:[#allocation2 + $0x7f0] sm:$0xff] }
0x2b59   :  { %v12892_v2 = vpack.c.bf16 %v13521_v12, %v13520_v29  ;;  %v13727_v17 = vpop.eup %13726  ;;  %v12908_v12 = vpack.c.bf16 %v4850_v0, %v4849_v55  ;;  %v4955_v29 = vld [vmem:[#allocation2 + $0x7f8] sm:$0xff] }
0x2b5a   :  { %v4602_v16 = vmul.f32 %v13727_v17, %v13723_v47  ;;  %v4703_v26 = vpop.permute.xlu0 %4702 }
0x2b5b   :  { %12893 = vmatprep.subr.bf16.mxu1 %v12892_v2  ;;  %v4717_v41 = vsel %vm178_vm3, %v4715_v39, %v4703_v26  ;;  %v4958_v39 = vld [vmem:[#allocation2 + $0x810] sm:$0xff] }
0x2b5c   :  { %12895 = vmatpush3.bf16.msra.mxu1 %v12892_v2  ;;  %v4956_v2 = vld [vmem:[#allocation2 + $0x800] sm:$0xff] }
0x2b5d   :  { %v13729_v6 = vpop.eup %13728  ;;  %12897 = vmatprep.subr.bf16.mxu1 %v12896_v13  ;;  %v12912_v17 = vpack.c.bf16 %v4956_v2, %v4955_v29 }
0x2b5e   :  { %v4601_v5 = vmul.f32 %v13729_v6, %v13725_v54  ;;  %v4847_v54 = vld [vmem:[#allocation2 + $0x7d8] sm:$0xff] }
0x2b5f   :  { %v12904_v62 = vpack.c.bf16 %v4848_v33, %v4847_v54 }
0x2b60   :  { %12037 = vmatprep.mubr.msk.f32.mxu1 %vm178_vm3, %v4601_v5 }
0x2b61   :  { %12038 = vmatmul.mubr.msk.f32.vlgmr.msra.gmra.mrb[38].mxu1 %vm178_vm3, %v4602_v16  ;;  %12905 = vmatprep.subr.bf16.mxu0 %v12904_v62 }
0x2b62   :  { %12899 = vmatpush3.bf16.msra.mxu1 %v12896_v13  ;;  %12907 = vmatpush3.bf16.msra.mxu0 %v12904_v62 }
0x2b63   :  { %12901 = vmatprep.subr.bf16.mxu1 %v12900_v22  ;;  %12909 = vmatprep.subr.bf16.mxu0 %v12908_v12 }
0x2b66   :  { %12903 = vmatpush3.bf16.msra.mxu1 %v12900_v22  ;;  %12911 = vmatpush3.bf16.msra.mxu0 %v12908_v12 }
0x2b67   :  { %12913 = vmatprep.subr.bf16.mxu1 %v12912_v17 }
0x2c34   :  { %v12039_v24 = vpop.f32.mrb[38].mxu1 }
0x2c35   :  { %4710 = vrot.lane.b32.xlu0 %v12039_v24, %s14015_s4  ;;  %v4681_v11 = vpop.f32.mrb[39].mxu1  ;;  %v10901_v24 = vld [vmem:[#allocation2 + $0x7c8] ss:$0 sm:$0xff] }
0x2c36   :  { %4708 = vrot.lane.b32.xlu1 %v4681_v11, %s14015_s4 }
0x2ca7   :  { %v4711_v43 = vpop.permute.xlu0 %4710 }
0x2ca8   :  { %v4709_v30 = vpop.permute.xlu1 %4708  ;;  %v4719_v34 = vsel %vm2224_vm5, %v4717_v41, %v4711_v43  ;;  %v4957_v43 = vld [vmem:[#allocation2 + $0x808] sm:$0xff]  ;;  %v4960_v41 = vld [vmem:[#allocation2 + $0x820] sm:$0xff] }
0x2ca9   :  { %v4718_v32 = vsel %vm2224_vm5, %v4716_v36, %v4709_v30  ;;  %v12916_v36 = vpack.c.bf16 %v4958_v39, %v4957_v43  ;;  %v4959_v30 = vld [vmem:[#allocation2 + $0x818] sm:$0xff] }
0x2caa   :  { %12048 = vmatprep.mubr.msk.f32.mxu1 %vm480_vm9, %v4718_v32  ;;  %v12920_v32 = vpack.c.bf16 %v4960_v41, %v4959_v30 }
0x2cab   :  { %12049 = vmatmul.mubr.msk.f32.vlgmr.msra.gmra.mrb[40].mxu1 %vm480_vm9, %v4719_v34  ;;  %v4961_v34 = vld [vmem:[#allocation2 + $0x828] sm:$0xff] }
0x2cac   :  { %12915 = vmatpush3.bf16.msra.mxu1 %v12912_v17 }
0x2cad   :  { %12917 = vmatprep.subr.bf16.mxu1 %v12916_v36 }
0x2cb0   :  { %12919 = vmatpush3.bf16.msra.mxu1 %v12916_v36 }
0x2cb1   :  { %12921 = vmatprep.subr.bf16.mxu1 %v12920_v32 }
0x2cb4   :  { %12923 = vmatpush3.bf16.msra.mxu1 %v12920_v32 }
0x2d7e   :  { %v12050_v58 = vpop.f32.mrb[40].mxu1 }
0x2d7f   :  { %v4802_v19 = vadd.f32 %v12050_v58, %v10897_v37  ;;  %v4796_v31 = vpop.f32.mrb[41].mxu1 }
0x2d80   :  { %v4797_v1 = vadd.f32 %v10897_v37, %v4796_v31  ;;  %v4962_v37 = vld [vmem:[#allocation2 + $0x830] sm:$0xff]  ;;  %v4964_v31 = vld [vmem:[#allocation2 + $0x840] sm:$0xff] }
0x2d81   :  { %v14748_v4 = vadd.f32 %v4802_v19, %v14619_v27  ;;  %v12924_v58 = vpack.c.bf16 %v4962_v37, %v4961_v34  ;;  %v4963_v19 = vld [vmem:[#allocation2 + $0x838] sm:$0xff] }
0x2d82   :  { %v14751_v48 = vadd.f32 %v4797_v1, %v14621_v28  ;;  %v4965_v1 = vld [vmem:[#allocation2 + $0x848] sm:$0xff] }
0x2d83   :  { %v4812_v49 = vsel %vm480_vm9, %v14748_v4, 0.0  ;;  %12925 = vmatprep.subr.bf16.mxu1 %v12924_v58 }
0x2d84   :  { %4813 = vadd.xlane.f32.xlu0 %v4812_v49  ;;  %v4809_v50 = vsel %vm480_vm9, %v14751_v48, 0.0  ;;  %v12928_v49 = vpack.c.bf16 %v4964_v31, %v4963_v19  ;;  %12927 = vmatpush3.bf16.msra.mxu1 %v12924_v58 }
0x2d85   :  { %4810 = vadd.xlane.f32.xlu1 %v4809_v50  ;;  %v4966_v50 = vld [vmem:[#allocation2 + $0x850] sm:$0xff] }
0x2d86   :  { %12929 = vmatprep.subr.bf16.mxu1 %v12928_v49 }
0x2d88   :  { %12931 = vmatpush3.bf16.msra.mxu1 %v12928_v49 }
0x2e11   :  { %v4814_v40 = vpop.xlane.xlu0 %4813 }
0x2e12   :  { %v4816_v51 = vmul.f32 0.03125, %v4814_v40  ;;  %v4811_v35 = vpop.xlane.xlu1 %4810  ;;  %v12932_v40 = vpack.c.bf16 %v4966_v50, %v4965_v1 }
0x2e13   :  { %v4815_v15 = vmul.f32 0.03125, %v4811_v35  ;;  %v4968_v35 = vld [vmem:[#allocation2 + $0x860] sm:$0xff] }
0x2e14   :  { %v4818_v52 = vsub.f32 %v14748_v4, %v4816_v51  ;;  %v4967_v51 = vld [vmem:[#allocation2 + $0x858] sm:$0xff]  ;;  %12933 = vmatprep.subr.bf16.mxu1 %v12932_v40 }
0x2e15   :  { %v4817_v27 = vsub.f32 %v14751_v48, %v4815_v15  ;;  %v12936_v15 = vpack.c.bf16 %v4968_v35, %v4967_v51  ;;  %12935 = vmatpush3.bf16.msra.mxu1 %v12932_v40 }
0x2e16   :  { %v4820_v47 = vmul.f32 %v4818_v52, %v4818_v52 }
0x2e17   :  { %v4819_v53 = vmul.f32 %v4817_v27, %v4817_v27  ;;  %12937 = vmatprep.subr.bf16.mxu1 %v12936_v15 }
0x2e18   :  { %v4824_v46 = vsel %vm480_vm9, %v4820_v47, 0.0 }
0x2e19   :  { %v4821_v28 = vsel %vm480_vm9, %v4819_v53, 0.0  ;;  %12939 = vmatpush3.bf16.msra.mxu1 %v12936_v15 }
0x2e1a   :  { %4822 = vadd.xlane.f32.xlu0 %v4821_v28  ;;  %v10902_v28 = vld [vmem:[#allocation2 + $0x798] ss:$0 sm:$0xff] }
0x2e1e   :  { %4825 = vadd.xlane.f32.xlu0 %v4824_v46 }
0x2ea7   :  { %v4823_v6 = vpop.xlane.xlu0 %4822 }
0x2ea8   :  { %v4827_v5 = vmul.f32 0.03125, %v4823_v6 }
0x2eaa   :  { %v4829_v16 = vadd.f32 1e-05, %v4827_v5 }
0x2eab   :  { %v4826_v44 = vpop.xlane.xlu0 %4825 }
0x2eac   :  { %13730 = vrsqrt.f32 %v4829_v16  ;;  %v4828_v59 = vmul.f32 0.03125, %v4826_v44 }
0x2eae   :  { %v4830_v10 = vadd.f32 1e-05, %v4828_v59 }
0x2eb0   :  { %13732 = vrsqrt.f32 %v4830_v10 }
0x2eb6   :  { %v13731_v13 = vpop.eup %13730 }
0x2eb7   :  { %v4833_v22 = vmul.f32 %v13731_v13, %v4817_v27  ;;  %v4970_v27 = vld [vmem:[#allocation2 + $0x870] sm:$0xff] }
0x2eb9   :  { %v4839_v11 = vmul.f32 %v10900_v61, %v4833_v22 }
0x2eba   :  { %v13733_v14 = vpop.eup %13732 }
0x2ebb   :  { %v4834_v18 = vmul.f32 %v13733_v14, %v4818_v52  ;;  %v4845_v26 = vadd.f32 %v10901_v24, %v4839_v11  ;;  %v4969_v52 = vld [vmem:[#allocation2 + $0x868] sm:$0xff] }
0x2ebc   :  { %v12940_v53 = vpack.c.bf16 %v4970_v27, %v4969_v52  ;;  %v10906_v27 = vld [vmem:[#allocation2 + $0x8c0] ss:$0 sm:$0xff] }
0x2ebd   :  { %v4840_v20 = vmul.f32 %v10900_v61, %v4834_v18  ;;  %12059 = vmatprep.mubr.msk.f32.mxu0 %vm480_vm9, %v4845_v26  ;;  %v10905_v18 = vld [vmem:[#allocation2 + $0x7a0] ss:$0 sm:$0xff] }
0x2ebe   :  { %12941 = vmatprep.subr.bf16.mxu1 %v12940_v53 }
0x2ebf   :  { %v4846_v21 = vadd.f32 %v10901_v24, %v4840_v20  ;;  %12943 = vmatpush3.bf16.msra.mxu1 %v12940_v53 }
0x2ec1   :  { %12060 = vmatmul.mubr.msk.f32.vlgmr.msra.gmra.mrb[52].mxu0 %vm480_vm9, %v4846_v21 }
0x2f94   :  { %v12061_v47 = vpop.f32.mrb[52].mxu0 }
0x2f95   :  { %v4934_v46 = vadd.f32 %v12061_v47, %v10902_v28  ;;  %v4928_v54 = vpop.f32.mrb[53].mxu0  ;;  %v10907_v47 = vld [vmem:[#allocation2 + $0x8b8] ss:$0 sm:$0xff] }
0x2f96   :  { %v4929_v33 = vadd.f32 %v10902_v28, %v4928_v54 }
0x2f97   :  { %v4940_v55 = vmul.f32 0.044715, %v4934_v46  ;;  %v4938_v22 = vmul.f32 0.5, %v4934_v46 }
0x2f98   :  { %v4939_v62 = vmul.f32 0.044715, %v4929_v33  ;;  %v4937_v13 = vmul.f32 0.5, %v4929_v33 }
0x2f99   :  { %v4942_v0 = vmul.f32 %v4940_v55, %v4934_v46 }
0x2f9a   :  { %v4941_v12 = vmul.f32 %v4939_v62, %v4929_v33 }
0x2f9b   :  { %v4944_v29 = vmul.f32 %v4942_v0, %v4934_v46 }
0x2f9c   :  { %v4943_v2 = vmul.f32 %v4941_v12, %v4929_v33 }
0x2f9d   :  { %v4946_v17 = vadd.f32 %v4944_v29, %v4934_v46 }
0x2f9e   :  { %v4945_v6 = vadd.f32 %v4943_v2, %v4929_v33 }
0x2f9f   :  { %v4948_v5 = vmul.f32 0.7978846, %v4946_v17 }
0x2fa0   :  { %v4947_v16 = vmul.f32 0.7978846, %v4945_v6 }
0x2fa1   :  { %13734 = vtanh.f32 %v4948_v5 }
0x2fa2   :  { %13736 = vtanh.f32 %v4947_v16 }
0x2fab   :  { %v13735_v44 = vpop.eup %13734 }
0x2fac   :  { %v13737_v59 = vpop.eup %13736  ;;  %v4952_v10 = vadd.f32 1.0, %v13735_v44 }
0x2fad   :  { %v4951_v61 = vadd.f32 1.0, %v13737_v59 }
0x2fae   :  { %v4954_v11 = vmul.f32 %v4952_v10, %v4938_v22  ;;  %v5136_v22 = vld [vmem:[#allocation2 + $0x3c8] sm:$0xff] }
0x2faf   :  { %v4953_v24 = vmul.f32 %v4951_v61, %v4937_v13  ;;  %v5135_v61 = vld [vmem:[#allocation2 + $0x3c0] sm:$0xff] }
0x2fb1   :  { %12094 = vmatprep.mubr.f32.mxu1 %v4953_v24  ;;  %v5137_v24 = vld [vmem:[#allocation2 + $0x3d0] sm:$0xff] }
0x2fb2   :  { %12095 = vmatmul.mubr.f32.vlgmr.msra.gmra.mrb[42].mxu1 %v4954_v11  ;;  %v12944_v11 = vpack.c.bf16 %v5136_v22, %v5135_v61 }
0x2fb4   :  { %12945 = vmatprep.subr.bf16.mxu0 %v12944_v11 }
0x2fb5   :  { %12947 = vmatpush3.bf16.msra.mxu0 %v12944_v11 }
0x3085   :  { %v12096_v14 = vpop.f32.mrb[42].mxu1 }
0x3086   :  { %v5047_v26 = vadd.f32 %v12096_v14, %v14748_v4  ;;  %v5037_v20 = vpop.f32.mrb[43].mxu1  ;;  %v5138_v14 = vld [vmem:[#allocation2 + $0x3d8] sm:$0xff] }
0x3087   :  { %v5046_v21 = vadd.f32 %v5037_v20, %v14751_v48 }
0x3088   :  { %v5054_v43 = vadd.f32 %v10905_v18, %v5047_v26 }
0x3089   :  { %v5053_v39 = vadd.f32 %v10905_v18, %v5046_v21  ;;  %v12948_v18 = vpack.c.bf16 %v5138_v14, %v5137_v24 }
0x308a   :  { %v5060_v36 = vsel %vm480_vm9, %v5054_v43, 0.0 }
0x308b   :  { %5061 = vadd.xlane.f32.xlu0 %v5060_v36  ;;  %v5057_v30 = vsel %vm480_vm9, %v5053_v39, 0.0  ;;  %12949 = vmatprep.subr.bf16.mxu0 %v12948_v18 }
0x308c   :  { %5058 = vadd.xlane.f32.xlu1 %v5057_v30  ;;  %12951 = vmatpush3.bf16.msra.mxu0 %v12948_v18 }
0x3118   :  { %v5062_v41 = vpop.xlane.xlu0 %5061 }
0x3119   :  { %v5064_v32 = vmul.f32 0.03125, %v5062_v41  ;;  %v5059_v34 = vpop.xlane.xlu1 %5058  ;;  %v10908_v41 = vld [vmem:[#allocation2 + $0x2e8] ss:$0 sm:$0xff] }
0x311a   :  { %v5063_v37 = vmul.f32 0.03125, %v5059_v34 }
0x311b   :  { %v5066_v58 = vsub.f32 %v5054_v43, %v5064_v32 }
0x311c   :  { %v5065_v19 = vsub.f32 %v5053_v39, %v5063_v37 }
0x311d   :  { %v5068_v31 = vmul.f32 %v5066_v58, %v5066_v58 }
0x311e   :  { %v5067_v1 = vmul.f32 %v5065_v19, %v5065_v19 }
0x311f   :  { %v5072_v4 = vsel %vm480_vm9, %v5068_v31, 0.0 }
0x3120   :  { %5073 = vadd.xlane.f32.xlu0 %v5072_v4  ;;  %v5069_v48 = vsel %vm480_vm9, %v5067_v1, 0.0 }
0x3121   :  { %5070 = vadd.xlane.f32.xlu1 %v5069_v48  ;;  %v10910_v48 = vld [vmem:[#allocation2 + $0x2d8] ss:$0 sm:$0xff] }
0x31ad   :  { %v5074_v49 = vpop.xlane.xlu0 %5073 }
0x31ae   :  { %v5076_v50 = vmul.f32 0.03125, %v5074_v49  ;;  %v5071_v40 = vpop.xlane.xlu1 %5070 }
0x31af   :  { %v5075_v51 = vmul.f32 0.03125, %v5071_v40 }
0x31b0   :  { %v5078_v35 = vadd.f32 1e-05, %v5076_v50 }
0x31b1   :  { %v5077_v15 = vadd.f32 1e-05, %v5075_v51 }
0x31b2   :  { %13738 = vrsqrt.f32 %v5078_v35 }
0x31b3   :  { %13740 = vrsqrt.f32 %v5077_v15 }
0x31bc   :  { %v13739_v52 = vpop.eup %13738 }
0x31bd   :  { %v13741_v53 = vpop.eup %13740  ;;  %v5082_v28 = vmul.f32 %v13739_v52, %v5066_v58  ;;  %v10909_v58 = vld [vmem:[#allocation2 + $0x2e0] ss:$0 sm:$0xff] }
0x31be   :  { %v5081_v46 = vmul.f32 %v13741_v53, %v5065_v19 }
0x31bf   :  { %v5088_v54 = vmul.f32 %v10906_v27, %v5082_v28 }
0x31c0   :  { %v5087_v33 = vmul.f32 %v10906_v27, %v5081_v46 }
0x31c1   :  { %v14769_v55 = vadd.f32 %v10907_v47, %v5088_v54 }
0x31c2   :  { %v14771_v62 = vadd.f32 %v10907_v47, %v5087_v33 }
0x31c3   :  { %v5100_v0 = vsel %vm480_vm9, %v14769_v55, 0.0 }
0x31c4   :  { %5101 = vadd.xlane.f32.xlu0 %v5100_v0  ;;  %v5097_v12 = vsel %vm480_vm9, %v14771_v62, 0.0 }
0x31c5   :  { %5098 = vadd.xlane.f32.xlu1 %v5097_v12 }
0x3251   :  { %v5102_v29 = vpop.xlane.xlu0 %5101 }
0x3252   :  { %v5104_v2 = vmul.f32 0.03125, %v5102_v29  ;;  %v5099_v17 = vpop.xlane.xlu1 %5098 }
0x3253   :  { %v5103_v6 = vmul.f32 0.03125, %v5099_v17 }
0x3254   :  { %v5106_v5 = vsub.f32 %v14769_v55, %v5104_v2 }
0x3255   :  { %v5105_v16 = vsub.f32 %v14771_v62, %v5103_v6 }
0x3256   :  { %v5108_v44 = vmul.f32 %v5106_v5, %v5106_v5 }
0x3257   :  { %v5107_v59 = vmul.f32 %v5105_v16, %v5105_v16 }
0x3258   :  { %v5112_v10 = vsel %vm480_vm9, %v5108_v44, 0.0 }
0x3259   :  { %5113 = vadd.xlane.f32.xlu0 %v5112_v10  ;;  %v5109_v13 = vsel %vm480_vm9, %v5107_v59, 0.0 }
0x325a   :  { %5110 = vadd.xlane.f32.xlu1 %v5109_v13 }
0x32e6   :  { %v5114_v26 = vpop.xlane.xlu0 %5113 }
0x32e7   :  { %v5116_v20 = vmul.f32 0.03125, %v5114_v26  ;;  %v5111_v21 = vpop.xlane.xlu1 %5110 }
0x32e8   :  { %v5115_v43 = vmul.f32 0.03125, %v5111_v21 }
0x32e9   :  { %v5118_v39 = vadd.f32 1e-05, %v5116_v20 }
0x32ea   :  { %v5117_v36 = vadd.f32 1e-05, %v5115_v43 }
0x32eb   :  { %13742 = vrsqrt.f32 %v5118_v39 }
0x32ec   :  { %13744 = vrsqrt.f32 %v5117_v36 }
0x32f5   :  { %v13743_v30 = vpop.eup %13742 }
0x32f6   :  { %v13745_v32 = vpop.eup %13744  ;;  %v5122_v34 = vmul.f32 %v13743_v30, %v5106_v5 }
0x32f7   :  { %v5121_v37 = vmul.f32 %v13745_v32, %v5105_v16 }
0x32f8   :  { %v5128_v19 = vmul.f32 %v10908_v41, %v5122_v34 }
0x32f9   :  { %v5127_v31 = vmul.f32 %v10908_v41, %v5121_v37 }
0x32fa   :  { %v5134_v4 = vadd.f32 %v10909_v58, %v5128_v19 }
0x32fb   :  { %v5133_v1 = vadd.f32 %v10909_v58, %v5127_v31 }
0x32fd   :  { %12105 = vmatprep.mubr.msk.f32.mxu0 %vm480_vm9, %v5133_v1 }
0x32fe   :  { %12106 = vmatmul.mubr.msk.f32.vlgmr.msra.gmra.mrb[54].mxu0 %vm480_vm9, %v5134_v4 }
0x33d1   :  { %v12107_v49 = vpop.f32.mrb[54].mxu0 }
0x33d2   :  { %v14783_v50 = vadd.f32 %v12107_v49, %v10910_v48  ;;  %v5216_v40 = vpop.f32.mrb[55].mxu0 }
0x33d3   :  { %v14785_v51 = vadd.f32 %v10910_v48, %v5216_v40 }
0x33d5   :  { %12112 = vmatprep.mubr.msk.f32.mxu0 %vm1131_vm11, %v14785_v51  ;;  %v14791_v35 = vpack.i.bf16 %v14783_v50, %v14785_v51 }
0x33d7   :  { %13523 = vrot.lane.b32.xlu1 %v14791_v35, %s14009_s18 }
0x33db   :  { %13528 = vrot.lane.b32.xlu1 %v14791_v35, %s14016_s5 }
0x33df   :  { %5432 = vrot.lane.b32.xlu1 %v14785_v51, %s14003_s12 }
0x33e3   :  { %13538 = vrot.lane.b32.xlu1 %v14791_v35, %s14011_s24 }
0x33e7   :  { %5434 = vrot.lane.b32.xlu1 %v14783_v50, %s14003_s12 }
0x33eb   :  { %5636 = vrot.lane.b32.xlu1 %v14785_v51, %s14001_s10 }
0x33ef   :  { %5638 = vrot.lane.b32.xlu1 %v14783_v50, %s14001_s10 }
0x3449   :  { %v13524_v15 = vpop.permute.xlu1 %13523 }
0x344a   :  { %v13526_v52 = vunpack.i.h.bf16 %v13524_v15  ;;  %v13525_v27 = vunpack.i.l.bf16 %v13524_v15 }
0x344c   :  { %v12952_v53 = vpack.c.bf16 %v13526_v52, %v13525_v27 }
0x344d   :  { %v13529_v28 = vpop.permute.xlu1 %13528 }
0x344e   :  { %v13531_v47 = vunpack.i.h.bf16 %v13529_v28  ;;  %v13530_v46 = vunpack.i.l.bf16 %v13529_v28  ;;  %12954 = vmatprep.subr.msk.bf16.mxu0 %vm14298_vm13, %v12952_v53 }
0x344f   :  { %12957 = vmatpush3.bf16.xpose.msk.msra.mxu0 %vm14298_vm13, %v12952_v53 }
0x3450   :  { %v12958_v54 = vpack.c.bf16 %v13531_v47, %v13530_v46 }
0x3451   :  { %v5433_v33 = vpop.permute.xlu1 %5432 }
0x3452   :  { %12959 = vmatprep.subr.bf16.mxu0 %v12958_v54 }
0x3455   :  { %v13539_v0 = vpop.permute.xlu1 %13538 }
0x3456   :  { %v13541_v12 = vunpack.i.h.bf16 %v13539_v0  ;;  %v13540_v29 = vunpack.i.l.bf16 %v13539_v0  ;;  %12113 = vmatmul.mubr.msk.f32.vlgmr.msra.gmra.mrb[56].mxu0 %vm1131_vm11, %v14783_v50 }
0x3457   :  { %12961 = vmatpush3.bf16.msra.mxu0 %v12958_v54 }
0x3458   :  { %v12972_v2 = vpack.c.bf16 %v13541_v12, %v13540_v29 }
0x3459   :  { %v5435_v17 = vpop.permute.xlu1 %5434 }
0x345a   :  { %12974 = vmatprep.subr.msk.bf16.mxu1 %vm14298_vm13, %v12972_v2 }
0x345b   :  { %12977 = vmatpush3.bf16.xpose.msk.msra.mxu1 %vm14298_vm13, %v12972_v2 }
0x345d   :  { %v5637_v6 = vpop.permute.xlu1 %5636 }
0x345e   :  { %12140 = vmatprep.mubr.msk.f32.mxu1 %vm1131_vm11, %v5637_v6 }
0x3461   :  { %v5639_v5 = vpop.permute.xlu1 %5638 }
0x3462   :  { %12141 = vmatmul.mubr.msk.f32.vlgmr.msra.gmra.mrb[44].mxu1 %vm1131_vm11, %v5639_v5 }
0x3529   :  { %v12114_v16 = vpop.f32.mrb[56].mxu0 }
0x352a   :  { %v5310_v44 = vpop.f32.mrb[57].mxu0  ;;  %v5320_v59 = vmul.f32 0.35355338, %v12114_v16 }
0x352b   :  { %v5319_v10 = vmul.f32 0.35355338, %v5310_v44 }
0x352c   :  { %v5322_v61 = vadd.f32 %v5320_v59, %v14506_v23 }
0x352d   :  { %v5321_v13 = vadd.f32 %v5319_v10, %v14509_v25 }
0x352e   :  { %v5326_v24 = vsel %vm178_vm3, %v5322_v61, -inf }
0x352f   :  { %v5323_v22 = vsel %vm178_vm3, %v5321_v13, -inf }
0x3530   :  { %5324 = vmax.xlane.f32.xlu0 %v5323_v22 }
0x3534   :  { %5327 = vmax.xlane.f32.xlu0 %v5326_v24 }
0x3535   :  { %v12142_v11 = vpop.f32.mrb[44].mxu1 }
0x3536   :  { %v5718_v14 = vpop.f32.mrb[45].mxu1  ;;  %v5728_v12 = vmul.f32 0.35355338, %v12142_v11 }
0x3537   :  { %v5727_v53 = vmul.f32 0.35355338, %v5718_v14 }
0x3539   :  { %v5729_v29 = vadd.f32 %v5727_v53, %v14509_v25 }
0x353b   :  { %v5731_v6 = vsel %vm178_vm3, %v5729_v29, -inf }
0x35bd   :  { %v5325_v18 = vpop.xlane.xlu0 %5324 }
0x35be   :  { %v5329_v26 = vsub.f32 %v5321_v13, %v5325_v18 }
0x35c0   :  { %v5331_v43 = vmul.f32 1.442695, %v5329_v26 }
0x35c1   :  { %v5328_v20 = vpop.xlane.xlu0 %5327 }
0x35c2   :  { %v5330_v21 = vsub.f32 %v5322_v61, %v5328_v20 }
0x35c4   :  { %v5333_v39 = vmul.f32 1.442695, %v5330_v21 }
0x35c6   :  { %13746 = vpow2.f32 %v5333_v39 }
0x35c7   :  { %13748 = vpow2.f32 %v5331_v43 }
0x35d0   :  { %v13747_v36 = vpop.eup %13746 }
0x35d1   :  { %v5338_v30 = vsel %vm178_vm3, %v13747_v36, 0.0  ;;  %v13749_v41 = vpop.eup %13748 }
0x35d2   :  { %5339 = vadd.xlane.f32.xlu0 %v5338_v30  ;;  %v5335_v32 = vsel %vm178_vm3, %v13749_v41, 0.0 }
0x35d6   :  { %5336 = vadd.xlane.f32.xlu0 %v5335_v32 }
0x35ec   :  { %13533 = vrot.lane.b32.xlu0 %v14791_v35, %s14010_s22 }
0x365f   :  { %v5340_v34 = vpop.xlane.xlu0 %5339 }
0x3660   :  { %13750 = vrcp.f32 %v5340_v34 }
0x3663   :  { %v5337_v37 = vpop.xlane.xlu0 %5336 }
0x3664   :  { %13752 = vrcp.f32 %v5337_v37 }
0x3667   :  { %v13534_v58 = vpop.permute.xlu0 %13533 }
0x3668   :  { %v13536_v19 = vunpack.i.h.bf16 %v13534_v58  ;;  %v13535_v31 = vunpack.i.l.bf16 %v13534_v58 }
0x366a   :  { %v12962_v1 = vpack.c.bf16 %v13536_v19, %v13535_v31  ;;  %v13751_v4 = vpop.eup %13750 }
0x366b   :  { %v5344_v40 = vmul.f32 %v13751_v4, %v13747_v36 }
0x366c   :  { %12964 = vmatprep.subr.msk.bf16.mxu0 %vm14298_vm13, %v12962_v1 }
0x366e   :  { %v13753_v48 = vpop.eup %13752 }
0x366f   :  { %v5343_v49 = vmul.f32 %v13753_v48, %v13749_v41 }
0x3671   :  { %12119 = vmatprep.mubr.msk.f32.mxu0 %vm178_vm3, %v5343_v49 }
0x3672   :  { %12120 = vmatmul.mubr.msk.f32.vlgmr.msra.gmra.mrb[58].mxu0 %vm178_vm3, %v5344_v40 }
0x3673   :  { %12967 = vmatpush3.bf16.xpose.msk.msra.mxu0 %vm14298_vm13, %v12962_v1  ;;  %12126 = vmatprep.mubr.msk.f32.mxu0 %vm1131_vm11, %v5433_v33 }
0x367a   :  { %12127 = vmatmul.mubr.msk.f32.vlgmr.msra.gmra.mrb[60].mxu0 %vm1131_vm11, %v5435_v17  ;;  %v5730_v17 = vadd.f32 %v5728_v12, %v14506_v23 }
0x367c   :  { %v5734_v5 = vsel %vm178_vm3, %v5730_v17, -inf }
0x3745   :  { %v14835_v15 = vpop.f32.mrb[58].mxu0 }
0x3746   :  { %v14837_v52 = vpop.f32.mrb[59].mxu0 }
0x374d   :  { %v12128_v27 = vpop.f32.mrb[60].mxu0 }
0x374e   :  { %v5524_v28 = vmul.f32 0.35355338, %v12128_v27  ;;  %v5514_v47 = vpop.f32.mrb[61].mxu0 }
0x374f   :  { %v5523_v46 = vmul.f32 0.35355338, %v5514_v47 }
0x3750   :  { %v5526_v54 = vadd.f32 %v5524_v28, %v14506_v23 }
0x3751   :  { %v5525_v0 = vadd.f32 %v5523_v46, %v14509_v25 }
0x3752   :  { %v5530_v33 = vsel %vm178_vm3, %v5526_v54, -inf }
0x3753   :  { %5531 = vmax.xlane.f32.xlu0 %v5530_v33  ;;  %v5527_v2 = vsel %vm178_vm3, %v5525_v0, -inf }
0x3754   :  { %5528 = vmax.xlane.f32.xlu1 %v5527_v2 }
0x3757   :  { %5732 = vmax.xlane.f32.xlu0 %v5731_v6 }
0x375b   :  { %5735 = vmax.xlane.f32.xlu0 %v5734_v5 }
0x37e0   :  { %v5532_v16 = vpop.xlane.xlu0 %5531 }
0x37e1   :  { %v5534_v10 = vsub.f32 %v5526_v54, %v5532_v16  ;;  %v5529_v39 = vpop.xlane.xlu1 %5528 }
0x37e2   :  { %v5533_v36 = vsub.f32 %v5525_v0, %v5529_v39 }
0x37e3   :  { %v5537_v24 = vmul.f32 1.442695, %v5534_v10 }
0x37e4   :  { %v5733_v44 = vpop.xlane.xlu0 %5732  ;;  %v5535_v30 = vmul.f32 1.442695, %v5533_v36 }
0x37e5   :  { %v5737_v59 = vsub.f32 %v5729_v29, %v5733_v44 }
0x37e7   :  { %v5739_v13 = vmul.f32 1.442695, %v5737_v59 }
0x37e8   :  { %v5736_v61 = vpop.xlane.xlu0 %5735 }
0x37e9   :  { %13754 = vpow2.f32 %v5739_v13  ;;  %v5738_v22 = vsub.f32 %v5730_v17, %v5736_v61 }
0x37eb   :  { %v5741_v11 = vmul.f32 1.442695, %v5738_v22 }
0x37ed   :  { %13756 = vpow2.f32 %v5741_v11 }
0x37ee   :  { %13758 = vpow2.f32 %v5537_v24 }
0x37ef   :  { %13760 = vpow2.f32 %v5535_v30 }
0x37f3   :  { %v13755_v14 = vpop.eup %13754 }
0x37f4   :  { %v5743_v18 = vsel %vm178_vm3, %v13755_v14, 0.0 }
0x37f5   :  { %5744 = vadd.xlane.f32.xlu1 %v5743_v18 }
0x37f7   :  { %v13757_v26 = vpop.eup %13756 }
0x37f8   :  { %v5746_v20 = vsel %vm178_vm3, %v13757_v26, 0.0  ;;  %v13759_v21 = vpop.eup %13758 }
0x37f9   :  { %5747 = vadd.xlane.f32.xlu0 %v5746_v20  ;;  %v5542_v43 = vsel %vm178_vm3, %v13759_v21, 0.0  ;;  %v13761_v41 = vpop.eup %13760 }
0x37fa   :  { %v5539_v32 = vsel %vm178_vm3, %v13761_v41, 0.0 }
0x37fd   :  { %5543 = vadd.xlane.f32.xlu0 %v5542_v43 }
0x3806   :  { %13543 = vrot.lane.b32.xlu1 %v14791_v35, %s14017_s6 }
0x3813   :  { %13548 = vrot.lane.b32.xlu0 %v14791_v35, %s14018_s7 }
0x382a   :  { %5540 = vadd.xlane.f32.xlu1 %v5539_v32 }
0x383b   :  { %13553 = vrot.lane.b32.xlu1 %v14791_v35, %s14013_s29 }
0x383f   :  { %5840 = vrot.lane.b32.xlu1 %v14785_v51, %s14004_s13 }
0x3843   :  { %5842 = vrot.lane.b32.xlu1 %v14783_v50, %s14004_s13 }
0x3882   :  { %v5745_v34 = vpop.xlane.xlu1 %5744 }
0x3883   :  { %13762 = vrcp.f32 %v5745_v34 }
0x3886   :  { %v5748_v37 = vpop.xlane.xlu0 %5747  ;;  %v13544_v58 = vpop.permute.xlu1 %13543 }
0x3887   :  { %v13546_v19 = vunpack.i.h.bf16 %v13544_v58  ;;  %v13545_v31 = vunpack.i.l.bf16 %v13544_v58 }
0x3889   :  { %v12968_v1 = vpack.c.bf16 %v13546_v19, %v13545_v31 }
0x388a   :  { %v5544_v4 = vpop.xlane.xlu0 %5543 }
0x388b   :  { %12969 = vmatprep.subr.bf16.mxu0 %v12968_v1  ;;  %13764 = vrcp.f32 %v5544_v4 }
0x388c   :  { %12971 = vmatpush3.bf16.msra.mxu0 %v12968_v1 }
0x388d   :  { %v13763_v53 = vpop.eup %13762 }
0x388e   :  { %v13549_v48 = vpop.permute.xlu0 %13548  ;;  %v5751_v33 = vmul.f32 %v13763_v53, %v13755_v14  ;;  %v5227_v53 = vld [vmem:[#allocation2 + $0x3b0] sm:$0xff] }
0x388f   :  { %v13551_v49 = vunpack.i.h.bf16 %v13549_v48  ;;  %v13550_v40 = vunpack.i.l.bf16 %v13549_v48 }
0x3891   :  { %v12978_v27 = vpack.c.bf16 %v13551_v49, %v13550_v40 }
0x3893   :  { %12979 = vmatprep.subr.bf16.mxu0 %v12978_v27 }
0x3895   :  { %v13765_v28 = vpop.eup %13764 }
0x3896   :  { %v5548_v12 = vmul.f32 %v13765_v28, %v13759_v21 }
0x38b7   :  { %v5541_v51 = vpop.xlane.xlu1 %5540 }
0x38b8   :  { %13766 = vrcp.f32 %v5541_v51 }
0x38b9   :  { %13768 = vrcp.f32 %v5748_v37 }
0x38bb   :  { %v13554_v50 = vpop.permute.xlu1 %13553 }
0x38bc   :  { %v13556_v46 = vunpack.i.h.bf16 %v13554_v50  ;;  %v13555_v54 = vunpack.i.l.bf16 %v13554_v50  ;;  %v5226_v50 = vld [vmem:[#allocation2 + $0x3a8] sm:$0xff] }
0x38be   :  { %v12982_v2 = vpack.c.bf16 %v13556_v46, %v13555_v54 }
0x38bf   :  { %v5841_v6 = vpop.permute.xlu1 %5840 }
0x38c2   :  { %v13767_v47 = vpop.eup %13766 }
0x38c3   :  { %v5547_v0 = vmul.f32 %v13767_v47, %v13761_v41  ;;  %v13769_v29 = vpop.eup %13768  ;;  %v5843_v5 = vpop.permute.xlu1 %5842  ;;  %v5228_v47 = vld [vmem:[#allocation2 + $0x3b8] sm:$0xff] }
0x38c4   :  { %v5752_v17 = vmul.f32 %v13769_v29, %v13757_v26  ;;  %v12996_v46 = vpack.c.bf16 %v5228_v47, %v5227_v53  ;;  %v6310_v53 = vld [vmem:[#allocation2 + $0x328] sm:$0xff] }
0x38c5   :  { %12133 = vmatprep.mubr.msk.f32.mxu0 %vm178_vm3, %v5547_v0 }
0x38c6   :  { %12134 = vmatmul.mubr.msk.f32.vlgmr.msra.gmra.mrb[62].mxu0 %vm178_vm3, %v5548_v12 }
0x38c7   :  { %12981 = vmatpush3.bf16.msra.mxu0 %v12978_v27  ;;  %12147 = vmatprep.mubr.msk.f32.mxu0 %vm178_vm3, %v5751_v33 }
0x38c8   :  { %12984 = vmatprep.subr.msk.bf16.mxu0 %vm14298_vm13, %v12982_v2 }
0x38ca   :  { %12148 = vmatmul.mubr.msk.f32.vlgmr.msra.gmra.mrb[64].mxu0 %vm178_vm3, %v5752_v17 }
0x38cb   :  { %12154 = vmatprep.mubr.msk.f32.mxu0 %vm1131_vm11, %v5841_v6 }
0x38d0   :  { %12987 = vmatpush3.bf16.xpose.msk.msra.mxu0 %vm14298_vm13, %v12982_v2 }
0x38d7   :  { %12155 = vmatmul.mubr.msk.f32.vlgmr.msra.gmra.mrb[66].mxu0 %vm1131_vm11, %v5843_v5 }
0x3999   :  { %v12135_v16 = vpop.f32.mrb[62].mxu0 }
0x399a   :  { %v5627_v44 = vpop.f32.mrb[63].mxu0 }
0x399d   :  { %v12149_v59 = vpop.f32.mrb[64].mxu0 }
0x399e   :  { %v5831_v10 = vpop.f32.mrb[65].mxu0 }
0x39aa   :  { %v12156_v13 = vpop.f32.mrb[66].mxu0 }
0x39ab   :  { %v5932_v61 = vmul.f32 0.35355338, %v12156_v13  ;;  %v5922_v22 = vpop.f32.mrb[67].mxu0 }
0x39ac   :  { %v5931_v24 = vmul.f32 0.35355338, %v5922_v22 }
0x39ad   :  { %v5934_v11 = vadd.f32 %v5932_v61, %v14506_v23  ;;  %v10937_v61 = vld [vmem:[#allocation2 + $0x2d0] ss:$0 sm:$0xff] }
0x39ae   :  { %v5933_v14 = vadd.f32 %v5931_v24, %v14509_v25 }
0x39af   :  { %v5938_v18 = vsel %vm178_vm3, %v5934_v11, -inf }
0x39b0   :  { %5939 = vmax.xlane.f32.xlu1 %v5938_v18  ;;  %v5935_v26 = vsel %vm178_vm3, %v5933_v14, -inf }
0x39b1   :  { %5936 = vmax.xlane.f32.xlu0 %v5935_v26 }
0x39c1   :  { %6046 = vrot.lane.b32.xlu1 %v5627_v44, %s13994_s23 }
0x39c5   :  { %6048 = vrot.lane.b32.xlu1 %v12135_v16, %s13994_s23 }
0x39c9   :  { %6054 = vrot.lane.b32.xlu1 %v5831_v10, %s14014_s30 }
0x3a3d   :  { %v5940_v20 = vpop.xlane.xlu1 %5939 }
0x3a3e   :  { %v5942_v21 = vsub.f32 %v5934_v11, %v5940_v20  ;;  %v5937_v43 = vpop.xlane.xlu0 %5936 }
0x3a3f   :  { %v5941_v39 = vsub.f32 %v5933_v14, %v5937_v43  ;;  %v10822_v14 = vld [vmem:[#allocation2 + $0x5d0] ss:$0 sm:$0xff] }
0x3a40   :  { %v5945_v36 = vmul.f32 1.442695, %v5942_v21  ;;  %v2300_v20 = vadd.f32 %v10822_v14, %v14460_v3 }
0x3a41   :  { %v5943_v30 = vmul.f32 1.442695, %v5941_v39  ;;  %v6047_v12 = vpop.permute.xlu1 %6046 }
0x3a42   :  { %13770 = vpow2.f32 %v5945_v36  ;;  %v6068_v17 = vsel %vm1131_vm11, %v14837_v52, %v6047_v12  ;;  %v2305_v43 = vsel %vm480_vm9, %v2300_v20, 0.0 }
0x3a43   :  { %13772 = vpow2.f32 %v5943_v30 }
0x3a45   :  { %v6049_v29 = vpop.permute.xlu1 %6048 }
0x3a46   :  { %v6069_v5 = vsel %vm1131_vm11, %v14835_v15, %v6049_v29 }
0x3a49   :  { %v6055_v2 = vpop.permute.xlu1 %6054 }
0x3a4a   :  { %v6070_v16 = vsel %vm178_vm3, %v6068_v17, %v6055_v2 }
0x3a4c   :  { %v13771_v41 = vpop.eup %13770 }
0x3a4d   :  { %v5950_v32 = vsel %vm178_vm3, %v13771_v41, 0.0  ;;  %v13773_v34 = vpop.eup %13772 }
0x3a4e   :  { %5951 = vadd.xlane.f32.xlu0 %v5950_v32  ;;  %v5947_v37 = vsel %vm178_vm3, %v13773_v34, 0.0 }
0x3a52   :  { %5948 = vadd.xlane.f32.xlu0 %v5947_v37 }
0x3a68   :  { %13558 = vrot.lane.b32.xlu0 %v14791_v35, %s14019_s8  ;;  %v5225_v35 = vld [vmem:[#allocation2 + $0x3a0] sm:$0xff] }
0x3a69   :  { %v12992_v28 = vpack.c.bf16 %v5226_v50, %v5225_v35  ;;  %v6309_v50 = vld [vmem:[#allocation2 + $0x320] sm:$0xff] }
0x3a6c   :  { %6056 = vrot.lane.b32.xlu0 %v12149_v59, %s14014_s30 }
0x3adb   :  { %v5952_v58 = vpop.xlane.xlu0 %5951 }
0x3adc   :  { %13774 = vrcp.f32 %v5952_v58 }
0x3adf   :  { %v5949_v19 = vpop.xlane.xlu0 %5948 }
0x3ae0   :  { %13776 = vrcp.f32 %v5949_v19 }
0x3ae3   :  { %v13559_v31 = vpop.permute.xlu0 %13558 }
0x3ae4   :  { %v13561_v1 = vunpack.i.h.bf16 %v13559_v31  ;;  %v13560_v4 = vunpack.i.l.bf16 %v13559_v31 }
0x3ae6   :  { %v12988_v48 = vpack.c.bf16 %v13561_v1, %v13560_v4  ;;  %v13775_v49 = vpop.eup %13774 }
0x3ae7   :  { %v5956_v51 = vmul.f32 %v13775_v49, %v13771_v41  ;;  %v6057_v33 = vpop.permute.xlu0 %6056  ;;  %v6202_v49 = vld [vmem:[#allocation2 + $0x308] sm:$0xff] }
0x3ae8   :  { %12989 = vmatprep.subr.bf16.mxu1 %v12988_v48  ;;  %v6071_v59 = vsel %vm178_vm3, %v6069_v5, %v6057_v33  ;;  %v10940_v5 = vld [vmem:[#allocation2 + $0x2f8] ss:$0 sm:$0xff] }
0x3ae9   :  { %12991 = vmatpush3.bf16.msra.mxu1 %v12988_v48  ;;  %v6201_v48 = vld [vmem:[#allocation2 + $0x300] sm:$0xff] }
0x3aea   :  { %v13777_v40 = vpop.eup %13776  ;;  %12993 = vmatprep.subr.bf16.mxu1 %v12992_v28 }
0x3aeb   :  { %v5955_v27 = vmul.f32 %v13777_v40, %v13773_v34  ;;  %v6203_v40 = vld [vmem:[#allocation2 + $0x310] sm:$0xff] }
0x3aed   :  { %12161 = vmatprep.mubr.msk.f32.mxu1 %vm178_vm3, %v5955_v27  ;;  %v13000_v27 = vpack.c.bf16 %v6202_v49, %v6201_v48  ;;  %v6322_v48 = vld [vmem:[#allocation2 + $0x388] sm:$0xff] }
0x3aee   :  { %12162 = vmatmul.mubr.msk.f32.vlgmr.msra.gmra.mrb[46].mxu1 %vm178_vm3, %v5956_v51  ;;  %v6204_v51 = vld [vmem:[#allocation2 + $0x318] sm:$0xff] }
0x3aef   :  { %12995 = vmatpush3.bf16.msra.mxu1 %v12992_v28  ;;  %v13004_v35 = vpack.c.bf16 %v6204_v51, %v6203_v40  ;;  %13001 = vmatprep.subr.bf16.mxu0 %v13000_v27  ;;  %v13008_v28 = vpack.c.bf16 %v6310_v53, %v6309_v50  ;;  %v6323_v40 = vld [vmem:[#allocation2 + $0x390] sm:$0xff] }
0x3af0   :  { %12997 = vmatprep.subr.bf16.mxu1 %v12996_v46  ;;  %13003 = vmatpush3.bf16.msra.mxu0 %v13000_v27  ;;  %v6324_v27 = vld [vmem:[#allocation2 + $0x398] sm:$0xff] }
0x3af1   :  { %13005 = vmatprep.subr.bf16.mxu0 %v13004_v35  ;;  %v13036_v51 = vpack.c.bf16 %v6324_v27, %v6323_v40  ;;  %v6474_v40 = vld [vmem:[#allocation2 + $0x138] sm:$0xff]  ;;  %v6475_v27 = vld [vmem:[#allocation2 + $0x140] sm:$0xff] }
0x3af3   :  { %12999 = vmatpush3.bf16.msra.mxu1 %v12996_v46 }
0x3af4   :  { %13007 = vmatpush3.bf16.msra.mxu0 %v13004_v35  ;;  %13009 = vmatprep.subr.bf16.mxu1 %v13008_v28  ;;  %v10942_v35 = vld [vmem:[#allocation2 + $0x2c0] ss:$0 sm:$0xff] }
0x3bc1   :  { %v12163_v54 = vpop.f32.mrb[46].mxu1 }
0x3bc2   :  { %6064 = vrot.lane.b32.xlu0 %v12163_v54, %s14015_s4  ;;  %v6035_v0 = vpop.f32.mrb[47].mxu1 }
0x3bc3   :  { %6062 = vrot.lane.b32.xlu1 %v6035_v0, %s14015_s4 }
0x3c34   :  { %v6065_v6 = vpop.permute.xlu0 %6064 }
0x3c35   :  { %v6063_v44 = vpop.permute.xlu1 %6062  ;;  %v6073_v13 = vsel %vm2224_vm5, %v6071_v59, %v6065_v6 }
0x3c36   :  { %v6072_v10 = vsel %vm2224_vm5, %v6070_v16, %v6063_v44  ;;  %v10941_v44 = vld [vmem:[#allocation2 + $0x2f0] ss:$0 sm:$0xff] }
0x3c37   :  { %12172 = vmatprep.mubr.msk.f32.mxu1 %vm480_vm9, %v6072_v10 }
0x3c38   :  { %12173 = vmatmul.mubr.msk.f32.vlgmr.msra.gmra.mrb[48].mxu1 %vm480_vm9, %v6073_v13 }
0x3c39   :  { %13011 = vmatpush3.bf16.msra.mxu1 %v13008_v28 }
0x3d0b   :  { %v12174_v22 = vpop.f32.mrb[48].mxu1 }
0x3d0c   :  { %v6156_v52 = vadd.f32 %v12174_v22, %v10937_v61  ;;  %v6150_v24 = vpop.f32.mrb[49].mxu1 }
0x3d0d   :  { %v6151_v11 = vadd.f32 %v10937_v61, %v6150_v24  ;;  %v10824_v24 = vld [vmem:[#allocation2 + $0x528] ss:$0 sm:$0xff] }
0x3d0e   :  { %v14898_v15 = vadd.f32 %v6156_v52, %v14769_v55 }
0x3d0f   :  { %v14901_v18 = vadd.f32 %v6151_v11, %v14771_v62 }
0x3d10   :  { %v6166_v26 = vsel %vm480_vm9, %v14898_v15, 0.0 }
0x3d11   :  { %6167 = vadd.xlane.f32.xlu0 %v6166_v26  ;;  %v6163_v21 = vsel %vm480_vm9, %v14901_v18, 0.0  ;;  %v10825_v26 = vld [vmem:[#allocation2 + $0x520] ss:$0 sm:$0xff] }
0x3d12   :  { %6164 = vadd.xlane.f32.xlu1 %v6163_v21 }
0x3d16   :  { %2306 = vadd.xlane.f32.xlu1 %v2305_v43  ;;  %v6311_v43 = vld [vmem:[#allocation2 + $0x330] sm:$0xff] }
0x3d9e   :  { %v6168_v39 = vpop.xlane.xlu0 %6167 }
0x3d9f   :  { %v6170_v36 = vmul.f32 0.03125, %v6168_v39  ;;  %v6165_v55 = vpop.xlane.xlu1 %6164  ;;  %v6312_v39 = vld [vmem:[#allocation2 + $0x338] sm:$0xff] }
0x3da0   :  { %v6169_v30 = vmul.f32 0.03125, %v6165_v55  ;;  %v6313_v55 = vld [vmem:[#allocation2 + $0x340] sm:$0xff] }
0x3da1   :  { %v6172_v62 = vsub.f32 %v14898_v15, %v6170_v36  ;;  %v13012_v36 = vpack.c.bf16 %v6312_v39, %v6311_v43 }
0x3da2   :  { %v6171_v41 = vsub.f32 %v14901_v18, %v6169_v30  ;;  %v6314_v30 = vld [vmem:[#allocation2 + $0x348] sm:$0xff] }
0x3da3   :  { %v2307_v32 = vpop.xlane.xlu1 %2306  ;;  %v6174_v19 = vmul.f32 %v6172_v62, %v6172_v62  ;;  %13013 = vmatprep.subr.bf16.mxu1 %v13012_v36 }
0x3da4   :  { %v2308_v34 = vmul.f32 0.03125, %v2307_v32  ;;  %v6173_v37 = vmul.f32 %v6171_v41, %v6171_v41  ;;  %13015 = vmatpush3.bf16.msra.mxu1 %v13012_v36  ;;  %v6316_v32 = vld [vmem:[#allocation2 + $0x358] sm:$0xff] }
0x3da5   :  { %v6178_v31 = vsel %vm480_vm9, %v6174_v19, 0.0 }
0x3da6   :  { %v2309_v3 = vsub.f32 %v2300_v20, %v2308_v34  ;;  %v6175_v58 = vsel %vm480_vm9, %v6173_v37, 0.0  ;;  %v6317_v37 = vld [vmem:[#allocation2 + $0x360] sm:$0xff] }
0x3da7   :  { %6176 = vadd.xlane.f32.xlu0 %v6175_v58  ;;  %v6319_v58 = vld [vmem:[#allocation2 + $0x370] sm:$0xff] }
0x3da8   :  { %v2310_v1 = vmul.f32 %v2309_v3, %v2309_v3 }
0x3daa   :  { %v2311_v4 = vsel %vm480_vm9, %v2310_v1, 0.0 }
0x3dab   :  { %6179 = vadd.xlane.f32.xlu0 %v6178_v31  ;;  %v6320_v31 = vld [vmem:[#allocation2 + $0x378] sm:$0xff] }
0x3dac   :  { %v13028_v1 = vpack.c.bf16 %v6320_v31, %v6319_v58 }
0x3daf   :  { %2312 = vadd.xlane.f32.xlu0 %v2311_v4  ;;  %v6321_v4 = vld [vmem:[#allocation2 + $0x380] sm:$0xff] }
0x3db0   :  { %v13032_v49 = vpack.c.bf16 %v6322_v48, %v6321_v4 }
0x3e34   :  { %v6177_v47 = vpop.xlane.xlu0 %6176 }
0x3e35   :  { %v6181_v46 = vmul.f32 0.03125, %v6177_v47 }
0x3e37   :  { %v6183_v54 = vadd.f32 1e-05, %v6181_v46 }
0x3e38   :  { %v6180_v0 = vpop.xlane.xlu0 %6179 }
0x3e39   :  { %13778 = vrsqrt.f32 %v6183_v54  ;;  %v6182_v12 = vmul.f32 0.03125, %v6180_v0 }
0x3e3b   :  { %v6184_v29 = vadd.f32 1e-05, %v6182_v12 }
0x3e3c   :  { %v2313_v33 = vpop.xlane.xlu0 %2312 }
0x3e3d   :  { %13780 = vrsqrt.f32 %v6184_v29  ;;  %v2314_v2 = vmul.f32 0.03125, %v2313_v33 }
0x3e3f   :  { %v2315_v17 = vadd.f32 1e-05, %v2314_v2 }
0x3e41   :  { %13782 = vrsqrt.f32 %v2315_v17 }
0x3e43   :  { %v13779_v6 = vpop.eup %13778 }
0x3e44   :  { %v6187_v16 = vmul.f32 %v13779_v6, %v6171_v41  ;;  %v6315_v41 = vld [vmem:[#allocation2 + $0x350] sm:$0xff] }
0x3e45   :  { %v13020_v34 = vpack.c.bf16 %v6316_v32, %v6315_v41 }
0x3e46   :  { %v6193_v59 = vmul.f32 %v10940_v5, %v6187_v16 }
0x3e47   :  { %v13781_v10 = vpop.eup %13780 }
0x3e48   :  { %v6188_v13 = vmul.f32 %v13781_v10, %v6172_v62  ;;  %v6199_v61 = vadd.f32 %v10941_v44, %v6193_v59  ;;  %v13016_v62 = vpack.c.bf16 %v6314_v30, %v6313_v55 }
0x3e4a   :  { %v6194_v22 = vmul.f32 %v10940_v5, %v6188_v13  ;;  %12183 = vmatprep.mubr.msk.f32.mxu0 %vm480_vm9, %v6199_v61  ;;  %13017 = vmatprep.subr.bf16.mxu1 %v13016_v62 }
0x3e4b   :  { %v13783_v52 = vpop.eup %13782  ;;  %13019 = vmatpush3.bf16.msra.mxu1 %v13016_v62 }
0x3e4c   :  { %v6200_v11 = vadd.f32 %v10941_v44, %v6194_v22  ;;  %v2317_v14 = vmul.f32 %v13783_v52, %v2309_v3  ;;  %v6318_v3 = vld [vmem:[#allocation2 + $0x368] sm:$0xff]  ;;  %13021 = vmatprep.subr.bf16.mxu1 %v13020_v34 }
0x3e4d   :  { %v13024_v19 = vpack.c.bf16 %v6318_v3, %v6317_v37 }
0x3e4e   :  { %12184 = vmatmul.mubr.msk.f32.vlgmr.msra.gmra.mrb[68].mxu0 %vm480_vm9, %v6200_v11  ;;  %v2322_v20 = vmul.f32 %v10824_v24, %v2317_v14  ;;  %v10945_v11 = vld [vmem:[#allocation2 + $0x2c8] ss:$0 sm:$0xff] }
0x3e4f   :  { %13023 = vmatpush3.bf16.msra.mxu1 %v13020_v34 }
0x3e50   :  { %v14916_v21 = vadd.f32 %v10825_v26, %v2322_v20  ;;  %13025 = vmatprep.subr.bf16.mxu1 %v13024_v19 }
0x3e52   :  { %2328 = vst.msk [vmem:[%s15406_s3] sm:$0xff] %vm480_vm9, %v14916_v21  ;;  %v6451_v30 = vsel %vm480_vm9, %v14916_v21, 0.0 }
0x3e53   :  { %13027 = vmatpush3.bf16.msra.mxu1 %v13024_v19 }
0x3e54   :  { %13029 = vmatprep.subr.bf16.mxu1 %v13028_v1 }
0x3e57   :  { %13031 = vmatpush3.bf16.msra.mxu1 %v13028_v1 }
0x3e58   :  { %13033 = vmatprep.subr.bf16.mxu1 %v13032_v49 }
0x3e5b   :  { %13035 = vmatpush3.bf16.msra.mxu1 %v13032_v49 }
0x3e5c   :  { %13037 = vmatprep.subr.bf16.mxu1 %v13036_v51 }
0x3e5f   :  { %13039 = vmatpush3.bf16.msra.mxu1 %v13036_v51  ;;  %v13040_v51 = vpack.c.bf16 %v6475_v27, %v6474_v40 }
0x3e61   :  { %13041 = vmatprep.subr.bf16.mxu0 %v13040_v51 }
0x3e62   :  { %13043 = vmatpush3.bf16.msra.mxu0 %v13040_v51 }
0x3f21   :  { %v12185_v50 = vpop.f32.mrb[68].mxu0 }
0x3f22   :  { %v6288_v53 = vadd.f32 %v12185_v50, %v10942_v35  ;;  %v6282_v28 = vpop.f32.mrb[69].mxu0  ;;  %v6477_v50 = vld [vmem:[#allocation2 + $0x150] sm:$0xff] }
0x3f23   :  { %v6283_v47 = vadd.f32 %v10942_v35, %v6282_v28  ;;  %v6476_v35 = vld [vmem:[#allocation2 + $0x148] sm:$0xff] }
0x3f24   :  { %v6294_v46 = vmul.f32 0.044715, %v6288_v53  ;;  %v6292_v61 = vmul.f32 0.5, %v6288_v53 }
0x3f25   :  { %v6293_v54 = vmul.f32 0.044715, %v6283_v47  ;;  %v6291_v10 = vmul.f32 0.5, %v6283_v47 }
0x3f26   :  { %v6296_v0 = vmul.f32 %v6294_v46, %v6288_v53 }
0x3f27   :  { %v6295_v12 = vmul.f32 %v6293_v54, %v6283_v47 }
0x3f28   :  { %v6298_v29 = vmul.f32 %v6296_v0, %v6288_v53 }
0x3f29   :  { %v6297_v33 = vmul.f32 %v6295_v12, %v6283_v47 }
0x3f2a   :  { %v6300_v2 = vadd.f32 %v6298_v29, %v6288_v53  ;;  %v13044_v53 = vpack.c.bf16 %v6477_v50, %v6476_v35 }
0x3f2b   :  { %v6299_v17 = vadd.f32 %v6297_v33, %v6283_v47 }
0x3f2c   :  { %v6302_v6 = vmul.f32 0.7978846, %v6300_v2  ;;  %13045 = vmatprep.subr.bf16.mxu0 %v13044_v53 }
0x3f2d   :  { %v6301_v5 = vmul.f32 0.7978846, %v6299_v17  ;;  %13047 = vmatpush3.bf16.msra.mxu0 %v13044_v53  ;;  %v10946_v17 = vld [vmem:[#allocation2 + $0x30] ss:$0 sm:$0xff] }
0x3f2e   :  { %13784 = vtanh.f32 %v6302_v6  ;;  %13048 = vmatprep.subr.bf16.mxu0 %v13996_v38 }
0x3f2f   :  { %13786 = vtanh.f32 %v6301_v5 }
0x3f38   :  { %v13785_v16 = vpop.eup %13784 }
0x3f39   :  { %v13787_v44 = vpop.eup %13786  ;;  %v6306_v59 = vadd.f32 1.0, %v13785_v16 }
0x3f3a   :  { %v6305_v13 = vadd.f32 1.0, %v13787_v44  ;;  %v10947_v44 = vld [vmem:[#allocation2 + $0x28] ss:$0 sm:$0xff] }
0x3f3b   :  { %v6308_v52 = vmul.f32 %v6306_v59, %v6292_v61 }
0x3f3c   :  { %v6307_v22 = vmul.f32 %v6305_v13, %v6291_v10  ;;  %v6564_v10 = vld [vmem:[#allocation2 + $0xf8] sm:$0xff]  ;;  %v6565_v13 = vld [vmem:[#allocation2 + $0x100] sm:$0xff] }
0x3f3e   :  { %12218 = vmatprep.mubr.f32.mxu1 %v6307_v22 }
0x3f3f   :  { %12219 = vmatmul.mubr.f32.vlgmr.msra.gmra.mrb[50].mxu1 %v6308_v52 }
0x4012   :  { %v12220_v24 = vpop.f32.mrb[50].mxu1 }
0x4013   :  { %v6401_v14 = vadd.f32 %v12220_v24, %v14898_v15  ;;  %v6391_v26 = vpop.f32.mrb[51].mxu1  ;;  %v13049_v24 = vpack.c.bf16 %v6565_v13, %v6564_v10 }
0x4014   :  { %v6400_v20 = vadd.f32 %v6391_v26, %v14901_v18  ;;  %v6566_v26 = vld [vmem:[#allocation2 + $0x108] sm:$0xff] }
0x4015   :  { %v14925_v43 = vadd.f32 %v10945_v11, %v6401_v14 }
0x4016   :  { %v14927_v39 = vadd.f32 %v10945_v11, %v6400_v20  ;;  %v6567_v20 = vld [vmem:[#allocation2 + $0x110] sm:$0xff] }
0x4017   :  { %v6414_v36 = vsel %vm480_vm9, %v14925_v43, 0.0 }
0x4018   :  { %6415 = vadd.xlane.f32.xlu0 %v6414_v36  ;;  %v6411_v55 = vsel %vm480_vm9, %v14927_v39, 0.0  ;;  %v10948_v36 = vld [vmem:[#allocation2 + $0x50] ss:$0 sm:$0xff] }
0x4019   :  { %6412 = vadd.xlane.f32.xlu1 %v6411_v55  ;;  %v13052_v55 = vpack.c.bf16 %v6567_v20, %v6566_v26 }
0x401d   :  { %6452 = vadd.xlane.f32.xlu1 %v6451_v30 }
0x40a5   :  { %v6416_v15 = vpop.xlane.xlu0 %6415 }
0x40a6   :  { %v6418_v62 = vmul.f32 0.03125, %v6416_v15  ;;  %v6413_v41 = vpop.xlane.xlu1 %6412  ;;  %v10949_v15 = vld [vmem:[#allocation2 + $0x48] ss:$0 sm:$0xff] }
0x40a7   :  { %v6417_v18 = vmul.f32 0.03125, %v6413_v41  ;;  %v10950_v41 = vld [vmem:[#allocation2 + $0x20] ss:$0 sm:$0xff] }
0x40a8   :  { %v6420_v32 = vsub.f32 %v14925_v43, %v6418_v62 }
0x40a9   :  { %v6419_v34 = vsub.f32 %v14927_v39, %v6417_v18 }
0x40aa   :  { %v6453_v37 = vpop.xlane.xlu1 %6452  ;;  %v6422_v3 = vmul.f32 %v6420_v32, %v6420_v32 }
0x40ab   :  { %v6454_v58 = vmul.f32 0.03125, %v6453_v37  ;;  %v6421_v19 = vmul.f32 %v6419_v34, %v6419_v34  ;;  %v10953_v37 = vld [vmem:[#allocation2 + $0x10] ss:$0 sm:$0xff] }
0x40ac   :  { %v6426_v31 = vsel %vm480_vm9, %v6422_v3, 0.0 }
0x40ad   :  { %v6455_v1 = vsub.f32 %v14916_v21, %v6454_v58  ;;  %6427 = vadd.xlane.f32.xlu1 %v6426_v31  ;;  %v6423_v4 = vsel %vm480_vm9, %v6421_v19, 0.0 }
0x40ae   :  { %6424 = vadd.xlane.f32.xlu0 %v6423_v4 }
0x40af   :  { %v6456_v48 = vmul.f32 %v6455_v1, %v6455_v1 }
0x40b1   :  { %v6457_v49 = vsel %vm480_vm9, %v6456_v48, 0.0 }
0x40b2   :  { %6458 = vadd.xlane.f32.xlu0 %v6457_v49 }
0x413a   :  { %v6428_v21 = vpop.xlane.xlu1 %6427 }
0x413b   :  { %v6430_v28 = vmul.f32 0.03125, %v6428_v21  ;;  %v6425_v47 = vpop.xlane.xlu0 %6424 }
0x413c   :  { %v6429_v46 = vmul.f32 0.03125, %v6425_v47 }
0x413d   :  { %v6432_v54 = vadd.f32 1e-05, %v6430_v28 }
0x413e   :  { %v6431_v0 = vadd.f32 1e-05, %v6429_v46 }
0x413f   :  { %13788 = vrsqrt.f32 %v6432_v54  ;;  %v6459_v12 = vpop.xlane.xlu0 %6458 }
0x4140   :  { %13790 = vrsqrt.f32 %v6431_v0  ;;  %v6460_v29 = vmul.f32 0.03125, %v6459_v12 }
0x4142   :  { %v6461_v33 = vadd.f32 1e-05, %v6460_v29 }
0x4144   :  { %13792 = vrsqrt.f32 %v6461_v33 }
0x4149   :  { %v13789_v2 = vpop.eup %13788 }
0x414a   :  { %v13791_v6 = vpop.eup %13790  ;;  %v6436_v5 = vmul.f32 %v13789_v2, %v6420_v32 }
0x414b   :  { %v6435_v16 = vmul.f32 %v13791_v6, %v6419_v34 }
0x414c   :  { %v6442_v59 = vmul.f32 %v10946_v17, %v6436_v5 }
0x414d   :  { %v6441_v61 = vmul.f32 %v10946_v17, %v6435_v16 }
0x414e   :  { %v13793_v22 = vpop.eup %13792  ;;  %v6448_v14 = vadd.f32 %v10947_v44, %v6442_v59 }
0x414f   :  { %v6447_v52 = vadd.f32 %v10947_v44, %v6441_v61  ;;  %v14942_v11 = vmul.f32 %v13793_v22, %v6455_v1  ;;  %v69_v1 = vshra.s32 %v14164_v56, 2 }
0x4151   :  { %12229 = vmatprep.mubr.msk.f32.mxu0 %vm480_vm9, %v6447_v52  ;;  %v6468_v30 = vmul.f32 %v10948_v36, %v14942_v11  ;;  %vm71_vm0 = vcmp.eq.s32.totalorder %v56_v8, %v69_v1  ;;  %vm70_vm1 = vcmp.eq.s32.totalorder %v55_v63, %v69_v1 }
0x4152   :  { %12230 = vmatmul.mubr.msk.f32.vlgmr.msra.gmra.mrb[70].mxu0 %vm480_vm9, %v6448_v14  ;;  %v14965_v4 = vsel %vm71_vm0, 0.0, %v14000_v60  ;;  %v14968_v40 = vsel %vm70_vm1, 0.0, %v14000_v60 }
0x4153   :  { %13050 = vmatpush3.bf16.msra.mxu0 %v13049_v24  ;;  %12240 = vmatprep.mubr.msk.f32.mxu0 %vm13997_vm2, %v13998_v42  ;;  %v6473_v62 = vadd.f32 %v10949_v15, %v6468_v30 }
0x4154   :  { %13051 = vmatprep.subr.bf16.mxu0 %v13996_v38 }
0x4157   :  { %13053 = vmatpush3.bf16.msra.mxu0 %v13052_v55 }
0x415a   :  { %12241 = vmatmul.mubr.msk.f32.vlgmr.msra.gmra.mrb[72].mxu0 %vm480_vm9, %v6473_v62 }
0x4225   :  { %v12231_v18 = vpop.f32.mrb[70].mxu0 }
0x4226   :  { %v6555_v32 = vpop.f32.mrb[71].mxu0  ;;  %v6561_v31 = vadd.f32 %v12231_v18, %v10950_v41 }
0x4227   :  { %v6556_v34 = vadd.f32 %v10950_v41, %v6555_v32 }
0x4229   :  { %12245 = vmatprep.mubr.msk.f32.mxu0 %vm1131_vm11, %v6556_v34 }
0x422d   :  { %v6642_v3 = vpop.f32.mrb[72].mxu0 }
0x422e   :  { %v14952_v58 = vadd.f32 %v10953_v37, %v6642_v3  ;;  %v12242_v19 = vpop.f32.mrb[73].mxu0 }
0x4230   :  { %12243 = vmatprep.subr.msk.mxu0 %vm1131_vm11, %v14952_v58 }
0x4231   :  { %12244 = vmatpush3.xpose.msk.msra.mxu0 %vm1131_vm11, %v14952_v58 }
0x4234   :  { %12246 = vmatmul.mubr.msk.f32.vlgmr.msra.gmra.mrb[74].mxu0 %vm1131_vm11, %v6561_v31 }
0x4307   :  { %v12247_v48 = vpop.f32.mrb[74].mxu0 }
0x4308   :  { %v6736_v49 = vmul.f32 0.35355338, %v12247_v48  ;;  %v6726_v27 = vpop.f32.mrb[75].mxu0 }
0x4309   :  { %v6735_v51 = vmul.f32 0.35355338, %v6726_v27 }
0x430a   :  { %v6738_v35 = vadd.f32 %v6736_v49, %v14965_v4 }
0x430b   :  { %v6737_v50 = vadd.f32 %v6735_v51, %v14968_v40 }
0x430c   :  { %v6742_v7 = vsel %vm1131_vm11, %v6738_v35, -inf }
0x430d   :  { %6743 = vmax.xlane.f32.xlu0 %v6742_v7  ;;  %v6739_v8 = vsel %vm1131_vm11, %v6737_v50, -inf }
0x430e   :  { %6740 = vmax.xlane.f32.xlu1 %v6739_v8 }
0x431f   :  { %6761 = vrot.lane.b32.xlu1 %v14952_v58, %s14009_s18 }
0x4323   :  { %6849 = vrot.lane.b32.xlu0 %v14952_v58, %s14003_s12  ;;  %6845 = vrot.lane.b32.xlu1 %v6556_v34, %s14003_s12 }
0x4327   :  { %6847 = vrot.lane.b32.xlu1 %v6561_v31, %s14003_s12 }
0x432b   :  { %7046 = vrot.lane.b32.xlu1 %v14952_v58, %s14001_s10 }
0x439a   :  { %v6744_v60 = vpop.xlane.xlu0 %6743 }
0x439b   :  { %v6746_v63 = vsub.f32 %v6738_v35, %v6744_v60  ;;  %v6741_v53 = vpop.xlane.xlu1 %6740 }
0x439c   :  { %v6745_v21 = vsub.f32 %v6737_v50, %v6741_v53 }
0x439d   :  { %v6749_v28 = vmul.f32 1.442695, %v6746_v63 }
0x439e   :  { %v6747_v47 = vmul.f32 1.442695, %v6745_v21  ;;  %v6850_v54 = vpop.permute.xlu0 %6849 }
0x439f   :  { %13794 = vpow2.f32 %v6749_v28  ;;  %v6762_v46 = vpop.permute.xlu1 %6761 }
0x43a0   :  { %13796 = vpow2.f32 %v6747_v47  ;;  %12248 = vmatprep.subr.mxu0 %v6762_v46 }
0x43a1   :  { %12249 = vmatpush3.msra.mxu0 %v6762_v46 }
0x43a2   :  { %12253 = vmatprep.subr.msk.mxu0 %vm1131_vm11, %v6850_v54 }
0x43a3   :  { %v6846_v0 = vpop.permute.xlu1 %6845 }
0x43a7   :  { %v6848_v12 = vpop.permute.xlu1 %6847 }
0x43a9   :  { %v13795_v29 = vpop.eup %13794 }
0x43aa   :  { %v13797_v33 = vpop.eup %13796  ;;  %v6754_v2 = vsel %vm1131_vm11, %v13795_v29, 0.0 }
0x43ab   :  { %6755 = vadd.xlane.f32.xlu0 %v6754_v2  ;;  %v7047_v17 = vpop.permute.xlu1 %7046  ;;  %v6751_v6 = vsel %vm1131_vm11, %v13797_v33, 0.0 }
0x43ac   :  { %6752 = vadd.xlane.f32.xlu1 %v6751_v6  ;;  %12263 = vmatprep.subr.msk.mxu1 %vm1131_vm11, %v7047_v17 }
0x43ad   :  { %12264 = vmatpush3.xpose.msk.msra.mxu1 %vm1131_vm11, %v7047_v17 }
0x43bd   :  { %7044 = vrot.lane.b32.xlu1 %v6561_v31, %s14001_s10 }
0x43c1   :  { %7042 = vrot.lane.b32.xlu0 %v6556_v34, %s14001_s10  ;;  %7239 = vrot.lane.b32.xlu1 %v6556_v34, %s14004_s13 }
0x43c5   :  { %7243 = vrot.lane.b32.xlu0 %v14952_v58, %s14004_s13 }
0x43c9   :  { %7241 = vrot.lane.b32.xlu0 %v6561_v31, %s14004_s13 }
0x4438   :  { %v6756_v5 = vpop.xlane.xlu0 %6755 }
0x4439   :  { %13798 = vrcp.f32 %v6756_v5  ;;  %v6753_v16 = vpop.xlane.xlu1 %6752 }
0x443a   :  { %13800 = vrcp.f32 %v6753_v16 }
0x443c   :  { %v7043_v44 = vpop.permute.xlu0 %7042 }
0x443d   :  { %12265 = vmatprep.mubr.msk.f32.mxu1 %vm1131_vm11, %v7043_v44  ;;  %v7045_v59 = vpop.permute.xlu1 %7044 }
0x443e   :  { %12266 = vmatmul.mubr.msk.f32.vlgmr.msra.gmra.mrb[52].mxu1 %vm1131_vm11, %v7045_v59 }
0x4440   :  { %v7244_v10 = vpop.permute.xlu0 %7243 }
0x4441   :  { %12273 = vmatprep.subr.msk.mxu1 %vm1131_vm11, %v7244_v10  ;;  %v7240_v13 = vpop.permute.xlu1 %7239 }
0x4442   :  { %12274 = vmatpush3.xpose.msk.msra.mxu1 %vm1131_vm11, %v7244_v10  ;;  %12275 = vmatprep.mubr.msk.f32.mxu1 %vm1131_vm11, %v7240_v13 }
0x4443   :  { %v13799_v61 = vpop.eup %13798 }
0x4444   :  { %v13801_v22 = vpop.eup %13800  ;;  %v7242_v52 = vpop.permute.xlu0 %7241  ;;  %v6760_v14 = vmul.f32 %v13799_v61, %v13795_v29 }
0x4445   :  { %12276 = vmatmul.mubr.msk.f32.vlgmr.msra.gmra.mrb[54].mxu1 %vm1131_vm11, %v7242_v52  ;;  %v6759_v24 = vmul.f32 %v13801_v22, %v13797_v33 }
0x4447   :  { %12250 = vmatprep.mubr.msk.f32.mxu0 %vm1131_vm11, %v6759_v24 }
0x4448   :  { %12251 = vmatmul.mubr.msk.f32.vlgmr.msra.gmra.mrb[76].mxu0 %vm1131_vm11, %v6760_v14 }
0x4449   :  { %12254 = vmatpush3.xpose.msk.msra.mxu0 %vm1131_vm11, %v6850_v54  ;;  %12255 = vmatprep.mubr.msk.f32.mxu0 %vm1131_vm11, %v6846_v0 }
0x444c   :  { %12256 = vmatmul.mubr.msk.f32.vlgmr.msra.gmra.mrb[78].mxu0 %vm1131_vm11, %v6848_v12 }
0x4511   :  { %v12267_v26 = vpop.f32.mrb[52].mxu1 }
0x4512   :  { %v7120_v20 = vpop.f32.mrb[53].mxu1  ;;  %v7130_v31 = vmul.f32 0.35355338, %v12267_v26 }
0x4513   :  { %v7129_v41 = vmul.f32 0.35355338, %v7120_v20 }
0x4514   :  { %v7132_v51 = vadd.f32 %v7130_v31, %v14965_v4 }
0x4515   :  { %v7131_v1 = vadd.f32 %v7129_v41, %v14968_v40 }
0x4516   :  { %v7136_v60 = vsel %vm1131_vm11, %v7132_v51, -inf }
0x4517   :  { %v7133_v50 = vsel %vm1131_vm11, %v7131_v1, -inf }
0x4518   :  { %v12277_v36 = vpop.f32.mrb[54].mxu1 }
0x4519   :  { %v7317_v55 = vpop.f32.mrb[55].mxu1  ;;  %v7327_v35 = vmul.f32 0.35355338, %v12277_v36 }
0x451a   :  { %v7326_v34 = vmul.f32 0.35355338, %v7317_v55 }
0x451b   :  { %v15004_v30 = vpop.f32.mrb[76].mxu0  ;;  %v7329_v8 = vadd.f32 %v7327_v35, %v14965_v4 }
0x451c   :  { %v15006_v15 = vpop.f32.mrb[77].mxu0  ;;  %v7328_v49 = vadd.f32 %v7326_v34, %v14968_v40 }
0x451d   :  { %v7333_v63 = vsel %vm1131_vm11, %v7329_v8, -inf }
0x451e   :  { %v7330_v7 = vsel %vm1131_vm11, %v7328_v49, -inf }
0x451f   :  { %v12257_v62 = vpop.f32.mrb[78].mxu0 }
0x4520   :  { %v6933_v18 = vmul.f32 0.35355338, %v12257_v62  ;;  %v6923_v32 = vpop.f32.mrb[79].mxu0 }
0x4521   :  { %v6932_v37 = vmul.f32 0.35355338, %v6923_v32 }
0x4522   :  { %v6935_v3 = vadd.f32 %v6933_v18, %v14965_v4 }
0x4523   :  { %v6934_v19 = vadd.f32 %v6932_v37, %v14968_v40 }
0x4524   :  { %v6939_v48 = vsel %vm1131_vm11, %v6935_v3, -inf }
0x4525   :  { %6940 = vmax.xlane.f32.xlu0 %v6939_v48  ;;  %v6936_v27 = vsel %vm1131_vm11, %v6934_v19, -inf }
0x4526   :  { %6937 = vmax.xlane.f32.xlu1 %v6936_v27 }
0x4529   :  { %7134 = vmax.xlane.f32.xlu0 %v7133_v50 }
0x452a   :  { %7331 = vmax.xlane.f32.xlu1 %v7330_v7 }
0x452d   :  { %7137 = vmax.xlane.f32.xlu0 %v7136_v60 }
0x4531   :  { %7334 = vmax.xlane.f32.xlu0 %v7333_v63 }
0x45b2   :  { %v6941_v53 = vpop.xlane.xlu0 %6940 }
0x45b3   :  { %v6938_v21 = vpop.xlane.xlu1 %6937  ;;  %v6943_v2 = vsub.f32 %v6935_v3, %v6941_v53 }
0x45b4   :  { %v6942_v36 = vsub.f32 %v6934_v19, %v6938_v21 }
0x45b5   :  { %v6946_v16 = vmul.f32 1.442695, %v6943_v2 }
0x45b6   :  { %v7135_v28 = vpop.xlane.xlu0 %7134  ;;  %v6944_v55 = vmul.f32 1.442695, %v6942_v36  ;;  %v10975_v36 = vld [vmem:[#allocation2 + $0x18] ss:$0 sm:$0xff] }
0x45b7   :  { %v7139_v47 = vsub.f32 %v7131_v1, %v7135_v28  ;;  %v7332_v46 = vpop.xlane.xlu1 %7331  ;;  %v6646_v28 = vld [vmem:[#allocation2 + $0x118] sm:$0xff] }
0x45b8   :  { %v7336_v54 = vsub.f32 %v7328_v49, %v7332_v46 }
0x45b9   :  { %v7141_v0 = vmul.f32 1.442695, %v7139_v47  ;;  %v6647_v47 = vld [vmem:[#allocation2 + $0x120] sm:$0xff] }
0x45ba   :  { %v7338_v12 = vmul.f32 1.442695, %v7336_v54  ;;  %v7138_v29 = vpop.xlane.xlu0 %7137  ;;  %v13054_v46 = vpack.c.bf16 %v6647_v47, %v6646_v28  ;;  %v6648_v54 = vld [vmem:[#allocation2 + $0x128] sm:$0xff] }
0x45bb   :  { %13802 = vpow2.f32 %v7141_v0  ;;  %v7140_v33 = vsub.f32 %v7132_v51, %v7138_v29  ;;  %v6649_v0 = vld [vmem:[#allocation2 + $0x130] sm:$0xff] }
0x45bc   :  { %13804 = vpow2.f32 %v7338_v12  ;;  %13055 = vmatprep.subr.bf16.mxu1 %v13054_v46  ;;  %v13058_v12 = vpack.c.bf16 %v6649_v0, %v6648_v54 }
0x45bd   :  { %v7143_v17 = vmul.f32 1.442695, %v7140_v33  ;;  %13057 = vmatpush3.bf16.msra.mxu1 %v13054_v46 }
0x45be   :  { %v7335_v6 = vpop.xlane.xlu0 %7334  ;;  %13059 = vmatprep.subr.bf16.mxu1 %v13058_v12 }
0x45bf   :  { %13806 = vpow2.f32 %v7143_v17  ;;  %v7337_v5 = vsub.f32 %v7329_v8, %v7335_v6 }
0x45c1   :  { %v7340_v44 = vmul.f32 1.442695, %v7337_v5  ;;  %13061 = vmatpush3.bf16.msra.mxu1 %v13058_v12 }
0x45c3   :  { %13808 = vpow2.f32 %v7340_v44 }
0x45c4   :  { %13810 = vpow2.f32 %v6946_v16 }
0x45c5   :  { %v13803_v59 = vpop.eup %13802  ;;  %13812 = vpow2.f32 %v6944_v55 }
0x45c6   :  { %v7145_v10 = vsel %vm1131_vm11, %v13803_v59, 0.0  ;;  %v13805_v13 = vpop.eup %13804 }
0x45c7   :  { %7146 = vadd.xlane.f32.xlu1 %v7145_v10  ;;  %v7342_v52 = vsel %vm1131_vm11, %v13805_v13, 0.0 }
0x45c9   :  { %v13807_v61 = vpop.eup %13806 }
0x45ca   :  { %v7148_v22 = vsel %vm1131_vm11, %v13807_v61, 0.0 }
0x45cb   :  { %7149 = vadd.xlane.f32.xlu0 %v7148_v22  ;;  %7343 = vadd.xlane.f32.xlu1 %v7342_v52 }
0x45cd   :  { %v13809_v24 = vpop.eup %13808 }
0x45ce   :  { %v7345_v14 = vsel %vm1131_vm11, %v13809_v24, 0.0  ;;  %v13811_v26 = vpop.eup %13810 }
0x45cf   :  { %7346 = vadd.xlane.f32.xlu0 %v7345_v14  ;;  %v6951_v20 = vsel %vm1131_vm11, %v13811_v26, 0.0  ;;  %v13813_v62 = vpop.eup %13812 }
0x45d0   :  { %v6948_v41 = vsel %vm1131_vm11, %v13813_v62, 0.0 }
0x45d3   :  { %6952 = vadd.xlane.f32.xlu0 %v6951_v20 }
0x45dc   :  { %6958 = vrot.lane.b32.xlu1 %v14952_v58, %s14010_s22 }
0x45e9   :  { %7155 = vrot.lane.b32.xlu0 %v14952_v58, %s14011_s24 }
0x4600   :  { %6949 = vadd.xlane.f32.xlu1 %v6948_v41 }
0x4611   :  { %7352 = vrot.lane.b32.xlu1 %v14952_v58, %s14013_s29 }
0x4654   :  { %v7147_v18 = vpop.xlane.xlu1 %7146 }
0x4655   :  { %13814 = vrcp.f32 %v7147_v18 }
0x4658   :  { %v7150_v32 = vpop.xlane.xlu0 %7149  ;;  %v7344_v34 = vpop.xlane.xlu1 %7343 }
0x465c   :  { %v7347_v37 = vpop.xlane.xlu0 %7346  ;;  %v6959_v3 = vpop.permute.xlu1 %6958 }
0x465d   :  { %12258 = vmatprep.subr.mxu0 %v6959_v3 }
0x465e   :  { %12259 = vmatpush3.msra.mxu0 %v6959_v3 }
0x465f   :  { %v13815_v48 = vpop.eup %13814 }
0x4660   :  { %v6953_v31 = vpop.xlane.xlu0 %6952  ;;  %v7153_v50 = vmul.f32 %v13815_v48, %v13803_v59 }
0x4661   :  { %13816 = vrcp.f32 %v6953_v31 }
0x4664   :  { %v7156_v1 = vpop.permute.xlu0 %7155 }
0x4665   :  { %12268 = vmatprep.subr.mxu0 %v7156_v1 }
0x466b   :  { %v13817_v49 = vpop.eup %13816 }
0x466c   :  { %v6957_v51 = vmul.f32 %v13817_v49, %v13811_v26 }
0x468d   :  { %v6950_v19 = vpop.xlane.xlu1 %6949 }
0x468e   :  { %13818 = vrcp.f32 %v6950_v19 }
0x468f   :  { %13820 = vrcp.f32 %v7150_v32 }
0x4690   :  { %13822 = vrcp.f32 %v7344_v34 }
0x4691   :  { %13824 = vrcp.f32 %v7347_v37  ;;  %v7353_v8 = vpop.permute.xlu1 %7352 }
0x4698   :  { %v13819_v58 = vpop.eup %13818 }
0x4699   :  { %v6956_v27 = vmul.f32 %v13819_v58, %v13813_v62  ;;  %v13821_v35 = vpop.eup %13820 }
0x469a   :  { %v13823_v7 = vpop.eup %13822  ;;  %v7154_v60 = vmul.f32 %v13821_v35, %v13807_v61  ;;  %v7595_v35 = vld [vmem:[#allocation2 + $0x68] sm:$0xff] }
0x469b   :  { %12260 = vmatprep.mubr.msk.f32.mxu0 %vm1131_vm11, %v6956_v27  ;;  %v13825_v63 = vpop.eup %13824  ;;  %v7350_v53 = vmul.f32 %v13823_v7, %v13805_v13  ;;  %v7593_v27 = vld [vmem:[#allocation2 + $0x58] sm:$0xff]  ;;  %v7596_v7 = vld [vmem:[#allocation2 + $0x70] sm:$0xff] }
0x469c   :  { %12261 = vmatmul.mubr.msk.f32.vlgmr.msra.gmra.mrb[80].mxu0 %vm1131_vm11, %v6957_v51  ;;  %v7351_v21 = vmul.f32 %v13825_v63, %v13809_v24  ;;  %v7594_v51 = vld [vmem:[#allocation2 + $0x60] sm:$0xff] }
0x469d   :  { %12269 = vmatpush3.msra.mxu0 %v7156_v1  ;;  %12270 = vmatprep.mubr.msk.f32.mxu0 %vm1131_vm11, %v7153_v50  ;;  %v13062_v50 = vpack.c.bf16 %v7594_v51, %v7593_v27  ;;  %v7702_v63 = vld [vmem:[#allocation2 + $0x80] sm:$0xff] }
0x469e   :  { %12278 = vmatprep.subr.mxu0 %v7353_v8 }
0x46a0   :  { %12271 = vmatmul.mubr.msk.f32.vlgmr.msra.gmra.mrb[82].mxu0 %vm1131_vm11, %v7154_v60  ;;  %v7701_v60 = vld [vmem:[#allocation2 + $0x78] sm:$0xff] }
0x46a1   :  { %12279 = vmatpush3.msra.mxu0 %v7353_v8  ;;  %12280 = vmatprep.mubr.msk.f32.mxu0 %vm1131_vm11, %v7350_v53  ;;  %v13066_v8 = vpack.c.bf16 %v7596_v7, %v7595_v35  ;;  %v13070_v53 = vpack.c.bf16 %v7702_v63, %v7701_v60 }
0x46a2   :  { %13063 = vmatprep.subr.bf16.mxu0 %v13062_v50 }
0x46a3   :  { %13071 = vmatprep.subr.bf16.mxu1 %v13070_v53 }
0x46a4   :  { %12281 = vmatmul.mubr.msk.f32.vlgmr.msra.gmra.mrb[84].mxu0 %vm1131_vm11, %v7351_v21 }
0x46a5   :  { %13065 = vmatpush3.bf16.msra.mxu0 %v13062_v50 }
0x46a6   :  { %13067 = vmatprep.subr.bf16.mxu0 %v13066_v8 }
0x46a9   :  { %13069 = vmatpush3.bf16.msra.mxu0 %v13066_v8 }
0x476f   :  { %v12262_v29 = vpop.f32.mrb[80].mxu0 }
0x4770   :  { %7440 = vrot.lane.b32.xlu1 %v12262_v29, %s13994_s23  ;;  %v7033_v33 = vpop.f32.mrb[81].mxu0  ;;  %v10978_v29 = vld [vmem:[#allocation2 + $0x40] ss:$0 sm:$0xff] }
0x4773   :  { %v12272_v2 = vpop.f32.mrb[82].mxu0 }
0x4774   :  { %7438 = vrot.lane.b32.xlu1 %v7033_v33, %s13994_s23  ;;  %v7230_v17 = vpop.f32.mrb[83].mxu0 }
0x4775   :  { %7446 = vrot.lane.b32.xlu0 %v7230_v17, %s14014_s30 }
0x4777   :  { %v12282_v6 = vpop.f32.mrb[84].mxu0 }
0x4778   :  { %7448 = vrot.lane.b32.xlu1 %v12272_v2, %s14014_s30  ;;  %v7427_v5 = vpop.f32.mrb[85].mxu0  ;;  %v10979_v2 = vld [vmem:[#allocation2 + $0x38] ss:$0 sm:$0xff] }
0x4779   :  { %7454 = vrot.lane.b32.xlu0 %v7427_v5, %s14015_s4 }
0x477c   :  { %7456 = vrot.lane.b32.xlu1 %v12282_v6, %s14015_s4 }
0x47e2   :  { %v7441_v16 = vpop.permute.xlu1 %7440 }
0x47e3   :  { %v7461_v24 = vsel %vm1131_vm11, %v15004_v30, %v7441_v16 }
0x47e6   :  { %v7439_v44 = vpop.permute.xlu1 %7438 }
0x47e7   :  { %v7447_v59 = vpop.permute.xlu0 %7446  ;;  %v7460_v10 = vsel %vm1131_vm11, %v15006_v15, %v7439_v44 }
0x47e8   :  { %v7462_v61 = vsel %vm178_vm3, %v7460_v10, %v7447_v59  ;;  %v7703_v10 = vld [vmem:[#allocation2 + $0x88] sm:$0xff] }
0x47ea   :  { %v7449_v13 = vpop.permute.xlu1 %7448 }
0x47eb   :  { %v7455_v22 = vpop.permute.xlu0 %7454  ;;  %v7463_v14 = vsel %vm178_vm3, %v7461_v24, %v7449_v13  ;;  %v7704_v13 = vld [vmem:[#allocation2 + $0x90] sm:$0xff] }
0x47ec   :  { %v7464_v52 = vsel %vm2224_vm5, %v7462_v61, %v7455_v22  ;;  %v13074_v61 = vpack.c.bf16 %v7704_v13, %v7703_v10  ;;  %v7705_v22 = vld [vmem:[#allocation2 + $0x98] sm:$0xff] }
0x47ed   :  { %12291 = vmatprep.mubr.msk.f32.mxu1 %vm480_vm9, %v7464_v52  ;;  %v7706_v52 = vld [vmem:[#allocation2 + $0xa0] sm:$0xff] }
0x47ee   :  { %v7457_v26 = vpop.permute.xlu1 %7456  ;;  %v13078_v24 = vpack.c.bf16 %v7706_v52, %v7705_v22 }
0x47ef   :  { %v7465_v20 = vsel %vm2224_vm5, %v7463_v14, %v7457_v26  ;;  %v7707_v14 = vld [vmem:[#allocation2 + $0xa8] sm:$0xff]  ;;  %v7708_v26 = vld [vmem:[#allocation2 + $0xb0] sm:$0xff] }
0x47f0   :  { %12292 = vmatmul.mubr.msk.f32.vlgmr.msra.gmra.mrb[56].mxu1 %vm480_vm9, %v7465_v20  ;;  %v13082_v20 = vpack.c.bf16 %v7708_v26, %v7707_v14 }
0x47f1   :  { %13073 = vmatpush3.bf16.msra.mxu1 %v13070_v53 }
0x47f2   :  { %13075 = vmatprep.subr.bf16.mxu1 %v13074_v61 }
0x47f5   :  { %13077 = vmatpush3.bf16.msra.mxu1 %v13074_v61 }
0x47f6   :  { %13079 = vmatprep.subr.bf16.mxu1 %v13078_v24 }
0x47f9   :  { %13081 = vmatpush3.bf16.msra.mxu1 %v13078_v24 }
0x47fa   :  { %13083 = vmatprep.subr.bf16.mxu1 %v13082_v20 }
0x47fd   :  { %13085 = vmatpush3.bf16.msra.mxu1 %v13082_v20 }
0x48c3   :  { %v12293_v15 = vpop.f32.mrb[56].mxu1 }
0x48c4   :  { %v7548_v55 = vadd.f32 %v12293_v15, %v10975_v36  ;;  %v7542_v62 = vpop.f32.mrb[57].mxu1  ;;  %v7710_v15 = vld [vmem:[#allocation2 + $0xc0] sm:$0xff] }
0x48c5   :  { %v7543_v41 = vadd.f32 %v10975_v36, %v7542_v62  ;;  %v7709_v36 = vld [vmem:[#allocation2 + $0xb8] sm:$0xff]  ;;  %v7711_v62 = vld [vmem:[#allocation2 + $0xc8] sm:$0xff] }
0x48c6   :  { %v15055_v18 = vadd.f32 %v7548_v55, %v14925_v43  ;;  %v13086_v55 = vpack.c.bf16 %v7710_v15, %v7709_v36  ;;  %v7841_v15 = vld [vmem:[#allocation2 + $0x4e0] sm:$0xff] }
0x48c7   :  { %v15058_v32 = vadd.f32 %v7543_v41, %v14927_v39  ;;  %v7712_v41 = vld [vmem:[#allocation2 + $0xd0] sm:$0xff] }
0x48c8   :  { %v7558_v30 = vsel %vm480_vm9, %v15055_v18, 0.0  ;;  %13087 = vmatprep.subr.bf16.mxu1 %v13086_v55 }
0x48c9   :  { %7559 = vadd.xlane.f32.xlu1 %v7558_v30  ;;  %v7555_v34 = vsel %vm480_vm9, %v15058_v32, 0.0  ;;  %v13090_v30 = vpack.c.bf16 %v7712_v41, %v7711_v62  ;;  %13089 = vmatpush3.bf16.msra.mxu1 %v13086_v55  ;;  %v7842_v55 = vld [vmem:[#allocation2 + $0x4e8] sm:$0xff]  ;;  %v7843_v62 = vld [vmem:[#allocation2 + $0x4f0] sm:$0xff] }
0x48ca   :  { %7556 = vadd.xlane.f32.xlu0 %v7555_v34  ;;  %v7713_v34 = vld [vmem:[#allocation2 + $0xd8] sm:$0xff]  ;;  %v13102_v41 = vpack.c.bf16 %v7842_v55, %v7841_v15 }
0x48cb   :  { %13091 = vmatprep.subr.bf16.mxu1 %v13090_v30 }
0x48cc   :  { %13103 = vmatprep.subr.bf16.mxu0 %v13102_v41 }
0x48cd   :  { %13093 = vmatpush3.bf16.msra.mxu1 %v13090_v30  ;;  %v7844_v30 = vld [vmem:[#allocation2 + $0x4f8] sm:$0xff] }
0x4956   :  { %v7560_v37 = vpop.xlane.xlu1 %7559 }
0x4957   :  { %v7562_v3 = vmul.f32 0.03125, %v7560_v37  ;;  %v7557_v31 = vpop.xlane.xlu0 %7556  ;;  %v7714_v37 = vld [vmem:[#allocation2 + $0xe0] sm:$0xff] }
0x4958   :  { %v7561_v1 = vmul.f32 0.03125, %v7557_v31  ;;  %v7715_v31 = vld [vmem:[#allocation2 + $0xe8] sm:$0xff] }
0x4959   :  { %v7564_v19 = vsub.f32 %v15055_v18, %v7562_v3  ;;  %v13094_v3 = vpack.c.bf16 %v7714_v37, %v7713_v34  ;;  %v13106_v34 = vpack.c.bf16 %v7844_v30, %v7843_v62 }
0x495a   :  { %v7563_v43 = vsub.f32 %v15058_v32, %v7561_v1  ;;  %v7716_v1 = vld [vmem:[#allocation2 + $0xf0] sm:$0xff] }
0x495b   :  { %v7566_v49 = vmul.f32 %v7564_v19, %v7564_v19  ;;  %13095 = vmatprep.subr.bf16.mxu1 %v13094_v3 }
0x495c   :  { %v7565_v48 = vmul.f32 %v7563_v43, %v7563_v43  ;;  %13097 = vmatpush3.bf16.msra.mxu1 %v13094_v3 }
0x495d   :  { %v7570_v58 = vsel %vm480_vm9, %v7566_v49, 0.0 }
0x495e   :  { %v7567_v39 = vsel %vm480_vm9, %v7565_v48, 0.0 }
0x495f   :  { %7568 = vadd.xlane.f32.xlu0 %v7567_v39 }
0x4963   :  { %7571 = vadd.xlane.f32.xlu0 %v7570_v58 }
0x49ec   :  { %v7569_v21 = vpop.xlane.xlu0 %7568 }
0x49ed   :  { %v7573_v28 = vmul.f32 0.03125, %v7569_v21 }
0x49ef   :  { %v7575_v47 = vadd.f32 1e-05, %v7573_v28 }
0x49f0   :  { %v7572_v46 = vpop.xlane.xlu0 %7571 }
0x49f1   :  { %13826 = vrsqrt.f32 %v7575_v47  ;;  %v7574_v54 = vmul.f32 0.03125, %v7572_v46 }
0x49f3   :  { %v7576_v0 = vadd.f32 1e-05, %v7574_v54 }
0x49f5   :  { %13828 = vrsqrt.f32 %v7576_v0 }
0x49fb   :  { %v13827_v12 = vpop.eup %13826 }
0x49fc   :  { %v7579_v33 = vmul.f32 %v13827_v12, %v7563_v43  ;;  %v10980_v43 = vld [vmem:[#allocation2] ss:$0 sm:$0xff] }
0x49fe   :  { %v7585_v17 = vmul.f32 %v10978_v29, %v7579_v33 }
0x49ff   :  { %v13829_v6 = vpop.eup %13828 }
0x4a00   :  { %v7580_v5 = vmul.f32 %v13829_v6, %v7564_v19  ;;  %v7591_v16 = vadd.f32 %v10979_v2, %v7585_v17  ;;  %v13098_v19 = vpack.c.bf16 %v7716_v1, %v7715_v31  ;;  %v10983_v17 = vld [vmem:[#allocation2 + $0x8] ss:$0 sm:$0xff] }
0x4a02   :  { %v7586_v44 = vmul.f32 %v10978_v29, %v7580_v5  ;;  %12302 = vmatprep.mubr.msk.f32.mxu0 %vm480_vm9, %v7591_v16  ;;  %13099 = vmatprep.subr.bf16.mxu1 %v13098_v19 }
0x4a03   :  { %13101 = vmatpush3.bf16.msra.mxu1 %v13098_v19 }
0x4a04   :  { %v7592_v59 = vadd.f32 %v10979_v2, %v7586_v44 }
0x4a06   :  { %12303 = vmatmul.mubr.msk.f32.vlgmr.msra.gmra.mrb[86].mxu0 %vm480_vm9, %v7592_v59 }
0x4a07   :  { %13105 = vmatpush3.bf16.msra.mxu0 %v13102_v41 }
0x4a08   :  { %13107 = vmatprep.subr.bf16.mxu0 %v13106_v34 }
0x4a0b   :  { %13109 = vmatpush3.bf16.msra.mxu0 %v13106_v34 }
0x4ad9   :  { %v12304_v48 = vpop.f32.mrb[86].mxu0 }
0x4ada   :  { %v7680_v39 = vadd.f32 %v12304_v48, %v10980_v43  ;;  %v7674_v49 = vpop.f32.mrb[87].mxu0 }
0x4adb   :  { %v7675_v58 = vadd.f32 %v10980_v43, %v7674_v49 }
0x4adc   :  { %v7686_v27 = vmul.f32 0.044715, %v7680_v39  ;;  %v7684_v12 = vmul.f32 0.5, %v7680_v39 }
0x4add   :  { %v7685_v51 = vmul.f32 0.044715, %v7675_v58  ;;  %v7683_v54 = vmul.f32 0.5, %v7675_v58 }
0x4ade   :  { %v7688_v35 = vmul.f32 %v7686_v27, %v7680_v39 }
0x4adf   :  { %v7687_v50 = vmul.f32 %v7685_v51, %v7675_v58  ;;  %v10985_v51 = vld [vmem:[#allocation2 + $0x400] ss:$0 sm:$0xff] }
0x4ae0   :  { %v7690_v7 = vmul.f32 %v7688_v35, %v7680_v39 }
0x4ae1   :  { %v7689_v8 = vmul.f32 %v7687_v50, %v7675_v58 }
0x4ae2   :  { %v7692_v60 = vadd.f32 %v7690_v7, %v7680_v39  ;;  %v10984_v39 = vld [vmem:[#allocation2 + $0x408] ss:$0 sm:$0xff] }
0x4ae3   :  { %v7691_v63 = vadd.f32 %v7689_v8, %v7675_v58 }
0x4ae4   :  { %v7694_v53 = vmul.f32 0.7978846, %v7692_v60  ;;  %v10986_v60 = vld [vmem:[#allocation2 + $0x3f8] ss:$0 sm:$0xff] }
0x4ae5   :  { %v7693_v21 = vmul.f32 0.7978846, %v7691_v63 }
0x4ae6   :  { %13830 = vtanh.f32 %v7694_v53 }
0x4ae7   :  { %13832 = vtanh.f32 %v7693_v21 }
0x4af0   :  { %v13831_v28 = vpop.eup %13830 }
0x4af1   :  { %v13833_v47 = vpop.eup %13832  ;;  %v7698_v46 = vadd.f32 1.0, %v13831_v28 }
0x4af2   :  { %v7697_v0 = vadd.f32 1.0, %v13833_v47 }
0x4af3   :  { %v7700_v33 = vmul.f32 %v7698_v46, %v7684_v12 }
0x4af4   :  { %v7699_v29 = vmul.f32 %v7697_v0, %v7683_v54 }
0x4af6   :  { %12337 = vmatprep.mubr.f32.mxu1 %v7699_v29 }
0x4af7   :  { %12338 = vmatmul.mubr.f32.vlgmr.msra.gmra.mrb[58].mxu1 %v7700_v33 }
0x4bca   :  { %v12339_v2 = vpop.f32.mrb[58].mxu1 }
0x4bcb   :  { %v7793_v6 = vadd.f32 %v12339_v2, %v15055_v18  ;;  %v7783_v5 = vpop.f32.mrb[59].mxu1 }
0x4bcc   :  { %v7792_v16 = vadd.f32 %v7783_v5, %v15058_v32 }
0x4bcd   :  { %v15072_v44 = vadd.f32 %v10983_v17, %v7793_v6 }
0x4bce   :  { %v15074_v59 = vadd.f32 %v10983_v17, %v7792_v16 }
0x4bcf   :  { %v7806_v10 = vsel %vm480_vm9, %v15072_v44, 0.0 }
0x4bd0   :  { %7807 = vadd.xlane.f32.xlu1 %v7806_v10  ;;  %v7803_v13 = vsel %vm480_vm9, %v15074_v59, 0.0 }
0x4bd1   :  { %7804 = vadd.xlane.f32.xlu0 %v7803_v13 }
0x4c5d   :  { %v7808_v61 = vpop.xlane.xlu1 %7807 }
0x4c5e   :  { %v7810_v22 = vmul.f32 0.03125, %v7808_v61  ;;  %v7805_v52 = vpop.xlane.xlu0 %7804 }
0x4c5f   :  { %v7809_v24 = vmul.f32 0.03125, %v7805_v52 }
0x4c60   :  { %v7812_v18 = vsub.f32 %v15072_v44, %v7810_v22 }
0x4c61   :  { %v7811_v32 = vsub.f32 %v15074_v59, %v7809_v24 }
0x4c62   :  { %v7814_v14 = vmul.f32 %v7812_v18, %v7812_v18 }
0x4c63   :  { %v7813_v26 = vmul.f32 %v7811_v32, %v7811_v32 }
0x4c64   :  { %v7818_v20 = vsel %vm480_vm9, %v7814_v14, 0.0 }
0x4c65   :  { %7819 = vadd.xlane.f32.xlu1 %v7818_v20  ;;  %v7815_v36 = vsel %vm480_vm9, %v7813_v26, 0.0 }
0x4c66   :  { %7816 = vadd.xlane.f32.xlu0 %v7815_v36 }
0x4cf2   :  { %v7820_v37 = vpop.xlane.xlu1 %7819 }
0x4cf3   :  { %v7822_v3 = vmul.f32 0.03125, %v7820_v37  ;;  %v7817_v31 = vpop.xlane.xlu0 %7816 }
0x4cf4   :  { %v7821_v1 = vmul.f32 0.03125, %v7817_v31 }
0x4cf5   :  { %v7824_v19 = vadd.f32 1e-05, %v7822_v3 }
0x4cf6   :  { %v7823_v43 = vadd.f32 1e-05, %v7821_v1 }
0x4cf7   :  { %13834 = vrsqrt.f32 %v7824_v19 }
0x4cf8   :  { %13836 = vrsqrt.f32 %v7823_v43 }
0x4d01   :  { %v13835_v48 = vpop.eup %13834 }
0x4d02   :  { %v13837_v49 = vpop.eup %13836  ;;  %v7828_v58 = vmul.f32 %v13835_v48, %v7812_v18 }
0x4d03   :  { %v7827_v27 = vmul.f32 %v13837_v49, %v7811_v32 }
0x4d04   :  { %v7834_v35 = vmul.f32 %v10984_v39, %v7828_v58 }
0x4d05   :  { %v7833_v50 = vmul.f32 %v10984_v39, %v7827_v27 }
0x4d06   :  { %v7840_v8 = vadd.f32 %v10985_v51, %v7834_v35 }
0x4d07   :  { %v7839_v7 = vadd.f32 %v10985_v51, %v7833_v50 }
0x4d09   :  { %12348 = vmatprep.mubr.msk.f32.mxu0 %vm480_vm9, %v7839_v7 }
0x4d0a   :  { %12349 = vmatmul.mubr.msk.f32.vlgmr.msra.gmra.mrb[88].mxu0 %vm480_vm9, %v7840_v8 }
0x4ddd   :  { %v12350_v63 = vpop.f32.mrb[88].mxu0 }
0x4dde   :  { %v15086_v53 = vadd.f32 %v12350_v63, %v10986_v60  ;;  %v7922_v21 = vpop.f32.mrb[89].mxu0 }
0x4ddf   :  { %v15088_v28 = vadd.f32 %v10986_v60, %v7922_v21 }
0x4de1   :  { %12355 = vmatprep.mubr.msk.f32.mxu0 %vm1131_vm11, %v15088_v28  ;;  %v15094_v47 = vpack.i.bf16 %v15086_v53, %v15088_v28 }
0x4de3   :  { %13563 = vrot.lane.b32.xlu0 %v15094_v47, %s14009_s18 }
0x4de7   :  { %13573 = vrot.lane.b32.xlu0 %v15094_v47, %s14010_s22 }
0x4deb   :  { %8138 = vrot.lane.b32.xlu0 %v15088_v28, %s14003_s12 }
0x4def   :  { %13578 = vrot.lane.b32.xlu0 %v15094_v47, %s14011_s24 }
0x4df3   :  { %8342 = vrot.lane.b32.xlu0 %v15088_v28, %s14001_s10 }
0x4e55   :  { %v13564_v46 = vpop.permute.xlu0 %13563 }
0x4e56   :  { %v13566_v54 = vunpack.i.h.bf16 %v13564_v46  ;;  %v13565_v0 = vunpack.i.l.bf16 %v13564_v46 }
0x4e58   :  { %v13110_v12 = vpack.c.bf16 %v13566_v54, %v13565_v0 }
0x4e59   :  { %v13574_v29 = vpop.permute.xlu0 %13573 }
0x4e5a   :  { %13112 = vmatprep.subr.msk.bf16.mxu0 %vm14298_vm13, %v13110_v12  ;;  %v13576_v62 = vunpack.i.h.bf16 %v13574_v29  ;;  %v13575_v30 = vunpack.i.l.bf16 %v13574_v29 }
0x4e5b   :  { %13115 = vmatpush3.bf16.xpose.msk.msra.mxu0 %vm14298_vm13, %v13110_v12 }
0x4e5c   :  { %v13120_v31 = vpack.c.bf16 %v13576_v62, %v13575_v30 }
0x4e5d   :  { %v8139_v33 = vpop.permute.xlu0 %8138 }
0x4e61   :  { %v13579_v2 = vpop.permute.xlu0 %13578 }
0x4e62   :  { %v13581_v17 = vunpack.i.h.bf16 %v13579_v2  ;;  %v13580_v6 = vunpack.i.l.bf16 %v13579_v2  ;;  %12356 = vmatmul.mubr.msk.f32.vlgmr.msra.gmra.mrb[90].mxu0 %vm1131_vm11, %v15086_v53 }
0x4e64   :  { %v13130_v5 = vpack.c.bf16 %v13581_v17, %v13580_v6 }
0x4e65   :  { %v8343_v16 = vpop.permute.xlu0 %8342 }
0x4e66   :  { %13132 = vmatprep.subr.msk.bf16.mxu1 %vm14298_vm13, %v13130_v5  ;;  %12383 = vmatprep.mubr.msk.f32.mxu1 %vm1131_vm11, %v8343_v16 }
0x4e67   :  { %13135 = vmatpush3.bf16.xpose.msk.msra.mxu1 %vm14298_vm13, %v13130_v5 }
0x4f35   :  { %v12357_v10 = vpop.f32.mrb[90].mxu0 }
0x4f36   :  { %v8016_v13 = vpop.f32.mrb[91].mxu0  ;;  %v8026_v61 = vmul.f32 0.35355338, %v12357_v10 }
0x4f37   :  { %v8025_v22 = vmul.f32 0.35355338, %v8016_v13 }
0x4f38   :  { %v8028_v24 = vadd.f32 %v8026_v61, %v14506_v23 }
0x4f39   :  { %v8027_v52 = vadd.f32 %v8025_v22, %v14509_v25 }
0x4f3a   :  { %v8032_v32 = vsel %vm178_vm3, %v8028_v24, -inf }
0x4f3b   :  { %v8029_v18 = vsel %vm178_vm3, %v8027_v52, -inf }
0x4f3c   :  { %8030 = vmax.xlane.f32.xlu1 %v8029_v18 }
0x4f40   :  { %8033 = vmax.xlane.f32.xlu1 %v8032_v32 }
0x4f51   :  { %13568 = vrot.lane.b32.xlu1 %v15094_v47, %s14016_s5 }
0x4fc9   :  { %v8031_v14 = vpop.xlane.xlu1 %8030 }
0x4fca   :  { %v8035_v26 = vsub.f32 %v8027_v52, %v8031_v14 }
0x4fcc   :  { %v8037_v15 = vmul.f32 1.442695, %v8035_v26 }
0x4fcd   :  { %v8034_v20 = vpop.xlane.xlu1 %8033 }
0x4fce   :  { %v8036_v36 = vsub.f32 %v8028_v24, %v8034_v20 }
0x4fd0   :  { %v8039_v55 = vmul.f32 1.442695, %v8036_v36 }
0x4fd1   :  { %v13569_v41 = vpop.permute.xlu1 %13568 }
0x4fd2   :  { %13838 = vpow2.f32 %v8039_v55  ;;  %v13571_v34 = vunpack.i.h.bf16 %v13569_v41  ;;  %v13570_v37 = vunpack.i.l.bf16 %v13569_v41 }
0x4fd3   :  { %13840 = vpow2.f32 %v8037_v15 }
0x4fd4   :  { %v13116_v3 = vpack.c.bf16 %v13571_v34, %v13570_v37 }
0x4fd6   :  { %13117 = vmatprep.subr.bf16.mxu0 %v13116_v3 }
0x4fd7   :  { %13119 = vmatpush3.bf16.msra.mxu0 %v13116_v3 }
0x4fd8   :  { %13122 = vmatprep.subr.msk.bf16.mxu0 %vm14298_vm13, %v13120_v31 }
0x4fdc   :  { %v13839_v1 = vpop.eup %13838 }
0x4fdd   :  { %v8044_v19 = vsel %vm178_vm3, %v13839_v1, 0.0  ;;  %v13841_v43 = vpop.eup %13840 }
0x4fde   :  { %8045 = vadd.xlane.f32.xlu1 %v8044_v19  ;;  %v8041_v48 = vsel %vm178_vm3, %v13841_v43, 0.0 }
0x4fe2   :  { %8042 = vadd.xlane.f32.xlu1 %v8041_v48 }
0x4ff3   :  { %8140 = vrot.lane.b32.xlu1 %v15086_v53, %s14003_s12 }
0x4ff7   :  { %8344 = vrot.lane.b32.xlu1 %v15086_v53, %s14001_s10 }
0x506b   :  { %v8046_v39 = vpop.xlane.xlu1 %8045 }
0x506c   :  { %13842 = vrcp.f32 %v8046_v39 }
0x506f   :  { %v8043_v49 = vpop.xlane.xlu1 %8042 }
0x5070   :  { %13844 = vrcp.f32 %v8043_v49 }
0x5073   :  { %v8141_v58 = vpop.permute.xlu1 %8140 }
0x5076   :  { %v13843_v51 = vpop.eup %13842 }
0x5077   :  { %v8345_v27 = vpop.permute.xlu1 %8344  ;;  %v8050_v7 = vmul.f32 %v13843_v51, %v13839_v1 }
0x5078   :  { %12384 = vmatmul.mubr.msk.f32.vlgmr.msra.gmra.mrb[60].mxu1 %vm1131_vm11, %v8345_v27 }
0x507a   :  { %v13845_v35 = vpop.eup %13844 }
0x507b   :  { %v8049_v50 = vmul.f32 %v13845_v35, %v13841_v43 }
0x507d   :  { %12362 = vmatprep.mubr.msk.f32.mxu0 %vm178_vm3, %v8049_v50 }
0x507e   :  { %12363 = vmatmul.mubr.msk.f32.vlgmr.msra.gmra.mrb[92].mxu0 %vm178_vm3, %v8050_v7 }
0x507f   :  { %13125 = vmatpush3.bf16.xpose.msk.msra.mxu0 %vm14298_vm13, %v13120_v31  ;;  %12369 = vmatprep.mubr.msk.f32.mxu0 %vm1131_vm11, %v8139_v33 }
0x5086   :  { %12370 = vmatmul.mubr.msk.f32.vlgmr.msra.gmra.mrb[94].mxu0 %vm1131_vm11, %v8141_v58 }
0x514b   :  { %v12385_v8 = vpop.f32.mrb[60].mxu1 }
0x514c   :  { %v8424_v60 = vpop.f32.mrb[61].mxu1  ;;  %v8434_v33 = vmul.f32 0.35355338, %v12385_v8 }
0x514d   :  { %v8433_v12 = vmul.f32 0.35355338, %v8424_v60 }
0x514e   :  { %v8436_v10 = vadd.f32 %v8434_v33, %v14506_v23 }
0x514f   :  { %v8435_v5 = vadd.f32 %v8433_v12, %v14509_v25 }
0x5150   :  { %v8440_v61 = vsel %vm178_vm3, %v8436_v10, -inf }
0x5151   :  { %v15138_v63 = vpop.f32.mrb[92].mxu0  ;;  %v8437_v13 = vsel %vm178_vm3, %v8435_v5, -inf }
0x5152   :  { %v15140_v21 = vpop.f32.mrb[93].mxu0 }
0x5159   :  { %v12371_v46 = vpop.f32.mrb[94].mxu0 }
0x515a   :  { %v8230_v54 = vmul.f32 0.35355338, %v12371_v46  ;;  %v8220_v0 = vpop.f32.mrb[95].mxu0 }
0x515b   :  { %v8229_v29 = vmul.f32 0.35355338, %v8220_v0 }
0x515c   :  { %v8232_v2 = vadd.f32 %v8230_v54, %v14506_v23 }
0x515d   :  { %v8231_v17 = vadd.f32 %v8229_v29, %v14509_v25 }
0x515e   :  { %v8236_v6 = vsel %vm178_vm3, %v8232_v2, -inf }
0x515f   :  { %8237 = vmax.xlane.f32.xlu1 %v8236_v6  ;;  %v8233_v16 = vsel %vm178_vm3, %v8231_v17, -inf }
0x5160   :  { %8234 = vmax.xlane.f32.xlu0 %v8233_v16 }
0x5164   :  { %8438 = vmax.xlane.f32.xlu0 %v8437_v13 }
0x5168   :  { %8441 = vmax.xlane.f32.xlu0 %v8440_v61 }
0x51ec   :  { %v8238_v24 = vpop.xlane.xlu1 %8237 }
0x51ed   :  { %v8235_v22 = vpop.xlane.xlu0 %8234  ;;  %v8240_v14 = vsub.f32 %v8232_v2, %v8238_v24 }
0x51ee   :  { %v8239_v52 = vsub.f32 %v8231_v17, %v8235_v22 }
0x51ef   :  { %v8243_v55 = vmul.f32 1.442695, %v8240_v14 }
0x51f0   :  { %v8241_v26 = vmul.f32 1.442695, %v8239_v52 }
0x51f1   :  { %v8439_v18 = vpop.xlane.xlu0 %8438 }
0x51f2   :  { %v8443_v32 = vsub.f32 %v8435_v5, %v8439_v18 }
0x51f4   :  { %v8445_v20 = vmul.f32 1.442695, %v8443_v32 }
0x51f5   :  { %v8442_v36 = vpop.xlane.xlu0 %8441 }
0x51f6   :  { %13846 = vpow2.f32 %v8445_v20  ;;  %v8444_v15 = vsub.f32 %v8436_v10, %v8442_v36 }
0x51f7   :  { %13848 = vpow2.f32 %v8241_v26 }
0x51f8   :  { %v8447_v62 = vmul.f32 1.442695, %v8444_v15 }
0x51fa   :  { %13850 = vpow2.f32 %v8447_v62 }
0x51fb   :  { %13852 = vpow2.f32 %v8243_v55 }
0x5200   :  { %v13847_v41 = vpop.eup %13846 }
0x5201   :  { %v8449_v30 = vsel %vm178_vm3, %v13847_v41, 0.0  ;;  %v13849_v34 = vpop.eup %13848 }
0x5202   :  { %8450 = vadd.xlane.f32.xlu0 %v8449_v30  ;;  %v8245_v3 = vsel %vm178_vm3, %v13849_v34, 0.0 }
0x5204   :  { %v13851_v37 = vpop.eup %13850 }
0x5205   :  { %v8452_v31 = vsel %vm178_vm3, %v13851_v37, 0.0  ;;  %v13853_v1 = vpop.eup %13852 }
0x5206   :  { %8246 = vadd.xlane.f32.xlu0 %v8245_v3  ;;  %8453 = vadd.xlane.f32.xlu1 %v8452_v31  ;;  %v8248_v19 = vsel %vm178_vm3, %v13853_v1, 0.0 }
0x520a   :  { %8249 = vadd.xlane.f32.xlu1 %v8248_v19 }
0x521b   :  { %13588 = vrot.lane.b32.xlu1 %v15094_v47, %s14018_s7 }
0x521c   :  { %13583 = vrot.lane.b32.xlu0 %v15094_v47, %s14017_s6 }
0x521f   :  { %13593 = vrot.lane.b32.xlu1 %v15094_v47, %s14013_s29 }
0x5220   :  { %8548 = vrot.lane.b32.xlu0 %v15086_v53, %s14004_s13 }
0x5223   :  { %8546 = vrot.lane.b32.xlu1 %v15088_v28, %s14004_s13 }
0x528f   :  { %v8451_v43 = vpop.xlane.xlu0 %8450 }
0x5293   :  { %v8454_v48 = vpop.xlane.xlu1 %8453  ;;  %v8247_v39 = vpop.xlane.xlu0 %8246 }
0x5294   :  { %13854 = vrcp.f32 %v8247_v39 }
0x5295   :  { %13856 = vrcp.f32 %v8451_v43 }
0x5297   :  { %v8250_v49 = vpop.xlane.xlu1 %8249  ;;  %v13584_v58 = vpop.permute.xlu0 %13583 }
0x5298   :  { %13858 = vrcp.f32 %v8250_v49  ;;  %v13586_v27 = vunpack.i.h.bf16 %v13584_v58  ;;  %v13585_v51 = vunpack.i.l.bf16 %v13584_v58 }
0x5299   :  { %13860 = vrcp.f32 %v8454_v48 }
0x529a   :  { %v13126_v35 = vpack.c.bf16 %v13586_v27, %v13585_v51  ;;  %v7931_v51 = vld [vmem:[#allocation2 + $0x4c0] sm:$0xff] }
0x529b   :  { %v13589_v50 = vpop.permute.xlu1 %13588  ;;  %v8549_v10 = vpop.permute.xlu0 %8548 }
0x529c   :  { %v13591_v7 = vunpack.i.h.bf16 %v13589_v50  ;;  %v13590_v8 = vunpack.i.l.bf16 %v13589_v50  ;;  %13127 = vmatprep.subr.bf16.mxu0 %v13126_v35  ;;  %v7933_v50 = vld [vmem:[#allocation2 + $0x4d0] sm:$0xff] }
0x529d   :  { %13129 = vmatpush3.bf16.msra.mxu0 %v13126_v35  ;;  %v7932_v35 = vld [vmem:[#allocation2 + $0x4c8] sm:$0xff] }
0x529e   :  { %v13136_v53 = vpack.c.bf16 %v13591_v7, %v13590_v8  ;;  %v13855_v60 = vpop.eup %13854  ;;  %v13150_v7 = vpack.c.bf16 %v7932_v35, %v7931_v51  ;;  %v7934_v8 = vld [vmem:[#allocation2 + $0x4d8] sm:$0xff]  ;;  %v11017_v35 = vld [vmem:[#allocation2 + $0x410] ss:$0 sm:$0xff] }
0x529f   :  { %v13594_v28 = vpop.permute.xlu1 %13593  ;;  %v8253_v46 = vmul.f32 %v13855_v60, %v13849_v34  ;;  %v13857_v54 = vpop.eup %13856 }
0x52a0   :  { %13137 = vmatprep.subr.bf16.mxu0 %v13136_v53  ;;  %v13596_v0 = vunpack.i.h.bf16 %v13594_v28  ;;  %v13595_v12 = vunpack.i.l.bf16 %v13594_v28  ;;  %v8457_v6 = vmul.f32 %v13857_v54, %v13847_v41 }
0x52a1   :  { %12376 = vmatprep.mubr.msk.f32.mxu0 %vm178_vm3, %v8253_v46 }
0x52a2   :  { %v13859_v29 = vpop.eup %13858  ;;  %v13140_v33 = vpack.c.bf16 %v13596_v0, %v13595_v12 }
0x52a3   :  { %v8254_v2 = vmul.f32 %v13859_v29, %v13853_v1  ;;  %v13861_v17 = vpop.eup %13860  ;;  %v8547_v16 = vpop.permute.xlu1 %8546 }
0x52a4   :  { %v8458_v5 = vmul.f32 %v13861_v17, %v13851_v37 }
0x52a5   :  { %12377 = vmatmul.mubr.msk.f32.vlgmr.msra.gmra.mrb[96].mxu0 %vm178_vm3, %v8254_v2 }
0x52a6   :  { %13139 = vmatpush3.bf16.msra.mxu0 %v13136_v53  ;;  %12390 = vmatprep.mubr.msk.f32.mxu0 %vm178_vm3, %v8457_v6  ;;  %v13154_v53 = vpack.c.bf16 %v7934_v8, %v7933_v50 }
0x52a7   :  { %13142 = vmatprep.subr.msk.bf16.mxu0 %vm14298_vm13, %v13140_v33 }
0x52a9   :  { %12391 = vmatmul.mubr.msk.f32.vlgmr.msra.gmra.mrb[98].mxu0 %vm178_vm3, %v8458_v5 }
0x52aa   :  { %12397 = vmatprep.mubr.msk.f32.mxu0 %vm1131_vm11, %v8547_v16 }
0x52af   :  { %13145 = vmatpush3.bf16.xpose.msk.msra.mxu0 %vm14298_vm13, %v13140_v33 }
0x52b6   :  { %12398 = vmatmul.mubr.msk.f32.vlgmr.msra.gmra.mrb[100].mxu0 %vm1131_vm11, %v8549_v10 }
0x5378   :  { %v12378_v13 = vpop.f32.mrb[96].mxu0 }
0x5379   :  { %v8333_v61 = vpop.f32.mrb[97].mxu0 }
0x537c   :  { %v12392_v22 = vpop.f32.mrb[98].mxu0 }
0x537d   :  { %v8537_v52 = vpop.f32.mrb[99].mxu0 }
0x5389   :  { %v12399_v24 = vpop.f32.mrb[100].mxu0 }
0x538a   :  { %v8638_v18 = vmul.f32 0.35355338, %v12399_v24  ;;  %v8628_v32 = vpop.f32.mrb[101].mxu0 }
0x538b   :  { %v8637_v14 = vmul.f32 0.35355338, %v8628_v32 }
0x538c   :  { %v8640_v26 = vadd.f32 %v8638_v18, %v14506_v23 }
0x538d   :  { %v8639_v20 = vadd.f32 %v8637_v14, %v14509_v25 }
0x538e   :  { %v8644_v36 = vsel %vm178_vm3, %v8640_v26, -inf }
0x538f   :  { %8645 = vmax.xlane.f32.xlu0 %v8644_v36  ;;  %v8641_v45 = vsel %vm178_vm3, %v8639_v20, -inf }
0x5390   :  { %8642 = vmax.xlane.f32.xlu1 %v8641_v45 }
0x53a1   :  { %13598 = vrot.lane.b32.xlu1 %v15094_v47, %s14019_s8 }
0x53a5   :  { %8754 = vrot.lane.b32.xlu1 %v12378_v13, %s13994_s23  ;;  %v11013_v13 = vld [vmem:[#allocation2 + $0x3f0] ss:$0 sm:$0xff] }
0x53a9   :  { %8760 = vrot.lane.b32.xlu1 %v8537_v52, %s14014_s30 }
0x53ad   :  { %8762 = vrot.lane.b32.xlu1 %v12392_v22, %s14014_s30 }
0x541c   :  { %v8646_v15 = vpop.xlane.xlu0 %8645 }
0x541d   :  { %v8648_v55 = vsub.f32 %v8640_v26, %v8646_v15  ;;  %v8643_v23 = vpop.xlane.xlu1 %8642 }
0x541e   :  { %v8647_v62 = vsub.f32 %v8639_v20, %v8643_v23 }
0x541f   :  { %v8651_v25 = vmul.f32 1.442695, %v8648_v55 }
0x5420   :  { %v8649_v41 = vmul.f32 1.442695, %v8647_v62  ;;  %v8907_v62 = vld [vmem:[#allocation2 + $0x420] sm:$0xff] }
0x5421   :  { %v13599_v30 = vpop.permute.xlu1 %13598 }
0x5422   :  { %13862 = vpow2.f32 %v8649_v41  ;;  %v13601_v34 = vunpack.i.h.bf16 %v13599_v30  ;;  %v13600_v37 = vunpack.i.l.bf16 %v13599_v30  ;;  %v8909_v30 = vld [vmem:[#allocation2 + $0x430] sm:$0xff] }
0x5423   :  { %13864 = vpow2.f32 %v8651_v25  ;;  %v8908_v25 = vld [vmem:[#allocation2 + $0x428] sm:$0xff] }
0x5424   :  { %v13146_v3 = vpack.c.bf16 %v13601_v34, %v13600_v37  ;;  %v13158_v41 = vpack.c.bf16 %v8908_v25, %v8907_v62  ;;  %v8910_v34 = vld [vmem:[#allocation2 + $0x438] sm:$0xff] }
0x5425   :  { %v8755_v46 = vpop.permute.xlu1 %8754  ;;  %v13162_v37 = vpack.c.bf16 %v8910_v34, %v8909_v30 }
0x5426   :  { %13147 = vmatprep.subr.bf16.mxu1 %v13146_v3  ;;  %v8775_v17 = vsel %vm1131_vm11, %v15138_v63, %v8755_v46  ;;  %13159 = vmatprep.subr.bf16.mxu0 %v13158_v41  ;;  %v9017_v46 = vld [vmem:[#allocation2 + $0x450] sm:$0xff] }
0x5427   :  { %13149 = vmatpush3.bf16.msra.mxu1 %v13146_v3  ;;  %13161 = vmatpush3.bf16.msra.mxu0 %v13158_v41  ;;  %v9015_v3 = vld [vmem:[#allocation2 + $0x440] sm:$0xff] }
0x5428   :  { %13151 = vmatprep.subr.bf16.mxu1 %v13150_v7  ;;  %13163 = vmatprep.subr.bf16.mxu0 %v13162_v37 }
0x5429   :  { %v8761_v54 = vpop.permute.xlu1 %8760 }
0x542b   :  { %13165 = vmatpush3.bf16.msra.mxu0 %v13162_v37 }
0x542c   :  { %v13863_v47 = vpop.eup %13862 }
0x542d   :  { %v8653_v31 = vsel %vm178_vm3, %v13863_v47, 0.0  ;;  %v13865_v1 = vpop.eup %13864  ;;  %v8763_v12 = vpop.permute.xlu1 %8762 }
0x542e   :  { %8654 = vadd.xlane.f32.xlu0 %v8653_v31  ;;  %v8656_v19 = vsel %vm178_vm3, %v13865_v1, 0.0  ;;  %v8777_v5 = vsel %vm178_vm3, %v8775_v17, %v8763_v12  ;;  %v9019_v12 = vld [vmem:[#allocation2 + $0x460] sm:$0xff]  ;;  %v9021_v17 = vld [vmem:[#allocation2 + $0x470] sm:$0xff] }
0x5432   :  { %8657 = vadd.xlane.f32.xlu0 %v8656_v19 }
0x5448   :  { %8752 = vrot.lane.b32.xlu0 %v8333_v61, %s13994_s23 }
0x54bb   :  { %v8655_v43 = vpop.xlane.xlu0 %8654 }
0x54bc   :  { %13866 = vrcp.f32 %v8655_v43 }
0x54bf   :  { %v8658_v48 = vpop.xlane.xlu0 %8657 }
0x54c0   :  { %13868 = vrcp.f32 %v8658_v48 }
0x54c3   :  { %v8753_v0 = vpop.permute.xlu0 %8752 }
0x54c4   :  { %v8774_v29 = vsel %vm1131_vm11, %v15140_v21, %v8753_v0 }
0x54c5   :  { %v8776_v6 = vsel %vm178_vm3, %v8774_v29, %v8761_v54  ;;  %v9018_v54 = vld [vmem:[#allocation2 + $0x458] sm:$0xff]  ;;  %v9020_v29 = vld [vmem:[#allocation2 + $0x468] sm:$0xff] }
0x54c6   :  { %v13867_v39 = vpop.eup %13866  ;;  %v13170_v0 = vpack.c.bf16 %v9018_v54, %v9017_v46 }
0x54c7   :  { %v8661_v49 = vmul.f32 %v13867_v39, %v13863_v47  ;;  %v9016_v47 = vld [vmem:[#allocation2 + $0x448] sm:$0xff] }
0x54c8   :  { %v13166_v31 = vpack.c.bf16 %v9016_v47, %v9015_v3 }
0x54c9   :  { %12404 = vmatprep.mubr.msk.f32.mxu1 %vm178_vm3, %v8661_v49 }
0x54ca   :  { %v13869_v58 = vpop.eup %13868 }
0x54cb   :  { %v8662_v27 = vmul.f32 %v13869_v58, %v13865_v1 }
0x54cd   :  { %12405 = vmatmul.mubr.msk.f32.vlgmr.msra.gmra.mrb[62].mxu1 %vm178_vm3, %v8662_v27  ;;  %v11016_v27 = vld [vmem:[#allocation2 + $0x418] ss:$0 sm:$0xff] }
0x54ce   :  { %13153 = vmatpush3.bf16.msra.mxu1 %v13150_v7 }
0x54cf   :  { %13155 = vmatprep.subr.bf16.mxu1 %v13154_v53 }
0x54d2   :  { %13157 = vmatpush3.bf16.msra.mxu1 %v13154_v53 }
0x54d3   :  { %13167 = vmatprep.subr.bf16.mxu1 %v13166_v31 }
0x55a0   :  { %v12406_v60 = vpop.f32.mrb[62].mxu1 }
0x55a1   :  { %8770 = vrot.lane.b32.xlu1 %v12406_v60, %s14015_s4  ;;  %v8741_v28 = vpop.f32.mrb[63].mxu1 }
0x55a2   :  { %8768 = vrot.lane.b32.xlu0 %v8741_v28, %s14015_s4 }
0x5613   :  { %v8771_v2 = vpop.permute.xlu1 %8770 }
0x5614   :  { %v8769_v33 = vpop.permute.xlu0 %8768  ;;  %v8779_v10 = vsel %vm2224_vm5, %v8777_v5, %v8771_v2  ;;  %v13174_v2 = vpack.c.bf16 %v9020_v29, %v9019_v12  ;;  %v9023_v5 = vld [vmem:[#allocation2 + $0x480] sm:$0xff] }
0x5615   :  { %v8778_v16 = vsel %vm2224_vm5, %v8776_v6, %v8769_v33  ;;  %v9022_v6 = vld [vmem:[#allocation2 + $0x478] sm:$0xff] }
0x5616   :  { %12415 = vmatprep.mubr.msk.f32.mxu1 %vm480_vm9, %v8778_v16  ;;  %v13178_v33 = vpack.c.bf16 %v9022_v6, %v9021_v17  ;;  %v9024_v16 = vld [vmem:[#allocation2 + $0x488] sm:$0xff]  ;;  %v9167_v6 = vld [vmem:[#allocation2 + $0x290] sm:$0xff] }
0x5617   :  { %12416 = vmatmul.mubr.msk.f32.vlgmr.msra.gmra.mrb[64].mxu1 %vm480_vm9, %v8779_v10  ;;  %v9025_v10 = vld [vmem:[#allocation2 + $0x490] sm:$0xff] }
0x5618   :  { %13169 = vmatpush3.bf16.msra.mxu1 %v13166_v31 }
0x5619   :  { %13171 = vmatprep.subr.bf16.mxu1 %v13170_v0 }
0x561c   :  { %13173 = vmatpush3.bf16.msra.mxu1 %v13170_v0 }
0x561d   :  { %13175 = vmatprep.subr.bf16.mxu1 %v13174_v2 }
0x5620   :  { %13177 = vmatpush3.bf16.msra.mxu1 %v13174_v2 }
0x5621   :  { %13179 = vmatprep.subr.bf16.mxu1 %v13178_v33 }
0x5624   :  { %13181 = vmatpush3.bf16.msra.mxu1 %v13178_v33  ;;  %v9168_v33 = vld [vmem:[#allocation2 + $0x298] sm:$0xff] }
0x56ea   :  { %v12417_v61 = vpop.f32.mrb[64].mxu1 }
0x56eb   :  { %v8862_v21 = vadd.f32 %v12417_v61, %v11013_v13  ;;  %v8856_v22 = vpop.f32.mrb[65].mxu1  ;;  %v9026_v61 = vld [vmem:[#allocation2 + $0x498] sm:$0xff] }
0x56ec   :  { %v8857_v52 = vadd.f32 %v11013_v13, %v8856_v22  ;;  %v13182_v13 = vpack.c.bf16 %v9024_v16, %v9023_v5  ;;  %v9027_v22 = vld [vmem:[#allocation2 + $0x4a0] sm:$0xff]  ;;  %v13198_v5 = vpack.c.bf16 %v9168_v33, %v9167_v6 }
0x56ed   :  { %v15201_v63 = vadd.f32 %v8862_v21, %v15072_v44  ;;  %v13186_v21 = vpack.c.bf16 %v9026_v61, %v9025_v10  ;;  %v9169_v16 = vld [vmem:[#allocation2 + $0x2a0] sm:$0xff]  ;;  %v9170_v10 = vld [vmem:[#allocation2 + $0x2a8] sm:$0xff] }
0x56ee   :  { %v15204_v24 = vadd.f32 %v8857_v52, %v15074_v59  ;;  %13183 = vmatprep.subr.bf16.mxu1 %v13182_v13  ;;  %v9028_v52 = vld [vmem:[#allocation2 + $0x4a8] sm:$0xff]  ;;  %13199 = vmatprep.subr.bf16.mxu0 %v13198_v5 }
0x56ef   :  { %v8872_v18 = vsel %vm480_vm9, %v15201_v63, 0.0  ;;  %13185 = vmatpush3.bf16.msra.mxu1 %v13182_v13  ;;  %v13202_v13 = vpack.c.bf16 %v9170_v10, %v9169_v16 }
0x56f0   :  { %8873 = vadd.xlane.f32.xlu1 %v8872_v18  ;;  %v8869_v32 = vsel %vm480_vm9, %v15204_v24, 0.0  ;;  %13187 = vmatprep.subr.bf16.mxu1 %v13186_v21  ;;  %v13190_v18 = vpack.c.bf16 %v9028_v52, %v9027_v22 }
0x56f1   :  { %8870 = vadd.xlane.f32.xlu0 %v8869_v32  ;;  %v9029_v32 = vld [vmem:[#allocation2 + $0x4b0] sm:$0xff] }
0x56f3   :  { %13189 = vmatpush3.bf16.msra.mxu1 %v13186_v21 }
0x56f4   :  { %13191 = vmatprep.subr.bf16.mxu1 %v13190_v18 }
0x56f7   :  { %13193 = vmatpush3.bf16.msra.mxu1 %v13190_v18 }
0x577d   :  { %v8874_v14 = vpop.xlane.xlu1 %8873 }
0x577e   :  { %v8876_v26 = vmul.f32 0.03125, %v8874_v14  ;;  %v8871_v20 = vpop.xlane.xlu0 %8870  ;;  %v9030_v14 = vld [vmem:[#allocation2 + $0x4b8] sm:$0xff] }
0x577f   :  { %v8875_v36 = vmul.f32 0.03125, %v8871_v20  ;;  %v11018_v20 = vld [vmem:[#allocation2 + $0x3e0] ss:$0 sm:$0xff] }
0x5780   :  { %v8878_v45 = vsub.f32 %v15201_v63, %v8876_v26  ;;  %v13194_v26 = vpack.c.bf16 %v9030_v14, %v9029_v32 }
0x5781   :  { %v8877_v44 = vsub.f32 %v15204_v24, %v8875_v36 }
0x5782   :  { %v8880_v55 = vmul.f32 %v8878_v45, %v8878_v45  ;;  %13195 = vmatprep.subr.bf16.mxu1 %v13194_v26 }
0x5783   :  { %v8879_v15 = vmul.f32 %v8877_v44, %v8877_v44  ;;  %13197 = vmatpush3.bf16.msra.mxu1 %v13194_v26  ;;  %v11022_v26 = vld [vmem:[#allocation2 + $0x188] ss:$0 sm:$0xff] }
0x5784   :  { %v8884_v23 = vsel %vm480_vm9, %v8880_v55, 0.0 }
0x5785   :  { %v8881_v59 = vsel %vm480_vm9, %v8879_v15, 0.0 }
0x5786   :  { %8882 = vadd.xlane.f32.xlu0 %v8881_v59 }
0x578a   :  { %8885 = vadd.xlane.f32.xlu0 %v8884_v23 }
0x5813   :  { %v8883_v1 = vpop.xlane.xlu0 %8882 }
0x5814   :  { %v8887_v19 = vmul.f32 0.03125, %v8883_v1 }
0x5816   :  { %v8889_v43 = vadd.f32 1e-05, %v8887_v19 }
0x5817   :  { %v8886_v48 = vpop.xlane.xlu0 %8885 }
0x5818   :  { %13870 = vrsqrt.f32 %v8889_v43  ;;  %v8888_v39 = vmul.f32 0.03125, %v8886_v48 }
0x581a   :  { %v8890_v49 = vadd.f32 1e-05, %v8888_v39 }
0x581c   :  { %13872 = vrsqrt.f32 %v8890_v49 }
0x5822   :  { %v13871_v58 = vpop.eup %13870 }
0x5823   :  { %v8893_v51 = vmul.f32 %v13871_v58, %v8877_v44 }
0x5825   :  { %v8899_v50 = vmul.f32 %v11016_v27, %v8893_v51 }
0x5826   :  { %v13873_v7 = vpop.eup %13872 }
0x5827   :  { %v8894_v8 = vmul.f32 %v13873_v7, %v8878_v45  ;;  %v8905_v53 = vadd.f32 %v11017_v35, %v8899_v50 }
0x5829   :  { %v8900_v60 = vmul.f32 %v11016_v27, %v8894_v8  ;;  %12426 = vmatprep.mubr.msk.f32.mxu0 %vm480_vm9, %v8905_v53  ;;  %v11021_v27 = vld [vmem:[#allocation2 + $0x3e8] ss:$0 sm:$0xff] }
0x582b   :  { %v8906_v28 = vadd.f32 %v11017_v35, %v8900_v60 }
0x582d   :  { %12427 = vmatmul.mubr.msk.f32.vlgmr.msra.gmra.mrb[102].mxu0 %vm480_vm9, %v8906_v28 }
0x582e   :  { %13201 = vmatpush3.bf16.msra.mxu0 %v13198_v5 }
0x582f   :  { %13203 = vmatprep.subr.bf16.mxu0 %v13202_v13 }
0x5832   :  { %13205 = vmatpush3.bf16.msra.mxu0 %v13202_v13 }
0x5833   :  { %13206 = vmatprep.subr.bf16.mxu0 %v13996_v38 }
0x5900   :  { %v12428_v36 = vpop.f32.mrb[102].mxu0 }
0x5901   :  { %v8994_v45 = vadd.f32 %v12428_v36, %v11018_v20  ;;  %v8988_v44 = vpop.f32.mrb[103].mxu0 }
0x5902   :  { %v8989_v15 = vadd.f32 %v11018_v20, %v8988_v44  ;;  %v11023_v44 = vld [vmem:[#allocation2 + $0x180] ss:$0 sm:$0xff] }
0x5903   :  { %v9000_v59 = vmul.f32 0.044715, %v8994_v45  ;;  %v8998_v48 = vmul.f32 0.5, %v8994_v45 }
0x5904   :  { %v8999_v55 = vmul.f32 0.044715, %v8989_v15  ;;  %v8997_v19 = vmul.f32 0.5, %v8989_v15 }
0x5905   :  { %v9002_v23 = vmul.f32 %v9000_v59, %v8994_v45  ;;  %v9257_v59 = vld [vmem:[#allocation2 + $0x250] sm:$0xff] }
0x5906   :  { %v9001_v62 = vmul.f32 %v8999_v55, %v8989_v15  ;;  %v9258_v55 = vld [vmem:[#allocation2 + $0x258] sm:$0xff] }
0x5907   :  { %v9004_v25 = vmul.f32 %v9002_v23, %v8994_v45 }
0x5908   :  { %v9003_v41 = vmul.f32 %v9001_v62, %v8989_v15 }
0x5909   :  { %v9006_v30 = vadd.f32 %v9004_v25, %v8994_v45  ;;  %v13207_v25 = vpack.c.bf16 %v9258_v55, %v9257_v59 }
0x590a   :  { %v9005_v34 = vadd.f32 %v9003_v41, %v8989_v15 }
0x590b   :  { %v9008_v37 = vmul.f32 0.7978846, %v9006_v30  ;;  %v9259_v30 = vld [vmem:[#allocation2 + $0x260] sm:$0xff] }
0x590c   :  { %v9007_v3 = vmul.f32 0.7978846, %v9005_v34  ;;  %v9260_v34 = vld [vmem:[#allocation2 + $0x268] sm:$0xff] }
0x590d   :  { %13874 = vtanh.f32 %v9008_v37  ;;  %v11024_v37 = vld [vmem:[#allocation2 + $0x1a8] ss:$0 sm:$0xff] }
0x590e   :  { %13876 = vtanh.f32 %v9007_v3  ;;  %v13210_v3 = vpack.c.bf16 %v9260_v34, %v9259_v30 }
0x5917   :  { %v13875_v47 = vpop.eup %13874 }
0x5918   :  { %v13877_v31 = vpop.eup %13876  ;;  %v9012_v1 = vadd.f32 1.0, %v13875_v47  ;;  %v9161_v47 = vmul.f32 %v11024_v37, %v14942_v11 }
0x5919   :  { %v9011_v43 = vadd.f32 1.0, %v13877_v31  ;;  %v11025_v31 = vld [vmem:[#allocation2 + $0x1a0] ss:$0 sm:$0xff] }
0x591a   :  { %v9014_v49 = vmul.f32 %v9012_v1, %v8998_v48  ;;  %v9166_v1 = vadd.f32 %v11025_v31, %v9161_v47 }
0x591b   :  { %v9013_v39 = vmul.f32 %v9011_v43, %v8997_v19  ;;  %v11026_v19 = vld [vmem:[#allocation2 + $0x178] ss:$0 sm:$0xff] }
0x591d   :  { %12461 = vmatprep.mubr.f32.mxu1 %v9013_v39 }
0x591e   :  { %12462 = vmatmul.mubr.f32.vlgmr.msra.gmra.mrb[66].mxu1 %v9014_v49  ;;  %v11029_v49 = vld [vmem:[#allocation2 + $0x168] ss:$0 sm:$0xff] }
0x59f1   :  { %v12463_v58 = vpop.f32.mrb[66].mxu1 }
0x59f2   :  { %v9107_v51 = vadd.f32 %v12463_v58, %v15201_v63  ;;  %v9097_v35 = vpop.f32.mrb[67].mxu1 }
0x59f3   :  { %v9106_v50 = vadd.f32 %v9097_v35, %v15204_v24 }
0x59f4   :  { %v15218_v7 = vadd.f32 %v11021_v27, %v9107_v51 }
0x59f5   :  { %v15220_v8 = vadd.f32 %v11021_v27, %v9106_v50 }
0x59f6   :  { %v9120_v53 = vsel %vm480_vm9, %v15218_v7, 0.0 }
0x59f7   :  { %9121 = vadd.xlane.f32.xlu1 %v9120_v53  ;;  %v9117_v60 = vsel %vm480_vm9, %v15220_v8, 0.0 }
0x59f8   :  { %9118 = vadd.xlane.f32.xlu0 %v9117_v60 }
0x5a84   :  { %v9122_v28 = vpop.xlane.xlu1 %9121 }
0x5a85   :  { %v9124_v46 = vmul.f32 0.03125, %v9122_v28  ;;  %v9119_v54 = vpop.xlane.xlu0 %9118 }
0x5a86   :  { %v9123_v0 = vmul.f32 0.03125, %v9119_v54 }
0x5a87   :  { %v9126_v63 = vsub.f32 %v15218_v7, %v9124_v46 }
0x5a88   :  { %v9125_v24 = vsub.f32 %v15220_v8, %v9123_v0 }
0x5a89   :  { %v9128_v12 = vmul.f32 %v9126_v63, %v9126_v63 }
0x5a8a   :  { %v9127_v29 = vmul.f32 %v9125_v24, %v9125_v24 }
0x5a8b   :  { %v9132_v2 = vsel %vm480_vm9, %v9128_v12, 0.0 }
0x5a8c   :  { %9133 = vadd.xlane.f32.xlu1 %v9132_v2  ;;  %v9129_v17 = vsel %vm480_vm9, %v9127_v29, 0.0 }
0x5a8d   :  { %9130 = vadd.xlane.f32.xlu0 %v9129_v17 }
0x5b19   :  { %v9134_v61 = vpop.xlane.xlu1 %9133 }
0x5b1a   :  { %v9136_v21 = vmul.f32 0.03125, %v9134_v61  ;;  %v9131_v22 = vpop.xlane.xlu0 %9130 }
0x5b1b   :  { %v9135_v52 = vmul.f32 0.03125, %v9131_v22 }
0x5b1c   :  { %v9138_v18 = vadd.f32 1e-05, %v9136_v21 }
0x5b1d   :  { %v9137_v32 = vadd.f32 1e-05, %v9135_v52 }
0x5b1e   :  { %13878 = vrsqrt.f32 %v9138_v18 }
0x5b1f   :  { %13880 = vrsqrt.f32 %v9137_v32 }
0x5b28   :  { %v13879_v14 = vpop.eup %13878 }
0x5b29   :  { %v13881_v20 = vpop.eup %13880  ;;  %v9142_v36 = vmul.f32 %v13879_v14, %v9126_v63 }
0x5b2a   :  { %v9141_v45 = vmul.f32 %v13881_v20, %v9125_v24 }
0x5b2b   :  { %v9148_v15 = vmul.f32 %v11022_v26, %v9142_v36 }
0x5b2c   :  { %v9147_v23 = vmul.f32 %v11022_v26, %v9141_v45 }
0x5b2d   :  { %v9154_v41 = vadd.f32 %v11023_v44, %v9148_v15 }
0x5b2e   :  { %v9153_v62 = vadd.f32 %v11023_v44, %v9147_v23 }
0x5b30   :  { %12472 = vmatprep.mubr.msk.f32.mxu0 %vm480_vm9, %v9153_v62 }
0x5b31   :  { %12473 = vmatmul.mubr.msk.f32.vlgmr.msra.gmra.mrb[104].mxu0 %vm480_vm9, %v9154_v41 }
0x5b32   :  { %13208 = vmatpush3.bf16.msra.mxu0 %v13207_v25  ;;  %12483 = vmatprep.mubr.msk.f32.mxu0 %vm13997_vm2, %v13998_v42 }
0x5b33   :  { %13209 = vmatprep.subr.bf16.mxu0 %v13996_v38 }
0x5b36   :  { %13211 = vmatpush3.bf16.msra.mxu0 %v13210_v3 }
0x5b39   :  { %12484 = vmatmul.mubr.msk.f32.vlgmr.msra.gmra.mrb[106].mxu0 %vm480_vm9, %v9166_v1 }
0x5c04   :  { %v12474_v43 = vpop.f32.mrb[104].mxu0 }
0x5c05   :  { %v9248_v48 = vpop.f32.mrb[105].mxu0  ;;  %v9254_v38 = vadd.f32 %v12474_v43, %v11026_v19 }
0x5c06   :  { %v9249_v39 = vadd.f32 %v11026_v19, %v9248_v48 }
0x5c08   :  { %12488 = vmatprep.mubr.msk.f32.mxu0 %vm1131_vm11, %v9249_v39 }
0x5c0c   :  { %v9335_v58 = vpop.f32.mrb[106].mxu0 }
0x5c0d   :  { %v15239_v27 = vadd.f32 %v11029_v49, %v9335_v58  ;;  %v12485_v51 = vpop.f32.mrb[107].mxu0 }
0x5c0f   :  { %12486 = vmatprep.subr.msk.mxu0 %vm1131_vm11, %v15239_v27 }
0x5c10   :  { %12487 = vmatpush3.xpose.msk.msra.mxu0 %vm1131_vm11, %v15239_v27 }
0x5c13   :  { %12489 = vmatmul.mubr.msk.f32.vlgmr.msra.gmra.mrb[108].mxu0 %vm1131_vm11, %v9254_v38 }
0x5ce6   :  { %v12490_v11 = vpop.f32.mrb[108].mxu0 }
0x5ce7   :  { %v9429_v35 = vmul.f32 0.35355338, %v12490_v11  ;;  %v9419_v50 = vpop.f32.mrb[109].mxu0 }
0x5ce8   :  { %v9428_v53 = vmul.f32 0.35355338, %v9419_v50 }
0x5ce9   :  { %v9431_v60 = vadd.f32 %v9429_v35, %v14965_v4 }
0x5cea   :  { %v9430_v28 = vadd.f32 %v9428_v53, %v14968_v40 }
0x5ceb   :  { %v9435_v46 = vsel %vm1131_vm11, %v9431_v60, -inf }
0x5cec   :  { %9436 = vmax.xlane.f32.xlu1 %v9435_v46  ;;  %v9432_v54 = vsel %vm1131_vm11, %v9430_v28, -inf }
0x5ced   :  { %9433 = vmax.xlane.f32.xlu0 %v9432_v54 }
0x5cfd   :  { %9542 = vrot.lane.b32.xlu1 %v15239_v27, %s14003_s12 }
0x5d01   :  { %9538 = vrot.lane.b32.xlu1 %v9249_v39, %s14003_s12 }
0x5d03   :  { %9454 = vrot.lane.b32.xlu0 %v15239_v27, %s14009_s18 }
0x5d05   :  { %9540 = vrot.lane.b32.xlu1 %v9254_v38, %s14003_s12 }
0x5d79   :  { %v9437_v0 = vpop.xlane.xlu1 %9436 }
0x5d7a   :  { %v9439_v63 = vsub.f32 %v9431_v60, %v9437_v0  ;;  %v9434_v24 = vpop.xlane.xlu0 %9433 }
0x5d7b   :  { %v9438_v12 = vsub.f32 %v9430_v28, %v9434_v24 }
0x5d7c   :  { %v9442_v29 = vmul.f32 1.442695, %v9439_v63 }
0x5d7d   :  { %v9440_v2 = vmul.f32 1.442695, %v9438_v12  ;;  %v9543_v6 = vpop.permute.xlu1 %9542 }
0x5d7e   :  { %13882 = vpow2.f32 %v9442_v29  ;;  %v9455_v17 = vpop.permute.xlu0 %9454 }
0x5d7f   :  { %13884 = vpow2.f32 %v9440_v2  ;;  %12491 = vmatprep.subr.mxu0 %v9455_v17 }
0x5d80   :  { %12492 = vmatpush3.msra.mxu0 %v9455_v17 }
0x5d81   :  { %12496 = vmatprep.subr.msk.mxu0 %vm1131_vm11, %v9543_v6  ;;  %v9539_v13 = vpop.permute.xlu1 %9538 }
0x5d85   :  { %v9541_v61 = vpop.permute.xlu1 %9540 }
0x5d88   :  { %v13883_v33 = vpop.eup %13882 }
0x5d89   :  { %v13885_v5 = vpop.eup %13884  ;;  %v9447_v16 = vsel %vm1131_vm11, %v13883_v33, 0.0 }
0x5d8a   :  { %9448 = vadd.xlane.f32.xlu1 %v9447_v16  ;;  %v9444_v10 = vsel %vm1131_vm11, %v13885_v5, 0.0 }
0x5d8b   :  { %9445 = vadd.xlane.f32.xlu0 %v9444_v10 }
0x5d9b   :  { %9735 = vrot.lane.b32.xlu1 %v9249_v39, %s14001_s10 }
0x5d9f   :  { %9936 = vrot.lane.b32.xlu1 %v15239_v27, %s14004_s13 }
0x5da1   :  { %9739 = vrot.lane.b32.xlu0 %v15239_v27, %s14001_s10 }
0x5da3   :  { %9934 = vrot.lane.b32.xlu1 %v9254_v38, %s14004_s13 }
0x5da5   :  { %9737 = vrot.lane.b32.xlu0 %v9254_v38, %s14001_s10 }
0x5da9   :  { %9932 = vrot.lane.b32.xlu0 %v9249_v39, %s14004_s13 }
0x5e17   :  { %v9449_v21 = vpop.xlane.xlu1 %9448 }
0x5e18   :  { %13886 = vrcp.f32 %v9449_v21  ;;  %v9446_v22 = vpop.xlane.xlu0 %9445 }
0x5e19   :  { %13888 = vrcp.f32 %v9446_v22 }
0x5e1b   :  { %v9736_v52 = vpop.permute.xlu1 %9735 }
0x5e1c   :  { %12508 = vmatprep.mubr.msk.f32.mxu1 %vm1131_vm11, %v9736_v52  ;;  %v9740_v18 = vpop.permute.xlu0 %9739 }
0x5e1d   :  { %12506 = vmatprep.subr.msk.mxu1 %vm1131_vm11, %v9740_v18 }
0x5e1e   :  { %12507 = vmatpush3.xpose.msk.msra.mxu1 %vm1131_vm11, %v9740_v18 }
0x5e1f   :  { %v9937_v32 = vpop.permute.xlu1 %9936 }
0x5e20   :  { %12516 = vmatprep.subr.msk.mxu1 %vm1131_vm11, %v9937_v32  ;;  %v9738_v14 = vpop.permute.xlu0 %9737 }
0x5e21   :  { %12509 = vmatmul.mubr.msk.f32.vlgmr.msra.gmra.mrb[68].mxu1 %vm1131_vm11, %v9738_v14 }
0x5e22   :  { %v13887_v26 = vpop.eup %13886  ;;  %12517 = vmatpush3.xpose.msk.msra.mxu1 %vm1131_vm11, %v9937_v32 }
0x5e23   :  { %v13889_v20 = vpop.eup %13888  ;;  %v9453_v44 = vmul.f32 %v13887_v26, %v13883_v33  ;;  %v9935_v15 = vpop.permute.xlu1 %9934 }
0x5e24   :  { %v9933_v36 = vpop.permute.xlu0 %9932  ;;  %v9452_v45 = vmul.f32 %v13889_v20, %v13885_v5 }
0x5e25   :  { %12518 = vmatprep.mubr.msk.f32.mxu1 %vm1131_vm11, %v9933_v36 }
0x5e26   :  { %12493 = vmatprep.mubr.msk.f32.mxu0 %vm1131_vm11, %v9452_v45  ;;  %12519 = vmatmul.mubr.msk.f32.vlgmr.msra.gmra.mrb[70].mxu1 %vm1131_vm11, %v9935_v15 }
0x5e27   :  { %12494 = vmatmul.mubr.msk.f32.vlgmr.msra.gmra.mrb[110].mxu0 %vm1131_vm11, %v9453_v44 }
0x5e28   :  { %12497 = vmatpush3.xpose.msk.msra.mxu0 %vm1131_vm11, %v9543_v6  ;;  %12498 = vmatprep.mubr.msk.f32.mxu0 %vm1131_vm11, %v9539_v13 }
0x5e2b   :  { %12499 = vmatmul.mubr.msk.f32.vlgmr.msra.gmra.mrb[112].mxu0 %vm1131_vm11, %v9541_v61 }
0x5ef4   :  { %v12510_v59 = vpop.f32.mrb[68].mxu1 }
0x5ef5   :  { %v9813_v55 = vpop.f32.mrb[69].mxu1  ;;  %v9823_v19 = vmul.f32 0.35355338, %v12510_v59 }
0x5ef6   :  { %v9822_v23 = vmul.f32 0.35355338, %v9813_v55 }
0x5ef7   :  { %v9825_v51 = vadd.f32 %v9823_v19, %v14965_v4 }
0x5ef8   :  { %v9824_v62 = vadd.f32 %v9822_v23, %v14968_v40 }
0x5ef9   :  { %v12520_v25 = vpop.f32.mrb[70].mxu1  ;;  %v9829_v53 = vsel %vm1131_vm11, %v9825_v51, -inf }
0x5efa   :  { %v15281_v41 = vpop.f32.mrb[110].mxu0  ;;  %v10010_v30 = vpop.f32.mrb[71].mxu1  ;;  %v9826_v34 = vsel %vm1131_vm11, %v9824_v62, -inf  ;;  %v10020_v47 = vmul.f32 0.35355338, %v12520_v25 }
0x5efb   :  { %v15284_v37 = vpop.f32.mrb[111].mxu0  ;;  %9827 = vmax.xlane.f32.xlu0 %v9826_v34  ;;  %v10019_v38 = vmul.f32 0.35355338, %v10010_v30 }
0x5efc   :  { %v10022_v49 = vadd.f32 %v10020_v47, %v14965_v4 }
0x5efd   :  { %v10021_v50 = vadd.f32 %v10019_v38, %v14968_v40 }
0x5efe   :  { %v12500_v3 = vpop.f32.mrb[112].mxu0  ;;  %v10026_v35 = vsel %vm1131_vm11, %v10022_v49, -inf }
0x5eff   :  { %v9626_v31 = vmul.f32 0.35355338, %v12500_v3  ;;  %v9616_v1 = vpop.f32.mrb[113].mxu0  ;;  %v10023_v60 = vsel %vm1131_vm11, %v10021_v50, -inf }
0x5f00   :  { %v9625_v43 = vmul.f32 0.35355338, %v9616_v1 }
0x5f01   :  { %v9628_v48 = vadd.f32 %v9626_v31, %v14965_v4 }
0x5f02   :  { %v9627_v39 = vadd.f32 %v9625_v43, %v14968_v40 }
0x5f03   :  { %v9632_v58 = vsel %vm1131_vm11, %v9628_v48, -inf }
0x5f04   :  { %9633 = vmax.xlane.f32.xlu1 %v9632_v58  ;;  %v9629_v11 = vsel %vm1131_vm11, %v9627_v39, -inf }
0x5f05   :  { %9630 = vmax.xlane.f32.xlu0 %v9629_v11  ;;  %v9339_v11 = vld [vmem:[#allocation2 + $0x270] sm:$0xff] }
0x5f08   :  { %10027 = vmax.xlane.f32.xlu1 %v10026_v35  ;;  %v9340_v35 = vld [vmem:[#allocation2 + $0x278] sm:$0xff] }
0x5f09   :  { %9830 = vmax.xlane.f32.xlu0 %v9829_v53  ;;  %v9341_v53 = vld [vmem:[#allocation2 + $0x280] sm:$0xff] }
0x5f0d   :  { %10024 = vmax.xlane.f32.xlu0 %v10023_v60  ;;  %v9342_v60 = vld [vmem:[#allocation2 + $0x288] sm:$0xff] }
0x5f88   :  { %v9828_v28 = vpop.xlane.xlu0 %9827 }
0x5f89   :  { %v9832_v46 = vsub.f32 %v9824_v62, %v9828_v28  ;;  %v13216_v28 = vpack.c.bf16 %v9342_v60, %v9341_v53 }
0x5f8b   :  { %v9834_v54 = vmul.f32 1.442695, %v9832_v46 }
0x5f8d   :  { %13890 = vpow2.f32 %v9834_v54 }
0x5f91   :  { %v9634_v4 = vpop.xlane.xlu1 %9633 }
0x5f92   :  { %v9631_v0 = vpop.xlane.xlu0 %9630  ;;  %v9636_v17 = vsub.f32 %v9628_v48, %v9634_v4 }
0x5f93   :  { %v9635_v6 = vsub.f32 %v9627_v39, %v9631_v0 }
0x5f94   :  { %v9639_v13 = vmul.f32 1.442695, %v9636_v17 }
0x5f95   :  { %v10028_v63 = vpop.xlane.xlu1 %10027  ;;  %v9637_v61 = vmul.f32 1.442695, %v9635_v6 }
0x5f96   :  { %v10030_v24 = vsub.f32 %v10022_v49, %v10028_v63  ;;  %v9831_v12 = vpop.xlane.xlu0 %9830 }
0x5f97   :  { %v13891_v29 = vpop.eup %13890  ;;  %v9833_v2 = vsub.f32 %v9825_v51, %v9831_v12 }
0x5f98   :  { %v9838_v40 = vsel %vm1131_vm11, %v13891_v29, 0.0  ;;  %v10033_v33 = vmul.f32 1.442695, %v10030_v24 }
0x5f99   :  { %v9836_v5 = vmul.f32 1.442695, %v9833_v2  ;;  %9839 = vadd.xlane.f32.xlu0 %v9838_v40 }
0x5f9a   :  { %v10025_v16 = vpop.xlane.xlu0 %10024 }
0x5f9b   :  { %13892 = vpow2.f32 %v9836_v5  ;;  %v10029_v10 = vsub.f32 %v10021_v50, %v10025_v16  ;;  %v13212_v50 = vpack.c.bf16 %v9340_v35, %v9339_v11  ;;  %v11055_v35 = vld [vmem:[#allocation2 + $0x190] ss:$0 sm:$0xff] }
0x5f9c   :  { %13894 = vpow2.f32 %v10033_v33 }
0x5f9d   :  { %v10031_v21 = vmul.f32 1.442695, %v10029_v10  ;;  %13213 = vmatprep.subr.bf16.mxu1 %v13212_v50 }
0x5f9e   :  { %13215 = vmatpush3.bf16.msra.mxu1 %v13212_v50 }
0x5f9f   :  { %13896 = vpow2.f32 %v10031_v21  ;;  %13217 = vmatprep.subr.bf16.mxu1 %v13216_v28  ;;  %v11051_v21 = vld [vmem:[#allocation2 + $0x170] ss:$0 sm:$0xff] }
0x5fa0   :  { %13898 = vpow2.f32 %v9639_v13 }
0x5fa1   :  { %13900 = vpow2.f32 %v9637_v61 }
0x5fa2   :  { %13219 = vmatpush3.bf16.msra.mxu1 %v13216_v28 }
0x5fa5   :  { %v13893_v22 = vpop.eup %13892 }
0x5fa6   :  { %v9841_v52 = vsel %vm1131_vm11, %v13893_v22, 0.0  ;;  %v13895_v18 = vpop.eup %13894 }
0x5fa7   :  { %9842 = vadd.xlane.f32.xlu1 %v9841_v52  ;;  %v10038_v26 = vsel %vm1131_vm11, %v13895_v18, 0.0 }
0x5fa9   :  { %v13897_v32 = vpop.eup %13896 }
0x5faa   :  { %v13899_v14 = vpop.eup %13898  ;;  %v10035_v20 = vsel %vm1131_vm11, %v13897_v32, 0.0 }
0x5fab   :  { %v13901_v36 = vpop.eup %13900  ;;  %10039 = vadd.xlane.f32.xlu1 %v10038_v26  ;;  %10036 = vadd.xlane.f32.xlu0 %v10035_v20  ;;  %v9644_v45 = vsel %vm1131_vm11, %v13899_v14, 0.0 }
0x5fac   :  { %v9641_v44 = vsel %vm1131_vm11, %v13901_v36, 0.0 }
0x5faf   :  { %9645 = vadd.xlane.f32.xlu1 %v9644_v45  ;;  %9642 = vadd.xlane.f32.xlu0 %v9641_v44 }
0x5fc0   :  { %9848 = vrot.lane.b32.xlu1 %v15239_v27, %s14011_s24 }
0x5fc4   :  { %10045 = vrot.lane.b32.xlu1 %v15239_v27, %s14013_s29 }
0x5fc5   :  { %9651 = vrot.lane.b32.xlu0 %v15239_v27, %s14010_s22 }
0x6026   :  { %v9840_v15 = vpop.xlane.xlu0 %9839 }
0x6027   :  { %13902 = vrcp.f32 %v9840_v15 }
0x6031   :  { %v13903_v3 = vpop.eup %13902 }
0x6032   :  { %v9846_v43 = vmul.f32 %v13903_v3, %v13891_v29  ;;  %v10289_v3 = vld [vmem:[#allocation2 + $0x1c8] sm:$0xff] }
0x6034   :  { %v9843_v59 = vpop.xlane.xlu1 %9842 }
0x6038   :  { %v10040_v55 = vpop.xlane.xlu1 %10039  ;;  %v10037_v23 = vpop.xlane.xlu0 %10036 }
0x603c   :  { %v9646_v62 = vpop.xlane.xlu1 %9645  ;;  %v9643_v25 = vpop.xlane.xlu0 %9642 }
0x603d   :  { %13904 = vrcp.f32 %v9646_v62  ;;  %v10286_v62 = vld [vmem:[#allocation2 + $0x1b0] sm:$0xff] }
0x603e   :  { %13906 = vrcp.f32 %v9643_v25  ;;  %v10287_v25 = vld [vmem:[#allocation2 + $0x1b8] sm:$0xff] }
0x603f   :  { %13908 = vrcp.f32 %v9843_v59 }
0x6040   :  { %v9652_v30 = vpop.permute.xlu0 %9651  ;;  %13910 = vrcp.f32 %v10037_v23  ;;  %v9849_v34 = vpop.permute.xlu1 %9848 }
0x6041   :  { %12501 = vmatprep.subr.mxu0 %v9652_v30  ;;  %13912 = vrcp.f32 %v10040_v55 }
0x6042   :  { %12502 = vmatpush3.msra.mxu0 %v9652_v30  ;;  %v13220_v30 = vpack.c.bf16 %v10287_v25, %v10286_v62 }
0x6043   :  { %12511 = vmatprep.subr.mxu0 %v9849_v34 }
0x6044   :  { %v10046_v39 = vpop.permute.xlu1 %10045 }
0x6047   :  { %v13905_v47 = vpop.eup %13904 }
0x6048   :  { %v13907_v27 = vpop.eup %13906  ;;  %v9650_v31 = vmul.f32 %v13905_v47, %v13899_v14 }
0x6049   :  { %v9649_v1 = vmul.f32 %v13907_v27, %v13901_v36  ;;  %v13909_v19 = vpop.eup %13908  ;;  %v10394_v27 = vld [vmem:[#allocation2 + $0x1d0] sm:$0xff] }
0x604a   :  { %v13911_v48 = vpop.eup %13910  ;;  %v9847_v49 = vmul.f32 %v13909_v19, %v13893_v22 }
0x604b   :  { %12503 = vmatprep.mubr.msk.f32.mxu0 %vm1131_vm11, %v9649_v1  ;;  %v13913_v58 = vpop.eup %13912  ;;  %v10043_v51 = vmul.f32 %v13911_v48, %v13897_v32 }
0x604c   :  { %12504 = vmatmul.mubr.msk.f32.vlgmr.msra.gmra.mrb[114].mxu0 %vm1131_vm11, %v9650_v31  ;;  %v10044_v38 = vmul.f32 %v13913_v58, %v13895_v18  ;;  %v10395_v31 = vld [vmem:[#allocation2 + $0x1d8] sm:$0xff] }
0x604d   :  { %12512 = vmatpush3.msra.mxu0 %v9849_v34  ;;  %12513 = vmatprep.mubr.msk.f32.mxu0 %vm1131_vm11, %v9846_v43  ;;  %v10288_v34 = vld [vmem:[#allocation2 + $0x1c0] sm:$0xff]  ;;  %v13228_v1 = vpack.c.bf16 %v10395_v31, %v10394_v27 }
0x604e   :  { %12521 = vmatprep.subr.mxu0 %v10046_v39  ;;  %v13224_v47 = vpack.c.bf16 %v10289_v3, %v10288_v34 }
0x604f   :  { %13229 = vmatprep.subr.bf16.mxu1 %v13228_v1 }
0x6050   :  { %12514 = vmatmul.mubr.msk.f32.vlgmr.msra.gmra.mrb[116].mxu0 %vm1131_vm11, %v9847_v49 }
0x6051   :  { %12522 = vmatpush3.msra.mxu0 %v10046_v39  ;;  %12523 = vmatprep.mubr.msk.f32.mxu0 %vm1131_vm11, %v10043_v51 }
0x6052   :  { %13221 = vmatprep.subr.bf16.mxu0 %v13220_v30 }
0x6054   :  { %12524 = vmatmul.mubr.msk.f32.vlgmr.msra.gmra.mrb[118].mxu0 %vm1131_vm11, %v10044_v38  ;;  %v11054_v38 = vld [vmem:[#allocation2 + $0x198] ss:$0 sm:$0xff] }
0x6055   :  { %13223 = vmatpush3.bf16.msra.mxu0 %v13220_v30 }
0x6056   :  { %13225 = vmatprep.subr.bf16.mxu0 %v13224_v47 }
0x6059   :  { %13227 = vmatpush3.bf16.msra.mxu0 %v13224_v47 }
0x611f   :  { %v12505_v46 = vpop.f32.mrb[114].mxu0 }
0x6120   :  { %10133 = vrot.lane.b32.xlu0 %v12505_v46, %s13994_s23  ;;  %v9726_v54 = vpop.f32.mrb[115].mxu0 }
0x6121   :  { %10131 = vrot.lane.b32.xlu1 %v9726_v54, %s13994_s23 }
0x6123   :  { %v12515_v4 = vpop.f32.mrb[116].mxu0 }
0x6124   :  { %10141 = vrot.lane.b32.xlu0 %v12515_v4, %s14014_s30  ;;  %v9923_v0 = vpop.f32.mrb[117].mxu0  ;;  %v10396_v4 = vld [vmem:[#allocation2 + $0x1e0] sm:$0xff] }
0x6125   :  { %10139 = vrot.lane.b32.xlu1 %v9923_v0, %s14014_s30  ;;  %v10397_v0 = vld [vmem:[#allocation2 + $0x1e8] sm:$0xff] }
0x6127   :  { %v12525_v63 = vpop.f32.mrb[118].mxu0 }
0x6128   :  { %10149 = vrot.lane.b32.xlu0 %v12525_v63, %s14015_s4  ;;  %v10120_v24 = vpop.f32.mrb[119].mxu0  ;;  %v13232_v63 = vpack.c.bf16 %v10397_v0, %v10396_v4 }
0x6129   :  { %10147 = vrot.lane.b32.xlu1 %v10120_v24, %s14015_s4  ;;  %v10398_v24 = vld [vmem:[#allocation2 + $0x1f0] sm:$0xff] }
0x6192   :  { %v10134_v12 = vpop.permute.xlu0 %10133 }
0x6193   :  { %v10132_v29 = vpop.permute.xlu1 %10131  ;;  %v10154_v33 = vsel %vm1131_vm11, %v15281_v41, %v10134_v12  ;;  %v10399_v12 = vld [vmem:[#allocation2 + $0x1f8] sm:$0xff] }
0x6194   :  { %v10153_v40 = vsel %vm1131_vm11, %v15284_v37, %v10132_v29  ;;  %v13236_v29 = vpack.c.bf16 %v10399_v12, %v10398_v24  ;;  %v15355_v12 = vld [vmem:[%s15405_s2] sm:$0xff] }
0x6195   :  { %vm10671_vm13 = vcmp.ge.s32.totalorder %v15355_v12, 13 }
0x6196   :  { %v10142_v2 = vpop.permute.xlu0 %10141 }
0x6197   :  { %v10140_v17 = vpop.permute.xlu1 %10139  ;;  %v10156_v10 = vsel %vm178_vm3, %v10154_v33, %v10142_v2  ;;  %v10400_v2 = vld [vmem:[#allocation2 + $0x200] sm:$0xff]  ;;  %v10403_v33 = vld [vmem:[#allocation2 + $0x218] sm:$0xff] }
0x6198   :  { %v10155_v5 = vsel %vm178_vm3, %v10153_v40, %v10140_v17  ;;  %v10401_v17 = vld [vmem:[#allocation2 + $0x208] sm:$0xff] }
0x6199   :  { %v13240_v40 = vpack.c.bf16 %v10401_v17, %v10400_v2  ;;  %v10534_v2 = vld [vmem:[#allocation2 + $0x500] sm:$0xff]  ;;  %v10535_v17 = vld [vmem:[#allocation2 + $0x508] sm:$0xff] }
0x619a   :  { %v10150_v6 = vpop.permute.xlu0 %10149 }
0x619b   :  { %v10148_v16 = vpop.permute.xlu1 %10147  ;;  %v10158_v61 = vsel %vm2224_vm5, %v10156_v10, %v10150_v6  ;;  %v10402_v6 = vld [vmem:[#allocation2 + $0x210] sm:$0xff]  ;;  %v10405_v10 = vld [vmem:[#allocation2 + $0x228] sm:$0xff] }
0x619c   :  { %v10157_v13 = vsel %vm2224_vm5, %v10155_v5, %v10148_v16  ;;  %v13244_v5 = vpack.c.bf16 %v10403_v33, %v10402_v6  ;;  %v10404_v16 = vld [vmem:[#allocation2 + $0x220] sm:$0xff]  ;;  %v10536_v6 = vld [vmem:[#allocation2 + $0x510] sm:$0xff]  ;;  %v10537_v33 = vld [vmem:[#allocation2 + $0x518] sm:$0xff] }
0x619d   :  { %12534 = vmatprep.mubr.msk.f32.mxu1 %vm480_vm9, %v10157_v13  ;;  %v13248_v13 = vpack.c.bf16 %v10405_v10, %v10404_v16 }
0x619e   :  { %12535 = vmatmul.mubr.msk.f32.vlgmr.msra.gmra.mrb[72].mxu1 %vm480_vm9, %v10158_v61  ;;  %v10406_v61 = vld [vmem:[#allocation2 + $0x230] sm:$0xff] }
0x619f   :  { %13231 = vmatpush3.bf16.msra.mxu1 %v13228_v1 }
0x61a0   :  { %13233 = vmatprep.subr.bf16.mxu1 %v13232_v63 }
0x61a3   :  { %13235 = vmatpush3.bf16.msra.mxu1 %v13232_v63 }
0x61a4   :  { %13237 = vmatprep.subr.bf16.mxu1 %v13236_v29 }
0x61a7   :  { %13239 = vmatpush3.bf16.msra.mxu1 %v13236_v29  ;;  %v15361_v29 = vld [vmem:[%s15405_s2 + $0x8] sm:$0xff] }
0x61a8   :  { %13241 = vmatprep.subr.bf16.mxu1 %v13240_v40  ;;  %vm10672_vm4 = vcmp.ge.s32.totalorder %v15361_v29, 13  ;;  %vm10718_vm5 = vcmp.eq.s32.totalorder %v15361_v29, 15 }
0x61ab   :  { %13243 = vmatpush3.bf16.msra.mxu1 %v13240_v40  ;;  %v13260_v40 = vpack.c.bf16 %v10535_v17, %v10534_v2 }
0x61ac   :  { %13245 = vmatprep.subr.bf16.mxu1 %v13244_v5 }
0x61ad   :  { %13261 = vmatprep.subr.bf16.mxu0 %v13260_v40 }
0x61af   :  { %13247 = vmatpush3.bf16.msra.mxu1 %v13244_v5  ;;  %v13264_v5 = vpack.c.bf16 %v10537_v33, %v10536_v6 }
0x61b0   :  { %13249 = vmatprep.subr.bf16.mxu1 %v13248_v13 }
0x61b3   :  { %13251 = vmatpush3.bf16.msra.mxu1 %v13248_v13 }
0x6271   :  { %v12536_v22 = vpop.f32.mrb[72].mxu1 }
0x6272   :  { %v10241_v37 = vadd.f32 %v12536_v22, %v11051_v21  ;;  %v10235_v52 = vpop.f32.mrb[73].mxu1 }
0x6273   :  { %v10236_v18 = vadd.f32 %v11051_v21, %v10235_v52  ;;  %v10407_v21 = vld [vmem:[#allocation2 + $0x238] sm:$0xff]  ;;  %v10409_v52 = vld [vmem:[#allocation2 + $0x248] sm:$0xff] }
0x6274   :  { %v15331_v41 = vadd.f32 %v10241_v37, %v15218_v7  ;;  %v13252_v22 = vpack.c.bf16 %v10407_v21, %v10406_v61  ;;  %v10408_v37 = vld [vmem:[#allocation2 + $0x240] sm:$0xff]  ;;  %v10635_v21 = vsub.s32 0, %v14166_v57 }
0x6275   :  { %v15334_v32 = vadd.f32 %v10236_v18, %v15220_v8  ;;  %v13256_v18 = vpack.c.bf16 %v10409_v52, %v10408_v37 }
0x6276   :  { %v10251_v14 = vsel %vm480_vm9, %v15331_v41, 0.0  ;;  %13253 = vmatprep.subr.bf16.mxu1 %v13252_v22 }
0x6277   :  { %10252 = vadd.xlane.f32.xlu0 %v10251_v14  ;;  %v10248_v26 = vsel %vm480_vm9, %v15334_v32, 0.0  ;;  %13255 = vmatpush3.bf16.msra.mxu1 %v13252_v22  ;;  %v11056_v14 = vld [vmem:[#allocation2 + $0x158] ss:$0 sm:$0xff] }
0x6278   :  { %10249 = vadd.xlane.f32.xlu1 %v10248_v26  ;;  %13257 = vmatprep.subr.bf16.mxu1 %v13256_v18 }
0x627b   :  { %13259 = vmatpush3.bf16.msra.mxu1 %v13256_v18  ;;  %v10636_v18 = vrot.slane %v14314_v9, %v10635_v21 }
0x6304   :  { %v10253_v20 = vpop.xlane.xlu0 %10252 }
0x6305   :  { %v10255_v36 = vmul.f32 0.03125, %v10253_v20  ;;  %v10250_v45 = vpop.xlane.xlu1 %10249 }
0x6306   :  { %v10254_v44 = vmul.f32 0.03125, %v10250_v45 }
0x6307   :  { %v10257_v15 = vsub.f32 %v15331_v41, %v10255_v36 }
0x6308   :  { %v10256_v7 = vsub.f32 %v15334_v32, %v10254_v44 }
0x6309   :  { %v10259_v55 = vmul.f32 %v10257_v15, %v10257_v15 }
0x630a   :  { %v10258_v59 = vmul.f32 %v10256_v7, %v10256_v7 }
0x630b   :  { %v10263_v23 = vsel %vm480_vm9, %v10259_v55, 0.0 }
0x630c   :  { %v10260_v8 = vsel %vm480_vm9, %v10258_v59, 0.0 }
0x630d   :  { %10261 = vadd.xlane.f32.xlu0 %v10260_v8 }
0x6311   :  { %10264 = vadd.xlane.f32.xlu0 %v10263_v23 }
0x639a   :  { %v10262_v19 = vpop.xlane.xlu0 %10261 }
0x639b   :  { %v10266_v43 = vmul.f32 0.03125, %v10262_v19 }
0x639d   :  { %v10268_v48 = vadd.f32 1e-05, %v10266_v43 }
0x639e   :  { %v10265_v39 = vpop.xlane.xlu0 %10264 }
0x639f   :  { %13914 = vrsqrt.f32 %v10268_v48  ;;  %v10267_v49 = vmul.f32 0.03125, %v10265_v39  ;;  %v11059_v39 = vld [vmem:[#allocation2 + $0x160] ss:$0 sm:$0xff] }
0x63a1   :  { %v10269_v58 = vadd.f32 1e-05, %v10267_v49 }
0x63a3   :  { %13916 = vrsqrt.f32 %v10269_v58 }
0x63a9   :  { %v13915_v51 = vpop.eup %13914 }
0x63aa   :  { %v10272_v11 = vmul.f32 %v13915_v51, %v10256_v7 }
0x63ac   :  { %v10278_v50 = vmul.f32 %v11054_v38, %v10272_v11 }
0x63ad   :  { %v13917_v53 = vpop.eup %13916 }
0x63ae   :  { %v10273_v60 = vmul.f32 %v13917_v53, %v10257_v15  ;;  %v10284_v28 = vadd.f32 %v11055_v35, %v10278_v50  ;;  %v14020_v53 = vmov 1  }
0x63af   :  { %13602 = vset.pattern.permute.xlu1 %v14020_v53  ;;  %13603 = vset.pattern.permute.xlu0 %v14020_v53 }
0x63b0   :  { %v10279_v46 = vmul.f32 %v11054_v38, %v10273_v60  ;;  %12545 = vmatprep.mubr.msk.f32.mxu0 %vm480_vm9, %v10284_v28 }
0x63b2   :  { %v10285_v54 = vadd.f32 %v11055_v35, %v10279_v46 }
0x63b4   :  { %12546 = vmatmul.mubr.msk.f32.vlgmr.msra.gmra.mrb[120].mxu0 %vm480_vm9, %v10285_v54 }
0x63b5   :  { %13263 = vmatpush3.bf16.msra.mxu0 %v13260_v40 }
0x63b6   :  { %13265 = vmatprep.subr.bf16.mxu0 %v13264_v5 }
0x63b9   :  { %13267 = vmatpush3.bf16.msra.mxu0 %v13264_v5 }
0x6487   :  { %v12547_v26 = vpop.f32.mrb[120].mxu0 }
0x6488   :  { %v10373_v20 = vadd.f32 %v12547_v26, %v11056_v14  ;;  %v10367_v36 = vpop.f32.mrb[121].mxu0 }
0x6489   :  { %v10368_v45 = vadd.f32 %v11056_v14, %v10367_v36 }
0x648a   :  { %v10379_v44 = vmul.f32 0.044715, %v10373_v20  ;;  %v10377_v1 = vmul.f32 0.5, %v10373_v20 }
0x648b   :  { %v10378_v15 = vmul.f32 0.044715, %v10368_v45  ;;  %v10376_v27 = vmul.f32 0.5, %v10368_v45 }
0x648c   :  { %v10381_v7 = vmul.f32 %v10379_v44, %v10373_v20 }
0x648d   :  { %v10380_v59 = vmul.f32 %v10378_v15, %v10368_v45 }
0x648e   :  { %v10383_v8 = vmul.f32 %v10381_v7, %v10373_v20 }
0x648f   :  { %v10382_v55 = vmul.f32 %v10380_v59, %v10368_v45  ;;  %v11061_v59 = vld [vmem:[#allocation2 + $0x2b0] ss:$0 sm:$0xff] }
0x6490   :  { %v10385_v23 = vadd.f32 %v10383_v8, %v10373_v20 }
0x6491   :  { %v10384_v62 = vadd.f32 %v10382_v55, %v10368_v45  ;;  %v11060_v45 = vld [vmem:[#allocation2 + $0x2b8] ss:$0 sm:$0xff] }
0x6492   :  { %v10387_v25 = vmul.f32 0.7978846, %v10385_v23 }
0x6493   :  { %v10386_v30 = vmul.f32 0.7978846, %v10384_v62 }
0x6494   :  { %13918 = vtanh.f32 %v10387_v25 }
0x6495   :  { %13920 = vtanh.f32 %v10386_v30 }
0x649e   :  { %v13919_v34 = vpop.eup %13918 }
0x649f   :  { %v13921_v3 = vpop.eup %13920  ;;  %v10391_v47 = vadd.f32 1.0, %v13919_v34 }
0x64a0   :  { %v10390_v31 = vadd.f32 1.0, %v13921_v3 }
0x64a1   :  { %v10393_v43 = vmul.f32 %v10391_v47, %v10377_v1 }
0x64a2   :  { %v10392_v19 = vmul.f32 %v10390_v31, %v10376_v27  ;;  %v10639_v31 = vsub.s32 1, %v14166_v57  ;;  %v48_v57 = vcvt.s32.f32 %v15355_v12 }
0x64a4   :  { %12580 = vmatprep.mubr.f32.mxu1 %v10392_v19 }
0x64a5   :  { %12581 = vmatmul.mubr.f32.vlgmr.msra.gmra.mrb[74].mxu1 %v10393_v43  ;;  %v10640_v43 = vrot.slane %v14314_v9, %v10639_v31 }
0x6578   :  { %v12582_v48 = vpop.f32.mrb[74].mxu1 }
0x6579   :  { %v10486_v49 = vadd.f32 %v12582_v48, %v15331_v41  ;;  %v10476_v58 = vpop.f32.mrb[75].mxu1 }
0x657a   :  { %v10485_v51 = vadd.f32 %v10476_v58, %v15334_v32 }
0x657b   :  { %v10493_v38 = vadd.f32 %v11059_v39, %v10486_v49 }
0x657c   :  { %v10492_v11 = vadd.f32 %v11059_v39, %v10485_v51 }
0x657d   :  { %v10499_v35 = vsel %vm480_vm9, %v10493_v38, 0.0 }
0x657e   :  { %10500 = vadd.xlane.f32.xlu0 %v10499_v35  ;;  %v10496_v50 = vsel %vm480_vm9, %v10492_v11, 0.0 }
0x657f   :  { %10497 = vadd.xlane.f32.xlu1 %v10496_v50 }
0x660b   :  { %v10501_v60 = vpop.xlane.xlu0 %10500 }
0x660c   :  { %v10503_v28 = vmul.f32 0.03125, %v10501_v60  ;;  %v10498_v46 = vpop.xlane.xlu1 %10497 }
0x660d   :  { %v10502_v54 = vmul.f32 0.03125, %v10498_v46 }
0x660e   :  { %v10505_v4 = vsub.f32 %v10493_v38, %v10503_v28 }
0x660f   :  { %v10504_v41 = vsub.f32 %v10492_v11, %v10502_v54 }
0x6610   :  { %v10507_v0 = vmul.f32 %v10505_v4, %v10505_v4 }
0x6611   :  { %v10506_v63 = vmul.f32 %v10504_v41, %v10504_v41 }
0x6612   :  { %v10511_v32 = vsel %vm480_vm9, %v10507_v0, 0.0 }
0x6613   :  { %10512 = vadd.xlane.f32.xlu0 %v10511_v32  ;;  %v10508_v24 = vsel %vm480_vm9, %v10506_v63, 0.0 }
0x6614   :  { %10509 = vadd.xlane.f32.xlu1 %v10508_v24 }
0x6625   :  { %10622 = vperm.xlu1 %13602, %v15355_v12  }
0x6629   :  { %10625 = vperm.xlu0 %13603, %v15361_v29  }
0x66a0   :  { %v10513_v16 = vpop.xlane.xlu0 %10512 }
0x66a1   :  { %v10515_v10 = vmul.f32 0.03125, %v10513_v16  ;;  %v10510_v13 = vpop.xlane.xlu1 %10509  ;;  %v49_v16 = vcvt.s32.f32 %v15361_v29 }
0x66a2   :  { %v10514_v61 = vmul.f32 0.03125, %v10510_v13 }
0x66a3   :  { %v10517_v22 = vadd.f32 1e-05, %v10515_v10 }
0x66a4   :  { %v10516_v37 = vadd.f32 1e-05, %v10514_v61 }
0x66a5   :  { %13922 = vrsqrt.f32 %v10517_v22  ;;  %v10623_v52 = vpop.permute.xlu1 %10622 }
0x66a6   :  { %13924 = vrsqrt.f32 %v10516_v37  ;;  %vm10627_vm2 = vcmp.eq.s32.totalorder %v14164_v56, %v10623_v52 }
0x66a7   :  { %v11064_v14 = vsel %vm10627_vm2, 1.0, %v13998_v42 }
0x66a8   :  { %v10641_v26 = vmul.f32 %v11064_v14, %v10636_v18  ;;  %v10626_v47 = vpop.permute.xlu0 %10625 }
0x66a9   :  { %vm10628_vm11 = vcmp.eq.s32.totalorder %v14164_v56, %v10626_v47 }
0x66aa   :  { %v10643_v20 = vsel %vm178_vm3, %v10641_v26, 0.0  ;;  %v11065_v19 = vsel %vm10628_vm11, 1.0, %v13998_v42 }
0x66ab   :  { %10644 = vadd.xlane.f32.xlu1 %v10643_v20  ;;  %v10642_v39 = vmul.f32 %v11065_v19, %v10640_v43 }
0x66ad   :  { %v10646_v56 = vsel %vm178_vm3, %v10642_v39, 0.0 }
0x66af   :  { %v13923_v36 = vpop.eup %13922 }
0x66b0   :  { %v13925_v44 = vpop.eup %13924  ;;  %v10521_v15 = vmul.f32 %v13923_v36, %v10505_v4 }
0x66b1   :  { %v10520_v7 = vmul.f32 %v13925_v44, %v10504_v41 }
0x66b2   :  { %v10527_v8 = vmul.f32 %v11060_v45, %v10521_v15 }
0x66b3   :  { %v10526_v55 = vmul.f32 %v11060_v45, %v10520_v7 }
0x66b4   :  { %v10533_v62 = vadd.f32 %v11061_v59, %v10527_v8 }
0x66b5   :  { %v10532_v23 = vadd.f32 %v11061_v59, %v10526_v55 }
0x66b7   :  { %12591 = vmatprep.mubr.msk.f32.mxu0 %vm480_vm9, %v10532_v23 }
0x66b8   :  { %12592 = vmatmul.mubr.msk.f32.vlgmr.msra.gmra.mrb[122].mxu0 %vm480_vm9, %v10533_v62  ;;  %vm10717_vm9 = vcmp.eq.s32.totalorder %v15355_v12, 15 }
0x6738   :  { %v10645_v25 = vpop.xlane.xlu1 %10644 }
0x6739   :  { %v10655_v30 = vand.u32 2147483647, %v10645_v25  ;;  %v10649_v51 = vmax.f32 %v10645_v25, 0.0  ;;  %v10651_v38 = vmul.f32 %v10645_v25, %v48_v57 }
0x673b   :  { %v10657_v34 = vsub.f32 0.0, %v10655_v30  ;;  %v10653_v35 = vsub.f32 %v10649_v51, %v10651_v38 }
0x673d   :  { %v10659_v3 = vmul.f32 1.442695, %v10657_v34 }
0x673f   :  { %13926 = vpow2.f32 %v10659_v3 }
0x6749   :  { %v13927_v27 = vpop.eup %13926 }
0x674a   :  { %v10663_v1 = vadd.f32 1.0, %v13927_v27 }
0x674c   :  { %13928 = vlog2.f32 %v10663_v1 }
0x6756   :  { %v13929_v9 = vpop.eup %13928 }
0x6757   :  { %v10666_v11 = vmul.f32 0.6931472, %v13929_v9 }
0x6759   :  { %v10669_v50 = vadd.f32 %v10666_v11, %v10653_v35 }
0x675b   :  { %v10673_v53 = vsub.f32 0.0, %v10669_v50 }
0x678b   :  { %v12593_v48 = vpop.f32.mrb[122].mxu0 }
0x678c   :  { %10620 = vst.msk [vmem:[%s15406_s3 + $0x18] sm:$0xff] %vm178_vm3, %v12593_v48  ;;  %v10610_v49 = vpop.f32.mrb[123].mxu0  ;;  %v10688_v58 = vsel %vm178_vm3, %v12593_v48, -inf  ;;  %v10710_v6 = vmul.f32 %v12593_v48, %v11065_v19 }
0x678d   :  { %10619 = vst.msk [vmem:[%s15406_s3 + $0x10] sm:$0xff] %vm178_vm3, %v10610_v49  ;;  %10689 = vmax.xlane.f32.xlu1 %v10688_v58  ;;  %v10685_v42 = vsel %vm178_vm3, %v10610_v49, -inf  ;;  %v10709_v24 = vmul.f32 %v11064_v14, %v10610_v49 }
0x678e   :  { %10686 = vmax.xlane.f32.xlu0 %v10685_v42  ;;  %v10714_v5 = vsel %vm178_vm3, %v10710_v6, 0.0 }
0x678f   :  { %v10711_v40 = vsel %vm178_vm3, %v10709_v24, 0.0 }
0x6791   :  { %10647 = vadd.xlane.f32.xlu1 %v10646_v56 }
0x67a2   :  { %10677 = vrot.lane.b32.xlu1 %v10673_v53, %s14021_s15 }
0x681a   :  { %v10690_v60 = vpop.xlane.xlu1 %10689 }
0x681b   :  { %v10687_v28 = vpop.xlane.xlu0 %10686  ;;  %v10692_v18 = vsub.f32 %v12593_v48, %v10690_v60 }
0x681c   :  { %v10691_v46 = vsub.f32 %v10610_v49, %v10687_v28 }
0x681d   :  { %v10695_v14 = vmul.f32 1.442695, %v10692_v18 }
0x681e   :  { %v10693_v54 = vmul.f32 1.442695, %v10691_v46  ;;  %v10648_v4 = vpop.xlane.xlu1 %10647 }
0x681f   :  { %v10656_v41 = vand.u32 2147483647, %v10648_v4  ;;  %v10650_v10 = vmax.f32 %v10648_v4, 0.0  ;;  %v10652_v13 = vmul.f32 %v10648_v4, %v49_v16 }
0x6820   :  { %13930 = vpow2.f32 %v10693_v54 }
0x6821   :  { %v10658_v0 = vsub.f32 0.0, %v10656_v41  ;;  %v10654_v21 = vsub.f32 %v10650_v10, %v10652_v13 }
0x6822   :  { %v10678_v15 = vpop.permute.xlu1 %10677 }
0x6823   :  { %v10661_v63 = vmul.f32 1.442695, %v10658_v0  ;;  %v10683_v25 = vsel %vm10671_vm13, 0.0, %v10678_v15 }
0x6825   :  { %13932 = vpow2.f32 %v10661_v63 }
0x682a   :  { %v13931_v32 = vpop.eup %13930 }
0x682b   :  { %v10697_v2 = vsel %vm178_vm3, %v13931_v32, 0.0 }
0x682c   :  { %10698 = vadd.xlane.f32.xlu0 %v10697_v2 }
0x682f   :  { %v13933_v17 = vpop.eup %13932 }
0x6830   :  { %v10664_v33 = vadd.f32 1.0, %v13933_v17  ;;  %10712 = vadd.xlane.f32.xlu0 %v10711_v40 }
0x6832   :  { %13934 = vlog2.f32 %v10664_v33 }
0x6833   :  { %13936 = vpow2.f32 %v10695_v14 }
0x6834   :  { %10715 = vadd.xlane.f32.xlu0 %v10714_v5 }
0x683c   :  { %v13935_v61 = vpop.eup %13934 }
0x683d   :  { %v10668_v22 = vmul.f32 0.6931472, %v13935_v61  ;;  %v13937_v26 = vpop.eup %13936 }
0x683e   :  { %v10700_v20 = vsel %vm178_vm3, %v13937_v26, 0.0  ;;  %vm10725_vm3 = vcmask 15368  }
0x683f   :  { %v10670_v37 = vadd.f32 %v10668_v22, %v10654_v21 }
0x6841   :  { %v10674_v52 = vsub.f32 0.0, %v10670_v37 }
0x6843   :  { %10679 = vrot.lane.b32.xlu1 %v10674_v52, %s14021_s15 }
0x6867   :  { %10701 = vadd.xlane.f32.xlu1 %v10700_v20 }
0x68b5   :  { %v10680_v59 = vpop.permute.xlu1 %10679 }
0x68b6   :  { %v10684_v48 = vsel %vm10672_vm4, 0.0, %v10680_v59 }
0x68b9   :  { %v10699_v36 = vpop.xlane.xlu0 %10698 }
0x68ba   :  { %13938 = vlog2.f32 %v10699_v36 }
0x68bd   :  { %v10713_v8 = vpop.xlane.xlu0 %10712 }
0x68c1   :  { %v10716_v1 = vpop.xlane.xlu0 %10715 }
0x68c4   :  { %v13939_v45 = vpop.eup %13938 }
0x68c5   :  { %v10704_v44 = vmul.f32 0.6931472, %v13939_v45 }
0x68c7   :  { %v10707_v7 = vadd.f32 %v10704_v44, %v10687_v28 }
0x68c9   :  { %v10719_v55 = vsub.f32 %v10713_v8, %v10707_v7 }
0x68cb   :  { %v10721_v62 = vsel %vm10717_vm9, 0.0, %v10719_v55 }
0x68cc   :  { %v10723_v30 = vadd.f32 %v10721_v62, %v10683_v25 }
0x68ce   :  { %v10726_v34 = vsel %vm10725_vm3, %v10723_v30, 0.0 }
0x68cf   :  { %v10727_v47 = vrot.slane %v10726_v34, 4 }
0x68d1   :  { %v10728_v19 = vadd.f32 %v10727_v47, %v10726_v34 }
0x68d3   :  { %v10729_v49 = vrot.slane %v10728_v19, 2 }
0x68d5   :  { %v10730_v56 = vadd.f32 %v10729_v49, %v10728_v19 }
0x68d7   :  { %v10731_v51 = vrot.slane %v10730_v56, 1 }
0x68d9   :  { %v10732_v35 = vadd.f32 %v10731_v51, %v10730_v56 }
0x68f4   :  { %v10702_v23 = vpop.xlane.xlu1 %10701 }
0x68f5   :  { %13940 = vlog2.f32 %v10702_v23 }
0x68ff   :  { %v13941_v3 = vpop.eup %13940 }
0x6900   :  { %v10706_v27 = vmul.f32 0.6931472, %v13941_v3 }
0x6902   :  { %v10708_v31 = vadd.f32 %v10706_v27, %v10690_v60 }
0x6904   :  { %v10720_v43 = vsub.f32 %v10716_v1, %v10708_v31 }
0x6906   :  { %v10722_v39 = vsel %vm10718_vm5, 0.0, %v10720_v43 }
0x6907   :  { %v10724_v12 = vadd.f32 %v10722_v39, %v10684_v48 }
0x6909   :  { %v10733_v58 = vsel %vm10725_vm3, %v10724_v12, 0.0 }
0x690a   :  { %v10734_v42 = vrot.slane %v10733_v58, 4 }
0x690c   :  { %v10735_v57 = vadd.f32 %v10734_v42, %v10733_v58 }
0x690e   :  { %v10736_v9 = vrot.slane %v10735_v57, 2 }
0x6910   :  { %v10737_v38 = vadd.f32 %v10736_v9, %v10735_v57 }
0x6912   :  { %v10738_v11 = vrot.slane %v10737_v38, 1 }
0x6914   :  { %v10739_v50 = vadd.f32 %v10738_v11, %v10737_v38 }
0x6916   :  { %v10740_v53 = vsel %vm255_vm6, %v10732_v35, %v10739_v50 }
0x6917   :  { %10742 = vrot.lane.b32.xlu0 %v10740_v53, %s14021_s15 }
0x6989   :  { %v10743_v29 = vpop.permute.xlu0 %10742 }
0x698a   :  { %10746 = vst.msk [vmem:[%s15406_s3 + $0x20] sm:$0x3] %vm10745_vm7, %v10743_v29 }
0x698b   :  { %10751 = vsyncpa [#allocation3], 1 }
0x698c   :  { %10752 = vsyncpa [#allocation5], 1 }

</bundles_post_ra>
